<compile_context>
chip_gen: v5e
topology: v5e:2x2
jax: 0.10.0
libtpu: 0.0.40
codegen_flags: <defaults>
</compile_context>

<pallas_src>
import functools
import math

import jax
import jax.numpy as jnp
from jax.experimental import pallas as pl
from jax.experimental.pallas import tpu as pltpu


# ----------------------------- in-kernel helpers -----------------------------
def _act(y, act):
    if act == "silu":
        # sigmoid(y) == 0.5*(tanh(0.5*y) + 1): one EUP op instead of exp + divide.
        return y * (0.5 * jnp.tanh(0.5 * y) + 0.5)
    if act == "relu":
        return jnp.maximum(y, 0.0)
    if act == "none":
        return y
    raise ValueError(f"unknown act: {act}")


def _mxu_dot(x_f32, w_bf16):
    """bf16 x bf16 MXU matmul with f32 accumulation."""
    return jnp.dot(x_f32.astype(jnp.bfloat16), w_bf16, preferred_element_type=jnp.float32)


# ----------------------------- JAX-side padding / phase decomposition -----------------------------
# TODO(synk): pad/phase extraction could be folded into BlockSpec index_maps to avoid one extra
#             HBM pass per strided conv; kept as glue for now.
def _pad_nhwc(x, pad, value=0.0):
    if pad == 0:
        return x
    return jnp.pad(x, ((0, 0), (pad, pad), (pad, pad), (0, 0)), constant_values=value)


def _phases(xp, stride, fill=0.0):
    """(N, Hp, Wp, C) padded input -> (N*stride^2, Hp//stride, Wp//stride, C) polyphase stack."""
    if stride == 1:
        return xp
    N, Hp, Wp, C = xp.shape
    he, we = (-Hp) % stride, (-Wp) % stride
    if he or we:
        xp = jnp.pad(xp, ((0, 0), (0, he), (0, we), (0, 0)), constant_values=fill)
        Hp, Wp = Hp + he, Wp + we
    phs = [xp[:, a::stride, b::stride, :] for a in range(stride) for b in range(stride)]
    return jnp.stack(phs, axis=1).reshape(N * stride * stride, Hp // stride, Wp // stride, C)


# ----------------------------- kernel: flat 1x1 conv (matmul + bias + act) -----------------------------
def _matmul_kernel(x_ref, w_ref, b_ref, o_ref, *, act):
    y = _mxu_dot(x_ref[...], w_ref[...]) + b_ref[...]
    o_ref[...] = _act(y, act).astype(o_ref.dtype)


@functools.partial(jax.jit, static_argnames=("act",))
def matmul_bias_act(x2d, w, b, *, act):
    R, Cin = x2d.shape
    Cout = w.shape[1]
    if R >= 2048:
        TR = 1024
    elif R >= 512:
        TR = 512
    else:
        TR = max(8, ((R + 7) // 8) * 8)
    Rp = ((R + TR - 1) // TR) * TR
    if Rp != R:
        x2d = jnp.pad(x2d, ((0, Rp - R), (0, 0)))
    out = pl.pallas_call(
        functools.partial(_matmul_kernel, act=act),
        out_shape=jax.ShapeDtypeStruct((Rp, Cout), jnp.float32),
        grid_spec=pltpu.PrefetchScalarGridSpec(
            num_scalar_prefetch=0,
            grid=(Rp // TR,),
            in_specs=[
                pl.BlockSpec((TR, Cin), lambda i: (i, 0)),
                pl.BlockSpec((Cin, Cout), lambda i: (0, 0)),
                pl.BlockSpec((1, Cout), lambda i: (0, 0)),
            ],
            out_specs=pl.BlockSpec((TR, Cout), lambda i: (i, 0)),
        ),
        compiler_params=pltpu.CompilerParams(dimension_semantics=("parallel",)),
    )(x2d, w, b)
    return out[:R]


def pointwise_act(x, w, b, *, act):
    N, H, W, C = x.shape
    y = matmul_bias_act(x.reshape(N * H * W, C), w, b, act=act)
    return y.reshape(N, H, W, w.shape[1])


# ----------------------------- kernel: dense KxK conv (per-tap full-image MXU dots) -----------------------------
def _convkxk_kernel(ph_ref, w_ref, b_ref, o_ref, *, K, S, act):
    Ho, Wo, Cout = o_ref.shape[1], o_ref.shape[2], o_ref.shape[3]
    Cin = ph_ref.shape[-1]
    w = w_ref[...]                      # (K*K, Cin, Cout) bf16
    acc = jnp.zeros((Ho * Wo, Cout), jnp.float32)
    for dy in range(K):
        for dx in range(K):
            p = (dy % S) * S + (dx % S)
            oy, ox = dy // S, dx // S
            tap = ph_ref[p, pl.ds(oy, Ho), pl.ds(ox, Wo), :]        # (Ho, Wo, Cin)
            acc = acc + _mxu_dot(tap.reshape(Ho * Wo, Cin), w[dy * K + dx])
    y = _act(acc + b_ref[...], act)
    o_ref[...] = y.reshape(1, Ho, Wo, Cout).astype(o_ref.dtype)


@functools.partial(jax.jit, static_argnames=("K", "stride", "act"))
def conv_kxk_act(x, w, b, *, K, stride, act):
    # x:(N,H,W,Cin)  w:(K*K*Cin, Cout) bf16  b:(1,Cout); 'same' padding, odd K, H,W divisible by stride
    N, H, W, Cin = x.shape
    Cout = w.shape[1]
    if K == 1 and stride == 1:
        return pointwise_act(x, w, b, act=act)
    pad = K // 2
    ph = _phases(_pad_nhwc(x, pad), stride)
    S2 = stride * stride
    Hph, Wph = ph.shape[1], ph.shape[2]
    Ho, Wo = H // stride, W // stride
    w3 = w.reshape(K * K, Cin, Cout)
    return pl.pallas_call(
        functools.partial(_convkxk_kernel, K=K, S=stride, act=act),
        out_shape=jax.ShapeDtypeStruct((N, Ho, Wo, Cout), jnp.float32),
        grid_spec=pltpu.PrefetchScalarGridSpec(
            num_scalar_prefetch=0,
            grid=(N,),
            in_specs=[
                pl.BlockSpec((S2, Hph, Wph, Cin), lambda n: (n, 0, 0, 0)),
                pl.BlockSpec((K * K, Cin, Cout), lambda n: (0, 0, 0)),
                pl.BlockSpec((1, Cout), lambda n: (0, 0)),
            ],
            out_specs=pl.BlockSpec((1, Ho, Wo, Cout), lambda n: (n, 0, 0, 0)),
        ),
        compiler_params=pltpu.CompilerParams(dimension_semantics=("parallel",)),
    )(ph, w3, b)


# ----------------------------- kernel: depthwise KxK -> 1x1 conv (fused) -----------------------------
def _dw_pw_kernel(ph_ref, wdw_ref, bdw_ref, wpw_ref, bpw_ref, o_ref, *, K, S, act_dw, act_pw):
    Ho, Wo, Cout = o_ref.shape[1], o_ref.shape[2], o_ref.shape[3]
    Cin = ph_ref.shape[-1]
    wdw = wdw_ref[...]                                    # (K*K, Cin) f32
    acc = jnp.zeros((Ho, Wo, Cin), jnp.float32)
    for dy in range(K):
        for dx in range(K):
            p = (dy % S) * S + (dx % S)
            oy, ox = dy // S, dx // S
            tap = ph_ref[p, pl.ds(oy, Ho), pl.ds(ox, Wo), :]      # (Ho, Wo, Cin)
            acc = acc + tap * wdw[dy * K + dx][None, None, :]
    y = _act(acc + bdw_ref[...][None, :, :], act_dw)              # stays in VMEM/vregs
    r = _mxu_dot(y.reshape(Ho * Wo, Cin), wpw_ref[...]) + bpw_ref[...]
    o_ref[...] = _act(r, act_pw).reshape(1, Ho, Wo, Cout).astype(o_ref.dtype)


@functools.partial(jax.jit, static_argnames=("K", "stride", "act_dw", "act_pw"))
def dw_pw_act(x, wdw, bdw, wpw, bpw, *, K, stride, act_dw, act_pw):
    N, H, W, Cin = x.shape
    Cout = wpw.shape[1]
    pad = K // 2
    ph = _phases(_pad_nhwc(x, pad), stride)
    S2 = stride * stride
    Hph, Wph = ph.shape[1], ph.shape[2]
    Ho, Wo = H // stride, W // stride
    return pl.pallas_call(
        functools.partial(_dw_pw_kernel, K=K, S=stride, act_dw=act_dw, act_pw=act_pw),
        out_shape=jax.ShapeDtypeStruct((N, Ho, Wo, Cout), jnp.float32),
        grid_spec=pltpu.PrefetchScalarGridSpec(
            num_scalar_prefetch=0,
            grid=(N,),
            in_specs=[
                pl.BlockSpec((S2, Hph, Wph, Cin), lambda n: (n, 0, 0, 0)),
                pl.BlockSpec((K * K, Cin), lambda n: (0, 0)),
                pl.BlockSpec((1, Cin), lambda n: (0, 0)),
                pl.BlockSpec((Cin, Cout), lambda n: (0, 0)),
                pl.BlockSpec((1, Cout), lambda n: (0, 0)),
            ],
            out_specs=pl.BlockSpec((1, Ho, Wo, Cout), lambda n: (n, 0, 0, 0)),
        ),
        compiler_params=pltpu.CompilerParams(dimension_semantics=("parallel",)),
    )(ph, wdw, bdw, wpw, bpw)


# ----------------------------- in-kernel padded scratch helpers -----------------------------
def _zero_halo(xpad_ref, H, W, C):
    zrow = jnp.zeros((1, W + 2, C), jnp.float32)
    zcol = jnp.zeros((H, 1, C), jnp.float32)
    xpad_ref[pl.ds(0, 1), :, :] = zrow
    xpad_ref[pl.ds(H + 1, 1), :, :] = zrow
    xpad_ref[pl.ds(1, H), pl.ds(0, 1), :] = zcol
    xpad_ref[pl.ds(1, H), pl.ds(W + 1, 1), :] = zcol


def _dw3_from_scratch(xpad_ref, wdw, H, W, C):
    acc = jnp.zeros((H, W, C), jnp.float32)
    for dy in range(3):
        for dx in range(3):
            tap = xpad_ref[pl.ds(dy, H), pl.ds(dx, W), :]
            acc = acc + tap * wdw[dy * 3 + dx][None, None, :]
    return acc


# ----------------------------- kernel: 1x1 -> dw3x3 -> 1x1 (ShuffleV2 stride-1 branch, fused) -----------------------------
def _pw_dw_pw_kernel(x_ref, w1_ref, b1_ref, wdw_ref, bdw_ref, w2_ref, b2_ref, o_ref, xpad_ref,
                     *, act, act_dw):
    H, W, Cin = x_ref.shape[1], x_ref.shape[2], x_ref.shape[3]
    Cb = w1_ref.shape[1]
    Cout = w2_ref.shape[1]
    # pw1: one big MXU dot, result stays in VMEM (padded scratch interior)
    r1 = _mxu_dot(x_ref[...].reshape(H * W, Cin), w1_ref[...]) + b1_ref[...]
    y1 = _act(r1, act)
    _zero_halo(xpad_ref, H, W, Cb)
    xpad_ref[pl.ds(1, H), pl.ds(1, W), :] = y1.reshape(H, W, Cb)
    # dw3x3 (stride 1)
    y2 = _act(_dw3_from_scratch(xpad_ref, wdw_ref[...], H, W, Cb) + bdw_ref[...][None, :, :], act_dw)
    # pw2: one big MXU dot
    r2 = _mxu_dot(y2.reshape(H * W, Cb), w2_ref[...]) + b2_ref[...]
    o_ref[...] = _act(r2, act).reshape(1, H, W, Cout).astype(o_ref.dtype)


@functools.partial(jax.jit, static_argnames=("act", "act_dw"))
def pw_dw_pw_act(x, w1, b1, wdw, bdw, w2, b2, *, act, act_dw="none"):
    N, H, W, Cin = x.shape
    Cb = w1.shape[1]
    Cout = w2.shape[1]
    return pl.pallas_call(
        functools.partial(_pw_dw_pw_kernel, act=act, act_dw=act_dw),
        out_shape=jax.ShapeDtypeStruct((N, H, W, Cout), jnp.float32),
        grid_spec=pltpu.PrefetchScalarGridSpec(
            num_scalar_prefetch=0,
            grid=(N,),
            in_specs=[
                pl.BlockSpec((1, H, W, Cin), lambda n: (n, 0, 0, 0)),
                pl.BlockSpec((Cin, Cb), lambda n: (0, 0)),
                pl.BlockSpec((1, Cb), lambda n: (0, 0)),
                pl.BlockSpec((9, Cb), lambda n: (0, 0)),
                pl.BlockSpec((1, Cb), lambda n: (0, 0)),
                pl.BlockSpec((Cb, Cout), lambda n: (0, 0)),
                pl.BlockSpec((1, Cout), lambda n: (0, 0)),
            ],
            out_specs=pl.BlockSpec((1, H, W, Cout), lambda n: (n, 0, 0, 0)),
            scratch_shapes=[pltpu.VMEM((H + 2, W + 2, Cb), jnp.float32)],
        ),
        compiler_params=pltpu.CompilerParams(dimension_semantics=("parallel",)),
    )(x, w1, b1, wdw, bdw, w2, b2)


# ----------------------------- kernel: GhostModule (1x1 -> dw3x3 -> channel concat, fused) -----------------------------
def _ghost_kernel(x_ref, w1_ref, b1_ref, wdw_ref, bdw_ref, o_ref, xpad_ref, *, act):
    H, W, Cin = x_ref.shape[1], x_ref.shape[2], x_ref.shape[3]
    Cg = w1_ref.shape[1]
    # primary 1x1 conv: one big MXU dot
    r = _mxu_dot(x_ref[...].reshape(H * W, Cin), w1_ref[...]) + b1_ref[...]
    x1 = _act(r, act).reshape(H, W, Cg)
    _zero_halo(xpad_ref, H, W, Cg)
    xpad_ref[pl.ds(1, H), pl.ds(1, W), :] = x1
    # cheap dw3x3 on the primary output
    x2 = _act(_dw3_from_scratch(xpad_ref, wdw_ref[...], H, W, Cg) + bdw_ref[...][None, :, :], act)
    o_ref[...] = jnp.concatenate([x1, x2], axis=-1)[None].astype(o_ref.dtype)


@functools.partial(jax.jit, static_argnames=("act",))
def ghost_module_act(x, w1, b1, wdw, bdw, *, act):
    N, H, W, Cin = x.shape
    Cg = w1.shape[1]
    return pl.pallas_call(
        functools.partial(_ghost_kernel, act=act),
        out_shape=jax.ShapeDtypeStruct((N, H, W, 2 * Cg), jnp.float32),
        grid_spec=pltpu.PrefetchScalarGridSpec(
            num_scalar_prefetch=0,
            grid=(N,),
            in_specs=[
                pl.BlockSpec((1, H, W, Cin), lambda n: (n, 0, 0, 0)),
                pl.BlockSpec((Cin, Cg), lambda n: (0, 0)),
                pl.BlockSpec((1, Cg), lambda n: (0, 0)),
                pl.BlockSpec((9, Cg), lambda n: (0, 0)),
                pl.BlockSpec((1, Cg), lambda n: (0, 0)),
            ],
            out_specs=pl.BlockSpec((1, H, W, 2 * Cg), lambda n: (n, 0, 0, 0)),
            scratch_shapes=[pltpu.VMEM((H + 2, W + 2, Cg), jnp.float32)],
        ),
        compiler_params=pltpu.CompilerParams(dimension_semantics=("parallel",)),
    )(x, w1, b1, wdw, bdw)


# ----------------------------- kernel: 3x3 max-pool, strided via phases -----------------------------
def _maxpool_kernel(ph_ref, o_ref, *, K, S):
    Ho, Wo, C = o_ref.shape[1], o_ref.shape[2], o_ref.shape[3]
    acc = None
    for dy in range(K):
        for dx in range(K):
            p = (dy % S) * S + (dx % S)
            oy, ox = dy // S, dx // S
            tap = ph_ref[p, pl.ds(oy, Ho), pl.ds(ox, Wo), :]
            acc = tap if acc is None else jnp.maximum(acc, tap)
    o_ref[...] = acc[None].astype(o_ref.dtype)


@functools.partial(jax.jit, static_argnames=("K", "stride"))
def maxpool2d(x, *, K, stride):
    N, H, W, C = x.shape
    pad = K // 2
    ph = _phases(_pad_nhwc(x, pad, value=-jnp.inf), stride, fill=-jnp.inf)
    S2 = stride * stride
    Hph, Wph = ph.shape[1], ph.shape[2]
    Ho, Wo = H // stride, W // stride
    return pl.pallas_call(
        functools.partial(_maxpool_kernel, K=K, S=stride),
        out_shape=jax.ShapeDtypeStruct((N, Ho, Wo, C), jnp.float32),
        grid_spec=pltpu.PrefetchScalarGridSpec(
            num_scalar_prefetch=0,
            grid=(N,),
            in_specs=[pl.BlockSpec((S2, Hph, Wph, C), lambda n: (n, 0, 0, 0))],
            out_specs=pl.BlockSpec((1, Ho, Wo, C), lambda n: (n, 0, 0, 0)),
        ),
        compiler_params=pltpu.CompilerParams(dimension_semantics=("parallel",)),
    )(ph)


# ----------------------------- remaining JAX glue -----------------------------
def channel_shuffle(x, groups):
    # TODO(synk): could be folded offline into the consumers' 1x1 weights; kept as cheap JAX glue.
    N, H, W, C = x.shape
    x = x.reshape(N, H, W, groups, C // groups)
    x = jnp.swapaxes(x, 3, 4)
    return x.reshape(N, H, W, C)


def upsample_nearest_2x(x):
    # TODO(synk): reference GhostPAN may use bilinear; nearest 2x kept, not folded into the next conv.
    x = jnp.repeat(x, 2, axis=1)
    return jnp.repeat(x, 2, axis=2)


# ----------------------------- deterministic synthetic parameters (BN folded) -----------------------------
class ParamGen:
    def __init__(self, seed=1):
        self.key = jax.random.PRNGKey(seed)

    def _next(self):
        self.key, sub = jax.random.split(self.key)
        return sub

    def _bn_fold(self, cout):
        gamma = 1.0 + 0.1 * jax.random.normal(self._next(), (cout,), jnp.float32)
        beta = 0.1 * jax.random.normal(self._next(), (cout,), jnp.float32)
        mean = 0.1 * jax.random.normal(self._next(), (cout,), jnp.float32)
        var = 1.0 + jax.random.uniform(self._next(), (cout,), jnp.float32)
        scale = gamma / jnp.sqrt(var + 1e-5)
        bias = beta - mean * scale
        return scale, bias

    def conv(self, K, cin, cout):
        w = jax.random.normal(self._next(), (K * K * cin, cout), jnp.float32) / math.sqrt(K * K * cin)
        scale, bias = self._bn_fold(cout)
        # MXU weights stored bf16 (halves weight DMA, 2x MXU throughput on v6e/v7x); bias stays f32.
        return (w * scale[None, :]).astype(jnp.bfloat16), bias[None, :]

    def dwconv(self, K, c):
        # depthwise weights stay f32 (used on the VPU elementwise path).
        w = jax.random.normal(self._next(), (K * K, c), jnp.float32) / math.sqrt(K * K)
        scale, bias = self._bn_fold(c)
        return w * scale[None, :], bias[None, :]


# ----------------------------- layer wrappers -----------------------------
class ConvBnAct:  # Conv2d(bias=False) + folded BN + act (BaseConv analogue)
    def __init__(self, pg, cin, cout, k=1, s=1, act="silu"):
        self.k, self.s, self.act = k, s, act
        self.w, self.b = pg.conv(k, cin, cout)

    def __call__(self, x):
        if self.k == 1 and self.s == 1:
            return pointwise_act(x, self.w, self.b, act=self.act)
        return conv_kxk_act(x, self.w, self.b, K=self.k, stride=self.s, act=self.act)


# ----------------------------- ShuffleNetV2 backbone -----------------------------
class ShuffleV2Block:
    def __init__(self, pg, cin, cout, stride, act):
        bf = cout // 2
        self.stride = stride
        self.act = act
        if stride == 2:
            self.b1_dw_w, self.b1_dw_b = pg.dwconv(3, cin)
            self.b1_pw_w, self.b1_pw_b = pg.conv(1, cin, bf)
            b2_in = cin
        else:
            assert cin == cout
            b2_in = bf
        self.b2_pw1_w, self.b2_pw1_b = pg.conv(1, b2_in, bf)
        self.b2_dw_w, self.b2_dw_b = pg.dwconv(3, bf)
        self.b2_pw2_w, self.b2_pw2_b = pg.conv(1, bf, bf)

    def __call__(self, x):
        if self.stride == 1:
            c = x.shape[-1] // 2
            x1, x2 = x[..., :c], x[..., c:]
            # fused pw1 -> dw3(s1) -> pw2, intermediates in VMEM
            b2 = pw_dw_pw_act(x2, self.b2_pw1_w, self.b2_pw1_b,
                              self.b2_dw_w, self.b2_dw_b,
                              self.b2_pw2_w, self.b2_pw2_b, act=self.act)
            out = jnp.concatenate([x1, b2], axis=-1)
        else:
            # branch1: fused dw3(s2) -> pw
            b1 = dw_pw_act(x, self.b1_dw_w, self.b1_dw_b, self.b1_pw_w, self.b1_pw_b,
                           K=3, stride=2, act_dw="none", act_pw=self.act)
            # branch2: pw1 at full resolution, then fused dw3(s2) -> pw2
            y1 = pointwise_act(x, self.b2_pw1_w, self.b2_pw1_b, act=self.act)
            b2 = dw_pw_act(y1, self.b2_dw_w, self.b2_dw_b, self.b2_pw2_w, self.b2_pw2_b,
                           K=3, stride=2, act_dw="none", act_pw=self.act)
            out = jnp.concatenate([b1, b2], axis=-1)
        return channel_shuffle(out, 2)


class ShuffleNetV2Backbone:
    def __init__(self, pg, channels, act, stem_channels=16, stage_repeats=(1, 2, 1)):
        self.stem = ConvBnAct(pg, 3, stem_channels, k=3, s=2, act=act)
        self.stage_names = ("stage2", "stage3", "stage4")
        self.stages = []
        cin = stem_channels
        for c, reps in zip(channels, stage_repeats):
            blocks = [ShuffleV2Block(pg, cin, c, stride=2, act=act)]
            for _ in range(reps - 1):
                blocks.append(ShuffleV2Block(pg, c, c, stride=1, act=act))
            self.stages.append(blocks)
            cin = c

    def __call__(self, x):
        x = self.stem(x)
        x = maxpool2d(x, K=3, stride=2)
        outs = {}
        for name, blocks in zip(self.stage_names, self.stages):
            for blk in blocks:
                x = blk(x)
            outs[name] = x
        return outs


# ----------------------------- GhostPAN neck -----------------------------
class GhostModule:
    def __init__(self, pg, inp, oup, act):
        self.oup = oup
        self.act = act
        init_c = math.ceil(oup / 2)  # ratio = 2
        self.pw_w, self.pw_b = pg.conv(1, inp, init_c)
        self.dw_w, self.dw_b = pg.dwconv(3, init_c)

    def __call__(self, x):
        y = ghost_module_act(x, self.pw_w, self.pw_b, self.dw_w, self.dw_b, act=self.act)
        return y[..., : self.oup]


class GhostBottleneck:
    # TODO(synk): at the smallest PAN levels the whole bottleneck could be fused into one
    #             pallas_call; kept as 3 fused kernels + a JAX add.
    def __init__(self, pg, in_c, mid_c, out_c, dw_k, act):
        self.ghost1 = GhostModule(pg, in_c, mid_c, act=act)
        self.ghost2 = GhostModule(pg, mid_c, out_c, act="none")
        self.has_shortcut = in_c != out_c
        self.dw_k = dw_k
        if self.has_shortcut:
            self.sc_dw_w, self.sc_dw_b = pg.dwconv(dw_k, in_c)
            self.sc_pw_w, self.sc_pw_b = pg.conv(1, in_c, out_c)

    def __call__(self, x):
        y = self.ghost2(self.ghost1(x))
        if self.has_shortcut:
            # fused dw(k)(s1) -> 1x1 shortcut
            sc = dw_pw_act(x, self.sc_dw_w, self.sc_dw_b, self.sc_pw_w, self.sc_pw_b,
                           K=self.dw_k, stride=1, act_dw="none", act_pw="none")
        else:
            sc = x
        return y + sc


class GhostBlocks:
    def __init__(self, pg, in_c, out_c, kernel_size, num_blocks, act):
        self.blocks = [
            GhostBottleneck(pg, in_c if i == 0 else out_c, out_c, out_c, kernel_size, act)
            for i in range(num_blocks)
        ]

    def __call__(self, x):
        for b in self.blocks:
            x = b(x)
        return x


class GhostPANNeck:
    def __init__(self, pg, in_channels, out_channels, act, kernel_size=5, num_blocks=1):
        self.in_channels = in_channels
        n = len(in_channels)
        self.reduce_layers = [ConvBnAct(pg, c, out_channels, k=1, s=1, act=act) for c in in_channels]
        self.top_down_blocks = [
            GhostBlocks(pg, out_channels * 2, out_channels, kernel_size, num_blocks, act) for _ in range(n - 1)
        ]
        self.downsamples = [
            ConvBnAct(pg, out_channels, out_channels, k=kernel_size, s=2, act=act) for _ in range(n - 1)
        ]
        self.bottom_up_blocks = [
            GhostBlocks(pg, out_channels * 2, out_channels, kernel_size, num_blocks, act) for _ in range(n - 1)
        ]

    def __call__(self, feats):
        n = len(self.in_channels)
        inputs = [reduce(f) for f, reduce in zip(feats, self.reduce_layers)]
        # top-down path
        inner_outs = [inputs[-1]]
        for idx in range(n - 1, 0, -1):
            feat_high = inner_outs[0]
            feat_low = inputs[idx - 1]
            up = upsample_nearest_2x(feat_high)
            inner = self.top_down_blocks[n - 1 - idx](jnp.concatenate([up, feat_low], axis=-1))
            inner_outs.insert(0, inner)
        # bottom-up path
        outs = [inner_outs[0]]
        for idx in range(n - 1):
            feat_low = outs[-1]
            feat_high = inner_outs[idx + 1]
            down = self.downsamples[idx](feat_low)          # fused 5x5/s2 conv (no im2col in HBM)
            out = self.bottom_up_blocks[idx](jnp.concatenate([down, feat_high], axis=-1))
            outs.append(out)
        return tuple(outs)


# ----------------------------- top-level module -----------------------------
class ShuffleV2GhostPAN:
    def __init__(self, depth=1.0, width=1.0, in_features=("stage2", "stage3", "stage4"),
                 in_channels=(32, 64, 128), out_channels=512, depthwise=False, act="silu",
                 neck_out_channels=32, stem_channels=16, stage_repeats=(1, 2, 1)):
        # TODO(synk): depthwise=True neck (DWConv) not implemented; reference default is False.
        assert not depthwise
        pg = ParamGen(seed=1)
        self.in_features = in_features
        self.in_channels = list(in_channels)
        self.backbone = ShuffleNetV2Backbone(pg, self.in_channels, act, stem_channels, stage_repeats)
        # the reference hard-codes neck out_channels = 128; scaled down here to 32 for the demo
        self.out_channels = neck_out_channels
        self.neck = GhostPANNeck(pg, self.in_channels, self.out_channels, act=act)

    def __call__(self, x_nchw):
        x = jnp.transpose(x_nchw.astype(jnp.float32), (0, 2, 3, 1))  # NCHW -> NHWC
        out_features = self.backbone(x)
        features = [out_features[f] for f in self.in_features]
        x2, x1, x0 = features
        outputs = self.neck([x2, x1, x0])
        return tuple(jnp.transpose(o, (0, 3, 1, 2)) for o in outputs)  # NHWC -> NCHW


if __name__ == "__main__":
    key = jax.random.PRNGKey(0)
    x = jax.random.normal(key, (2, 3, 64, 64), jnp.float32)  # NCHW input, like the PyTorch module

    model = ShuffleV2GhostPAN(in_channels=[32, 64, 128])
    outs = model(x)
    outs = jax.block_until_ready(outs)

    assert outs[0].shape == (2, 32, 8, 8)
    assert outs[1].shape == (2, 32, 4, 4)
    assert outs[2].shape == (2, 32, 2, 2)
    assert all(bool(jnp.all(jnp.isfinite(o))) for o in outs)
    print("KERNEL_OK")
</pallas_src>

<mosaic_0001>
module attributes {stable_mosaic.version = 11 : i64} {
  func.func @_convkxk_kernel(%arg0: i32, %arg1: memref<4x33x33x3xf32, #tpu.memory_space<vmem>>, %arg2: memref<9x3x16xbf16, #tpu.memory_space<vmem>>, %arg3: memref<1x16xf32, #tpu.memory_space<vmem>>, %arg4: memref<1x32x32x16xf32, #tpu.memory_space<vmem>>) attributes {dimension_semantics = [#tpu.dimension_semantics<parallel>], iteration_bounds = array<i64: 2>, scalar_prefetch = 0 : i64, scratch_operands = 0 : i64, tpu.core_type = #tpu.core_type<tc>, window_params = [{transform_indices = @transform_0, window_bounds = array<i64: 4, 33, 33, 3>}, {pipeline_mode = #tpu.pipeline_mode<synchronous>, transform_indices = @transform_1, window_bounds = array<i64: 9, 3, 16>}, {pipeline_mode = #tpu.pipeline_mode<synchronous>, transform_indices = @transform_2, window_bounds = array<i64: 1, 16>}, {transform_indices = @transform_3, window_bounds = array<i64: 1, 32, 32, 16>}]} {
    %c0 = arith.constant 0 : index
    %c0_0 = arith.constant 0 : index
    %c0_1 = arith.constant 0 : index
    %0 = vector.load %arg2[%c0, %c0_0, %c0_1] : memref<9x3x16xbf16, #tpu.memory_space<vmem>>, vector<9x3x16xbf16>
    %cst = arith.constant 0.000000e+00 : f32
    %1 = vector.broadcast %cst : f32 to vector<1024x16xf32>
    %c0_2 = arith.constant 0 : index
    %c0_3 = arith.constant 0 : index
    %c0_4 = arith.constant 0 : index
    %c0_5 = arith.constant 0 : index
    %2 = vector.load %arg1[%c0_2, %c0_3, %c0_4, %c0_5] : memref<4x33x33x3xf32, #tpu.memory_space<vmem>>, vector<1x32x32x3xf32>
    %3 = vector.shape_cast %2 : vector<1x32x32x3xf32> to vector<32x32x3xf32>
    %4 = vector.shape_cast %3 : vector<32x32x3xf32> to vector<1024x3xf32>
    %5 = vector.extract_strided_slice %0 {offsets = [0, 0, 0], sizes = [1, 3, 16], strides = [1, 1, 1]} : vector<9x3x16xbf16> to vector<1x3x16xbf16>
    %6 = vector.shape_cast %5 : vector<1x3x16xbf16> to vector<3x16xbf16>
    %7 = arith.truncf %4 : vector<1024x3xf32> to vector<1024x3xbf16>
    %cst_6 = arith.constant dense<0.000000e+00> : vector<1024x16xf32>
    %8 = tpu.matmul %7, %6, %cst_6 {dimension_numbers = #tpu.dot_dimension_numbers<[1], [0], [0], [1], [0, 0, 1, 1], [], []>} : vector<1024x3xbf16>, vector<3x16xbf16>, vector<1024x16xf32> -> vector<1024x16xf32>
    %9 = arith.addf %1, %8 : vector<1024x16xf32>
    %c1 = arith.constant 1 : index
    %c0_7 = arith.constant 0 : index
    %c0_8 = arith.constant 0 : index
    %c0_9 = arith.constant 0 : index
    %10 = vector.load %arg1[%c1, %c0_7, %c0_8, %c0_9] : memref<4x33x33x3xf32, #tpu.memory_space<vmem>>, vector<1x32x32x3xf32>
    %11 = vector.shape_cast %10 : vector<1x32x32x3xf32> to vector<32x32x3xf32>
    %12 = vector.shape_cast %11 : vector<32x32x3xf32> to vector<1024x3xf32>
    %13 = vector.extract_strided_slice %0 {offsets = [1, 0, 0], sizes = [1, 3, 16], strides = [1, 1, 1]} : vector<9x3x16xbf16> to vector<1x3x16xbf16>
    %14 = vector.shape_cast %13 : vector<1x3x16xbf16> to vector<3x16xbf16>
    %15 = arith.truncf %12 : vector<1024x3xf32> to vector<1024x3xbf16>
    %cst_10 = arith.constant dense<0.000000e+00> : vector<1024x16xf32>
    %16 = tpu.matmul %15, %14, %cst_10 {dimension_numbers = #tpu.dot_dimension_numbers<[1], [0], [0], [1], [0, 0, 1, 1], [], []>} : vector<1024x3xbf16>, vector<3x16xbf16>, vector<1024x16xf32> -> vector<1024x16xf32>
    %17 = arith.addf %9, %16 : vector<1024x16xf32>
    %c0_11 = arith.constant 0 : index
    %c0_12 = arith.constant 0 : index
    %c1_13 = arith.constant 1 : index
    %c0_14 = arith.constant 0 : index
    %18 = vector.load %arg1[%c0_11, %c0_12, %c1_13, %c0_14] : memref<4x33x33x3xf32, #tpu.memory_space<vmem>>, vector<1x32x32x3xf32>
    %19 = vector.shape_cast %18 : vector<1x32x32x3xf32> to vector<32x32x3xf32>
    %20 = vector.shape_cast %19 : vector<32x32x3xf32> to vector<1024x3xf32>
    %21 = vector.extract_strided_slice %0 {offsets = [2, 0, 0], sizes = [1, 3, 16], strides = [1, 1, 1]} : vector<9x3x16xbf16> to vector<1x3x16xbf16>
    %22 = vector.shape_cast %21 : vector<1x3x16xbf16> to vector<3x16xbf16>
    %23 = arith.truncf %20 : vector<1024x3xf32> to vector<1024x3xbf16>
    %cst_15 = arith.constant dense<0.000000e+00> : vector<1024x16xf32>
    %24 = tpu.matmul %23, %22, %cst_15 {dimension_numbers = #tpu.dot_dimension_numbers<[1], [0], [0], [1], [0, 0, 1, 1], [], []>} : vector<1024x3xbf16>, vector<3x16xbf16>, vector<1024x16xf32> -> vector<1024x16xf32>
    %25 = arith.addf %17, %24 : vector<1024x16xf32>
    %c2 = arith.constant 2 : index
    %c0_16 = arith.constant 0 : index
    %c0_17 = arith.constant 0 : index
    %c0_18 = arith.constant 0 : index
    %26 = vector.load %arg1[%c2, %c0_16, %c0_17, %c0_18] : memref<4x33x33x3xf32, #tpu.memory_space<vmem>>, vector<1x32x32x3xf32>
    %27 = vector.shape_cast %26 : vector<1x32x32x3xf32> to vector<32x32x3xf32>
    %28 = vector.shape_cast %27 : vector<32x32x3xf32> to vector<1024x3xf32>
    %29 = vector.extract_strided_slice %0 {offsets = [3, 0, 0], sizes = [1, 3, 16], strides = [1, 1, 1]} : vector<9x3x16xbf16> to vector<1x3x16xbf16>
    %30 = vector.shape_cast %29 : vector<1x3x16xbf16> to vector<3x16xbf16>
    %31 = arith.truncf %28 : vector<1024x3xf32> to vector<1024x3xbf16>
    %cst_19 = arith.constant dense<0.000000e+00> : vector<1024x16xf32>
    %32 = tpu.matmul %31, %30, %cst_19 {dimension_numbers = #tpu.dot_dimension_numbers<[1], [0], [0], [1], [0, 0, 1, 1], [], []>} : vector<1024x3xbf16>, vector<3x16xbf16>, vector<1024x16xf32> -> vector<1024x16xf32>
    %33 = arith.addf %25, %32 : vector<1024x16xf32>
    %c3 = arith.constant 3 : index
    %c0_20 = arith.constant 0 : index
    %c0_21 = arith.constant 0 : index
    %c0_22 = arith.constant 0 : index
    %34 = vector.load %arg1[%c3, %c0_20, %c0_21, %c0_22] : memref<4x33x33x3xf32, #tpu.memory_space<vmem>>, vector<1x32x32x3xf32>
    %35 = vector.shape_cast %34 : vector<1x32x32x3xf32> to vector<32x32x3xf32>
    %36 = vector.shape_cast %35 : vector<32x32x3xf32> to vector<1024x3xf32>
    %37 = vector.extract_strided_slice %0 {offsets = [4, 0, 0], sizes = [1, 3, 16], strides = [1, 1, 1]} : vector<9x3x16xbf16> to vector<1x3x16xbf16>
    %38 = vector.shape_cast %37 : vector<1x3x16xbf16> to vector<3x16xbf16>
    %39 = arith.truncf %36 : vector<1024x3xf32> to vector<1024x3xbf16>
    %cst_23 = arith.constant dense<0.000000e+00> : vector<1024x16xf32>
    %40 = tpu.matmul %39, %38, %cst_23 {dimension_numbers = #tpu.dot_dimension_numbers<[1], [0], [0], [1], [0, 0, 1, 1], [], []>} : vector<1024x3xbf16>, vector<3x16xbf16>, vector<1024x16xf32> -> vector<1024x16xf32>
    %41 = arith.addf %33, %40 : vector<1024x16xf32>
    %c2_24 = arith.constant 2 : index
    %c0_25 = arith.constant 0 : index
    %c1_26 = arith.constant 1 : index
    %c0_27 = arith.constant 0 : index
    %42 = vector.load %arg1[%c2_24, %c0_25, %c1_26, %c0_27] : memref<4x33x33x3xf32, #tpu.memory_space<vmem>>, vector<1x32x32x3xf32>
    %43 = vector.shape_cast %42 : vector<1x32x32x3xf32> to vector<32x32x3xf32>
    %44 = vector.shape_cast %43 : vector<32x32x3xf32> to vector<1024x3xf32>
    %45 = vector.extract_strided_slice %0 {offsets = [5, 0, 0], sizes = [1, 3, 16], strides = [1, 1, 1]} : vector<9x3x16xbf16> to vector<1x3x16xbf16>
    %46 = vector.shape_cast %45 : vector<1x3x16xbf16> to vector<3x16xbf16>
    %47 = arith.truncf %44 : vector<1024x3xf32> to vector<1024x3xbf16>
    %cst_28 = arith.constant dense<0.000000e+00> : vector<1024x16xf32>
    %48 = tpu.matmul %47, %46, %cst_28 {dimension_numbers = #tpu.dot_dimension_numbers<[1], [0], [0], [1], [0, 0, 1, 1], [], []>} : vector<1024x3xbf16>, vector<3x16xbf16>, vector<1024x16xf32> -> vector<1024x16xf32>
    %49 = arith.addf %41, %48 : vector<1024x16xf32>
    %c0_29 = arith.constant 0 : index
    %c1_30 = arith.constant 1 : index
    %c0_31 = arith.constant 0 : index
    %c0_32 = arith.constant 0 : index
    %50 = vector.load %arg1[%c0_29, %c1_30, %c0_31, %c0_32] : memref<4x33x33x3xf32, #tpu.memory_space<vmem>>, vector<1x32x32x3xf32>
    %51 = vector.shape_cast %50 : vector<1x32x32x3xf32> to vector<32x32x3xf32>
    %52 = vector.shape_cast %51 : vector<32x32x3xf32> to vector<1024x3xf32>
    %53 = vector.extract_strided_slice %0 {offsets = [6, 0, 0], sizes = [1, 3, 16], strides = [1, 1, 1]} : vector<9x3x16xbf16> to vector<1x3x16xbf16>
    %54 = vector.shape_cast %53 : vector<1x3x16xbf16> to vector<3x16xbf16>
    %55 = arith.truncf %52 : vector<1024x3xf32> to vector<1024x3xbf16>
    %cst_33 = arith.constant dense<0.000000e+00> : vector<1024x16xf32>
    %56 = tpu.matmul %55, %54, %cst_33 {dimension_numbers = #tpu.dot_dimension_numbers<[1], [0], [0], [1], [0, 0, 1, 1], [], []>} : vector<1024x3xbf16>, vector<3x16xbf16>, vector<1024x16xf32> -> vector<1024x16xf32>
    %57 = arith.addf %49, %56 : vector<1024x16xf32>
    %c1_34 = arith.constant 1 : index
    %c1_35 = arith.constant 1 : index
    %c0_36 = arith.constant 0 : index
    %c0_37 = arith.constant 0 : index
    %58 = vector.load %arg1[%c1_34, %c1_35, %c0_36, %c0_37] : memref<4x33x33x3xf32, #tpu.memory_space<vmem>>, vector<1x32x32x3xf32>
    %59 = vector.shape_cast %58 : vector<1x32x32x3xf32> to vector<32x32x3xf32>
    %60 = vector.shape_cast %59 : vector<32x32x3xf32> to vector<1024x3xf32>
    %61 = vector.extract_strided_slice %0 {offsets = [7, 0, 0], sizes = [1, 3, 16], strides = [1, 1, 1]} : vector<9x3x16xbf16> to vector<1x3x16xbf16>
    %62 = vector.shape_cast %61 : vector<1x3x16xbf16> to vector<3x16xbf16>
    %63 = arith.truncf %60 : vector<1024x3xf32> to vector<1024x3xbf16>
    %cst_38 = arith.constant dense<0.000000e+00> : vector<1024x16xf32>
    %64 = tpu.matmul %63, %62, %cst_38 {dimension_numbers = #tpu.dot_dimension_numbers<[1], [0], [0], [1], [0, 0, 1, 1], [], []>} : vector<1024x3xbf16>, vector<3x16xbf16>, vector<1024x16xf32> -> vector<1024x16xf32>
    %65 = arith.addf %57, %64 : vector<1024x16xf32>
    %c0_39 = arith.constant 0 : index
    %c1_40 = arith.constant 1 : index
    %c1_41 = arith.constant 1 : index
    %c0_42 = arith.constant 0 : index
    %66 = vector.load %arg1[%c0_39, %c1_40, %c1_41, %c0_42] : memref<4x33x33x3xf32, #tpu.memory_space<vmem>>, vector<1x32x32x3xf32>
    %67 = vector.shape_cast %66 : vector<1x32x32x3xf32> to vector<32x32x3xf32>
    %68 = vector.shape_cast %67 : vector<32x32x3xf32> to vector<1024x3xf32>
    %69 = vector.extract_strided_slice %0 {offsets = [8, 0, 0], sizes = [1, 3, 16], strides = [1, 1, 1]} : vector<9x3x16xbf16> to vector<1x3x16xbf16>
    %70 = vector.shape_cast %69 : vector<1x3x16xbf16> to vector<3x16xbf16>
    %71 = arith.truncf %68 : vector<1024x3xf32> to vector<1024x3xbf16>
    %cst_43 = arith.constant dense<0.000000e+00> : vector<1024x16xf32>
    %72 = tpu.matmul %71, %70, %cst_43 {dimension_numbers = #tpu.dot_dimension_numbers<[1], [0], [0], [1], [0, 0, 1, 1], [], []>} : vector<1024x3xbf16>, vector<3x16xbf16>, vector<1024x16xf32> -> vector<1024x16xf32>
    %73 = arith.addf %65, %72 : vector<1024x16xf32>
    %c0_44 = arith.constant 0 : index
    %c0_45 = arith.constant 0 : index
    %74 = vector.load %arg3[%c0_44, %c0_45] : memref<1x16xf32, #tpu.memory_space<vmem>>, vector<1x16xf32>
    %75 = vector.broadcast %74 : vector<1x16xf32> to vector<1024x16xf32>
    %76 = arith.addf %73, %75 : vector<1024x16xf32>
    %cst_46 = arith.constant 5.000000e-01 : f32
    %77 = vector.broadcast %cst_46 : f32 to vector<1024x16xf32>
    %78 = arith.mulf %77, %76 : vector<1024x16xf32>
    %79 = math.tanh %78 : vector<1024x16xf32>
    %cst_47 = arith.constant 5.000000e-01 : f32
    %80 = vector.broadcast %cst_47 : f32 to vector<1024x16xf32>
    %81 = arith.mulf %80, %79 : vector<1024x16xf32>
    %cst_48 = arith.constant 5.000000e-01 : f32
    %82 = vector.broadcast %cst_48 : f32 to vector<1024x16xf32>
    %83 = arith.addf %81, %82 : vector<1024x16xf32>
    %84 = arith.mulf %76, %83 : vector<1024x16xf32>
    %85 = vector.shape_cast %84 : vector<1024x16xf32> to vector<1x32x32x16xf32>
    %c0_49 = arith.constant 0 : index
    %c0_50 = arith.constant 0 : index
    %c0_51 = arith.constant 0 : index
    %c0_52 = arith.constant 0 : index
    %86 = vector.load %arg4[%c0_49, %c0_50, %c0_51, %c0_52] : memref<1x32x32x16xf32, #tpu.memory_space<vmem>>, vector<1x32x32x16xf32>
    tpu.vector_store %arg4[%c0_49, %c0_50, %c0_51, %c0_52], %85 {strides = array<i32>} : memref<1x32x32x16xf32, #tpu.memory_space<vmem>>, vector<1x32x32x16xf32>,
    return
  }
  func.func @transform_0(%arg0: i32) -> (i32, i32, i32, i32) {
    %c0_i32 = arith.constant 0 : i32
    %c0_i32_0 = arith.constant 0 : i32
    %c0_i32_1 = arith.constant 0 : i32
    %c0_i32_2 = arith.constant 0 : i32
    return %arg0, %c0_i32, %c0_i32_0, %c0_i32_1 : i32, i32, i32, i32
  }
  func.func @transform_1(%arg0: i32) -> (i32, i32, i32) {
    %c0_i32 = arith.constant 0 : i32
    %c0_i32_0 = arith.constant 0 : i32
    %c0_i32_1 = arith.constant 0 : i32
    %c0_i32_2 = arith.constant 0 : i32
    return %c0_i32, %c0_i32_0, %c0_i32_1 : i32, i32, i32
  }
  func.func @transform_2(%arg0: i32) -> (i32, i32) {
    %c0_i32 = arith.constant 0 : i32
    %c0_i32_0 = arith.constant 0 : i32
    %c0_i32_1 = arith.constant 0 : i32
    return %c0_i32, %c0_i32_0 : i32, i32
  }
  func.func @transform_3(%arg0: i32) -> (i32, i32, i32, i32) {
    %c0_i32 = arith.constant 0 : i32
    %c0_i32_0 = arith.constant 0 : i32
    %c0_i32_1 = arith.constant 0 : i32
    %c0_i32_2 = arith.constant 0 : i32
    return %arg0, %c0_i32, %c0_i32_0, %c0_i32_1 : i32, i32, i32, i32
  }
}

</mosaic_0001>

<bundles_post_ra>
// kernel: conv_kxk_act.1
= control target key start
LH: loop header
LB: loop body
LE: loop exit
PB: predicated region body
PF: predicated region fallthrough
CT: control target
= control target key end

     0   :  { %s10280_s12 = smov 0   ;;  %s13254_s0 = inlined_call_operand.vmem [shape: f32[8,33,33,3], index: 0, kind: input, shape index: {}]   ;;  %s13255_s1 = inlined_call_operand.vmem [shape: bf16[9,3,16], index: 1, kind: input, shape index: {}]   ;;  %s13256_s2 = inlined_call_operand.vmem [shape: f32[1,16], index: 2, kind: input, shape index: {}]   ;;  %s13257_s3 = inlined_call_operand.vmem [shape: f32[2,32,32,16], index: 3, kind: output, shape index: {}]  }
   0x1 LB: > { %s10286_s13 = sadd.s32 4294967295, %s10257_s12   ;;  %p8496_p0 = scmp.ge.s32.totalorder %s10257_s12, 1  ;;  %s10257_s12 = sphi %s10280_s12, %s13_s12  }
   0x2   : > { %p139_p1 = scmp.lt.s32.totalorder %s10257_s12, 3 }
   0x4   : > { %p140_p2 = pnand %p8496_p0, %p139_p1 }
   0x6   : > { %143 = sbr.rel (%p140_p2) target bundleno = 2474 (0x9aa), region = 32 }
   0xb   : > { %v178_v0 = vld [vmem:[%s13255_s1 + $0x2] sm:$0x3]  ;;  %vm764_vm0 = vcmask 1040384   ;;  %vm765_vm1 = vcmask 1041408   ;;  %s8497_s16 = sshll.u32 %s10286_s13, 2  ;;  %v10259_v1 = vmov 65535  }
   0xc   : > { %v766_v2 = vsel %vm764_vm0, 4294967295, %v10259_v1  ;;  %p165_p3 = scmp.lt.s32.totalorder %s8497_s16, 7  ;;  %v179_v3 = vld [vmem:[%s13255_s1 + $0x4] sm:$0x3]  ;;  %v180_v5 = vld [vmem:[%s13255_s1 + $0x6] sm:$0x3] }
   0xd   : > { %v10297_v4 = vsel %vm765_vm1, %v766_v2, 0  ;;  %v177_v6 = vld [vmem:[%s13255_s1] sm:$0x3]  ;;  %v181_v10 = vld [vmem:[%s13255_s1 + $0x8] sm:$0x3]  ;;  %vm571_vm2 = vcmask 23552  }
   0xe   : > { %v769_v7 = vand.u32 %v10297_v4, %v178_v0  ;;  %s13609_s16 = smov (!%p165_p3, %s8497_s16), 7  ;;  %v2009_v8 = vand.u32 %v10297_v4, %v179_v3  ;;  %v2854_v9 = vand.u32 %v10297_v4, %v180_v5  ;;  %v1293_v11 = vand.u32 %v10297_v4, %v177_v6  ;;  %p171_p4 = scmp.lt.s32.totalorder %s10286_s13, 1 }
   0xf   : > { %v3699_v12 = vand.u32 %v10297_v4, %v181_v10  ;;  %s9979_s25 = smul.u32 1320, %s13609_s16  ;;  %vm8308_vm3 = vcmask 130048  }
  0x10   : > { %9976 = vmatpush.bf16.msra.mxu1 %v769_v7  ;;  %9977 = vmatpush.bf16.msra.mxu2 %v769_v7  ;;  %s13611_s13 = smov (!%p171_p4, %s10286_s13), 1 }
  0x11   : > { %9978 = vmatpush.bf16.msra.mxu3 %v769_v7  ;;  %778 = vmatpush.bf16.msra.mxu0 %v769_v7  ;;  %s10316_s28 = scalar_lea.vmem %s13254_s0, %s9979_s25  ;;  %s9975_s14 = sshll.u32 %s13611_s13, 10 }
  0x12   : > { %v8533_v13 = vld [vmem:[%s10316_s28 + $0x668] sm:$0xff]  ;;  %v8534_v14 = vld [vmem:[%s10316_s28 + $0x670] sm:$0xff]  ;;  %v8535_v25 = vld [vmem:[%s10316_s28 + $0x678] sm:$0xff]  ;;  %s12069_s17 = scalar_lea.vmem %s13257_s3, %s9975_s14 }
  0x13   : > { %v8565_v15 = vld [vmem:[%s10316_s28 + $0x7a8] sm:$0xff]  ;;  %v523_v16 = vpack.c.bf16 %v8534_v14, %v8533_v13  ;;  %v8566_v17 = vld [vmem:[%s10316_s28 + $0x7b0] sm:$0xff]  ;;  %v8536_v26 = vld [vmem:[%s10316_s28 + $0x680] sm:$0xff] }
  0x14   : > { %2018 = vmatpush.bf16.msrb.mxu2 %v2009_v8  ;;  %1302 = vmatpush.bf16.msrb.mxu1 %v1293_v11  ;;  %v8597_v18 = vld [vmem:[%s10316_s28 + $0x8e8] sm:$0xff]  ;;  %v8598_v19 = vld [vmem:[%s10316_s28 + $0x8f0] sm:$0xff]  ;;  %v539_v20 = vpack.c.bf16 %v8566_v17, %v8565_v15  ;;  %v8567_v27 = vld [vmem:[%s10316_s28 + $0x7b8] sm:$0xff]  ;;  %v524_v33 = vpack.c.bf16 %v8536_v26, %v8535_v25 }
  0x15   : > { %2863 = vmatpush.bf16.msrb.mxu3 %v2854_v9  ;;  %3708 = vmatpush.bf16.msrb.mxu0 %v3699_v12  ;;  %v555_v21 = vpack.c.bf16 %v8598_v19, %v8597_v18  ;;  %v8501_v22 = vld [vmem:[%s10316_s28 + $0x528] sm:$0xff]  ;;  %v8502_v23 = vld [vmem:[%s10316_s28 + $0x530] sm:$0xff]  ;;  %v8568_v28 = vld [vmem:[%s10316_s28 + $0x7c0] sm:$0xff] }
  0x16   : > { %8645 = vmatmul.msk.bf16.vlgmr.msra.gmra.mxu1 %vm571_vm2, %v523_v16  ;;  %v507_v24 = vpack.c.bf16 %v8502_v23, %v8501_v22  ;;  %8661 = vmatmul.msk.bf16.vlgmr.msra.gmra.mxu2 %vm571_vm2, %v539_v20  ;;  %v8599_v29 = vld [vmem:[%s10316_s28 + $0x8f8] sm:$0xff]  ;;  %v8600_v30 = vld [vmem:[%s10316_s28 + $0x900] sm:$0xff]  ;;  %v540_v34 = vpack.c.bf16 %v8568_v28, %v8567_v27  ;;  %v8537_v37 = vld [vmem:[%s10316_s28 + $0x690] sm:$0xff] }
  0x17   : > { %8677 = vmatmul.msk.bf16.vlgmr.msra.gmra.mxu3 %vm571_vm2, %v555_v21  ;;  %v8503_v31 = vld [vmem:[%s10316_s28 + $0x538] sm:$0xff]  ;;  %v8504_v32 = vld [vmem:[%s10316_s28 + $0x540] sm:$0xff]  ;;  %v556_v35 = vpack.c.bf16 %v8600_v30, %v8599_v29  ;;  %v8569_v39 = vld [vmem:[%s10316_s28 + $0x7d0] sm:$0xff] }
  0x18   : > { %8629 = vmatmul.msk.bf16.vlgmr.msra.gmra.mxu0 %vm571_vm2, %v507_v24  ;;  %v508_v36 = vpack.c.bf16 %v8504_v32, %v8503_v31  ;;  %v8538_v38 = vld [vmem:[%s10316_s28 + $0x698] sm:$0xff]  ;;  %v8601_v41 = vld [vmem:[%s10316_s28 + $0x910] sm:$0xff]  ;;  %v8539_v49 = vld [vmem:[%s10316_s28 + $0x6a0] sm:$0xff] }
  0x19   : > { %v8570_v40 = vld [vmem:[%s10316_s28 + $0x7d8] sm:$0xff]  ;;  %v8505_v43 = vld [vmem:[%s10316_s28 + $0x550] sm:$0xff]  ;;  %v525_v45 = vpack.c.bf16 %v8538_v38, %v8537_v37  ;;  %v8540_v50 = vld [vmem:[%s10316_s28 + $0x6a8] sm:$0xff] }
  0x1a   : > { %v8602_v42 = vld [vmem:[%s10316_s28 + $0x918] sm:$0xff]  ;;  %v541_v46 = vpack.c.bf16 %v8570_v40, %v8569_v39  ;;  %v8571_v51 = vld [vmem:[%s10316_s28 + $0x7e0] sm:$0xff]  ;;  %v8572_v52 = vld [vmem:[%s10316_s28 + $0x7e8] sm:$0xff]  ;;  %v526_v57 = vpack.c.bf16 %v8540_v50, %v8539_v49 }
  0x1b   : > { %v8506_v44 = vld [vmem:[%s10316_s28 + $0x558] sm:$0xff]  ;;  %v557_v47 = vpack.c.bf16 %v8602_v42, %v8601_v41  ;;  %v8603_v53 = vld [vmem:[%s10316_s28 + $0x920] sm:$0xff]  ;;  %v8604_v54 = vld [vmem:[%s10316_s28 + $0x928] sm:$0xff]  ;;  %v542_v58 = vpack.c.bf16 %v8572_v52, %v8571_v51 }
  0x1c   : > { %v509_v48 = vpack.c.bf16 %v8506_v44, %v8505_v43  ;;  %v8507_v55 = vld [vmem:[%s10316_s28 + $0x560] sm:$0xff]  ;;  %v8508_v56 = vld [vmem:[%s10316_s28 + $0x568] sm:$0xff]  ;;  %v558_v59 = vpack.c.bf16 %v8604_v54, %v8603_v53  ;;  %v8541_v61 = vld [vmem:[%s10316_s28 + $0x6b8] sm:$0xff] }
  0x1d   : > { %v510_v60 = vpack.c.bf16 %v8508_v56, %v8507_v55  ;;  %v8542_v62 = vld [vmem:[%s10316_s28 + $0x6c0] sm:$0xff]  ;;  %v8573_v63 = vld [vmem:[%s10316_s28 + $0x7f8] sm:$0xff]  ;;  %v8543_v10 = vld [vmem:[%s10316_s28 + $0x6c8] sm:$0xff] }
  0x1e   : > { %v8574_v0 = vld [vmem:[%s10316_s28 + $0x800] sm:$0xff]  ;;  %v8605_v1 = vld [vmem:[%s10316_s28 + $0x938] sm:$0xff]  ;;  %v527_v6 = vpack.c.bf16 %v8542_v62, %v8541_v61  ;;  %v8544_v11 = vld [vmem:[%s10316_s28 + $0x6d0] sm:$0xff] }
  0x1f   : > { %v8606_v2 = vld [vmem:[%s10316_s28 + $0x940] sm:$0xff]  ;;  %v8509_v3 = vld [vmem:[%s10316_s28 + $0x578] sm:$0xff]  ;;  %v543_v7 = vpack.c.bf16 %v8574_v0, %v8573_v63  ;;  %v8575_v12 = vld [vmem:[%s10316_s28 + $0x808] sm:$0xff]  ;;  %v528_v18 = vpack.c.bf16 %v8544_v11, %v8543_v10 }
  0x20   : > { %v8510_v5 = vld [vmem:[%s10316_s28 + $0x580] sm:$0xff]  ;;  %v559_v8 = vpack.c.bf16 %v8606_v2, %v8605_v1  ;;  %v8576_v13 = vld [vmem:[%s10316_s28 + $0x810] sm:$0xff]  ;;  %v8607_v14 = vld [vmem:[%s10316_s28 + $0x948] sm:$0xff] }
  0x21   : > { %v511_v9 = vpack.c.bf16 %v8510_v5, %v8509_v3  ;;  %v8608_v15 = vld [vmem:[%s10316_s28 + $0x950] sm:$0xff]  ;;  %v8511_v16 = vld [vmem:[%s10316_s28 + $0x588] sm:$0xff]  ;;  %v544_v19 = vpack.c.bf16 %v8576_v13, %v8575_v12  ;;  %v8545_v22 = vld [vmem:[%s10316_s28 + $0x6e0] sm:$0xff] }
  0x22   : > { %v8512_v17 = vld [vmem:[%s10316_s28 + $0x590] sm:$0xff]  ;;  %v560_v20 = vpack.c.bf16 %v8608_v15, %v8607_v14  ;;  %v8546_v23 = vld [vmem:[%s10316_s28 + $0x6e8] sm:$0xff]  ;;  %v8577_v24 = vld [vmem:[%s10316_s28 + $0x820] sm:$0xff] }
  0x23   : > { %v512_v21 = vpack.c.bf16 %v8512_v17, %v8511_v16  ;;  %v8578_v25 = vld [vmem:[%s10316_s28 + $0x828] sm:$0xff]  ;;  %v8609_v26 = vld [vmem:[%s10316_s28 + $0x960] sm:$0xff]  ;;  %v529_v30 = vpack.c.bf16 %v8546_v23, %v8545_v22  ;;  %v8580_v37 = vld [vmem:[%s10316_s28 + $0x838] sm:$0xff] }
  0x24   : > { %v8610_v27 = vld [vmem:[%s10316_s28 + $0x968] sm:$0xff]  ;;  %v8513_v28 = vld [vmem:[%s10316_s28 + $0x5a0] sm:$0xff]  ;;  %v545_v31 = vpack.c.bf16 %v8578_v25, %v8577_v24  ;;  %v8611_v38 = vld [vmem:[%s10316_s28 + $0x970] sm:$0xff] }
  0x25   : > { %v8514_v29 = vld [vmem:[%s10316_s28 + $0x5a8] sm:$0xff]  ;;  %v561_v32 = vpack.c.bf16 %v8610_v27, %v8609_v26  ;;  %v8612_v39 = vld [vmem:[%s10316_s28 + $0x978] sm:$0xff]  ;;  %v8515_v40 = vld [vmem:[%s10316_s28 + $0x5b0] sm:$0xff] }
  0x26   : > { %8646 = vmatmul.msk.bf16.gmra.mxu1 %vm571_vm2, %v524_v33  ;;  %8662 = vmatmul.msk.bf16.gmra.mxu2 %vm571_vm2, %v540_v34  ;;  %v513_v33 = vpack.c.bf16 %v8514_v29, %v8513_v28  ;;  %v8547_v34 = vld [vmem:[%s10316_s28 + $0x6f0] sm:$0xff]  ;;  %v8516_v41 = vld [vmem:[%s10316_s28 + $0x5b8] sm:$0xff]  ;;  %v562_v44 = vpack.c.bf16 %v8612_v39, %v8611_v38  ;;  %v8613_v50 = vld [vmem:[%s10316_s28 + $0x988] sm:$0xff] }
  0x27   : > { %8678 = vmatmul.msk.bf16.gmra.mxu3 %vm571_vm2, %v556_v35  ;;  %v8548_v35 = vld [vmem:[%s10316_s28 + $0x6f8] sm:$0xff]  ;;  %v8582_v49 = vld [vmem:[%s10316_s28 + $0x850] sm:$0xff]  ;;  %v8517_v52 = vld [vmem:[%s10316_s28 + $0x5c8] sm:$0xff] }
  0x28   : > { %8630 = vmatmul.msk.bf16.gmra.mxu0 %vm571_vm2, %v508_v36  ;;  %v8579_v36 = vld [vmem:[%s10316_s28 + $0x830] sm:$0xff]  ;;  %v530_v42 = vpack.c.bf16 %v8548_v35, %v8547_v34  ;;  %v8551_v0 = vld [vmem:[%s10316_s28 + $0x718] sm:$0xff]  ;;  %v8552_v1 = vld [vmem:[%s10316_s28 + $0x720] sm:$0xff] }
  0x29   : > { %v546_v43 = vpack.c.bf16 %v8580_v37, %v8579_v36  ;;  %v8614_v51 = vld [vmem:[%s10316_s28 + $0x990] sm:$0xff]  ;;  %v8583_v2 = vld [vmem:[%s10316_s28 + $0x858] sm:$0xff]  ;;  %v8584_v3 = vld [vmem:[%s10316_s28 + $0x860] sm:$0xff]  ;;  %v532_v11 = vpack.c.bf16 %v8552_v1, %v8551_v0 }
  0x2a   : > { %v8518_v53 = vld [vmem:[%s10316_s28 + $0x5d0] sm:$0xff]  ;;  %v8615_v5 = vld [vmem:[%s10316_s28 + $0x998] sm:$0xff]  ;;  %v548_v13 = vpack.c.bf16 %v8584_v3, %v8583_v2 }
  0x2b   : > { %v8554_v22 = vld [vmem:[%s10316_s28 + $0x738] sm:$0xff]  ;;  %v8585_v23 = vld [vmem:[%s10316_s28 + $0x870] sm:$0xff] }
  0x2c   : > { %v8586_v24 = vld [vmem:[%s10316_s28 + $0x878] sm:$0xff]  ;;  %v8617_v25 = vld [vmem:[%s10316_s28 + $0x9b0] sm:$0xff] }
  0x2d   : > { %v8618_v26 = vld [vmem:[%s10316_s28 + $0x9b8] sm:$0xff]  ;;  %v8521_v27 = vld [vmem:[%s10316_s28 + $0x5f0] sm:$0xff] }
  0x2e   : > { %v8522_v28 = vld [vmem:[%s10316_s28 + $0x5f8] sm:$0xff]  ;;  %v565_v34 = vpack.c.bf16 %v8618_v26, %v8617_v25 }
  0x2f   : > { %v517_v35 = vpack.c.bf16 %v8522_v28, %v8521_v27  ;;  %v8557_v3 = vld [vmem:[%s10316_s28 + $0x758] sm:$0xff] }
  0x36   : > { %8647 = vmatmul.msk.bf16.gmra.mxu1 %vm571_vm2, %v525_v45  ;;  %8663 = vmatmul.msk.bf16.gmra.mxu2 %vm571_vm2, %v541_v46  ;;  %v514_v45 = vpack.c.bf16 %v8516_v41, %v8515_v40  ;;  %v8549_v46 = vld [vmem:[%s10316_s28 + $0x708] sm:$0xff]  ;;  %v8555_v41 = vld [vmem:[%s10316_s28 + $0x740] sm:$0xff] }
  0x37   : > { %8679 = vmatmul.msk.bf16.gmra.mxu3 %vm571_vm2, %v557_v47  ;;  %v8550_v47 = vld [vmem:[%s10316_s28 + $0x710] sm:$0xff] }
  0x38   : > { %8631 = vmatmul.msk.bf16.gmra.mxu0 %vm571_vm2, %v509_v48  ;;  %v8581_v48 = vld [vmem:[%s10316_s28 + $0x848] sm:$0xff]  ;;  %v531_v54 = vpack.c.bf16 %v8550_v47, %v8549_v46  ;;  %v8523_v47 = vld [vmem:[%s10316_s28 + $0x600] sm:$0xff] }
  0x39   : > { %v547_v56 = vpack.c.bf16 %v8582_v49, %v8581_v48  ;;  %v8620_v46 = vld [vmem:[%s10316_s28 + $0x9c8] sm:$0xff] }
  0x3a   : > { %v8524_v48 = vld [vmem:[%s10316_s28 + $0x608] sm:$0xff] }
  0x46   : > { %8648 = vmatmul.msk.bf16.gmra.mxu1 %vm571_vm2, %v526_v57  ;;  %8664 = vmatmul.msk.bf16.gmra.mxu2 %vm571_vm2, %v542_v58  ;;  %v563_v57 = vpack.c.bf16 %v8614_v51, %v8613_v50  ;;  %v515_v58 = vpack.c.bf16 %v8518_v53, %v8517_v52 }
  0x47   : > { %8680 = vmatmul.msk.bf16.gmra.mxu3 %vm571_vm2, %v558_v59 }
  0x48   : > { %8632 = vmatmul.msk.bf16.gmra.mxu0 %vm571_vm2, %v510_v60 }
  0x56   : > { %8649 = vmatmul.msk.bf16.gmra.mxu1 %vm571_vm2, %v527_v6  ;;  %8665 = vmatmul.msk.bf16.gmra.mxu2 %vm571_vm2, %v543_v7  ;;  %v8616_v6 = vld [vmem:[%s10316_s28 + $0x9a0] sm:$0xff]  ;;  %v8519_v7 = vld [vmem:[%s10316_s28 + $0x5d8] sm:$0xff] }
  0x57   : > { %8681 = vmatmul.msk.bf16.gmra.mxu3 %vm571_vm2, %v559_v8  ;;  %v8520_v8 = vld [vmem:[%s10316_s28 + $0x5e0] sm:$0xff]  ;;  %v564_v14 = vpack.c.bf16 %v8616_v6, %v8615_v5  ;;  %v8589_v6 = vld [vmem:[%s10316_s28 + $0x898] sm:$0xff] }
  0x58   : > { %8633 = vmatmul.msk.bf16.gmra.mxu0 %vm571_vm2, %v511_v9  ;;  %v516_v15 = vpack.c.bf16 %v8520_v8, %v8519_v7  ;;  %v8558_v5 = vld [vmem:[%s10316_s28 + $0x760] sm:$0xff]  ;;  %v8621_v8 = vld [vmem:[%s10316_s28 + $0x9d8] sm:$0xff] }
  0x59   : > { %v8590_v7 = vld [vmem:[%s10316_s28 + $0x8a0] sm:$0xff] }
  0x66   : > { %8650 = vmatmul.msk.bf16.gmra.mxu1 %vm571_vm2, %v528_v18  ;;  %8666 = vmatmul.msk.bf16.gmra.mxu2 %vm571_vm2, %v544_v19 }
  0x67   : > { %8682 = vmatmul.msk.bf16.gmra.mxu3 %vm571_vm2, %v560_v20 }
  0x68   : > { %8634 = vmatmul.msk.bf16.gmra.mxu0 %vm571_vm2, %v512_v21  ;;  %v8553_v21 = vld [vmem:[%s10316_s28 + $0x730] sm:$0xff] }
  0x76   : > { %8651 = vmatmul.msk.bf16.gmra.mxu1 %vm571_vm2, %v529_v30  ;;  %8667 = vmatmul.msk.bf16.gmra.mxu2 %vm571_vm2, %v545_v31  ;;  %v533_v31 = vpack.c.bf16 %v8554_v22, %v8553_v21  ;;  %v535_v22 = vpack.c.bf16 %v8558_v5, %v8557_v3 }
  0x77   : > { %8683 = vmatmul.msk.bf16.gmra.mxu3 %vm571_vm2, %v561_v32 }
  0x78   : > { %8635 = vmatmul.msk.bf16.gmra.mxu0 %vm571_vm2, %v513_v33  ;;  %v549_v33 = vpack.c.bf16 %v8586_v24, %v8585_v23  ;;  %v551_v24 = vpack.c.bf16 %v8590_v7, %v8589_v6 }
  0x86   : > { %8652 = vmatmul.msk.bf16.gmra.mxu1 %vm571_vm2, %v530_v42  ;;  %8668 = vmatmul.msk.bf16.gmra.mxu2 %vm571_vm2, %v546_v43  ;;  %v8556_v42 = vld [vmem:[%s10316_s28 + $0x748] sm:$0xff]  ;;  %v8587_v43 = vld [vmem:[%s10316_s28 + $0x880] sm:$0xff] }
  0x87   : > { %8684 = vmatmul.msk.bf16.gmra.mxu3 %vm571_vm2, %v562_v44  ;;  %v8588_v44 = vld [vmem:[%s10316_s28 + $0x888] sm:$0xff]  ;;  %v534_v51 = vpack.c.bf16 %v8556_v42, %v8555_v41  ;;  %v8560_v41 = vld [vmem:[%s10316_s28 + $0x770] sm:$0xff] }
  0x88   : > { %8636 = vmatmul.msk.bf16.gmra.mxu0 %vm571_vm2, %v514_v45  ;;  %v8619_v45 = vld [vmem:[%s10316_s28 + $0x9c0] sm:$0xff]  ;;  %v550_v53 = vpack.c.bf16 %v8588_v44, %v8587_v43  ;;  %v8591_v42 = vld [vmem:[%s10316_s28 + $0x8a8] sm:$0xff]  ;;  %v8592_v43 = vld [vmem:[%s10316_s28 + $0x8b0] sm:$0xff] }
  0x89   : > { %v8623_v44 = vld [vmem:[%s10316_s28 + $0x9e8] sm:$0xff] }
  0x93   : > { %v10422_v55 = vpop.f32.mrf.mxu1 }
  0x95   : > { %v10424_v59 = vpop.f32.mrf.mxu0 }
  0x96   : > { %8653 = vmatmul.msk.bf16.gmra.mxu1 %vm571_vm2, %v531_v54  ;;  %8669 = vmatmul.msk.bf16.gmra.mxu2 %vm571_vm2, %v547_v56  ;;  %v566_v54 = vpack.c.bf16 %v8620_v46, %v8619_v45  ;;  %v518_v56 = vpack.c.bf16 %v8524_v48, %v8523_v47  ;;  %v8624_v45 = vld [vmem:[%s10316_s28 + $0x9f0] sm:$0xff]  ;;  %v8527_v46 = vld [vmem:[%s10316_s28 + $0x628] sm:$0xff] }
  0x97   : > { %8685 = vmatmul.msk.bf16.gmra.mxu3 %vm571_vm2, %v563_v57  ;;  %v8528_v47 = vld [vmem:[%s10316_s28 + $0x630] sm:$0xff]  ;;  %v568_v3 = vpack.c.bf16 %v8624_v45, %v8623_v44 }
  0x98   : > { %8637 = vmatmul.msk.bf16.gmra.mxu0 %vm571_vm2, %v515_v58  ;;  %v520_v5 = vpack.c.bf16 %v8528_v47, %v8527_v46 }
  0x99   : > { %v10430_v60 = vpop.f32.mrf.mxu2 }
  0x9a   : > { %13258 = vst [vmem:[#allocation2_spill] sm:$0xff] %v10430_v60  ;;  %v10432_v61 = vpop.f32.mrf.mxu3 }
  0x9b   : > { %13259 = vst [vmem:[#allocation3_spill] sm:$0xff] %v10432_v61  ;;  %v10434_v62 = vpop.f32.mrf.mxu1  ;;  %v9015_v61 = vld [vmem:[%s10316_s28 + $0xf88] sm:$0xff] }
  0x9d   : > { %v10436_v63 = vpop.f32.mrf.mxu0 }
  0xa1   : > { %v10446_v9 = vpop.f32.mrf.mxu2 }
  0xa2   : > { %13260 = vst [vmem:[#allocation4_spill] sm:$0xff] %v10446_v9  ;;  %v10448_v10 = vpop.f32.mrf.mxu3 }
  0xa3   : > { %13261 = vst [vmem:[#allocation5_spill] sm:$0xff] %v10448_v10  ;;  %v10450_v12 = vpop.f32.mrf.mxu1 }
  0xa5   : > { %v10452_v16 = vpop.f32.mrf.mxu0 }
  0xa6   : > { %8654 = vmatmul.msk.bf16.gmra.mxu1 %vm571_vm2, %v532_v11  ;;  %8670 = vmatmul.msk.bf16.gmra.mxu2 %vm571_vm2, %v548_v13  ;;  %v8622_v11 = vld [vmem:[%s10316_s28 + $0x9e0] sm:$0xff]  ;;  %v8525_v13 = vld [vmem:[%s10316_s28 + $0x618] sm:$0xff] }
  0xa7   : > { %8686 = vmatmul.msk.bf16.gmra.mxu3 %vm571_vm2, %v564_v14  ;;  %v8526_v14 = vld [vmem:[%s10316_s28 + $0x620] sm:$0xff]  ;;  %v567_v25 = vpack.c.bf16 %v8622_v11, %v8621_v8 }
  0xa8   : > { %8638 = vmatmul.msk.bf16.gmra.mxu0 %vm571_vm2, %v516_v15  ;;  %v519_v26 = vpack.c.bf16 %v8526_v14, %v8525_v13  ;;  %v8561_v14 = vld [vmem:[%s10316_s28 + $0x780] sm:$0xff] }
  0xa9   : > { %v10458_v17 = vpop.f32.mrf.mxu2 }
  0xaa   : > { %13262 = vst [vmem:[#allocation6_spill] sm:$0xff] %v10458_v17  ;;  %v10460_v18 = vpop.f32.mrf.mxu3 }
  0xab   : > { %13263 = vst [vmem:[#allocation7_spill] sm:$0xff] %v10460_v18  ;;  %v10462_v19 = vpop.f32.mrf.mxu1 }
  0xad   : > { %v10464_v20 = vpop.f32.mrf.mxu0 }
  0xb1   : > { %v10474_v29 = vpop.f32.mrf.mxu2 }
  0xb2   : > { %13264 = vst [vmem:[#allocation8_spill] sm:$0xff] %v10474_v29  ;;  %v10476_v30 = vpop.f32.mrf.mxu3 }
  0xb3   : > { %13265 = vst [vmem:[#allocation9_spill] sm:$0xff] %v10476_v30  ;;  %v10478_v32 = vpop.f32.mrf.mxu1 }
  0xb5   : > { %v10480_v36 = vpop.f32.mrf.mxu0 }
  0xb6   : > { %8655 = vmatmul.msk.bf16.gmra.mxu1 %vm571_vm2, %v533_v31  ;;  %8671 = vmatmul.msk.bf16.gmra.mxu2 %vm571_vm2, %v549_v33 }
  0xb7   : > { %8687 = vmatmul.msk.bf16.gmra.mxu3 %vm571_vm2, %v565_v34 }
  0xb8   : > { %8639 = vmatmul.msk.bf16.gmra.mxu0 %vm571_vm2, %v517_v35  ;;  %v8559_v35 = vld [vmem:[%s10316_s28 + $0x768] sm:$0xff] }
  0xb9   : > { %v10486_v37 = vpop.f32.mrf.mxu2 }
  0xba   : > { %13266 = vst [vmem:[#allocation10_spill] sm:$0xff] %v10486_v37  ;;  %v10488_v38 = vpop.f32.mrf.mxu3 }
  0xbb   : > { %13267 = vst [vmem:[#allocation11_spill] sm:$0xff] %v10488_v38  ;;  %v10490_v39 = vpop.f32.mrf.mxu1 }
  0xbd   : > { %v10492_v40 = vpop.f32.mrf.mxu0 }
  0xc1   : > { %v10502_v49 = vpop.f32.mrf.mxu2 }
  0xc2   : > { %13268 = vst [vmem:[#allocation12_spill] sm:$0xff] %v10502_v49  ;;  %v10504_v50 = vpop.f32.mrf.mxu3 }
  0xc3   : > { %13269 = vst [vmem:[#allocation13_spill] sm:$0xff] %v10504_v50  ;;  %v10506_v52 = vpop.f32.mrf.mxu1 }
  0xc5   : > { %v10508_v57 = vpop.f32.mrf.mxu0 }
  0xc6   : > { %8656 = vmatmul.msk.bf16.gmra.mxu1 %vm571_vm2, %v534_v51  ;;  %8672 = vmatmul.msk.bf16.gmra.mxu2 %vm571_vm2, %v550_v53  ;;  %v536_v53 = vpack.c.bf16 %v8560_v41, %v8559_v35  ;;  %v8626_v35 = vld [vmem:[%s10316_s28 + $0xa08] sm:$0xff]  ;;  %v8529_v41 = vld [vmem:[%s10316_s28 + $0x640] sm:$0xff] }
  0xc7   : > { %8688 = vmatmul.msk.bf16.gmra.mxu3 %vm571_vm2, %v566_v54 }
  0xc8   : > { %8640 = vmatmul.msk.bf16.gmra.mxu0 %vm571_vm2, %v518_v56  ;;  %v552_v56 = vpack.c.bf16 %v8592_v43, %v8591_v42  ;;  %v8530_v42 = vld [vmem:[%s10316_s28 + $0x648] sm:$0xff] }
  0xc9   : > { %v10514_v58 = vpop.f32.mrf.mxu2 }
  0xca   : > { %13270 = vst [vmem:[#allocation14_spill] sm:$0xff] %v10514_v58  ;;  %v10516_v0 = vpop.f32.mrf.mxu3 }
  0xcb   : > { %13271 = vst [vmem:[#allocation15_spill] sm:$0xff] %v10516_v0  ;;  %v10518_v1 = vpop.f32.mrf.mxu1  ;;  %v9013_v0 = vld [vmem:[%s10316_s28 + $0xf78] sm:$0xff] }
  0xcd   : > { %v10520_v2 = vpop.f32.mrf.mxu0 }
  0xd1   : > { %v10530_v15 = vpop.f32.mrf.mxu2 }
  0xd2   : > { %13272 = vst [vmem:[#allocation16_spill] sm:$0xff] %v10530_v15  ;;  %v10532_v21 = vpop.f32.mrf.mxu3 }
  0xd3   : > { %13273 = vst [vmem:[#allocation17_spill] sm:$0xff] %v10532_v21  ;;  %v10534_v23 = vpop.f32.mrf.mxu1 }
  0xd5   : > { %v10536_v27 = vpop.f32.mrf.mxu0 }
  0xd6   : > { %8657 = vmatmul.msk.bf16.gmra.mxu1 %vm571_vm2, %v535_v22  ;;  %8673 = vmatmul.msk.bf16.gmra.mxu2 %vm571_vm2, %v551_v24  ;;  %v8562_v22 = vld [vmem:[%s10316_s28 + $0x788] sm:$0xff]  ;;  %v8593_v24 = vld [vmem:[%s10316_s28 + $0x8c0] sm:$0xff] }
  0xd7   : > { %8689 = vmatmul.msk.bf16.gmra.mxu3 %vm571_vm2, %v567_v25  ;;  %v8594_v25 = vld [vmem:[%s10316_s28 + $0x8c8] sm:$0xff]  ;;  %v537_v45 = vpack.c.bf16 %v8562_v22, %v8561_v14 }
  0xd8   : > { %8641 = vmatmul.msk.bf16.gmra.mxu0 %vm571_vm2, %v519_v26  ;;  %v8625_v26 = vld [vmem:[%s10316_s28 + $0xa00] sm:$0xff]  ;;  %v553_v47 = vpack.c.bf16 %v8594_v25, %v8593_v24  ;;  %v184_v22 = vld [vmem:[%s13255_s1 + $0xe] sm:$0x3] }
  0xd9   : > { %v10542_v28 = vpop.f32.mrf.mxu2  ;;  %v6233_v24 = vand.u32 %v10297_v4, %v184_v22  ;;  %v8596_v22 = vld [vmem:[%s10316_s28 + $0x8d8] sm:$0xff] }
  0xda   : > { %13274 = vst [vmem:[#allocation18_spill] sm:$0xff] %v10542_v28  ;;  %v10544_v31 = vpop.f32.mrf.mxu3 }
  0xdb   : > { %13275 = vst [vmem:[#allocation19_spill] sm:$0xff] %v10544_v31  ;;  %v10546_v33 = vpop.f32.mrf.mxu1  ;;  %6242 = vmatpush.bf16.msra.mxu3 %v6233_v24  ;;  %v8532_v24 = vld [vmem:[%s10316_s28 + $0x658] sm:$0xff] }
  0xdd   : > { %v10548_v34 = vpop.f32.mrf.mxu0 }
  0xe1   : > { %v10558_v48 = vpop.f32.mrf.mxu2 }
  0xe2   : > { %13276 = vst [vmem:[#allocation20_spill] sm:$0xff] %v10558_v48  ;;  %v10560_v51 = vpop.f32.mrf.mxu3 }
  0xe3   : > { %13277 = vst [vmem:[#allocation21_spill] sm:$0xff] %v10560_v51  ;;  %v10562_v54 = vpop.f32.mrf.mxu1 }
  0xe4   : > { %13278 = vst [vmem:[#allocation22_spill] sm:$0xff] %v10562_v54 }
  0xe5   : > { %v10564_v6 = vpop.f32.mrf.mxu0 }
  0xe6   : > { %8658 = vmatmul.msk.bf16.gmra.mxu1 %vm571_vm2, %v536_v53  ;;  %8674 = vmatmul.msk.bf16.gmra.mxu2 %vm571_vm2, %v552_v56  ;;  %v569_v53 = vpack.c.bf16 %v8626_v35, %v8625_v26  ;;  %v521_v56 = vpack.c.bf16 %v8530_v42, %v8529_v41  ;;  %v182_v35 = vld [vmem:[%s13255_s1 + $0xa] sm:$0x3] }
  0xe7   : > { %8690 = vmatmul.msk.bf16.gmra.mxu3 %vm571_vm2, %v568_v3  ;;  %v4543_v42 = vand.u32 %v10297_v4, %v182_v35 }
  0xe8   : > { %8642 = vmatmul.msk.bf16.gmra.mxu0 %vm571_vm2, %v520_v5  ;;  %v183_v5 = vld [vmem:[%s13255_s1 + $0xc] sm:$0x3] }
  0xe9   : > { %v10570_v7 = vpop.f32.mrf.mxu2  ;;  %v5388_v14 = vand.u32 %v10297_v4, %v183_v5  ;;  %4552 = vmatpush.bf16.msra.mxu1 %v4543_v42  ;;  %v8564_v5 = vld [vmem:[%s10316_s28 + $0x798] sm:$0xff] }
  0xea   : > { %13279 = vst [vmem:[#allocation23_spill] sm:$0xff] %v10570_v7  ;;  %v10572_v8 = vpop.f32.mrf.mxu3 }
  0xeb   : > { %13280 = vst [vmem:[#allocation24_spill] sm:$0xff] %v10572_v8  ;;  %v10574_v11 = vpop.f32.mrf.mxu1  ;;  %5397 = vmatpush.bf16.msra.mxu2 %v5388_v14  ;;  %v8595_v14 = vld [vmem:[%s10316_s28 + $0x8d0] sm:$0xff] }
  0xec   : > { %13281 = vst [vmem:[#allocation25_spill] sm:$0xff] %v10574_v11  ;;  %v8531_v8 = vld [vmem:[%s10316_s28 + $0x650] sm:$0xff] }
  0xed   : > { %v10576_v13 = vpop.f32.mrf.mxu0  ;;  %v522_v21 = vpack.c.bf16 %v8532_v24, %v8531_v8  ;;  %v186_v8 = vld [vmem:[%s10316_s28] sm:$0xff]  ;;  %v1625_v24 = vld [vmem:[%s10316_s28 + $0x9] sm:$0xff] }
  0xf1   : > { %v10586_v43 = vpop.f32.mrf.mxu2 }
  0xf2   : > { %13282 = vst [vmem:[#allocation26_spill] sm:$0xff] %v10586_v43  ;;  %v10588_v44 = vpop.f32.mrf.mxu3 }
  0xf3   : > { %13283 = vst [vmem:[#allocation27_spill] sm:$0xff] %v10588_v44  ;;  %v10590_v46 = vpop.f32.mrf.mxu1  ;;  %v8628_v44 = vld [vmem:[%s10316_s28 + $0xa18] sm:$0xff] }
  0xf4   : > { %13284 = vst [vmem:[#allocation28_spill] sm:$0xff] %v10590_v46 }
  0xf5   : > { %v10592_v3 = vpop.f32.mrf.mxu0 }
  0xf6   : > { %8659 = vmatmul.msk.bf16.gmra.mxu1 %vm571_vm2, %v537_v45  ;;  %8675 = vmatmul.msk.bf16.gmra.mxu2 %vm571_vm2, %v553_v47  ;;  %v185_v47 = vld [vmem:[%s13255_s1 + $0x10] sm:$0x3] }
  0xf7   : > { %8691 = vmatmul.msk.bf16.gmra.mxu3 %vm571_vm2, %v569_v53  ;;  %v7077_v53 = vand.u32 %v10297_v4, %v185_v47  ;;  %v554_v4 = vpack.c.bf16 %v8596_v22, %v8595_v14  ;;  %v1624_v22 = vld [vmem:[%s10316_s28 + $0x1] sm:$0xff] }
  0xf8   : > { %8643 = vmatmul.msk.bf16.gmra.mxu0 %vm571_vm2, %v521_v56  ;;  %v8563_v56 = vld [vmem:[%s10316_s28 + $0x790] sm:$0xff]  ;;  %v1752_v38 = vpack.c.bf16 %v1625_v24, %v1624_v22  ;;  %v189_v24 = vld [vmem:[%s10316_s28 + $0x18] sm:$0xff] }
  0xf9   : > { %v10606_v25 = vpop.f32.mrf.mxu2  ;;  %7086 = vmatpush.bf16.msra.mxu0 %v7077_v53  ;;  %v538_v42 = vpack.c.bf16 %v8564_v5, %v8563_v56 }
  0xfa   : > { %13285 = vst [vmem:[#allocation29_spill] sm:$0xff] %v10606_v25  ;;  %v10608_v26 = vpop.f32.mrf.mxu3 }
  0xfb   : > { %13286 = vst [vmem:[#allocation30_spill] sm:$0xff] %v10608_v26  ;;  %v10613_v41 = vpop.f32.mrf.mxu1  ;;  %v8627_v26 = vld [vmem:[%s10316_s28 + $0xa10] sm:$0xff] }
  0xfc   : > { %13287 = vst [vmem:[#allocation31_spill] sm:$0xff] %v10613_v41  ;;  %v570_v47 = vpack.c.bf16 %v8628_v44, %v8627_v26  ;;  %v187_v26 = vld [vmem:[%s10316_s28 + $0x8] sm:$0xff]  ;;  %v9032_v41 = vld [vmem:[%s10316_s28 + $0x1030] sm:$0xff] }
  0xfd   : > { %v10616_v45 = vpop.f32.mrf.mxu0 }
 0x101   : > { %v10630_v51 = vpop.f32.mrf.mxu2 }
 0x102   : > { %13288 = vst [vmem:[#allocation32_spill] sm:$0xff] %v10630_v51  ;;  %v10632_v35 = vpop.f32.mrf.mxu3 }
 0x103   : > { %13289 = vst [vmem:[#allocation33_spill] sm:$0xff] %v10632_v35  ;;  %v10634_v31 = vpop.f32.mrf.mxu1  ;;  %v8821_v35 = vld [vmem:[%s10316_s28 + $0xa50] sm:$0xff] }
 0x104   : > { %13290 = vst [vmem:[#allocation34_spill] sm:$0xff] %v10634_v31  ;;  %v9031_v31 = vld [vmem:[%s10316_s28 + $0x1028] sm:$0xff] }
 0x105   : > { %v10636_v53 = vpop.f32.mrf.mxu0 }
 0x106   : > { %8660 = vmatmul.msk.bf16.gmra.mxu1 %vm571_vm2, %v538_v42  ;;  %8676 = vmatmul.msk.bf16.gmra.mxu2 %vm571_vm2, %v554_v4  ;;  %v8822_v42 = vld [vmem:[%s10316_s28 + $0xa58] sm:$0xff]  ;;  %v9014_v4 = vld [vmem:[%s10316_s28 + $0xf80] sm:$0xff] }
 0x107   : > { %8692 = vmatmul.msk.bf16.gmra.mxu3 %vm571_vm2, %v570_v47  ;;  %v314_v47 = vpack.c.bf16 %v187_v26, %v186_v8  ;;  %v2597_v30 = vpack.c.bf16 %v8822_v42, %v8821_v35  ;;  %v3442_v18 = vpack.c.bf16 %v9014_v4, %v9013_v0  ;;  %v188_v0 = vld [vmem:[%s10316_s28 + $0x10] sm:$0xff]  ;;  %v1627_v4 = vld [vmem:[%s10316_s28 + $0x19] sm:$0xff] }
 0x108   : > { %8644 = vmatmul.msk.bf16.gmra.mxu0 %vm571_vm2, %v522_v21  ;;  %v1626_v42 = vld [vmem:[%s10316_s28 + $0x11] sm:$0xff] }
 0x109   : > { %v10642_v56 = vpop.f32.mrf.mxu2 }
 0x10a   : > { %13291 = vst [vmem:[#allocation35_spill] sm:$0xff] %v10642_v56  ;;  %v10644_v5 = vpop.f32.mrf.mxu3 }
 0x10b   : > { %13292 = vst [vmem:[#allocation36_spill] sm:$0xff] %v10644_v5  ;;  %v10646_v14 = vpop.f32.mrf.mxu1 }
 0x10c   : > { %13293 = vst [vmem:[#allocation37_spill] sm:$0xff] %v10646_v14  ;;  %v8839_v14 = vld [vmem:[%s10316_s28 + $0xb00] sm:$0xff] }
 0x10d   : > { %v10648_v44 = vpop.f32.mrf.mxu0 }
 0x111   : > { %v10658_v50 = vpop.f32.mrf.mxu2 }
 0x112   : > { %13294 = vst [vmem:[#allocation38_spill] sm:$0xff] %v10658_v50  ;;  %v10660_v21 = vpop.f32.mrf.mxu3 }
 0x113   : > { %13295 = vst [vmem:[#allocation39_spill] sm:$0xff] %v10660_v21  ;;  %v10662_v5 = vpop.f32.mrf.mxu1  ;;  %v8823_v21 = vld [vmem:[%s10316_s28 + $0xa60] sm:$0xff] }
 0x114   : > { %13296 = vst [vmem:[#allocation40_spill] sm:$0xff] %v10662_v5 }
 0x115   : > { %v10664_v10 = vpop.f32.mrf.mxu0 }
 0x116   : > { %8693 = vmatmul.msk.bf16.vlgmr.msrb.gmra.mxu1 %vm571_vm2, %v314_v47  ;;  %8757 = vmatmul.msk.bf16.vlgmr.msrb.gmra.mxu2 %vm571_vm2, %v1752_v38  ;;  %v8824_v47 = vld [vmem:[%s10316_s28 + $0xa68] sm:$0xff]  ;;  %v9016_v38 = vld [vmem:[%s10316_s28 + $0xf90] sm:$0xff] }
 0x117   : > { %8949 = vmatmul.msk.bf16.vlgmr.msrb.gmra.mxu3 %vm571_vm2, %v2597_v30  ;;  %v315_v30 = vpack.c.bf16 %v189_v24, %v188_v0  ;;  %v2598_v56 = vpack.c.bf16 %v8824_v47, %v8823_v21  ;;  %v3443_v51 = vpack.c.bf16 %v9016_v38, %v9015_v61  ;;  %v190_v61 = vld [vmem:[%s10316_s28 + $0x28] sm:$0xff]  ;;  %v1629_v38 = vld [vmem:[%s10316_s28 + $0x31] sm:$0xff] }
 0x118   : > { %9141 = vmatmul.msk.bf16.vlgmr.msrb.gmra.mxu0 %vm571_vm2, %v3442_v18  ;;  %v1628_v47 = vld [vmem:[%s10316_s28 + $0x29] sm:$0xff] }
 0x119   : > { %v10670_v8 = vpop.f32.mrf.mxu2 }
 0x11a   : > { %13297 = vst [vmem:[#allocation41_spill] sm:$0xff] %v10670_v8  ;;  %v10672_v26 = vpop.f32.mrf.mxu3  ;;  %v1753_v8 = vpack.c.bf16 %v1627_v4, %v1626_v42  ;;  %v191_v4 = vld [vmem:[%s10316_s28 + $0x30] sm:$0xff] }
 0x11b   : > { %13298 = vst [vmem:[#allocation42_spill] sm:$0xff] %v10672_v26  ;;  %v10674_v22 = vpop.f32.mrf.mxu1 }
 0x11c   : > { %13299 = vst [vmem:[#allocation43_spill] sm:$0xff] %v10674_v22 }
 0x11d   : > { %v10676_v35 = vpop.f32.mrf.mxu0 }
 0x121   : > { %v10686_v50 = vpop.f32.mrf.mxu2 }
 0x122   : > { %13300 = vst [vmem:[#allocation44_spill] sm:$0xff] %v10686_v50  ;;  %v10688_v18 = vpop.f32.mrf.mxu3  ;;  %v9017_v50 = vld [vmem:[%s10316_s28 + $0xfa0] sm:$0xff] }
 0x123   : > { %13301 = vst [vmem:[#allocation45_spill] sm:$0xff] %v10688_v18  ;;  %v10690_v26 = vpop.f32.mrf.mxu1  ;;  %v8825_v18 = vld [vmem:[%s10316_s28 + $0xa78] sm:$0xff] }
 0x124   : > { %13302 = vst [vmem:[#allocation46_spill] sm:$0xff] %v10690_v26 }
 0x125   : > { %v10692_v25 = vpop.f32.mrf.mxu0 }
 0x126   : > { %8694 = vmatmul.msk.bf16.gmra.mxu1 %vm571_vm2, %v315_v30  ;;  %8758 = vmatmul.msk.bf16.gmra.mxu2 %vm571_vm2, %v1753_v8  ;;  %v8826_v30 = vld [vmem:[%s10316_s28 + $0xa80] sm:$0xff]  ;;  %v9018_v8 = vld [vmem:[%s10316_s28 + $0xfa8] sm:$0xff] }
 0x127   : > { %8950 = vmatmul.msk.bf16.gmra.mxu3 %vm571_vm2, %v2598_v56  ;;  %v316_v56 = vpack.c.bf16 %v191_v4, %v190_v61  ;;  %v2599_v7 = vpack.c.bf16 %v8826_v30, %v8825_v18  ;;  %v3444_v48 = vpack.c.bf16 %v9018_v8, %v9017_v50  ;;  %v192_v50 = vld [vmem:[%s10316_s28 + $0x38] sm:$0xff]  ;;  %v1631_v8 = vld [vmem:[%s10316_s28 + $0x41] sm:$0xff] }
 0x128   : > { %9142 = vmatmul.msk.bf16.gmra.mxu0 %vm571_vm2, %v3443_v51  ;;  %v1630_v30 = vld [vmem:[%s10316_s28 + $0x39] sm:$0xff] }
 0x129   : > { %v10698_v0 = vpop.f32.mrf.mxu2 }
 0x12a   : > { %13303 = vst [vmem:[#allocation47_spill] sm:$0xff] %v10698_v0  ;;  %v10700_v24 = vpop.f32.mrf.mxu3  ;;  %v1754_v0 = vpack.c.bf16 %v1629_v38, %v1628_v47  ;;  %v193_v38 = vld [vmem:[%s10316_s28 + $0x40] sm:$0xff] }
 0x12b   : > { %13304 = vst [vmem:[#allocation48_spill] sm:$0xff] %v10700_v24  ;;  %v10702_v42 = vpop.f32.mrf.mxu1 }
 0x12c   : > { %13305 = vst [vmem:[#allocation49_spill] sm:$0xff] %v10702_v42 }
 0x12d   : > { %v10704_v21 = vpop.f32.mrf.mxu0 }
 0x131   : > { %v10714_v43 = vpop.f32.mrf.mxu2 }
 0x132   : > { %13306 = vst [vmem:[#allocation50_spill] sm:$0xff] %v10714_v43  ;;  %v10716_v51 = vpop.f32.mrf.mxu3  ;;  %v9019_v43 = vld [vmem:[%s10316_s28 + $0xfb0] sm:$0xff] }
 0x133   : > { %13307 = vst [vmem:[#allocation51_spill] sm:$0xff] %v10716_v51  ;;  %v10718_v24 = vpop.f32.mrf.mxu1  ;;  %v8827_v51 = vld [vmem:[%s10316_s28 + $0xa88] sm:$0xff] }
 0x134   : > { %13308 = vst [vmem:[#allocation52_spill] sm:$0xff] %v10718_v24 }
 0x135   : > { %v10720_v28 = vpop.f32.mrf.mxu0 }
 0x136   : > { %8695 = vmatmul.msk.bf16.gmra.mxu1 %vm571_vm2, %v316_v56  ;;  %8759 = vmatmul.msk.bf16.gmra.mxu2 %vm571_vm2, %v1754_v0  ;;  %v8828_v56 = vld [vmem:[%s10316_s28 + $0xa90] sm:$0xff]  ;;  %v9020_v0 = vld [vmem:[%s10316_s28 + $0xfb8] sm:$0xff] }
 0x137   : > { %8951 = vmatmul.msk.bf16.gmra.mxu3 %vm571_vm2, %v2599_v7  ;;  %v317_v7 = vpack.c.bf16 %v193_v38, %v192_v50  ;;  %v2600_v58 = vpack.c.bf16 %v8828_v56, %v8827_v51  ;;  %v3445_v49 = vpack.c.bf16 %v9020_v0, %v9019_v43  ;;  %v194_v43 = vld [vmem:[%s10316_s28 + $0x50] sm:$0xff]  ;;  %v1633_v0 = vld [vmem:[%s10316_s28 + $0x59] sm:$0xff] }
 0x138   : > { %9143 = vmatmul.msk.bf16.gmra.mxu0 %vm571_vm2, %v3444_v48  ;;  %v1632_v56 = vld [vmem:[%s10316_s28 + $0x51] sm:$0xff] }
 0x139   : > { %v10726_v61 = vpop.f32.mrf.mxu2 }
 0x13a   : > { %13309 = vst [vmem:[#allocation53_spill] sm:$0xff] %v10726_v61  ;;  %v10728_v4 = vpop.f32.mrf.mxu3  ;;  %v1755_v61 = vpack.c.bf16 %v1631_v8, %v1630_v30  ;;  %v195_v8 = vld [vmem:[%s10316_s28 + $0x58] sm:$0xff] }
 0x13b   : > { %13310 = vst [vmem:[#allocation54_spill] sm:$0xff] %v10728_v4  ;;  %v10730_v47 = vpop.f32.mrf.mxu1 }
 0x13c   : > { %13311 = vst [vmem:[#allocation55_spill] sm:$0xff] %v10730_v47 }
 0x13d   : > { %v10732_v18 = vpop.f32.mrf.mxu0 }
 0x141   : > { %v10742_v15 = vpop.f32.mrf.mxu2 }
 0x142   : > { %13312 = vst [vmem:[#allocation56_spill] sm:$0xff] %v10742_v15  ;;  %v10744_v48 = vpop.f32.mrf.mxu3  ;;  %v9021_v15 = vld [vmem:[%s10316_s28 + $0xfc8] sm:$0xff] }
 0x143   : > { %13313 = vst [vmem:[#allocation57_spill] sm:$0xff] %v10744_v48  ;;  %v10746_v4 = vpop.f32.mrf.mxu1  ;;  %v8829_v48 = vld [vmem:[%s10316_s28 + $0xaa0] sm:$0xff] }
 0x144   : > { %13314 = vst [vmem:[#allocation58_spill] sm:$0xff] %v10746_v4 }
 0x145   : > { %v10748_v37 = vpop.f32.mrf.mxu0 }
 0x146   : > { %8696 = vmatmul.msk.bf16.gmra.mxu1 %vm571_vm2, %v317_v7  ;;  %8760 = vmatmul.msk.bf16.gmra.mxu2 %vm571_vm2, %v1755_v61  ;;  %v8830_v7 = vld [vmem:[%s10316_s28 + $0xaa8] sm:$0xff]  ;;  %v9022_v61 = vld [vmem:[%s10316_s28 + $0xfd0] sm:$0xff] }
 0x147   : > { %8952 = vmatmul.msk.bf16.gmra.mxu3 %vm571_vm2, %v2600_v58  ;;  %v318_v58 = vpack.c.bf16 %v195_v8, %v194_v43  ;;  %v2601_v17 = vpack.c.bf16 %v8830_v7, %v8829_v48  ;;  %v3446_v9 = vpack.c.bf16 %v9022_v61, %v9021_v15  ;;  %v196_v15 = vld [vmem:[%s10316_s28 + $0x60] sm:$0xff]  ;;  %v1635_v61 = vld [vmem:[%s10316_s28 + $0x69] sm:$0xff] }
 0x148   : > { %9144 = vmatmul.msk.bf16.gmra.mxu0 %vm571_vm2, %v3445_v49  ;;  %v1634_v7 = vld [vmem:[%s10316_s28 + $0x61] sm:$0xff] }
 0x149   : > { %v10754_v50 = vpop.f32.mrf.mxu2 }
 0x14a   : > { %13315 = vst [vmem:[#allocation59_spill] sm:$0xff] %v10754_v50  ;;  %v10756_v38 = vpop.f32.mrf.mxu3  ;;  %v1756_v50 = vpack.c.bf16 %v1633_v0, %v1632_v56  ;;  %v197_v0 = vld [vmem:[%s10316_s28 + $0x68] sm:$0xff] }
 0x14b   : > { %13316 = vst [vmem:[#allocation60_spill] sm:$0xff] %v10756_v38  ;;  %v10758_v30 = vpop.f32.mrf.mxu1 }
 0x14c   : > { %13317 = vst [vmem:[#allocation61_spill] sm:$0xff] %v10758_v30 }
 0x14d   : > { %v10760_v51 = vpop.f32.mrf.mxu0 }
 0x151   : > { %v10770_v29 = vpop.f32.mrf.mxu2 }
 0x152   : > { %13318 = vst [vmem:[#allocation62_spill] sm:$0xff] %v10770_v29  ;;  %v10772_v49 = vpop.f32.mrf.mxu3  ;;  %v9023_v29 = vld [vmem:[%s10316_s28 + $0xfd8] sm:$0xff] }
 0x153   : > { %13319 = vst [vmem:[#allocation63_spill] sm:$0xff] %v10772_v49  ;;  %v10774_v38 = vpop.f32.mrf.mxu1  ;;  %v8831_v49 = vld [vmem:[%s10316_s28 + $0xab0] sm:$0xff] }
 0x154   : > { %13320 = vst [vmem:[#allocation64_spill] sm:$0xff] %v10774_v38 }
 0x155   : > { %v10776_v60 = vpop.f32.mrf.mxu0 }
 0x156   : > { %8697 = vmatmul.msk.bf16.gmra.mxu1 %vm571_vm2, %v318_v58  ;;  %8761 = vmatmul.msk.bf16.gmra.mxu2 %vm571_vm2, %v1756_v50  ;;  %v8832_v58 = vld [vmem:[%s10316_s28 + $0xab8] sm:$0xff]  ;;  %v9024_v50 = vld [vmem:[%s10316_s28 + $0xfe0] sm:$0xff] }
 0x157   : > { %8953 = vmatmul.msk.bf16.gmra.mxu3 %vm571_vm2, %v2601_v17  ;;  %v319_v17 = vpack.c.bf16 %v197_v0, %v196_v15  ;;  %v3447_v30 = vpack.c.bf16 %v9024_v50, %v9023_v29  ;;  %v198_v29 = vld [vmem:[%s10316_s28 + $0x78] sm:$0xff]  ;;  %v1637_v50 = vld [vmem:[%s10316_s28 + $0x81] sm:$0xff] }
 0x158   : > { %9145 = vmatmul.msk.bf16.gmra.mxu0 %vm571_vm2, %v3446_v9 }
 0x159   : > { %v10782_v43 = vpop.f32.mrf.mxu2 }
 0x15a   : > { %13321 = vst [vmem:[#allocation65_spill] sm:$0xff] %v10782_v43  ;;  %v10784_v8 = vpop.f32.mrf.mxu3  ;;  %v1757_v43 = vpack.c.bf16 %v1635_v61, %v1634_v7  ;;  %v199_v61 = vld [vmem:[%s10316_s28 + $0x80] sm:$0xff] }
 0x15b   : > { %13322 = vst [vmem:[#allocation66_spill] sm:$0xff] %v10784_v8  ;;  %v10786_v56 = vpop.f32.mrf.mxu1 }
 0x15c   : > { %13323 = vst [vmem:[#allocation67_spill] sm:$0xff] %v10786_v56  ;;  %v2602_v56 = vpack.c.bf16 %v8832_v58, %v8831_v49  ;;  %v1636_v58 = vld [vmem:[%s10316_s28 + $0x79] sm:$0xff] }
 0x15d   : > { %v10788_v48 = vpop.f32.mrf.mxu0 }
 0x161   : > { %v10798_v38 = vpop.f32.mrf.mxu2 }
 0x162   : > { %13324 = vst [vmem:[#allocation68_spill] sm:$0xff] %v10798_v38  ;;  %v10800_v9 = vpop.f32.mrf.mxu3  ;;  %v9025_v38 = vld [vmem:[%s10316_s28 + $0xff0] sm:$0xff] }
 0x163   : > { %13325 = vst [vmem:[#allocation69_spill] sm:$0xff] %v10800_v9  ;;  %v10802_v8 = vpop.f32.mrf.mxu1  ;;  %v8833_v9 = vld [vmem:[%s10316_s28 + $0xac8] sm:$0xff] }
 0x164   : > { %13326 = vst [vmem:[#allocation70_spill] sm:$0xff] %v10802_v8 }
 0x165   : > { %v10804_v4 = vpop.f32.mrf.mxu0 }
 0x166   : > { %8698 = vmatmul.msk.bf16.gmra.mxu1 %vm571_vm2, %v319_v17  ;;  %8762 = vmatmul.msk.bf16.gmra.mxu2 %vm571_vm2, %v1757_v43  ;;  %v8834_v17 = vld [vmem:[%s10316_s28 + $0xad0] sm:$0xff]  ;;  %v9026_v43 = vld [vmem:[%s10316_s28 + $0xff8] sm:$0xff] }
 0x167   : > { %8954 = vmatmul.msk.bf16.gmra.mxu3 %vm571_vm2, %v2602_v56  ;;  %v320_v56 = vpack.c.bf16 %v199_v61, %v198_v29  ;;  %v3448_v47 = vpack.c.bf16 %v9026_v43, %v9025_v38  ;;  %v200_v38 = vld [vmem:[%s10316_s28 + $0x88] sm:$0xff]  ;;  %v1639_v43 = vld [vmem:[%s10316_s28 + $0x91] sm:$0xff] }
 0x168   : > { %9146 = vmatmul.msk.bf16.gmra.mxu0 %vm571_vm2, %v3447_v30 }
 0x169   : > { %v10810_v15 = vpop.f32.mrf.mxu2 }
 0x16a   : > { %13327 = vst [vmem:[#allocation71_spill] sm:$0xff] %v10810_v15  ;;  %v10812_v0 = vpop.f32.mrf.mxu3  ;;  %v1758_v15 = vpack.c.bf16 %v1637_v50, %v1636_v58  ;;  %v201_v50 = vld [vmem:[%s10316_s28 + $0x90] sm:$0xff] }
 0x16b   : > { %13328 = vst [vmem:[#allocation72_spill] sm:$0xff] %v10812_v0  ;;  %v10814_v7 = vpop.f32.mrf.mxu1 }
 0x16c   : > { %13329 = vst [vmem:[#allocation73_spill] sm:$0xff] %v10814_v7  ;;  %v2603_v7 = vpack.c.bf16 %v8834_v17, %v8833_v9  ;;  %v1638_v17 = vld [vmem:[%s10316_s28 + $0x89] sm:$0xff] }
 0x16d   : > { %v10816_v49 = vpop.f32.mrf.mxu0 }
 0x171   : > { %v10826_v8 = vpop.f32.mrf.mxu2 }
 0x172   : > { %13330 = vst [vmem:[#allocation74_spill] sm:$0xff] %v10826_v8  ;;  %v10828_v30 = vpop.f32.mrf.mxu3  ;;  %v9027_v8 = vld [vmem:[%s10316_s28 + $0x1000] sm:$0xff] }
 0x173   : > { %13331 = vst [vmem:[#allocation75_spill] sm:$0xff] %v10828_v30  ;;  %v10830_v0 = vpop.f32.mrf.mxu1  ;;  %v8835_v30 = vld [vmem:[%s10316_s28 + $0xad8] sm:$0xff] }
 0x174   : > { %13332 = vst [vmem:[#allocation76_spill] sm:$0xff] %v10830_v0 }
 0x175   : > { %v10832_v24 = vpop.f32.mrf.mxu0 }
 0x176   : > { %8699 = vmatmul.msk.bf16.gmra.mxu1 %vm571_vm2, %v320_v56  ;;  %8763 = vmatmul.msk.bf16.gmra.mxu2 %vm571_vm2, %v1758_v15  ;;  %v8836_v56 = vld [vmem:[%s10316_s28 + $0xae0] sm:$0xff]  ;;  %v9028_v15 = vld [vmem:[%s10316_s28 + $0x1008] sm:$0xff] }
 0x177   : > { %8955 = vmatmul.msk.bf16.gmra.mxu3 %vm571_vm2, %v2603_v7  ;;  %v321_v7 = vpack.c.bf16 %v201_v50, %v200_v38  ;;  %v3449_v42 = vpack.c.bf16 %v9028_v15, %v9027_v8  ;;  %v202_v8 = vld [vmem:[%s10316_s28 + $0xa0] sm:$0xff]  ;;  %v1641_v15 = vld [vmem:[%s10316_s28 + $0xa9] sm:$0xff] }
 0x178   : > { %9147 = vmatmul.msk.bf16.gmra.mxu0 %vm571_vm2, %v3448_v47 }
 0x179   : > { %v10838_v29 = vpop.f32.mrf.mxu2 }
 0x17a   : > { %13333 = vst [vmem:[#allocation77_spill] sm:$0xff] %v10838_v29  ;;  %v10840_v61 = vpop.f32.mrf.mxu3  ;;  %v1759_v29 = vpack.c.bf16 %v1639_v43, %v1638_v17  ;;  %v203_v43 = vld [vmem:[%s10316_s28 + $0xa8] sm:$0xff] }
 0x17b   : > { %13334 = vst [vmem:[#allocation78_spill] sm:$0xff] %v10840_v61  ;;  %v10842_v58 = vpop.f32.mrf.mxu1 }
 0x17c   : > { %13335 = vst [vmem:[#allocation79_spill] sm:$0xff] %v10842_v58  ;;  %v2604_v58 = vpack.c.bf16 %v8836_v56, %v8835_v30  ;;  %v1640_v56 = vld [vmem:[%s10316_s28 + $0xa1] sm:$0xff] }
 0x17d   : > { %v10844_v9 = vpop.f32.mrf.mxu0 }
 0x181   : > { %v10854_v0 = vpop.f32.mrf.mxu2 }
 0x182   : > { %13336 = vst [vmem:[#allocation80_spill] sm:$0xff] %v10854_v0  ;;  %v10856_v47 = vpop.f32.mrf.mxu3  ;;  %v9029_v0 = vld [vmem:[%s10316_s28 + $0x1018] sm:$0xff] }
 0x183   : > { %13337 = vst [vmem:[#allocation81_spill] sm:$0xff] %v10856_v47  ;;  %v10858_v61 = vpop.f32.mrf.mxu1  ;;  %v8837_v47 = vld [vmem:[%s10316_s28 + $0xaf0] sm:$0xff] }
 0x184   : > { %13338 = vst [vmem:[#allocation82_spill] sm:$0xff] %v10858_v61 }
 0x185   : > { %v10860_v26 = vpop.f32.mrf.mxu0 }
 0x186   : > { %8700 = vmatmul.msk.bf16.gmra.mxu1 %vm571_vm2, %v321_v7  ;;  %8764 = vmatmul.msk.bf16.gmra.mxu2 %vm571_vm2, %v1759_v29  ;;  %v8838_v7 = vld [vmem:[%s10316_s28 + $0xaf8] sm:$0xff]  ;;  %v9030_v29 = vld [vmem:[%s10316_s28 + $0x1020] sm:$0xff] }
 0x187   : > { %8956 = vmatmul.msk.bf16.gmra.mxu3 %vm571_vm2, %v2604_v58  ;;  %v3450_v22 = vpack.c.bf16 %v9030_v29, %v9029_v0  ;;  %v204_v29 = vld [vmem:[%s10316_s28 + $0xb0] sm:$0xff] }
 0x188   : > { %9148 = vmatmul.msk.bf16.gmra.mxu0 %vm571_vm2, %v3449_v42  ;;  %v322_v42 = vpack.c.bf16 %v203_v43, %v202_v8 }
 0x189   : > { %v10866_v38 = vpop.f32.mrf.mxu2 }
 0x18a   : > { %13339 = vst [vmem:[#allocation83_spill] sm:$0xff] %v10866_v38  ;;  %v10868_v50 = vpop.f32.mrf.mxu3 }
 0x18b   : > { %13340 = vst [vmem:[#allocation84_spill] sm:$0xff] %v10868_v50  ;;  %v10870_v17 = vpop.f32.mrf.mxu1  ;;  %v1760_v50 = vpack.c.bf16 %v1641_v15, %v1640_v56 }
 0x18c   : > { %13341 = vst [vmem:[#allocation85_spill] sm:$0xff] %v10870_v17  ;;  %v2605_v17 = vpack.c.bf16 %v8838_v7, %v8837_v47 }
 0x18d   : > { %v10872_v30 = vpop.f32.mrf.mxu0 }
 0x191   : > { %v10882_v61 = vpop.f32.mrf.mxu2 }
 0x192   : > { %13342 = vst [vmem:[#allocation86_spill] sm:$0xff] %v10882_v61  ;;  %v10884_v58 = vpop.f32.mrf.mxu3 }
 0x193   : > { %13343 = vst [vmem:[#allocation87_spill] sm:$0xff] %v10884_v58  ;;  %v1304_v38 = vpop.f32.mrf.mxu1  ;;  %v1642_v58 = vld [vmem:[%s10316_s28 + $0xb1] sm:$0xff] }
 0x194   : > { %v1305_v8 = vadd.f32 %v1304_v38, %v10424_v59 }
 0x195   : > { %v3710_v5 = vpop.f32.mrf.mxu0 }
 0x196   : > { %8701 = vmatmul.msk.bf16.gmra.mxu1 %vm571_vm2, %v322_v42  ;;  %8765 = vmatmul.msk.bf16.gmra.mxu2 %vm571_vm2, %v1760_v50  ;;  %v205_v42 = vld [vmem:[%s10316_s28 + $0xb8] sm:$0xff] }
 0x197   : > { %8957 = vmatmul.msk.bf16.gmra.mxu3 %vm571_vm2, %v2605_v17  ;;  %v1643_v50 = vld [vmem:[%s10316_s28 + $0xb9] sm:$0xff]  ;;  %v8840_v17 = vld [vmem:[%s10316_s28 + $0xb08] sm:$0xff]  ;;  %v323_v46 = vpack.c.bf16 %v205_v42, %v204_v29  ;;  %v207_v29 = vld [vmem:[%s10316_s28 + $0xd0] sm:$0xff] }
 0x198   : > { %9149 = vmatmul.msk.bf16.gmra.mxu0 %vm571_vm2, %v3450_v22  ;;  %v1644_v42 = vld [vmem:[%s10316_s28 + $0xc9] sm:$0xff] }
 0x199   : > { %v2020_v43 = vpop.f32.mrf.mxu2 }
 0x19a   : > { %v2865_v47 = vpop.f32.mrf.mxu3  ;;  %v2340_v56 = vadd.f32 %v2020_v43, %v1305_v8  ;;  %v1761_v43 = vpack.c.bf16 %v1643_v50, %v1642_v58 }
 0x19b   : > { %v1306_v0 = vpop.f32.mrf.mxu1 }
 0x19c   : > { %v3185_v15 = vadd.f32 %v2865_v47, %v2340_v56  ;;  %v1307_v22 = vadd.f32 %v1306_v0, %v10436_v63  ;;  %v2606_v47 = vpack.c.bf16 %v8840_v17, %v8839_v14  ;;  %v3451_v56 = vpack.c.bf16 %v9032_v41, %v9031_v31  ;;  %v1645_v17 = vld [vmem:[%s10316_s28 + $0xd1] sm:$0xff] }
 0x19d   : > { %v3712_v7 = vpop.f32.mrf.mxu0 }
 0x19e   : > { %v10894_v61 = vadd.f32 %v3710_v5, %v3185_v15  ;;  %v206_v15 = vld [vmem:[%s10316_s28 + $0xc8] sm:$0xff] }
 0x1a1   : > { %v2022_v59 = vpop.f32.mrf.mxu2 }
 0x1a2   : > { %v2867_v38 = vpop.f32.mrf.mxu3  ;;  %v2341_v11 = vadd.f32 %v2022_v59, %v1307_v22  ;;  %v9033_v59 = vld [vmem:[%s10316_s28 + $0x1040] sm:$0xff] }
 0x1a3   : > { %v1309_v8 = vpop.f32.mrf.mxu1 }
 0x1a4   : > { %v3186_v54 = vadd.f32 %v2867_v38, %v2341_v11  ;;  %v1310_v31 = vadd.f32 %v1309_v8, %v10452_v16  ;;  %v9034_v38 = vld [vmem:[%s10316_s28 + $0x1048] sm:$0xff] }
 0x1a5   : > { %v3715_v5 = vpop.f32.mrf.mxu0 }
 0x1a6   : > { %8702 = vmatmul.msk.bf16.gmra.mxu1 %vm571_vm2, %v323_v46  ;;  %8766 = vmatmul.msk.bf16.gmra.mxu2 %vm571_vm2, %v1761_v43  ;;  %v10905_v63 = vadd.f32 %v3712_v7, %v3186_v54  ;;  %v8841_v54 = vld [vmem:[%s10316_s28 + $0xb18] sm:$0xff]  ;;  %v8842_v7 = vld [vmem:[%s10316_s28 + $0xb20] sm:$0xff]  ;;  %v324_v43 = vpack.c.bf16 %v207_v29, %v206_v15 }
 0x1a7   : > { %8958 = vmatmul.msk.bf16.gmra.mxu3 %vm571_vm2, %v2606_v47 }
 0x1a8   : > { %9150 = vmatmul.msk.bf16.gmra.mxu0 %vm571_vm2, %v3451_v56 }
 0x1a9   : > { %v2025_v11 = vpop.f32.mrf.mxu2 }
 0x1aa   : > { %v2870_v41 = vpop.f32.mrf.mxu3  ;;  %v2342_v14 = vadd.f32 %v2025_v11, %v1310_v31  ;;  %v1762_v31 = vpack.c.bf16 %v1645_v17, %v1644_v42  ;;  %v2607_v11 = vpack.c.bf16 %v8842_v7, %v8841_v54  ;;  %v208_v7 = vld [vmem:[%s10316_s28 + $0xd8] sm:$0xff] }
 0x1ab   : > { %v1311_v58 = vpop.f32.mrf.mxu1 }
 0x1ac   : > { %v3187_v46 = vadd.f32 %v2870_v41, %v2342_v14  ;;  %v1312_v22 = vadd.f32 %v1311_v58, %v10464_v20  ;;  %v3452_v41 = vpack.c.bf16 %v9034_v38, %v9033_v59  ;;  %v1646_v59 = vld [vmem:[%s10316_s28 + $0xd9] sm:$0xff] }
 0x1ad   : > { %v3717_v0 = vpop.f32.mrf.mxu0 }
 0x1ae   : > { %v10912_v50 = vadd.f32 %v3715_v5, %v3187_v46 }
 0x1b1   : > { %v2027_v16 = vpop.f32.mrf.mxu2 }
 0x1b2   : > { %v2872_v8 = vpop.f32.mrf.mxu3  ;;  %v2343_v47 = vadd.f32 %v2027_v16, %v1312_v22  ;;  %v209_v22 = vld [vmem:[%s10316_s28 + $0xe0] sm:$0xff] }
 0x1b3   : > { %v1314_v56 = vpop.f32.mrf.mxu1  ;;  %v1647_v16 = vld [vmem:[%s10316_s28 + $0xe1] sm:$0xff] }
 0x1b4   : > { %v3188_v14 = vadd.f32 %v2872_v8, %v2343_v47  ;;  %v1315_v58 = vadd.f32 %v1314_v56, %v10480_v36  ;;  %v8844_v8 = vld [vmem:[%s10316_s28 + $0xb30] sm:$0xff] }
 0x1b5   : > { %v3720_v5 = vpop.f32.mrf.mxu0  ;;  %v9035_v47 = vld [vmem:[%s10316_s28 + $0x1050] sm:$0xff] }
 0x1b6   : > { %8703 = vmatmul.msk.bf16.gmra.mxu1 %vm571_vm2, %v324_v43  ;;  %8767 = vmatmul.msk.bf16.gmra.mxu2 %vm571_vm2, %v1762_v31  ;;  %v10923_v20 = vadd.f32 %v3717_v0, %v3188_v14  ;;  %v8843_v0 = vld [vmem:[%s10316_s28 + $0xb28] sm:$0xff]  ;;  %v9036_v31 = vld [vmem:[%s10316_s28 + $0x1058] sm:$0xff] }
 0x1b7   : > { %8959 = vmatmul.msk.bf16.gmra.mxu3 %vm571_vm2, %v2607_v11  ;;  %v325_v11 = vpack.c.bf16 %v209_v22, %v208_v7 }
 0x1b8   : > { %9151 = vmatmul.msk.bf16.gmra.mxu0 %vm571_vm2, %v3452_v41 }
 0x1b9   : > { %v2030_v46 = vpop.f32.mrf.mxu2 }
 0x1ba   : > { %v2875_v15 = vpop.f32.mrf.mxu3  ;;  %v2344_v29 = vadd.f32 %v2030_v46, %v1315_v58  ;;  %v1763_v58 = vpack.c.bf16 %v1647_v16, %v1646_v59  ;;  %v2608_v46 = vpack.c.bf16 %v8844_v8, %v8843_v0  ;;  %v210_v8 = vld [vmem:[%s10316_s28 + $0xf0] sm:$0xff] }
 0x1bb   : > { %v1316_v42 = vpop.f32.mrf.mxu1 }
 0x1bc   : > { %v3189_v17 = vadd.f32 %v2875_v15, %v2344_v29  ;;  %v1317_v43 = vadd.f32 %v1316_v42, %v10492_v40  ;;  %v3453_v15 = vpack.c.bf16 %v9036_v31, %v9035_v47  ;;  %v1648_v47 = vld [vmem:[%s10316_s28 + $0xf1] sm:$0xff] }
 0x1bd   : > { %v3722_v54 = vpop.f32.mrf.mxu0 }
 0x1be   : > { %v10930_v38 = vadd.f32 %v3720_v5, %v3189_v17 }
 0x1c1   : > { %v2032_v36 = vpop.f32.mrf.mxu2 }
 0x1c2   : > { %v2877_v56 = vpop.f32.mrf.mxu3  ;;  %v2345_v41 = vadd.f32 %v2032_v36, %v1317_v43  ;;  %v211_v43 = vld [vmem:[%s10316_s28 + $0xf8] sm:$0xff] }
 0x1c3   : > { %v1319_v14 = vpop.f32.mrf.mxu1  ;;  %v1649_v36 = vld [vmem:[%s10316_s28 + $0xf9] sm:$0xff] }
 0x1c4   : > { %v3190_v29 = vadd.f32 %v2877_v56, %v2345_v41  ;;  %v1320_v42 = vadd.f32 %v1319_v14, %v10508_v57  ;;  %v8846_v56 = vld [vmem:[%s10316_s28 + $0xb48] sm:$0xff] }
 0x1c5   : > { %v3725_v5 = vpop.f32.mrf.mxu0  ;;  %v9037_v41 = vld [vmem:[%s10316_s28 + $0x1068] sm:$0xff] }
 0x1c6   : > { %8704 = vmatmul.msk.bf16.gmra.mxu1 %vm571_vm2, %v325_v11  ;;  %8768 = vmatmul.msk.bf16.gmra.mxu2 %vm571_vm2, %v1763_v58  ;;  %v10941_v40 = vadd.f32 %v3722_v54, %v3190_v29  ;;  %v8845_v54 = vld [vmem:[%s10316_s28 + $0xb40] sm:$0xff]  ;;  %v9038_v58 = vld [vmem:[%s10316_s28 + $0x1070] sm:$0xff] }
 0x1c7   : > { %8960 = vmatmul.msk.bf16.gmra.mxu3 %vm571_vm2, %v2608_v46  ;;  %v326_v46 = vpack.c.bf16 %v211_v43, %v210_v8 }
 0x1c8   : > { %9152 = vmatmul.msk.bf16.gmra.mxu0 %vm571_vm2, %v3453_v15 }
 0x1c9   : > { %v2035_v17 = vpop.f32.mrf.mxu2 }
 0x1ca   : > { %v2880_v7 = vpop.f32.mrf.mxu3  ;;  %v2346_v22 = vadd.f32 %v2035_v17, %v1320_v42  ;;  %v1764_v42 = vpack.c.bf16 %v1649_v36, %v1648_v47  ;;  %v2609_v17 = vpack.c.bf16 %v8846_v56, %v8845_v54  ;;  %v212_v56 = vld [vmem:[%s10316_s28 + $0x100] sm:$0xff] }
 0x1cb   : > { %v1321_v59 = vpop.f32.mrf.mxu1 }
 0x1cc   : > { %v3191_v16 = vadd.f32 %v2880_v7, %v2346_v22  ;;  %v1322_v11 = vadd.f32 %v1321_v59, %v10520_v2  ;;  %v3454_v7 = vpack.c.bf16 %v9038_v58, %v9037_v41  ;;  %v1650_v41 = vld [vmem:[%s10316_s28 + $0x101] sm:$0xff] }
 0x1cd   : > { %v3727_v0 = vpop.f32.mrf.mxu0 }
 0x1ce   : > { %v10948_v31 = vadd.f32 %v3725_v5, %v3191_v16 }
 0x1d1   : > { %v2037_v57 = vpop.f32.mrf.mxu2 }
 0x1d2   : > { %v2882_v14 = vpop.f32.mrf.mxu3  ;;  %v2347_v15 = vadd.f32 %v2037_v57, %v1322_v11  ;;  %v213_v11 = vld [vmem:[%s10316_s28 + $0x108] sm:$0xff] }
 0x1d3   : > { %v1324_v29 = vpop.f32.mrf.mxu1  ;;  %v1651_v57 = vld [vmem:[%s10316_s28 + $0x109] sm:$0xff] }
 0x1d4   : > { %v3192_v22 = vadd.f32 %v2882_v14, %v2347_v15  ;;  %v1325_v59 = vadd.f32 %v1324_v29, %v10536_v27  ;;  %v8848_v14 = vld [vmem:[%s10316_s28 + $0xb58] sm:$0xff] }
 0x1d5   : > { %v3730_v5 = vpop.f32.mrf.mxu0  ;;  %v9039_v15 = vld [vmem:[%s10316_s28 + $0x1078] sm:$0xff] }
 0x1d6   : > { %8705 = vmatmul.msk.bf16.gmra.mxu1 %vm571_vm2, %v326_v46  ;;  %8769 = vmatmul.msk.bf16.gmra.mxu2 %vm571_vm2, %v1764_v42  ;;  %v10959_v2 = vadd.f32 %v3727_v0, %v3192_v22  ;;  %v8847_v0 = vld [vmem:[%s10316_s28 + $0xb50] sm:$0xff]  ;;  %v9040_v42 = vld [vmem:[%s10316_s28 + $0x1080] sm:$0xff] }
 0x1d7   : > { %8961 = vmatmul.msk.bf16.gmra.mxu3 %vm571_vm2, %v2609_v17  ;;  %v327_v17 = vpack.c.bf16 %v213_v11, %v212_v56 }
 0x1d8   : > { %9153 = vmatmul.msk.bf16.gmra.mxu0 %vm571_vm2, %v3454_v7 }
 0x1d9   : > { %v2040_v16 = vpop.f32.mrf.mxu2 }
 0x1da   : > { %v2885_v8 = vpop.f32.mrf.mxu3  ;;  %v2348_v43 = vadd.f32 %v2040_v16, %v1325_v59  ;;  %v1765_v59 = vpack.c.bf16 %v1651_v57, %v1650_v41  ;;  %v2610_v16 = vpack.c.bf16 %v8848_v14, %v8847_v0  ;;  %v214_v14 = vld [vmem:[%s10316_s28 + $0x118] sm:$0xff] }
 0x1db   : > { %v1326_v47 = vpop.f32.mrf.mxu1 }
 0x1dc   : > { %v3193_v36 = vadd.f32 %v2885_v8, %v2348_v43  ;;  %v1327_v46 = vadd.f32 %v1326_v47, %v10548_v34  ;;  %v3455_v8 = vpack.c.bf16 %v9040_v42, %v9039_v15  ;;  %v1652_v15 = vld [vmem:[%s10316_s28 + $0x119] sm:$0xff] }
 0x1dd   : > { %v3732_v54 = vpop.f32.mrf.mxu0 }
 0x1de   : > { %v10966_v58 = vadd.f32 %v3730_v5, %v3193_v36 }
 0x1e1   : > { %v2042_v27 = vpop.f32.mrf.mxu2 }
 0x1e2   : > { %v2887_v29 = vpop.f32.mrf.mxu3  ;;  %v2349_v7 = vadd.f32 %v2042_v27, %v1327_v46  ;;  %v215_v46 = vld [vmem:[%s10316_s28 + $0x120] sm:$0xff] }
 0x1e3   : > { %v1329_v22 = vpop.f32.mrf.mxu1  ;;  %v1653_v27 = vld [vmem:[%s10316_s28 + $0x121] sm:$0xff] }
 0x1e4   : > { %v3194_v43 = vadd.f32 %v2887_v29, %v2349_v7  ;;  %v1330_v47 = vadd.f32 %v1329_v22, %v10564_v6  ;;  %v8850_v29 = vld [vmem:[%s10316_s28 + $0xb70] sm:$0xff] }
 0x1e5   : > { %v3735_v5 = vpop.f32.mrf.mxu0  ;;  %v9041_v7 = vld [vmem:[%s10316_s28 + $0x1090] sm:$0xff] }
 0x1e6   : > { %8706 = vmatmul.msk.bf16.gmra.mxu1 %vm571_vm2, %v327_v17  ;;  %8770 = vmatmul.msk.bf16.gmra.mxu2 %vm571_vm2, %v1765_v59  ;;  %v10977_v34 = vadd.f32 %v3732_v54, %v3194_v43  ;;  %v8849_v54 = vld [vmem:[%s10316_s28 + $0xb68] sm:$0xff]  ;;  %v9042_v59 = vld [vmem:[%s10316_s28 + $0x1098] sm:$0xff] }
 0x1e7   : > { %8962 = vmatmul.msk.bf16.gmra.mxu3 %vm571_vm2, %v2610_v16  ;;  %v328_v16 = vpack.c.bf16 %v215_v46, %v214_v14 }
 0x1e8   : > { %9154 = vmatmul.msk.bf16.gmra.mxu0 %vm571_vm2, %v3455_v8 }
 0x1e9   : > { %v2045_v36 = vpop.f32.mrf.mxu2 }
 0x1ea   : > { %v2890_v56 = vpop.f32.mrf.mxu3  ;;  %v2350_v11 = vadd.f32 %v2045_v36, %v1330_v47  ;;  %v1766_v47 = vpack.c.bf16 %v1653_v27, %v1652_v15  ;;  %v2611_v36 = vpack.c.bf16 %v8850_v29, %v8849_v54  ;;  %v216_v29 = vld [vmem:[%s10316_s28 + $0x128] sm:$0xff] }
 0x1eb   : > { %v1331_v41 = vpop.f32.mrf.mxu1 }
 0x1ec   : > { %v3195_v57 = vadd.f32 %v2890_v56, %v2350_v11  ;;  %v1332_v17 = vadd.f32 %v1331_v41, %v10576_v13  ;;  %v3456_v56 = vpack.c.bf16 %v9042_v59, %v9041_v7  ;;  %v1654_v7 = vld [vmem:[%s10316_s28 + $0x129] sm:$0xff] }
 0x1ed   : > { %v3737_v0 = vpop.f32.mrf.mxu0 }
 0x1ee   : > { %v10984_v42 = vadd.f32 %v3735_v5, %v3195_v57 }
 0x1f1   : > { %v2047_v6 = vpop.f32.mrf.mxu2 }
 0x1f2   : > { %v2892_v22 = vpop.f32.mrf.mxu3  ;;  %v2351_v8 = vadd.f32 %v2047_v6, %v1332_v17  ;;  %v217_v17 = vld [vmem:[%s10316_s28 + $0x130] sm:$0xff] }
 0x1f3   : > { %v1334_v43 = vpop.f32.mrf.mxu1  ;;  %v1655_v6 = vld [vmem:[%s10316_s28 + $0x131] sm:$0xff] }
 0x1f4   : > { %v3196_v11 = vadd.f32 %v2892_v22, %v2351_v8  ;;  %v1335_v41 = vadd.f32 %v1334_v43, %v10592_v3  ;;  %v8852_v22 = vld [vmem:[%s10316_s28 + $0xb80] sm:$0xff] }
 0x1f5   : > { %v3740_v5 = vpop.f32.mrf.mxu0  ;;  %v9043_v8 = vld [vmem:[%s10316_s28 + $0x10a0] sm:$0xff] }
 0x1f6   : > { %8707 = vmatmul.msk.bf16.gmra.mxu1 %vm571_vm2, %v328_v16  ;;  %8771 = vmatmul.msk.bf16.gmra.mxu2 %vm571_vm2, %v1766_v47  ;;  %v10995_v13 = vadd.f32 %v3737_v0, %v3196_v11  ;;  %v8851_v0 = vld [vmem:[%s10316_s28 + $0xb78] sm:$0xff]  ;;  %v9044_v47 = vld [vmem:[%s10316_s28 + $0x10a8] sm:$0xff] }
 0x1f7   : > { %8963 = vmatmul.msk.bf16.gmra.mxu3 %vm571_vm2, %v2611_v36  ;;  %v329_v36 = vpack.c.bf16 %v217_v17, %v216_v29 }
 0x1f8   : > { %9155 = vmatmul.msk.bf16.gmra.mxu0 %vm571_vm2, %v3456_v56 }
 0x1f9   : > { %v2050_v57 = vpop.f32.mrf.mxu2 }
 0x1fa   : > { %v2895_v14 = vpop.f32.mrf.mxu3  ;;  %v2352_v46 = vadd.f32 %v2050_v57, %v1335_v41  ;;  %v1767_v41 = vpack.c.bf16 %v1655_v6, %v1654_v7  ;;  %v2612_v57 = vpack.c.bf16 %v8852_v22, %v8851_v0  ;;  %v218_v22 = vld [vmem:[%s10316_s28 + $0x140] sm:$0xff] }
 0x1fb   : > { %v1336_v15 = vpop.f32.mrf.mxu1 }
 0x1fc   : > { %v3197_v27 = vadd.f32 %v2895_v14, %v2352_v46  ;;  %v1337_v16 = vadd.f32 %v1336_v15, %v10616_v45  ;;  %v3457_v14 = vpack.c.bf16 %v9044_v47, %v9043_v8  ;;  %v1656_v8 = vld [vmem:[%s10316_s28 + $0x141] sm:$0xff] }
 0x1fd   : > { %v3742_v54 = vpop.f32.mrf.mxu0 }
 0x1fe   : > { %v11002_v59 = vadd.f32 %v3740_v5, %v3197_v27 }
 0x201   : > { %v2052_v3 = vpop.f32.mrf.mxu2 }
 0x202   : > { %v2897_v43 = vpop.f32.mrf.mxu3  ;;  %v2353_v56 = vadd.f32 %v2052_v3, %v1337_v16  ;;  %v219_v16 = vld [vmem:[%s10316_s28 + $0x148] sm:$0xff] }
 0x203   : > { %v1339_v11 = vpop.f32.mrf.mxu1  ;;  %v1657_v3 = vld [vmem:[%s10316_s28 + $0x149] sm:$0xff] }
 0x204   : > { %v3198_v46 = vadd.f32 %v2897_v43, %v2353_v56  ;;  %v1340_v15 = vadd.f32 %v1339_v11, %v10636_v53  ;;  %v8854_v43 = vld [vmem:[%s10316_s28 + $0xb98] sm:$0xff] }
 0x205   : > { %v3745_v5 = vpop.f32.mrf.mxu0  ;;  %v9045_v56 = vld [vmem:[%s10316_s28 + $0x10b8] sm:$0xff] }
 0x206   : > { %8708 = vmatmul.msk.bf16.gmra.mxu1 %vm571_vm2, %v329_v36  ;;  %8772 = vmatmul.msk.bf16.gmra.mxu2 %vm571_vm2, %v1767_v41  ;;  %v11013_v45 = vadd.f32 %v3742_v54, %v3198_v46  ;;  %v8853_v54 = vld [vmem:[%s10316_s28 + $0xb90] sm:$0xff]  ;;  %v9046_v41 = vld [vmem:[%s10316_s28 + $0x10c0] sm:$0xff] }
 0x207   : > { %8964 = vmatmul.msk.bf16.gmra.mxu3 %vm571_vm2, %v2612_v57  ;;  %v330_v57 = vpack.c.bf16 %v219_v16, %v218_v22 }
 0x208   : > { %9156 = vmatmul.msk.bf16.gmra.mxu0 %vm571_vm2, %v3457_v14 }
 0x209   : > { %v2055_v27 = vpop.f32.mrf.mxu2 }
 0x20a   : > { %v2900_v29 = vpop.f32.mrf.mxu3  ;;  %v2354_v17 = vadd.f32 %v2055_v27, %v1340_v15  ;;  %v1768_v15 = vpack.c.bf16 %v1657_v3, %v1656_v8  ;;  %v2613_v27 = vpack.c.bf16 %v8854_v43, %v8853_v54  ;;  %v220_v43 = vld [vmem:[%s10316_s28 + $0x150] sm:$0xff] }
 0x20b   : > { %v1341_v7 = vpop.f32.mrf.mxu1 }
 0x20c   : > { %v3199_v6 = vadd.f32 %v2900_v29, %v2354_v17  ;;  %v1342_v36 = vadd.f32 %v1341_v7, %v10648_v44  ;;  %v3458_v29 = vpack.c.bf16 %v9046_v41, %v9045_v56  ;;  %v1658_v56 = vld [vmem:[%s10316_s28 + $0x151] sm:$0xff] }
 0x20d   : > { %v3747_v0 = vpop.f32.mrf.mxu0 }
 0x20e   : > { %v11020_v47 = vadd.f32 %v3745_v5, %v3199_v6 }
 0x211   : > { %v2057_v53 = vpop.f32.mrf.mxu2 }
 0x212   : > { %v2902_v11 = vpop.f32.mrf.mxu3  ;;  %v2355_v14 = vadd.f32 %v2057_v53, %v1342_v36  ;;  %v221_v36 = vld [vmem:[%s10316_s28 + $0x158] sm:$0xff] }
 0x213   : > { %v1344_v46 = vpop.f32.mrf.mxu1  ;;  %v1659_v53 = vld [vmem:[%s10316_s28 + $0x159] sm:$0xff] }
 0x214   : > { %v3200_v17 = vadd.f32 %v2902_v11, %v2355_v14  ;;  %v1345_v7 = vadd.f32 %v1344_v46, %v10664_v10  ;;  %v8856_v11 = vld [vmem:[%s10316_s28 + $0xba8] sm:$0xff] }
 0x215   : > { %v3750_v5 = vpop.f32.mrf.mxu0  ;;  %v9047_v14 = vld [vmem:[%s10316_s28 + $0x10c8] sm:$0xff] }
 0x216   : > { %8709 = vmatmul.msk.bf16.gmra.mxu1 %vm571_vm2, %v330_v57  ;;  %8773 = vmatmul.msk.bf16.gmra.mxu2 %vm571_vm2, %v1768_v15  ;;  %v11031_v44 = vadd.f32 %v3747_v0, %v3200_v17  ;;  %v8855_v0 = vld [vmem:[%s10316_s28 + $0xba0] sm:$0xff]  ;;  %v9048_v15 = vld [vmem:[%s10316_s28 + $0x10d0] sm:$0xff] }
 0x217   : > { %8965 = vmatmul.msk.bf16.gmra.mxu3 %vm571_vm2, %v2613_v27  ;;  %v331_v27 = vpack.c.bf16 %v221_v36, %v220_v43 }
 0x218   : > { %9157 = vmatmul.msk.bf16.gmra.mxu0 %vm571_vm2, %v3458_v29 }
 0x219   : > { %v2060_v6 = vpop.f32.mrf.mxu2 }
 0x21a   : > { %v2905_v22 = vpop.f32.mrf.mxu3  ;;  %v2356_v16 = vadd.f32 %v2060_v6, %v1345_v7  ;;  %v1769_v7 = vpack.c.bf16 %v1659_v53, %v1658_v56  ;;  %v2614_v6 = vpack.c.bf16 %v8856_v11, %v8855_v0  ;;  %v222_v11 = vld [vmem:[%s10316_s28 + $0x168] sm:$0xff] }
 0x21b   : > { %v1346_v8 = vpop.f32.mrf.mxu1 }
 0x21c   : > { %v3201_v3 = vadd.f32 %v2905_v22, %v2356_v16  ;;  %v1347_v57 = vadd.f32 %v1346_v8, %v10676_v35  ;;  %v3459_v22 = vpack.c.bf16 %v9048_v15, %v9047_v14  ;;  %v1660_v14 = vld [vmem:[%s10316_s28 + $0x169] sm:$0xff] }
 0x21d   : > { %v3752_v54 = vpop.f32.mrf.mxu0 }
 0x21e   : > { %v11038_v41 = vadd.f32 %v3750_v5, %v3201_v3 }
 0x221   : > { %v2062_v10 = vpop.f32.mrf.mxu2 }
 0x222   : > { %v2907_v46 = vpop.f32.mrf.mxu3  ;;  %v2357_v29 = vadd.f32 %v2062_v10, %v1347_v57  ;;  %v223_v57 = vld [vmem:[%s10316_s28 + $0x170] sm:$0xff] }
 0x223   : > { %v1349_v17 = vpop.f32.mrf.mxu1  ;;  %v1661_v10 = vld [vmem:[%s10316_s28 + $0x171] sm:$0xff] }
 0x224   : > { %v3202_v16 = vadd.f32 %v2907_v46, %v2357_v29  ;;  %v1350_v8 = vadd.f32 %v1349_v17, %v10692_v25  ;;  %v8858_v46 = vld [vmem:[%s10316_s28 + $0xbc0] sm:$0xff] }
 0x225   : > { %v3755_v5 = vpop.f32.mrf.mxu0  ;;  %v9049_v29 = vld [vmem:[%s10316_s28 + $0x10e0] sm:$0xff] }
 0x226   : > { %8710 = vmatmul.msk.bf16.gmra.mxu1 %vm571_vm2, %v331_v27  ;;  %8774 = vmatmul.msk.bf16.gmra.mxu2 %vm571_vm2, %v1769_v7  ;;  %v11049_v35 = vadd.f32 %v3752_v54, %v3202_v16  ;;  %v8857_v54 = vld [vmem:[%s10316_s28 + $0xbb8] sm:$0xff]  ;;  %v9050_v7 = vld [vmem:[%s10316_s28 + $0x10e8] sm:$0xff] }
 0x227   : > { %8966 = vmatmul.msk.bf16.gmra.mxu3 %vm571_vm2, %v2614_v6  ;;  %v332_v6 = vpack.c.bf16 %v223_v57, %v222_v11 }
 0x228   : > { %9158 = vmatmul.msk.bf16.gmra.mxu0 %vm571_vm2, %v3459_v22 }
 0x229   : > { %v2065_v3 = vpop.f32.mrf.mxu2 }
 0x22a   : > { %v2910_v43 = vpop.f32.mrf.mxu3  ;;  %v2358_v36 = vadd.f32 %v2065_v3, %v1350_v8  ;;  %v1770_v8 = vpack.c.bf16 %v1661_v10, %v1660_v14  ;;  %v2615_v3 = vpack.c.bf16 %v8858_v46, %v8857_v54  ;;  %v224_v46 = vld [vmem:[%s10316_s28 + $0x178] sm:$0xff] }
 0x22b   : > { %v1351_v56 = vpop.f32.mrf.mxu1 }
 0x22c   : > { %v3203_v53 = vadd.f32 %v2910_v43, %v2358_v36  ;;  %v1352_v27 = vadd.f32 %v1351_v56, %v10704_v21  ;;  %v3460_v43 = vpack.c.bf16 %v9050_v7, %v9049_v29  ;;  %v1662_v29 = vld [vmem:[%s10316_s28 + $0x179] sm:$0xff] }
 0x22d   : > { %v3757_v0 = vpop.f32.mrf.mxu0 }
 0x22e   : > { %v11056_v15 = vadd.f32 %v3755_v5, %v3203_v53 }
 0x231   : > { %v2067_v25 = vpop.f32.mrf.mxu2 }
 0x232   : > { %v2912_v17 = vpop.f32.mrf.mxu3  ;;  %v2359_v22 = vadd.f32 %v2067_v25, %v1352_v27  ;;  %v225_v27 = vld [vmem:[%s10316_s28 + $0x180] sm:$0xff] }
 0x233   : > { %v1354_v16 = vpop.f32.mrf.mxu1  ;;  %v1663_v25 = vld [vmem:[%s10316_s28 + $0x181] sm:$0xff] }
 0x234   : > { %v3204_v36 = vadd.f32 %v2912_v17, %v2359_v22  ;;  %v1355_v56 = vadd.f32 %v1354_v16, %v10720_v28  ;;  %v8860_v17 = vld [vmem:[%s10316_s28 + $0xbd0] sm:$0xff] }
 0x235   : > { %v3760_v5 = vpop.f32.mrf.mxu0  ;;  %v9051_v22 = vld [vmem:[%s10316_s28 + $0x10f0] sm:$0xff] }
 0x236   : > { %8711 = vmatmul.msk.bf16.gmra.mxu1 %vm571_vm2, %v332_v6  ;;  %8775 = vmatmul.msk.bf16.gmra.mxu2 %vm571_vm2, %v1770_v8  ;;  %v11067_v21 = vadd.f32 %v3757_v0, %v3204_v36  ;;  %v8859_v0 = vld [vmem:[%s10316_s28 + $0xbc8] sm:$0xff]  ;;  %v9052_v8 = vld [vmem:[%s10316_s28 + $0x10f8] sm:$0xff] }
 0x237   : > { %8967 = vmatmul.msk.bf16.gmra.mxu3 %vm571_vm2, %v2615_v3  ;;  %v333_v3 = vpack.c.bf16 %v225_v27, %v224_v46 }
 0x238   : > { %9159 = vmatmul.msk.bf16.gmra.mxu0 %vm571_vm2, %v3460_v43 }
 0x239   : > { %v2070_v53 = vpop.f32.mrf.mxu2 }
 0x23a   : > { %v2915_v11 = vpop.f32.mrf.mxu3  ;;  %v2360_v57 = vadd.f32 %v2070_v53, %v1355_v56  ;;  %v1771_v56 = vpack.c.bf16 %v1663_v25, %v1662_v29  ;;  %v2616_v53 = vpack.c.bf16 %v8860_v17, %v8859_v0  ;;  %v226_v17 = vld [vmem:[%s10316_s28 + $0x190] sm:$0xff] }
 0x23b   : > { %v1356_v14 = vpop.f32.mrf.mxu1 }
 0x23c   : > { %v3205_v10 = vadd.f32 %v2915_v11, %v2360_v57  ;;  %v1357_v6 = vadd.f32 %v1356_v14, %v10732_v18  ;;  %v3461_v11 = vpack.c.bf16 %v9052_v8, %v9051_v22  ;;  %v1664_v22 = vld [vmem:[%s10316_s28 + $0x191] sm:$0xff] }
 0x23d   : > { %v3762_v54 = vpop.f32.mrf.mxu0 }
 0x23e   : > { %v11074_v7 = vadd.f32 %v3760_v5, %v3205_v10 }
 0x241   : > { %v2072_v28 = vpop.f32.mrf.mxu2 }
 0x242   : > { %v2917_v16 = vpop.f32.mrf.mxu3  ;;  %v2361_v43 = vadd.f32 %v2072_v28, %v1357_v6  ;;  %v227_v6 = vld [vmem:[%s10316_s28 + $0x198] sm:$0xff] }
 0x243   : > { %v1359_v36 = vpop.f32.mrf.mxu1  ;;  %v1665_v28 = vld [vmem:[%s10316_s28 + $0x199] sm:$0xff] }
 0x244   : > { %v3206_v57 = vadd.f32 %v2917_v16, %v2361_v43  ;;  %v1360_v14 = vadd.f32 %v1359_v36, %v10748_v37  ;;  %v8862_v16 = vld [vmem:[%s10316_s28 + $0xbe8] sm:$0xff] }
 0x245   : > { %v3765_v5 = vpop.f32.mrf.mxu0  ;;  %v9053_v43 = vld [vmem:[%s10316_s28 + $0x1108] sm:$0xff] }
 0x246   : > { %8712 = vmatmul.msk.bf16.gmra.mxu1 %vm571_vm2, %v333_v3  ;;  %8776 = vmatmul.msk.bf16.gmra.mxu2 %vm571_vm2, %v1771_v56  ;;  %v11085_v18 = vadd.f32 %v3762_v54, %v3206_v57  ;;  %v8861_v54 = vld [vmem:[%s10316_s28 + $0xbe0] sm:$0xff]  ;;  %v9054_v56 = vld [vmem:[%s10316_s28 + $0x1110] sm:$0xff] }
 0x247   : > { %8968 = vmatmul.msk.bf16.gmra.mxu3 %vm571_vm2, %v2616_v53  ;;  %v334_v53 = vpack.c.bf16 %v227_v6, %v226_v17 }
 0x248   : > { %9160 = vmatmul.msk.bf16.gmra.mxu0 %vm571_vm2, %v3461_v11 }
 0x249   : > { %v2075_v10 = vpop.f32.mrf.mxu2 }
 0x24a   : > { %v2920_v46 = vpop.f32.mrf.mxu3  ;;  %v2362_v27 = vadd.f32 %v2075_v10, %v1360_v14  ;;  %v1772_v14 = vpack.c.bf16 %v1665_v28, %v1664_v22  ;;  %v2617_v10 = vpack.c.bf16 %v8862_v16, %v8861_v54  ;;  %v228_v16 = vld [vmem:[%s10316_s28 + $0x1a0] sm:$0xff] }
 0x24b   : > { %v1361_v29 = vpop.f32.mrf.mxu1 }
 0x24c   : > { %v3207_v25 = vadd.f32 %v2920_v46, %v2362_v27  ;;  %v1362_v3 = vadd.f32 %v1361_v29, %v10760_v51  ;;  %v3462_v46 = vpack.c.bf16 %v9054_v56, %v9053_v43  ;;  %v1666_v43 = vld [vmem:[%s10316_s28 + $0x1a1] sm:$0xff] }
 0x24d   : > { %v3767_v0 = vpop.f32.mrf.mxu0 }
 0x24e   : > { %v11092_v8 = vadd.f32 %v3765_v5, %v3207_v25 }
 0x251   : > { %v2077_v37 = vpop.f32.mrf.mxu2 }
 0x252   : > { %v2922_v36 = vpop.f32.mrf.mxu3  ;;  %v2363_v11 = vadd.f32 %v2077_v37, %v1362_v3  ;;  %v229_v3 = vld [vmem:[%s10316_s28 + $0x1a8] sm:$0xff] }
 0x253   : > { %v1364_v57 = vpop.f32.mrf.mxu1  ;;  %v1667_v37 = vld [vmem:[%s10316_s28 + $0x1a9] sm:$0xff] }
 0x254   : > { %v3208_v27 = vadd.f32 %v2922_v36, %v2363_v11  ;;  %v1365_v29 = vadd.f32 %v1364_v57, %v10776_v60  ;;  %v8864_v36 = vld [vmem:[%s10316_s28 + $0xbf8] sm:$0xff] }
 0x255   : > { %v3770_v5 = vpop.f32.mrf.mxu0  ;;  %v9055_v11 = vld [vmem:[%s10316_s28 + $0x1118] sm:$0xff] }
 0x256   : > { %8713 = vmatmul.msk.bf16.gmra.mxu1 %vm571_vm2, %v334_v53  ;;  %8777 = vmatmul.msk.bf16.gmra.mxu2 %vm571_vm2, %v1772_v14  ;;  %v11103_v51 = vadd.f32 %v3767_v0, %v3208_v27  ;;  %v8863_v0 = vld [vmem:[%s10316_s28 + $0xbf0] sm:$0xff]  ;;  %v9056_v14 = vld [vmem:[%s10316_s28 + $0x1120] sm:$0xff] }
 0x257   : > { %8969 = vmatmul.msk.bf16.gmra.mxu3 %vm571_vm2, %v2617_v10  ;;  %v335_v10 = vpack.c.bf16 %v229_v3, %v228_v16 }
 0x258   : > { %9161 = vmatmul.msk.bf16.gmra.mxu0 %vm571_vm2, %v3462_v46 }
 0x259   : > { %v2080_v25 = vpop.f32.mrf.mxu2 }
 0x25a   : > { %v2925_v17 = vpop.f32.mrf.mxu3  ;;  %v2364_v6 = vadd.f32 %v2080_v25, %v1365_v29  ;;  %v1773_v29 = vpack.c.bf16 %v1667_v37, %v1666_v43  ;;  %v2618_v25 = vpack.c.bf16 %v8864_v36, %v8863_v0  ;;  %v230_v36 = vld [vmem:[%s10316_s28 + $0x1b8] sm:$0xff] }
 0x25b   : > { %v1366_v22 = vpop.f32.mrf.mxu1 }
 0x25c   : > { %v3209_v28 = vadd.f32 %v2925_v17, %v2364_v6  ;;  %v1367_v53 = vadd.f32 %v1366_v22, %v10788_v48  ;;  %v3463_v17 = vpack.c.bf16 %v9056_v14, %v9055_v11  ;;  %v1668_v11 = vld [vmem:[%s10316_s28 + $0x1b9] sm:$0xff] }
 0x25d   : > { %v3772_v54 = vpop.f32.mrf.mxu0 }
 0x25e   : > { %v11110_v56 = vadd.f32 %v3770_v5, %v3209_v28 }
 0x261   : > { %v2082_v60 = vpop.f32.mrf.mxu2 }
 0x262   : > { %v2927_v57 = vpop.f32.mrf.mxu3  ;;  %v2365_v46 = vadd.f32 %v2082_v60, %v1367_v53  ;;  %v231_v53 = vld [vmem:[%s10316_s28 + $0x1c0] sm:$0xff] }
 0x263   : > { %v1369_v27 = vpop.f32.mrf.mxu1  ;;  %v1669_v60 = vld [vmem:[%s10316_s28 + $0x1c1] sm:$0xff] }
 0x264   : > { %v3210_v6 = vadd.f32 %v2927_v57, %v2365_v46  ;;  %v1370_v22 = vadd.f32 %v1369_v27, %v10804_v4  ;;  %v8866_v57 = vld [vmem:[%s10316_s28 + $0xc10] sm:$0xff] }
 0x265   : > { %v3775_v5 = vpop.f32.mrf.mxu0  ;;  %v9057_v46 = vld [vmem:[%s10316_s28 + $0x1130] sm:$0xff] }
 0x266   : > { %8714 = vmatmul.msk.bf16.gmra.mxu1 %vm571_vm2, %v335_v10  ;;  %8778 = vmatmul.msk.bf16.gmra.mxu2 %vm571_vm2, %v1773_v29  ;;  %v11121_v48 = vadd.f32 %v3772_v54, %v3210_v6  ;;  %v8865_v54 = vld [vmem:[%s10316_s28 + $0xc08] sm:$0xff]  ;;  %v9058_v29 = vld [vmem:[%s10316_s28 + $0x1138] sm:$0xff] }
 0x267   : > { %8970 = vmatmul.msk.bf16.gmra.mxu3 %vm571_vm2, %v2618_v25  ;;  %v336_v25 = vpack.c.bf16 %v231_v53, %v230_v36 }
 0x268   : > { %9162 = vmatmul.msk.bf16.gmra.mxu0 %vm571_vm2, %v3463_v17 }
 0x269   : > { %v2085_v28 = vpop.f32.mrf.mxu2 }
 0x26a   : > { %v2930_v16 = vpop.f32.mrf.mxu3  ;;  %v2366_v3 = vadd.f32 %v2085_v28, %v1370_v22  ;;  %v1774_v22 = vpack.c.bf16 %v1669_v60, %v1668_v11  ;;  %v2619_v28 = vpack.c.bf16 %v8866_v57, %v8865_v54  ;;  %v232_v57 = vld [vmem:[%s10316_s28 + $0x1c8] sm:$0xff] }
 0x26b   : > { %v1371_v43 = vpop.f32.mrf.mxu1 }
 0x26c   : > { %v3211_v37 = vadd.f32 %v2930_v16, %v2366_v3  ;;  %v1372_v10 = vadd.f32 %v1371_v43, %v10816_v49  ;;  %v3464_v16 = vpack.c.bf16 %v9058_v29, %v9057_v46  ;;  %v1670_v46 = vld [vmem:[%s10316_s28 + $0x1c9] sm:$0xff] }
 0x26d   : > { %v3777_v0 = vpop.f32.mrf.mxu0 }
 0x26e   : > { %v11128_v14 = vadd.f32 %v3775_v5, %v3211_v37 }
 0x271   : > { %v2087_v4 = vpop.f32.mrf.mxu2 }
 0x272   : > { %v2932_v27 = vpop.f32.mrf.mxu3  ;;  %v2367_v17 = vadd.f32 %v2087_v4, %v1372_v10  ;;  %v233_v10 = vld [vmem:[%s10316_s28 + $0x1d0] sm:$0xff] }
 0x273   : > { %v1374_v6 = vpop.f32.mrf.mxu1  ;;  %v1671_v4 = vld [vmem:[%s10316_s28 + $0x1d1] sm:$0xff] }
 0x274   : > { %v3212_v3 = vadd.f32 %v2932_v27, %v2367_v17  ;;  %v1375_v43 = vadd.f32 %v1374_v6, %v10832_v24  ;;  %v8868_v27 = vld [vmem:[%s10316_s28 + $0xc20] sm:$0xff] }
 0x275   : > { %v3780_v5 = vpop.f32.mrf.mxu0  ;;  %v9059_v17 = vld [vmem:[%s10316_s28 + $0x1140] sm:$0xff] }
 0x276   : > { %8715 = vmatmul.msk.bf16.gmra.mxu1 %vm571_vm2, %v336_v25  ;;  %8779 = vmatmul.msk.bf16.gmra.mxu2 %vm571_vm2, %v1774_v22  ;;  %v11139_v49 = vadd.f32 %v3777_v0, %v3212_v3  ;;  %v8867_v0 = vld [vmem:[%s10316_s28 + $0xc18] sm:$0xff]  ;;  %v9060_v22 = vld [vmem:[%s10316_s28 + $0x1148] sm:$0xff] }
 0x277   : > { %8971 = vmatmul.msk.bf16.gmra.mxu3 %vm571_vm2, %v2619_v28  ;;  %v337_v28 = vpack.c.bf16 %v233_v10, %v232_v57 }
 0x278   : > { %9163 = vmatmul.msk.bf16.gmra.mxu0 %vm571_vm2, %v3464_v16 }
 0x279   : > { %v2090_v37 = vpop.f32.mrf.mxu2 }
 0x27a   : > { %v2935_v36 = vpop.f32.mrf.mxu3  ;;  %v2368_v53 = vadd.f32 %v2090_v37, %v1375_v43  ;;  %v1775_v43 = vpack.c.bf16 %v1671_v4, %v1670_v46  ;;  %v2620_v37 = vpack.c.bf16 %v8868_v27, %v8867_v0  ;;  %v234_v27 = vld [vmem:[%s10316_s28 + $0x1e0] sm:$0xff] }
 0x27b   : > { %v1376_v11 = vpop.f32.mrf.mxu1 }
 0x27c   : > { %v3213_v60 = vadd.f32 %v2935_v36, %v2368_v53  ;;  %v1377_v25 = vadd.f32 %v1376_v11, %v10844_v9  ;;  %v3465_v36 = vpack.c.bf16 %v9060_v22, %v9059_v17  ;;  %v1672_v17 = vld [vmem:[%s10316_s28 + $0x1e1] sm:$0xff] }
 0x27d   : > { %v3782_v54 = vpop.f32.mrf.mxu0 }
 0x27e   : > { %v11146_v29 = vadd.f32 %v3780_v5, %v3213_v60 }
 0x281   : > { %v2092_v24 = vpop.f32.mrf.mxu2 }
 0x282   : > { %v2937_v6 = vpop.f32.mrf.mxu3  ;;  %v2369_v16 = vadd.f32 %v2092_v24, %v1377_v25  ;;  %v235_v25 = vld [vmem:[%s10316_s28 + $0x1e8] sm:$0xff] }
 0x283   : > { %v1379_v3 = vpop.f32.mrf.mxu1  ;;  %v1673_v24 = vld [vmem:[%s10316_s28 + $0x1e9] sm:$0xff] }
 0x284   : > { %v3214_v53 = vadd.f32 %v2937_v6, %v2369_v16  ;;  %v1380_v11 = vadd.f32 %v1379_v3, %v10860_v26  ;;  %v8870_v6 = vld [vmem:[%s10316_s28 + $0xc38] sm:$0xff] }
 0x285   : > { %v3785_v5 = vpop.f32.mrf.mxu0  ;;  %v9061_v16 = vld [vmem:[%s10316_s28 + $0x1158] sm:$0xff] }
 0x286   : > { %8716 = vmatmul.msk.bf16.gmra.mxu1 %vm571_vm2, %v337_v28  ;;  %8780 = vmatmul.msk.bf16.gmra.mxu2 %vm571_vm2, %v1775_v43  ;;  %v11157_v9 = vadd.f32 %v3782_v54, %v3214_v53  ;;  %v8869_v54 = vld [vmem:[%s10316_s28 + $0xc30] sm:$0xff]  ;;  %v9062_v43 = vld [vmem:[%s10316_s28 + $0x1160] sm:$0xff] }
 0x287   : > { %8972 = vmatmul.msk.bf16.gmra.mxu3 %vm571_vm2, %v2620_v37  ;;  %v338_v37 = vpack.c.bf16 %v235_v25, %v234_v27 }
 0x288   : > { %9164 = vmatmul.msk.bf16.gmra.mxu0 %vm571_vm2, %v3465_v36 }
 0x289   : > { %v2095_v60 = vpop.f32.mrf.mxu2 }
 0x28a   : > { %v2940_v57 = vpop.f32.mrf.mxu3  ;;  %v2370_v10 = vadd.f32 %v2095_v60, %v1380_v11  ;;  %v1776_v11 = vpack.c.bf16 %v1673_v24, %v1672_v17  ;;  %v2621_v60 = vpack.c.bf16 %v8870_v6, %v8869_v54  ;;  %v236_v6 = vld [vmem:[%s10316_s28 + $0x1f0] sm:$0xff] }
 0x28b   : > { %v1381_v46 = vpop.f32.mrf.mxu1 }
 0x28c   : > { %v3215_v4 = vadd.f32 %v2940_v57, %v2370_v10  ;;  %v1382_v28 = vadd.f32 %v1381_v46, %v10872_v30  ;;  %v3466_v57 = vpack.c.bf16 %v9062_v43, %v9061_v16  ;;  %v1674_v16 = vld [vmem:[%s10316_s28 + $0x1f1] sm:$0xff] }
 0x28d   : > { %v3787_v0 = vpop.f32.mrf.mxu0 }
 0x28e   : > { %v11164_v22 = vadd.f32 %v3785_v5, %v3215_v4 }
 0x291   : > { %v2097_v26 = vpop.f32.mrf.mxu2 }
 0x292   : > { %v2942_v3 = vpop.f32.mrf.mxu3  ;;  %v2371_v36 = vadd.f32 %v2097_v26, %v1382_v28  ;;  %v237_v28 = vld [vmem:[%s10316_s28 + $0x1f8] sm:$0xff] }
 0x293   : > { %v1384_v53 = vpop.f32.mrf.mxu1  ;;  %v1675_v26 = vld [vmem:[%s10316_s28 + $0x1f9] sm:$0xff] }
 0x294   : > { %v3216_v10 = vadd.f32 %v2942_v3, %v2371_v36  ;;  %v1385_v46 = vadd.f32 %v1384_v53, %v10422_v55  ;;  %v8872_v3 = vld [vmem:[%s10316_s28 + $0xc48] sm:$0xff] }
 0x295   : > { %v3790_v5 = vpop.f32.mrf.mxu0  ;;  %v9063_v36 = vld [vmem:[%s10316_s28 + $0x1168] sm:$0xff] }
 0x296   : > { %8717 = vmatmul.msk.bf16.gmra.mxu1 %vm571_vm2, %v338_v37  ;;  %8781 = vmatmul.msk.bf16.gmra.mxu2 %vm571_vm2, %v1776_v11  ;;  %v11175_v30 = vadd.f32 %v3787_v0, %v3216_v10  ;;  %v8871_v0 = vld [vmem:[%s10316_s28 + $0xc40] sm:$0xff]  ;;  %v9064_v11 = vld [vmem:[%s10316_s28 + $0x1170] sm:$0xff] }
 0x297   : > { %8973 = vmatmul.msk.bf16.gmra.mxu3 %vm571_vm2, %v2621_v60  ;;  %v339_v60 = vpack.c.bf16 %v237_v28, %v236_v6 }
 0x298   : > { %9165 = vmatmul.msk.bf16.gmra.mxu0 %vm571_vm2, %v3466_v57 }
 0x299   : > { %v2100_v4 = vpop.f32.mrf.mxu2 }
 0x29a   : > { %v2945_v27 = vpop.f32.mrf.mxu3  ;;  %v2372_v25 = vadd.f32 %v2100_v4, %v1385_v46  ;;  %v1777_v46 = vpack.c.bf16 %v1675_v26, %v1674_v16  ;;  %v2622_v4 = vpack.c.bf16 %v8872_v3, %v8871_v0  ;;  %v238_v3 = vld [vmem:[%s10316_s28 + $0x208] sm:$0xff] }
 0x29b   : > { %v1386_v17 = vpop.f32.mrf.mxu1 }
 0x29c   : > { %v3217_v24 = vadd.f32 %v2945_v27, %v2372_v25  ;;  %v1387_v37 = vadd.f32 %v1386_v17, %v10434_v62  ;;  %v3467_v27 = vpack.c.bf16 %v9064_v11, %v9063_v36  ;;  %v1676_v36 = vld [vmem:[%s10316_s28 + $0x209] sm:$0xff] }
 0x29d   : > { %v3792_v54 = vpop.f32.mrf.mxu0 }
 0x29e   : > { %v11182_v43 = vadd.f32 %v3790_v5, %v3217_v24 }
 0x2a1   : > { %v2102_v55 = vpop.f32.mrf.mxu2 }
 0x2a2   : > { %v2947_v53 = vpop.f32.mrf.mxu3  ;;  %v2373_v57 = vadd.f32 %v2102_v55, %v1387_v37  ;;  %v239_v37 = vld [vmem:[%s10316_s28 + $0x210] sm:$0xff] }
 0x2a3   : > { %v1389_v10 = vpop.f32.mrf.mxu1  ;;  %v1677_v55 = vld [vmem:[%s10316_s28 + $0x211] sm:$0xff] }
 0x2a4   : > { %v3218_v25 = vadd.f32 %v2947_v53, %v2373_v57  ;;  %v1390_v17 = vadd.f32 %v1389_v10, %v10450_v12  ;;  %v8874_v53 = vld [vmem:[%s10316_s28 + $0xc60] sm:$0xff] }
 0x2a5   : > { %v3795_v5 = vpop.f32.mrf.mxu0  ;;  %v9065_v57 = vld [vmem:[%s10316_s28 + $0x1180] sm:$0xff] }
 0x2a6   : > { %8718 = vmatmul.msk.bf16.gmra.mxu1 %vm571_vm2, %v339_v60  ;;  %8782 = vmatmul.msk.bf16.gmra.mxu2 %vm571_vm2, %v1777_v46  ;;  %v11193_v62 = vadd.f32 %v3792_v54, %v3218_v25  ;;  %v8873_v54 = vld [vmem:[%s10316_s28 + $0xc58] sm:$0xff]  ;;  %v9066_v46 = vld [vmem:[%s10316_s28 + $0x1188] sm:$0xff] }
 0x2a7   : > { %8974 = vmatmul.msk.bf16.gmra.mxu3 %vm571_vm2, %v2622_v4  ;;  %v340_v4 = vpack.c.bf16 %v239_v37, %v238_v3 }
 0x2a8   : > { %9166 = vmatmul.msk.bf16.gmra.mxu0 %vm571_vm2, %v3467_v27 }
 0x2a9   : > { %v2105_v24 = vpop.f32.mrf.mxu2 }
 0x2aa   : > { %v2950_v6 = vpop.f32.mrf.mxu3  ;;  %v2374_v28 = vadd.f32 %v2105_v24, %v1390_v17  ;;  %v1778_v17 = vpack.c.bf16 %v1677_v55, %v1676_v36  ;;  %v2623_v24 = vpack.c.bf16 %v8874_v53, %v8873_v54  ;;  %v240_v53 = vld [vmem:[%s10316_s28 + $0x218] sm:$0xff] }
 0x2ab   : > { %v1391_v16 = vpop.f32.mrf.mxu1 }
 0x2ac   : > { %v3219_v26 = vadd.f32 %v2950_v6, %v2374_v28  ;;  %v1392_v60 = vadd.f32 %v1391_v16, %v10462_v19  ;;  %v3468_v6 = vpack.c.bf16 %v9066_v46, %v9065_v57  ;;  %v1678_v57 = vld [vmem:[%s10316_s28 + $0x219] sm:$0xff] }
 0x2ad   : > { %v3797_v0 = vpop.f32.mrf.mxu0 }
 0x2ae   : > { %v11200_v11 = vadd.f32 %v3795_v5, %v3219_v26 }
 0x2b1   : > { %v2107_v12 = vpop.f32.mrf.mxu2 }
 0x2b2   : > { %v2952_v10 = vpop.f32.mrf.mxu3  ;;  %v2375_v27 = vadd.f32 %v2107_v12, %v1392_v60  ;;  %v241_v60 = vld [vmem:[%s10316_s28 + $0x220] sm:$0xff] }
 0x2b3   : > { %v1394_v25 = vpop.f32.mrf.mxu1  ;;  %v1679_v12 = vld [vmem:[%s10316_s28 + $0x221] sm:$0xff] }
 0x2b4   : > { %v3220_v28 = vadd.f32 %v2952_v10, %v2375_v27  ;;  %v1395_v16 = vadd.f32 %v1394_v25, %v10478_v32  ;;  %v8876_v10 = vld [vmem:[%s10316_s28 + $0xc70] sm:$0xff] }
 0x2b5   : > { %v3800_v5 = vpop.f32.mrf.mxu0  ;;  %v9067_v27 = vld [vmem:[%s10316_s28 + $0x1190] sm:$0xff] }
 0x2b6   : > { %8719 = vmatmul.msk.bf16.gmra.mxu1 %vm571_vm2, %v340_v4  ;;  %8783 = vmatmul.msk.bf16.gmra.mxu2 %vm571_vm2, %v1778_v17  ;;  %v11211_v19 = vadd.f32 %v3797_v0, %v3220_v28  ;;  %v8875_v0 = vld [vmem:[%s10316_s28 + $0xc68] sm:$0xff]  ;;  %v9068_v17 = vld [vmem:[%s10316_s28 + $0x1198] sm:$0xff] }
 0x2b7   : > { %8975 = vmatmul.msk.bf16.gmra.mxu3 %vm571_vm2, %v2623_v24  ;;  %v341_v24 = vpack.c.bf16 %v241_v60, %v240_v53 }
 0x2b8   : > { %9167 = vmatmul.msk.bf16.gmra.mxu0 %vm571_vm2, %v3468_v6 }
 0x2b9   : > { %v2110_v26 = vpop.f32.mrf.mxu2 }
 0x2ba   : > { %v2955_v3 = vpop.f32.mrf.mxu3  ;;  %v2376_v37 = vadd.f32 %v2110_v26, %v1395_v16  ;;  %v1779_v16 = vpack.c.bf16 %v1679_v12, %v1678_v57  ;;  %v2624_v26 = vpack.c.bf16 %v8876_v10, %v8875_v0  ;;  %v242_v10 = vld [vmem:[%s10316_s28 + $0x230] sm:$0xff] }
 0x2bb   : > { %v1396_v36 = vpop.f32.mrf.mxu1 }
 0x2bc   : > { %v3221_v55 = vadd.f32 %v2955_v3, %v2376_v37  ;;  %v1397_v4 = vadd.f32 %v1396_v36, %v10490_v39  ;;  %v3469_v3 = vpack.c.bf16 %v9068_v17, %v9067_v27  ;;  %v1680_v27 = vld [vmem:[%s10316_s28 + $0x231] sm:$0xff] }
 0x2bd   : > { %v3802_v54 = vpop.f32.mrf.mxu0 }
 0x2be   : > { %v11218_v46 = vadd.f32 %v3800_v5, %v3221_v55 }
 0x2c1   : > { %v2112_v32 = vpop.f32.mrf.mxu2 }
 0x2c2   : > { %v2957_v25 = vpop.f32.mrf.mxu3  ;;  %v2377_v6 = vadd.f32 %v2112_v32, %v1397_v4  ;;  %v243_v4 = vld [vmem:[%s10316_s28 + $0x238] sm:$0xff] }
 0x2c3   : > { %v1399_v28 = vpop.f32.mrf.mxu1  ;;  %v1681_v32 = vld [vmem:[%s10316_s28 + $0x239] sm:$0xff] }
 0x2c4   : > { %v3222_v37 = vadd.f32 %v2957_v25, %v2377_v6  ;;  %v1400_v36 = vadd.f32 %v1399_v28, %v10506_v52  ;;  %v8878_v25 = vld [vmem:[%s10316_s28 + $0xc88] sm:$0xff] }
 0x2c5   : > { %v3805_v5 = vpop.f32.mrf.mxu0  ;;  %v9069_v6 = vld [vmem:[%s10316_s28 + $0x11a8] sm:$0xff] }
 0x2c6   : > { %8720 = vmatmul.msk.bf16.gmra.mxu1 %vm571_vm2, %v341_v24  ;;  %8784 = vmatmul.msk.bf16.gmra.mxu2 %vm571_vm2, %v1779_v16  ;;  %v11229_v39 = vadd.f32 %v3802_v54, %v3222_v37  ;;  %v8877_v54 = vld [vmem:[%s10316_s28 + $0xc80] sm:$0xff]  ;;  %v9070_v16 = vld [vmem:[%s10316_s28 + $0x11b0] sm:$0xff] }
 0x2c7   : > { %8976 = vmatmul.msk.bf16.gmra.mxu3 %vm571_vm2, %v2624_v26  ;;  %v342_v26 = vpack.c.bf16 %v243_v4, %v242_v10 }
 0x2c8   : > { %9168 = vmatmul.msk.bf16.gmra.mxu0 %vm571_vm2, %v3469_v3 }
 0x2c9   : > { %v2115_v55 = vpop.f32.mrf.mxu2 }
 0x2ca   : > { %v2960_v53 = vpop.f32.mrf.mxu3  ;;  %v2378_v60 = vadd.f32 %v2115_v55, %v1400_v36  ;;  %v1780_v36 = vpack.c.bf16 %v1681_v32, %v1680_v27  ;;  %v2625_v55 = vpack.c.bf16 %v8878_v25, %v8877_v54  ;;  %v244_v25 = vld [vmem:[%s10316_s28 + $0x240] sm:$0xff] }
 0x2cb   : > { %v1401_v57 = vpop.f32.mrf.mxu1 }
 0x2cc   : > { %v3223_v12 = vadd.f32 %v2960_v53, %v2378_v60  ;;  %v1402_v24 = vadd.f32 %v1401_v57, %v10518_v1  ;;  %v3470_v53 = vpack.c.bf16 %v9070_v16, %v9069_v6  ;;  %v1682_v6 = vld [vmem:[%s10316_s28 + $0x241] sm:$0xff] }
 0x2cd   : > { %v3807_v0 = vpop.f32.mrf.mxu0 }
 0x2ce   : > { %v11236_v17 = vadd.f32 %v3805_v5, %v3223_v12 }
 0x2d1   : > { %v2117_v52 = vpop.f32.mrf.mxu2 }
 0x2d2   : > { %v2962_v28 = vpop.f32.mrf.mxu3  ;;  %v2379_v3 = vadd.f32 %v2117_v52, %v1402_v24  ;;  %v245_v24 = vld [vmem:[%s10316_s28 + $0x248] sm:$0xff] }
 0x2d3   : > { %v1404_v37 = vpop.f32.mrf.mxu1  ;;  %v1683_v52 = vld [vmem:[%s10316_s28 + $0x249] sm:$0xff] }
 0x2d4   : > { %v3224_v60 = vadd.f32 %v2962_v28, %v2379_v3  ;;  %v1405_v57 = vadd.f32 %v1404_v37, %v10534_v23  ;;  %v8880_v28 = vld [vmem:[%s10316_s28 + $0xc98] sm:$0xff] }
 0x2d5   : > { %v3810_v5 = vpop.f32.mrf.mxu0  ;;  %v9071_v3 = vld [vmem:[%s10316_s28 + $0x11b8] sm:$0xff] }
 0x2d6   : > { %8721 = vmatmul.msk.bf16.gmra.mxu1 %vm571_vm2, %v342_v26  ;;  %8785 = vmatmul.msk.bf16.gmra.mxu2 %vm571_vm2, %v1780_v36  ;;  %v11247_v1 = vadd.f32 %v3807_v0, %v3224_v60  ;;  %v8879_v0 = vld [vmem:[%s10316_s28 + $0xc90] sm:$0xff]  ;;  %v9072_v36 = vld [vmem:[%s10316_s28 + $0x11c0] sm:$0xff] }
 0x2d7   : > { %8977 = vmatmul.msk.bf16.gmra.mxu3 %vm571_vm2, %v2625_v55  ;;  %v343_v55 = vpack.c.bf16 %v245_v24, %v244_v25 }
 0x2d8   : > { %13344 = vst [vmem:[#allocation88_spill] sm:$0xff] %v11247_v1  ;;  %9169 = vmatmul.msk.bf16.gmra.mxu0 %vm571_vm2, %v3470_v53 }
 0x2d9   : > { %v2120_v12 = vpop.f32.mrf.mxu2 }
 0x2da   : > { %v2965_v10 = vpop.f32.mrf.mxu3  ;;  %v2380_v4 = vadd.f32 %v2120_v12, %v1405_v57  ;;  %v1781_v57 = vpack.c.bf16 %v1683_v52, %v1682_v6  ;;  %v2626_v12 = vpack.c.bf16 %v8880_v28, %v8879_v0 }
 0x2db   : > { %v1406_v27 = vpop.f32.mrf.mxu1 }
 0x2dc   : > { %v3225_v32 = vadd.f32 %v2965_v10, %v2380_v4  ;;  %v1407_v26 = vadd.f32 %v1406_v27, %v10546_v33  ;;  %v3471_v10 = vpack.c.bf16 %v9072_v36, %v9071_v3  ;;  %v13347_v27 = vld [vmem:[#allocation22_spill] sm:$0xff] }
 0x2dd   : > { %v3812_v54 = vpop.f32.mrf.mxu0  ;;  %v247_v3 = vld [vmem:[%s10316_s28 + $0x260] sm:$0xff] }
 0x2de   : > { %v11254_v16 = vadd.f32 %v3810_v5, %v3225_v32  ;;  %v1684_v36 = vld [vmem:[%s10316_s28 + $0x259] sm:$0xff] }
 0x2e0   : > { %13345 = vst [vmem:[#allocation89_spill] sm:$0xff] %v11254_v16 }
 0x2e1   : > { %v2122_v23 = vpop.f32.mrf.mxu2 }
 0x2e2   : > { %v2967_v37 = vpop.f32.mrf.mxu3  ;;  %v2381_v53 = vadd.f32 %v2122_v23, %v1407_v26  ;;  %v246_v26 = vld [vmem:[%s10316_s28 + $0x258] sm:$0xff] }
 0x2e3   : > { %v1409_v60 = vpop.f32.mrf.mxu1 }
 0x2e4   : > { %v3226_v4 = vadd.f32 %v2967_v37, %v2381_v53  ;;  %v1410_v32 = vadd.f32 %v1409_v60, %v13347_v27  ;;  %v1685_v37 = vld [vmem:[%s10316_s28 + $0x261] sm:$0xff]  ;;  %v13349_v53 = vld [vmem:[#allocation25_spill] sm:$0xff]  ;;  %v344_v27 = vpack.c.bf16 %v247_v3, %v246_v26 }
 0x2e5   : > { %v3815_v5 = vpop.f32.mrf.mxu0 }
 0x2e6   : > { %8722 = vmatmul.msk.bf16.gmra.mxu1 %vm571_vm2, %v343_v55  ;;  %8786 = vmatmul.msk.bf16.gmra.mxu2 %vm571_vm2, %v1781_v57  ;;  %v11265_v33 = vadd.f32 %v3812_v54, %v3226_v4  ;;  %v8881_v54 = vld [vmem:[%s10316_s28 + $0xca8] sm:$0xff]  ;;  %v8882_v55 = vld [vmem:[%s10316_s28 + $0xcb0] sm:$0xff] }
 0x2e7   : > { %8978 = vmatmul.msk.bf16.gmra.mxu3 %vm571_vm2, %v2626_v12  ;;  %v9073_v12 = vld [vmem:[%s10316_s28 + $0x11d0] sm:$0xff] }
 0x2e8   : > { %13346 = vst [vmem:[#allocation90_spill] sm:$0xff] %v11265_v33  ;;  %9170 = vmatmul.msk.bf16.gmra.mxu0 %vm571_vm2, %v3471_v10  ;;  %v9074_v10 = vld [vmem:[%s10316_s28 + $0x11d8] sm:$0xff] }
 0x2e9   : > { %v2125_v25 = vpop.f32.mrf.mxu2 }
 0x2ea   : > { %v2970_v24 = vpop.f32.mrf.mxu3  ;;  %v2382_v6 = vadd.f32 %v2125_v25, %v1410_v32  ;;  %v1782_v25 = vpack.c.bf16 %v1685_v37, %v1684_v36 }
 0x2eb   : > { %v1411_v52 = vpop.f32.mrf.mxu1 }
 0x2ec   : > { %v3227_v0 = vadd.f32 %v2970_v24, %v2382_v6  ;;  %v1412_v57 = vadd.f32 %v1411_v52, %v13349_v53  ;;  %v2627_v24 = vpack.c.bf16 %v8882_v55, %v8881_v54  ;;  %v3472_v6 = vpack.c.bf16 %v9074_v10, %v9073_v12  ;;  %v248_v53 = vld [vmem:[%s10316_s28 + $0x268] sm:$0xff] }
 0x2ed   : > { %v3817_v28 = vpop.f32.mrf.mxu0  ;;  %v1686_v12 = vld [vmem:[%s10316_s28 + $0x269] sm:$0xff] }
 0x2ee   : > { %v11272_v23 = vadd.f32 %v3815_v5, %v3227_v0  ;;  %v13351_v0 = vld [vmem:[#allocation28_spill] sm:$0xff] }
 0x2f0   : > { %13348 = vst [vmem:[#allocation22_spill] sm:$0xff] %v11272_v23 }
 0x2f1   : > { %v2127_v60 = vpop.f32.mrf.mxu2 }
 0x2f2   : > { %v2972_v4 = vpop.f32.mrf.mxu3  ;;  %v2383_v33 = vadd.f32 %v2127_v60, %v1412_v57  ;;  %v249_v57 = vld [vmem:[%s10316_s28 + $0x270] sm:$0xff] }
 0x2f3   : > { %v1414_v32 = vpop.f32.mrf.mxu1  ;;  %v1687_v60 = vld [vmem:[%s10316_s28 + $0x271] sm:$0xff] }
 0x2f4   : > { %v3228_v16 = vadd.f32 %v2972_v4, %v2383_v33  ;;  %v1415_v26 = vadd.f32 %v1414_v32, %v13351_v0  ;;  %v13353_v4 = vld [vmem:[#allocation31_spill] sm:$0xff]  ;;  %v345_v0 = vpack.c.bf16 %v249_v57, %v248_v53 }
 0x2f5   : > { %v3820_v5 = vpop.f32.mrf.mxu0 }
 0x2f6   : > { %8723 = vmatmul.msk.bf16.gmra.mxu1 %vm571_vm2, %v344_v27  ;;  %8787 = vmatmul.msk.bf16.gmra.mxu2 %vm571_vm2, %v1782_v25  ;;  %v11283_v52 = vadd.f32 %v3817_v28, %v3228_v16  ;;  %v8883_v16 = vld [vmem:[%s10316_s28 + $0xcb8] sm:$0xff]  ;;  %v8884_v28 = vld [vmem:[%s10316_s28 + $0xcc0] sm:$0xff] }
 0x2f7   : > { %8979 = vmatmul.msk.bf16.gmra.mxu3 %vm571_vm2, %v2627_v24  ;;  %v9075_v25 = vld [vmem:[%s10316_s28 + $0x11e0] sm:$0xff]  ;;  %v9076_v24 = vld [vmem:[%s10316_s28 + $0x11e8] sm:$0xff] }
 0x2f8   : > { %13350 = vst [vmem:[#allocation25_spill] sm:$0xff] %v11283_v52  ;;  %9171 = vmatmul.msk.bf16.gmra.mxu0 %vm571_vm2, %v3472_v6 }
 0x2f9   : > { %v2130_v33 = vpop.f32.mrf.mxu2 }
 0x2fa   : > { %v2975_v3 = vpop.f32.mrf.mxu3  ;;  %v2384_v36 = vadd.f32 %v2130_v33, %v1415_v26  ;;  %v1783_v33 = vpack.c.bf16 %v1687_v60, %v1686_v12 }
 0x2fb   : > { %v1416_v37 = vpop.f32.mrf.mxu1 }
 0x2fc   : > { %v3229_v54 = vadd.f32 %v2975_v3, %v2384_v36  ;;  %v1417_v27 = vadd.f32 %v1416_v37, %v13353_v4  ;;  %v2628_v3 = vpack.c.bf16 %v8884_v28, %v8883_v16  ;;  %v3473_v36 = vpack.c.bf16 %v9076_v24, %v9075_v25  ;;  %v250_v4 = vld [vmem:[%s10316_s28 + $0x280] sm:$0xff] }
 0x2fd   : > { %v3822_v55 = vpop.f32.mrf.mxu0  ;;  %v1688_v25 = vld [vmem:[%s10316_s28 + $0x281] sm:$0xff] }
 0x2fe   : > { %v11290_v10 = vadd.f32 %v3820_v5, %v3229_v54  ;;  %v13355_v54 = vld [vmem:[#allocation34_spill] sm:$0xff] }
 0x300   : > { %13352 = vst [vmem:[#allocation28_spill] sm:$0xff] %v11290_v10 }
 0x301   : > { %v2132_v32 = vpop.f32.mrf.mxu2 }
 0x302   : > { %v2977_v6 = vpop.f32.mrf.mxu3  ;;  %v2385_v52 = vadd.f32 %v2132_v32, %v1417_v27  ;;  %v251_v27 = vld [vmem:[%s10316_s28 + $0x288] sm:$0xff] }
 0x303   : > { %v1419_v26 = vpop.f32.mrf.mxu1  ;;  %v1689_v32 = vld [vmem:[%s10316_s28 + $0x289] sm:$0xff] }
 0x304   : > { %v3230_v23 = vadd.f32 %v2977_v6, %v2385_v52  ;;  %v1420_v53 = vadd.f32 %v1419_v26, %v13355_v54  ;;  %v13357_v6 = vld [vmem:[#allocation37_spill] sm:$0xff]  ;;  %v346_v54 = vpack.c.bf16 %v251_v27, %v250_v4 }
 0x305   : > { %v3825_v5 = vpop.f32.mrf.mxu0 }
 0x306   : > { %8724 = vmatmul.msk.bf16.gmra.mxu1 %vm571_vm2, %v345_v0  ;;  %8788 = vmatmul.msk.bf16.gmra.mxu2 %vm571_vm2, %v1783_v33  ;;  %v11301_v37 = vadd.f32 %v3822_v55, %v3230_v23  ;;  %v8885_v23 = vld [vmem:[%s10316_s28 + $0xcd0] sm:$0xff]  ;;  %v8886_v55 = vld [vmem:[%s10316_s28 + $0xcd8] sm:$0xff] }
 0x307   : > { %8980 = vmatmul.msk.bf16.gmra.mxu3 %vm571_vm2, %v2628_v3  ;;  %v9077_v33 = vld [vmem:[%s10316_s28 + $0x11f8] sm:$0xff]  ;;  %v9078_v3 = vld [vmem:[%s10316_s28 + $0x1200] sm:$0xff] }
 0x308   : > { %13354 = vst [vmem:[#allocation31_spill] sm:$0xff] %v11301_v37  ;;  %9172 = vmatmul.msk.bf16.gmra.mxu0 %vm571_vm2, %v3473_v36 }
 0x309   : > { %v2135_v52 = vpop.f32.mrf.mxu2 }
 0x30a   : > { %v2980_v57 = vpop.f32.mrf.mxu3  ;;  %v2386_v12 = vadd.f32 %v2135_v52, %v1420_v53  ;;  %v1784_v52 = vpack.c.bf16 %v1689_v32, %v1688_v25 }
 0x30b   : > { %v1421_v60 = vpop.f32.mrf.mxu1 }
 0x30c   : > { %v3231_v16 = vadd.f32 %v2980_v57, %v2386_v12  ;;  %v1422_v0 = vadd.f32 %v1421_v60, %v13357_v6  ;;  %v2629_v57 = vpack.c.bf16 %v8886_v55, %v8885_v23  ;;  %v3474_v12 = vpack.c.bf16 %v9078_v3, %v9077_v33  ;;  %v252_v6 = vld [vmem:[%s10316_s28 + $0x290] sm:$0xff] }
 0x30d   : > { %v3827_v28 = vpop.f32.mrf.mxu0  ;;  %v1690_v33 = vld [vmem:[%s10316_s28 + $0x291] sm:$0xff] }
 0x30e   : > { %v11308_v24 = vadd.f32 %v3825_v5, %v3231_v16  ;;  %v13359_v16 = vld [vmem:[#allocation40_spill] sm:$0xff] }
 0x310   : > { %13356 = vst [vmem:[#allocation34_spill] sm:$0xff] %v11308_v24 }
 0x311   : > { %v2137_v26 = vpop.f32.mrf.mxu2 }
 0x312   : > { %v2982_v36 = vpop.f32.mrf.mxu3  ;;  %v2387_v37 = vadd.f32 %v2137_v26, %v1422_v0  ;;  %v253_v0 = vld [vmem:[%s10316_s28 + $0x298] sm:$0xff] }
 0x313   : > { %v1424_v53 = vpop.f32.mrf.mxu1  ;;  %v1691_v26 = vld [vmem:[%s10316_s28 + $0x299] sm:$0xff] }
 0x314   : > { %v3232_v10 = vadd.f32 %v2982_v36, %v2387_v37  ;;  %v1425_v4 = vadd.f32 %v1424_v53, %v13359_v16  ;;  %v13361_v36 = vld [vmem:[#allocation43_spill] sm:$0xff]  ;;  %v347_v16 = vpack.c.bf16 %v253_v0, %v252_v6 }
 0x315   : > { %v3830_v5 = vpop.f32.mrf.mxu0 }
 0x316   : > { %8725 = vmatmul.msk.bf16.gmra.mxu1 %vm571_vm2, %v346_v54  ;;  %8789 = vmatmul.msk.bf16.gmra.mxu2 %vm571_vm2, %v1784_v52  ;;  %v11319_v60 = vadd.f32 %v3827_v28, %v3232_v10  ;;  %v8887_v10 = vld [vmem:[%s10316_s28 + $0xce0] sm:$0xff]  ;;  %v8888_v28 = vld [vmem:[%s10316_s28 + $0xce8] sm:$0xff] }
 0x317   : > { %8981 = vmatmul.msk.bf16.gmra.mxu3 %vm571_vm2, %v2629_v57  ;;  %v9079_v52 = vld [vmem:[%s10316_s28 + $0x1208] sm:$0xff]  ;;  %v9080_v57 = vld [vmem:[%s10316_s28 + $0x1210] sm:$0xff] }
 0x318   : > { %13358 = vst [vmem:[#allocation37_spill] sm:$0xff] %v11319_v60  ;;  %9173 = vmatmul.msk.bf16.gmra.mxu0 %vm571_vm2, %v3474_v12 }
 0x319   : > { %v2140_v37 = vpop.f32.mrf.mxu2 }
 0x31a   : > { %v2985_v27 = vpop.f32.mrf.mxu3  ;;  %v2388_v25 = vadd.f32 %v2140_v37, %v1425_v4  ;;  %v1785_v37 = vpack.c.bf16 %v1691_v26, %v1690_v33 }
 0x31b   : > { %v1426_v32 = vpop.f32.mrf.mxu1 }
 0x31c   : > { %v3233_v23 = vadd.f32 %v2985_v27, %v2388_v25  ;;  %v1427_v54 = vadd.f32 %v1426_v32, %v13361_v36  ;;  %v2630_v27 = vpack.c.bf16 %v8888_v28, %v8887_v10  ;;  %v3475_v25 = vpack.c.bf16 %v9080_v57, %v9079_v52  ;;  %v254_v36 = vld [vmem:[%s10316_s28 + $0x2a8] sm:$0xff] }
 0x31d   : > { %v3832_v55 = vpop.f32.mrf.mxu0  ;;  %v1692_v52 = vld [vmem:[%s10316_s28 + $0x2a9] sm:$0xff] }
 0x31e   : > { %v11326_v3 = vadd.f32 %v3830_v5, %v3233_v23  ;;  %v13363_v23 = vld [vmem:[#allocation46_spill] sm:$0xff] }
 0x320   : > { %13360 = vst [vmem:[#allocation40_spill] sm:$0xff] %v11326_v3 }
 0x321   : > { %v2142_v53 = vpop.f32.mrf.mxu2 }
 0x322   : > { %v2987_v12 = vpop.f32.mrf.mxu3  ;;  %v2389_v60 = vadd.f32 %v2142_v53, %v1427_v54  ;;  %v255_v54 = vld [vmem:[%s10316_s28 + $0x2b0] sm:$0xff] }
 0x323   : > { %v1429_v4 = vpop.f32.mrf.mxu1  ;;  %v1693_v53 = vld [vmem:[%s10316_s28 + $0x2b1] sm:$0xff] }
 0x324   : > { %v3234_v24 = vadd.f32 %v2987_v12, %v2389_v60  ;;  %v1430_v6 = vadd.f32 %v1429_v4, %v13363_v23  ;;  %v13365_v12 = vld [vmem:[#allocation49_spill] sm:$0xff]  ;;  %v348_v23 = vpack.c.bf16 %v255_v54, %v254_v36 }
 0x325   : > { %v3835_v5 = vpop.f32.mrf.mxu0 }
 0x326   : > { %8726 = vmatmul.msk.bf16.gmra.mxu1 %vm571_vm2, %v347_v16  ;;  %8790 = vmatmul.msk.bf16.gmra.mxu2 %vm571_vm2, %v1785_v37  ;;  %v11337_v32 = vadd.f32 %v3832_v55, %v3234_v24  ;;  %v8889_v24 = vld [vmem:[%s10316_s28 + $0xcf8] sm:$0xff]  ;;  %v8890_v55 = vld [vmem:[%s10316_s28 + $0xd00] sm:$0xff] }
 0x327   : > { %8982 = vmatmul.msk.bf16.gmra.mxu3 %vm571_vm2, %v2630_v27  ;;  %v9081_v37 = vld [vmem:[%s10316_s28 + $0x1220] sm:$0xff]  ;;  %v9082_v27 = vld [vmem:[%s10316_s28 + $0x1228] sm:$0xff] }
 0x328   : > { %13362 = vst [vmem:[#allocation43_spill] sm:$0xff] %v11337_v32  ;;  %9174 = vmatmul.msk.bf16.gmra.mxu0 %vm571_vm2, %v3475_v25 }
 0x329   : > { %v2145_v60 = vpop.f32.mrf.mxu2 }
 0x32a   : > { %v2990_v0 = vpop.f32.mrf.mxu3  ;;  %v2390_v33 = vadd.f32 %v2145_v60, %v1430_v6  ;;  %v1786_v60 = vpack.c.bf16 %v1693_v53, %v1692_v52 }
 0x32b   : > { %v1431_v26 = vpop.f32.mrf.mxu1 }
 0x32c   : > { %v3235_v10 = vadd.f32 %v2990_v0, %v2390_v33  ;;  %v1432_v16 = vadd.f32 %v1431_v26, %v13365_v12  ;;  %v2631_v0 = vpack.c.bf16 %v8890_v55, %v8889_v24  ;;  %v3476_v33 = vpack.c.bf16 %v9082_v27, %v9081_v37  ;;  %v256_v12 = vld [vmem:[%s10316_s28 + $0x2b8] sm:$0xff] }
 0x32d   : > { %v3837_v28 = vpop.f32.mrf.mxu0  ;;  %v1694_v37 = vld [vmem:[%s10316_s28 + $0x2b9] sm:$0xff] }
 0x32e   : > { %v11344_v57 = vadd.f32 %v3835_v5, %v3235_v10  ;;  %v13367_v10 = vld [vmem:[#allocation52_spill] sm:$0xff] }
 0x330   : > { %13364 = vst [vmem:[#allocation46_spill] sm:$0xff] %v11344_v57 }
 0x331   : > { %v2147_v4 = vpop.f32.mrf.mxu2 }
 0x332   : > { %v2992_v25 = vpop.f32.mrf.mxu3  ;;  %v2391_v32 = vadd.f32 %v2147_v4, %v1432_v16  ;;  %v257_v16 = vld [vmem:[%s10316_s28 + $0x2c0] sm:$0xff] }
 0x333   : > { %v1434_v6 = vpop.f32.mrf.mxu1  ;;  %v1695_v4 = vld [vmem:[%s10316_s28 + $0x2c1] sm:$0xff] }
 0x334   : > { %v3236_v3 = vadd.f32 %v2992_v25, %v2391_v32  ;;  %v1435_v36 = vadd.f32 %v1434_v6, %v13367_v10  ;;  %v13369_v25 = vld [vmem:[#allocation55_spill] sm:$0xff]  ;;  %v349_v10 = vpack.c.bf16 %v257_v16, %v256_v12 }
 0x335   : > { %v3840_v5 = vpop.f32.mrf.mxu0 }
 0x336   : > { %8727 = vmatmul.msk.bf16.gmra.mxu1 %vm571_vm2, %v348_v23  ;;  %8791 = vmatmul.msk.bf16.gmra.mxu2 %vm571_vm2, %v1786_v60  ;;  %v11355_v26 = vadd.f32 %v3837_v28, %v3236_v3  ;;  %v8891_v3 = vld [vmem:[%s10316_s28 + $0xd08] sm:$0xff]  ;;  %v8892_v28 = vld [vmem:[%s10316_s28 + $0xd10] sm:$0xff] }
 0x337   : > { %8983 = vmatmul.msk.bf16.gmra.mxu3 %vm571_vm2, %v2631_v0  ;;  %v9083_v60 = vld [vmem:[%s10316_s28 + $0x1230] sm:$0xff]  ;;  %v9084_v0 = vld [vmem:[%s10316_s28 + $0x1238] sm:$0xff] }
 0x338   : > { %13366 = vst [vmem:[#allocation49_spill] sm:$0xff] %v11355_v26  ;;  %9175 = vmatmul.msk.bf16.gmra.mxu0 %vm571_vm2, %v3476_v33 }
 0x339   : > { %v2150_v32 = vpop.f32.mrf.mxu2 }
 0x33a   : > { %v2995_v54 = vpop.f32.mrf.mxu3  ;;  %v2392_v52 = vadd.f32 %v2150_v32, %v1435_v36  ;;  %v1787_v32 = vpack.c.bf16 %v1695_v4, %v1694_v37 }
 0x33b   : > { %v1436_v53 = vpop.f32.mrf.mxu1 }
 0x33c   : > { %v3237_v24 = vadd.f32 %v2995_v54, %v2392_v52  ;;  %v1437_v23 = vadd.f32 %v1436_v53, %v13369_v25  ;;  %v2632_v54 = vpack.c.bf16 %v8892_v28, %v8891_v3  ;;  %v3477_v52 = vpack.c.bf16 %v9084_v0, %v9083_v60  ;;  %v258_v25 = vld [vmem:[%s10316_s28 + $0x2d0] sm:$0xff] }
 0x33d   : > { %v3842_v55 = vpop.f32.mrf.mxu0  ;;  %v1696_v60 = vld [vmem:[%s10316_s28 + $0x2d1] sm:$0xff] }
 0x33e   : > { %v11362_v27 = vadd.f32 %v3840_v5, %v3237_v24  ;;  %v13371_v24 = vld [vmem:[#allocation58_spill] sm:$0xff] }
 0x340   : > { %13368 = vst [vmem:[#allocation52_spill] sm:$0xff] %v11362_v27 }
 0x341   : > { %v2152_v6 = vpop.f32.mrf.mxu2 }
 0x342   : > { %v2997_v33 = vpop.f32.mrf.mxu3  ;;  %v2393_v26 = vadd.f32 %v2152_v6, %v1437_v23  ;;  %v259_v23 = vld [vmem:[%s10316_s28 + $0x2d8] sm:$0xff] }
 0x343   : > { %v1439_v36 = vpop.f32.mrf.mxu1  ;;  %v1697_v6 = vld [vmem:[%s10316_s28 + $0x2d9] sm:$0xff] }
 0x344   : > { %v3238_v57 = vadd.f32 %v2997_v33, %v2393_v26  ;;  %v1440_v12 = vadd.f32 %v1439_v36, %v13371_v24  ;;  %v13373_v33 = vld [vmem:[#allocation61_spill] sm:$0xff]  ;;  %v350_v24 = vpack.c.bf16 %v259_v23, %v258_v25 }
 0x345   : > { %v3845_v5 = vpop.f32.mrf.mxu0 }
 0x346   : > { %8728 = vmatmul.msk.bf16.gmra.mxu1 %vm571_vm2, %v349_v10  ;;  %8792 = vmatmul.msk.bf16.gmra.mxu2 %vm571_vm2, %v1787_v32  ;;  %v11373_v53 = vadd.f32 %v3842_v55, %v3238_v57  ;;  %v8893_v57 = vld [vmem:[%s10316_s28 + $0xd20] sm:$0xff]  ;;  %v8894_v55 = vld [vmem:[%s10316_s28 + $0xd28] sm:$0xff] }
 0x347   : > { %8984 = vmatmul.msk.bf16.gmra.mxu3 %vm571_vm2, %v2632_v54  ;;  %v9085_v32 = vld [vmem:[%s10316_s28 + $0x1248] sm:$0xff]  ;;  %v9086_v54 = vld [vmem:[%s10316_s28 + $0x1250] sm:$0xff] }
 0x348   : > { %13370 = vst [vmem:[#allocation55_spill] sm:$0xff] %v11373_v53  ;;  %9176 = vmatmul.msk.bf16.gmra.mxu0 %vm571_vm2, %v3477_v52 }
 0x349   : > { %v2155_v26 = vpop.f32.mrf.mxu2 }
 0x34a   : > { %v3000_v16 = vpop.f32.mrf.mxu3  ;;  %v2394_v37 = vadd.f32 %v2155_v26, %v1440_v12  ;;  %v1788_v26 = vpack.c.bf16 %v1697_v6, %v1696_v60 }
 0x34b   : > { %v1441_v4 = vpop.f32.mrf.mxu1 }
 0x34c   : > { %v3239_v3 = vadd.f32 %v3000_v16, %v2394_v37  ;;  %v1442_v10 = vadd.f32 %v1441_v4, %v13373_v33  ;;  %v2633_v16 = vpack.c.bf16 %v8894_v55, %v8893_v57  ;;  %v3478_v37 = vpack.c.bf16 %v9086_v54, %v9085_v32  ;;  %v260_v33 = vld [vmem:[%s10316_s28 + $0x2e0] sm:$0xff] }
 0x34d   : > { %v3847_v28 = vpop.f32.mrf.mxu0  ;;  %v1698_v32 = vld [vmem:[%s10316_s28 + $0x2e1] sm:$0xff] }
 0x34e   : > { %v11380_v0 = vadd.f32 %v3845_v5, %v3239_v3  ;;  %v13375_v3 = vld [vmem:[#allocation64_spill] sm:$0xff] }
 0x350   : > { %13372 = vst [vmem:[#allocation58_spill] sm:$0xff] %v11380_v0 }
 0x351   : > { %v2157_v36 = vpop.f32.mrf.mxu2 }
 0x352   : > { %v3002_v52 = vpop.f32.mrf.mxu3  ;;  %v2395_v53 = vadd.f32 %v2157_v36, %v1442_v10  ;;  %v261_v10 = vld [vmem:[%s10316_s28 + $0x2e8] sm:$0xff] }
 0x353   : > { %v1444_v12 = vpop.f32.mrf.mxu1  ;;  %v1699_v36 = vld [vmem:[%s10316_s28 + $0x2e9] sm:$0xff] }
 0x354   : > { %v3240_v27 = vadd.f32 %v3002_v52, %v2395_v53  ;;  %v1445_v25 = vadd.f32 %v1444_v12, %v13375_v3  ;;  %v13377_v52 = vld [vmem:[#allocation67_spill] sm:$0xff]  ;;  %v351_v3 = vpack.c.bf16 %v261_v10, %v260_v33 }
 0x355   : > { %v3850_v5 = vpop.f32.mrf.mxu0 }
 0x356   : > { %8729 = vmatmul.msk.bf16.gmra.mxu1 %vm571_vm2, %v350_v24  ;;  %8793 = vmatmul.msk.bf16.gmra.mxu2 %vm571_vm2, %v1788_v26  ;;  %v11391_v4 = vadd.f32 %v3847_v28, %v3240_v27  ;;  %v8895_v27 = vld [vmem:[%s10316_s28 + $0xd30] sm:$0xff]  ;;  %v8896_v28 = vld [vmem:[%s10316_s28 + $0xd38] sm:$0xff] }
 0x357   : > { %8985 = vmatmul.msk.bf16.gmra.mxu3 %vm571_vm2, %v2633_v16  ;;  %v9087_v26 = vld [vmem:[%s10316_s28 + $0x1258] sm:$0xff]  ;;  %v9088_v16 = vld [vmem:[%s10316_s28 + $0x1260] sm:$0xff] }
 0x358   : > { %13374 = vst [vmem:[#allocation61_spill] sm:$0xff] %v11391_v4  ;;  %9177 = vmatmul.msk.bf16.gmra.mxu0 %vm571_vm2, %v3478_v37 }
 0x359   : > { %v2160_v53 = vpop.f32.mrf.mxu2 }
 0x35a   : > { %v3005_v23 = vpop.f32.mrf.mxu3  ;;  %v2396_v60 = vadd.f32 %v2160_v53, %v1445_v25  ;;  %v1789_v53 = vpack.c.bf16 %v1699_v36, %v1698_v32 }
 0x35b   : > { %v1446_v6 = vpop.f32.mrf.mxu1 }
 0x35c   : > { %v3241_v57 = vadd.f32 %v3005_v23, %v2396_v60  ;;  %v1447_v24 = vadd.f32 %v1446_v6, %v13377_v52  ;;  %v2634_v23 = vpack.c.bf16 %v8896_v28, %v8895_v27  ;;  %v3479_v60 = vpack.c.bf16 %v9088_v16, %v9087_v26  ;;  %v262_v52 = vld [vmem:[%s10316_s28 + $0x2f8] sm:$0xff] }
 0x35d   : > { %v3852_v55 = vpop.f32.mrf.mxu0  ;;  %v1700_v26 = vld [vmem:[%s10316_s28 + $0x2f9] sm:$0xff] }
 0x35e   : > { %v11398_v54 = vadd.f32 %v3850_v5, %v3241_v57  ;;  %v13379_v57 = vld [vmem:[#allocation70_spill] sm:$0xff] }
 0x360   : > { %13376 = vst [vmem:[#allocation64_spill] sm:$0xff] %v11398_v54 }
 0x361   : > { %v2162_v12 = vpop.f32.mrf.mxu2 }
 0x362   : > { %v3007_v37 = vpop.f32.mrf.mxu3  ;;  %v2397_v4 = vadd.f32 %v2162_v12, %v1447_v24  ;;  %v263_v24 = vld [vmem:[%s10316_s28 + $0x300] sm:$0xff] }
 0x363   : > { %v1449_v25 = vpop.f32.mrf.mxu1  ;;  %v1701_v12 = vld [vmem:[%s10316_s28 + $0x301] sm:$0xff] }
 0x364   : > { %v3242_v0 = vadd.f32 %v3007_v37, %v2397_v4  ;;  %v1450_v33 = vadd.f32 %v1449_v25, %v13379_v57  ;;  %v13381_v37 = vld [vmem:[#allocation73_spill] sm:$0xff]  ;;  %v352_v57 = vpack.c.bf16 %v263_v24, %v262_v52 }
 0x365   : > { %v3855_v5 = vpop.f32.mrf.mxu0 }
 0x366   : > { %8730 = vmatmul.msk.bf16.gmra.mxu1 %vm571_vm2, %v351_v3  ;;  %8794 = vmatmul.msk.bf16.gmra.mxu2 %vm571_vm2, %v1789_v53  ;;  %v11409_v6 = vadd.f32 %v3852_v55, %v3242_v0  ;;  %v8897_v0 = vld [vmem:[%s10316_s28 + $0xd48] sm:$0xff]  ;;  %v8898_v55 = vld [vmem:[%s10316_s28 + $0xd50] sm:$0xff] }
 0x367   : > { %8986 = vmatmul.msk.bf16.gmra.mxu3 %vm571_vm2, %v2634_v23  ;;  %v9089_v53 = vld [vmem:[%s10316_s28 + $0x1270] sm:$0xff]  ;;  %v9090_v23 = vld [vmem:[%s10316_s28 + $0x1278] sm:$0xff] }
 0x368   : > { %13378 = vst [vmem:[#allocation67_spill] sm:$0xff] %v11409_v6  ;;  %9178 = vmatmul.msk.bf16.gmra.mxu0 %vm571_vm2, %v3479_v60 }
 0x369   : > { %v2165_v4 = vpop.f32.mrf.mxu2 }
 0x36a   : > { %v3010_v10 = vpop.f32.mrf.mxu3  ;;  %v2398_v32 = vadd.f32 %v2165_v4, %v1450_v33  ;;  %v1790_v4 = vpack.c.bf16 %v1701_v12, %v1700_v26 }
 0x36b   : > { %v1451_v36 = vpop.f32.mrf.mxu1 }
 0x36c   : > { %v3243_v27 = vadd.f32 %v3010_v10, %v2398_v32  ;;  %v1452_v3 = vadd.f32 %v1451_v36, %v13381_v37  ;;  %v2635_v10 = vpack.c.bf16 %v8898_v55, %v8897_v0  ;;  %v3480_v32 = vpack.c.bf16 %v9090_v23, %v9089_v53  ;;  %v264_v37 = vld [vmem:[%s10316_s28 + $0x308] sm:$0xff] }
 0x36d   : > { %v3857_v28 = vpop.f32.mrf.mxu0  ;;  %v1702_v53 = vld [vmem:[%s10316_s28 + $0x309] sm:$0xff] }
 0x36e   : > { %v11416_v16 = vadd.f32 %v3855_v5, %v3243_v27  ;;  %v13383_v27 = vld [vmem:[#allocation76_spill] sm:$0xff] }
 0x370   : > { %13380 = vst [vmem:[#allocation70_spill] sm:$0xff] %v11416_v16 }
 0x371   : > { %v2167_v25 = vpop.f32.mrf.mxu2 }
 0x372   : > { %v3012_v60 = vpop.f32.mrf.mxu3  ;;  %v2399_v6 = vadd.f32 %v2167_v25, %v1452_v3  ;;  %v265_v3 = vld [vmem:[%s10316_s28 + $0x310] sm:$0xff] }
 0x373   : > { %v1454_v33 = vpop.f32.mrf.mxu1  ;;  %v1703_v25 = vld [vmem:[%s10316_s28 + $0x311] sm:$0xff] }
 0x374   : > { %v3244_v54 = vadd.f32 %v3012_v60, %v2399_v6  ;;  %v1455_v52 = vadd.f32 %v1454_v33, %v13383_v27  ;;  %v13385_v60 = vld [vmem:[#allocation79_spill] sm:$0xff]  ;;  %v353_v27 = vpack.c.bf16 %v265_v3, %v264_v37 }
 0x375   : > { %v3860_v5 = vpop.f32.mrf.mxu0 }
 0x376   : > { %8731 = vmatmul.msk.bf16.gmra.mxu1 %vm571_vm2, %v352_v57  ;;  %8795 = vmatmul.msk.bf16.gmra.mxu2 %vm571_vm2, %v1790_v4  ;;  %v11427_v36 = vadd.f32 %v3857_v28, %v3244_v54  ;;  %v8899_v54 = vld [vmem:[%s10316_s28 + $0xd58] sm:$0xff]  ;;  %v8900_v28 = vld [vmem:[%s10316_s28 + $0xd60] sm:$0xff] }
 0x377   : > { %8987 = vmatmul.msk.bf16.gmra.mxu3 %vm571_vm2, %v2635_v10  ;;  %v9091_v4 = vld [vmem:[%s10316_s28 + $0x1280] sm:$0xff]  ;;  %v9092_v10 = vld [vmem:[%s10316_s28 + $0x1288] sm:$0xff] }
 0x378   : > { %13382 = vst [vmem:[#allocation73_spill] sm:$0xff] %v11427_v36  ;;  %9179 = vmatmul.msk.bf16.gmra.mxu0 %vm571_vm2, %v3480_v32 }
 0x379   : > { %v2170_v6 = vpop.f32.mrf.mxu2 }
 0x37a   : > { %v3015_v24 = vpop.f32.mrf.mxu3  ;;  %v2400_v26 = vadd.f32 %v2170_v6, %v1455_v52  ;;  %v1791_v6 = vpack.c.bf16 %v1703_v25, %v1702_v53 }
 0x37b   : > { %v1456_v12 = vpop.f32.mrf.mxu1 }
 0x37c   : > { %v3245_v0 = vadd.f32 %v3015_v24, %v2400_v26  ;;  %v1457_v57 = vadd.f32 %v1456_v12, %v13385_v60  ;;  %v2636_v24 = vpack.c.bf16 %v8900_v28, %v8899_v54  ;;  %v3481_v26 = vpack.c.bf16 %v9092_v10, %v9091_v4  ;;  %v266_v60 = vld [vmem:[%s10316_s28 + $0x320] sm:$0xff] }
 0x37d   : > { %v3862_v55 = vpop.f32.mrf.mxu0  ;;  %v1704_v4 = vld [vmem:[%s10316_s28 + $0x321] sm:$0xff] }
 0x37e   : > { %v11434_v23 = vadd.f32 %v3860_v5, %v3245_v0  ;;  %v13387_v0 = vld [vmem:[#allocation82_spill] sm:$0xff] }
 0x380   : > { %13384 = vst [vmem:[#allocation76_spill] sm:$0xff] %v11434_v23 }
 0x381   : > { %v2172_v33 = vpop.f32.mrf.mxu2 }
 0x382   : > { %v3017_v32 = vpop.f32.mrf.mxu3  ;;  %v2401_v36 = vadd.f32 %v2172_v33, %v1457_v57  ;;  %v267_v57 = vld [vmem:[%s10316_s28 + $0x328] sm:$0xff] }
 0x383   : > { %v1459_v52 = vpop.f32.mrf.mxu1  ;;  %v1705_v33 = vld [vmem:[%s10316_s28 + $0x329] sm:$0xff] }
 0x384   : > { %v3246_v16 = vadd.f32 %v3017_v32, %v2401_v36  ;;  %v1460_v37 = vadd.f32 %v1459_v52, %v13387_v0  ;;  %v13389_v32 = vld [vmem:[#allocation85_spill] sm:$0xff]  ;;  %v354_v0 = vpack.c.bf16 %v267_v57, %v266_v60 }
 0x385   : > { %v3865_v5 = vpop.f32.mrf.mxu0 }
 0x386   : > { %8732 = vmatmul.msk.bf16.gmra.mxu1 %vm571_vm2, %v353_v27  ;;  %8796 = vmatmul.msk.bf16.gmra.mxu2 %vm571_vm2, %v1791_v6  ;;  %v11445_v12 = vadd.f32 %v3862_v55, %v3246_v16  ;;  %v8901_v16 = vld [vmem:[%s10316_s28 + $0xd70] sm:$0xff]  ;;  %v8902_v55 = vld [vmem:[%s10316_s28 + $0xd78] sm:$0xff] }
 0x387   : > { %8988 = vmatmul.msk.bf16.gmra.mxu3 %vm571_vm2, %v2636_v24  ;;  %v9093_v6 = vld [vmem:[%s10316_s28 + $0x1298] sm:$0xff]  ;;  %v9094_v24 = vld [vmem:[%s10316_s28 + $0x12a0] sm:$0xff] }
 0x388   : > { %13386 = vst [vmem:[#allocation79_spill] sm:$0xff] %v11445_v12  ;;  %9180 = vmatmul.msk.bf16.gmra.mxu0 %vm571_vm2, %v3481_v26 }
 0x389   : > { %v2175_v36 = vpop.f32.mrf.mxu2 }
 0x38a   : > { %v3020_v3 = vpop.f32.mrf.mxu3  ;;  %v2402_v53 = vadd.f32 %v2175_v36, %v1460_v37  ;;  %v1792_v36 = vpack.c.bf16 %v1705_v33, %v1704_v4 }
 0x38b   : > { %v1461_v25 = vpop.f32.mrf.mxu1 }
 0x38c   : > { %v3247_v54 = vadd.f32 %v3020_v3, %v2402_v53  ;;  %v1462_v27 = vadd.f32 %v1461_v25, %v13389_v32  ;;  %v2637_v3 = vpack.c.bf16 %v8902_v55, %v8901_v16  ;;  %v3482_v53 = vpack.c.bf16 %v9094_v24, %v9093_v6  ;;  %v268_v32 = vld [vmem:[%s10316_s28 + $0x330] sm:$0xff] }
 0x38d   : > { %v3867_v28 = vpop.f32.mrf.mxu0  ;;  %v1706_v6 = vld [vmem:[%s10316_s28 + $0x331] sm:$0xff] }
 0x38e   : > { %v11452_v10 = vadd.f32 %v3865_v5, %v3247_v54  ;;  %v13391_v54 = vld [vmem:[#allocation2_spill] sm:$0xff] }
 0x390   : > { %13388 = vst [vmem:[#allocation82_spill] sm:$0xff] %v11452_v10 }
 0x391   : > { %v2177_v52 = vpop.f32.mrf.mxu2 }
 0x392   : > { %v3022_v26 = vpop.f32.mrf.mxu3  ;;  %v2403_v12 = vadd.f32 %v2177_v52, %v1462_v27  ;;  %v269_v27 = vld [vmem:[%s10316_s28 + $0x338] sm:$0xff] }
 0x393   : > { %v1464_v37 = vpop.f32.mrf.mxu1  ;;  %v1707_v52 = vld [vmem:[%s10316_s28 + $0x339] sm:$0xff] }
 0x394   : > { %v3248_v23 = vadd.f32 %v3022_v26, %v2403_v12  ;;  %v1465_v60 = vadd.f32 %v1464_v37, %v13391_v54  ;;  %v13393_v26 = vld [vmem:[#allocation4_spill] sm:$0xff]  ;;  %v355_v54 = vpack.c.bf16 %v269_v27, %v268_v32 }
 0x395   : > { %v3870_v5 = vpop.f32.mrf.mxu0 }
 0x396   : > { %8733 = vmatmul.msk.bf16.gmra.mxu1 %vm571_vm2, %v354_v0  ;;  %8797 = vmatmul.msk.bf16.gmra.mxu2 %vm571_vm2, %v1792_v36  ;;  %v11463_v25 = vadd.f32 %v3867_v28, %v3248_v23  ;;  %v8903_v23 = vld [vmem:[%s10316_s28 + $0xd80] sm:$0xff]  ;;  %v8904_v28 = vld [vmem:[%s10316_s28 + $0xd88] sm:$0xff] }
 0x397   : > { %8989 = vmatmul.msk.bf16.gmra.mxu3 %vm571_vm2, %v2637_v3  ;;  %v9095_v36 = vld [vmem:[%s10316_s28 + $0x12a8] sm:$0xff]  ;;  %v9096_v3 = vld [vmem:[%s10316_s28 + $0x12b0] sm:$0xff] }
 0x398   : > { %13390 = vst [vmem:[#allocation85_spill] sm:$0xff] %v11463_v25  ;;  %9181 = vmatmul.msk.bf16.gmra.mxu0 %vm571_vm2, %v3482_v53 }
 0x399   : > { %v2180_v12 = vpop.f32.mrf.mxu2 }
 0x39a   : > { %v3025_v57 = vpop.f32.mrf.mxu3  ;;  %v2404_v4 = vadd.f32 %v2180_v12, %v1465_v60  ;;  %v1793_v12 = vpack.c.bf16 %v1707_v52, %v1706_v6 }
 0x39b   : > { %v1466_v33 = vpop.f32.mrf.mxu1 }
 0x39c   : > { %v3249_v16 = vadd.f32 %v3025_v57, %v2404_v4  ;;  %v1467_v0 = vadd.f32 %v1466_v33, %v13393_v26  ;;  %v2638_v57 = vpack.c.bf16 %v8904_v28, %v8903_v23  ;;  %v3483_v4 = vpack.c.bf16 %v9096_v3, %v9095_v36  ;;  %v270_v26 = vld [vmem:[%s10316_s28 + $0x348] sm:$0xff] }
 0x39d   : > { %v3872_v55 = vpop.f32.mrf.mxu0  ;;  %v1708_v36 = vld [vmem:[%s10316_s28 + $0x349] sm:$0xff] }
 0x39e   : > { %v11470_v24 = vadd.f32 %v3870_v5, %v3249_v16  ;;  %v13395_v16 = vld [vmem:[#allocation6_spill] sm:$0xff] }
 0x3a0   : > { %13392 = vst [vmem:[#allocation2_spill] sm:$0xff] %v11470_v24 }
 0x3a1   : > { %v2182_v37 = vpop.f32.mrf.mxu2 }
 0x3a2   : > { %v3027_v53 = vpop.f32.mrf.mxu3  ;;  %v2405_v25 = vadd.f32 %v2182_v37, %v1467_v0  ;;  %v271_v0 = vld [vmem:[%s10316_s28 + $0x350] sm:$0xff] }
 0x3a3   : > { %v1469_v60 = vpop.f32.mrf.mxu1  ;;  %v1709_v37 = vld [vmem:[%s10316_s28 + $0x351] sm:$0xff] }
 0x3a4   : > { %v3250_v10 = vadd.f32 %v3027_v53, %v2405_v25  ;;  %v1470_v32 = vadd.f32 %v1469_v60, %v13395_v16  ;;  %v13397_v53 = vld [vmem:[#allocation8_spill] sm:$0xff]  ;;  %v356_v16 = vpack.c.bf16 %v271_v0, %v270_v26 }
 0x3a5   : > { %v3875_v5 = vpop.f32.mrf.mxu0 }
 0x3a6   : > { %8734 = vmatmul.msk.bf16.gmra.mxu1 %vm571_vm2, %v355_v54  ;;  %8798 = vmatmul.msk.bf16.gmra.mxu2 %vm571_vm2, %v1793_v12  ;;  %v11481_v33 = vadd.f32 %v3872_v55, %v3250_v10  ;;  %v8905_v10 = vld [vmem:[%s10316_s28 + $0xd98] sm:$0xff]  ;;  %v8906_v55 = vld [vmem:[%s10316_s28 + $0xda0] sm:$0xff] }
 0x3a7   : > { %8990 = vmatmul.msk.bf16.gmra.mxu3 %vm571_vm2, %v2638_v57  ;;  %v9097_v12 = vld [vmem:[%s10316_s28 + $0x12c0] sm:$0xff]  ;;  %v9098_v57 = vld [vmem:[%s10316_s28 + $0x12c8] sm:$0xff] }
 0x3a8   : > { %13394 = vst [vmem:[#allocation4_spill] sm:$0xff] %v11481_v33  ;;  %9182 = vmatmul.msk.bf16.gmra.mxu0 %vm571_vm2, %v3483_v4 }
 0x3a9   : > { %v2185_v25 = vpop.f32.mrf.mxu2 }
 0x3aa   : > { %v3030_v27 = vpop.f32.mrf.mxu3  ;;  %v2406_v6 = vadd.f32 %v2185_v25, %v1470_v32  ;;  %v1794_v25 = vpack.c.bf16 %v1709_v37, %v1708_v36 }
 0x3ab   : > { %v1471_v52 = vpop.f32.mrf.mxu1 }
 0x3ac   : > { %v3251_v23 = vadd.f32 %v3030_v27, %v2406_v6  ;;  %v1472_v54 = vadd.f32 %v1471_v52, %v13397_v53  ;;  %v2639_v27 = vpack.c.bf16 %v8906_v55, %v8905_v10  ;;  %v3484_v6 = vpack.c.bf16 %v9098_v57, %v9097_v12  ;;  %v272_v53 = vld [vmem:[%s10316_s28 + $0x358] sm:$0xff] }
 0x3ad   : > { %v3877_v28 = vpop.f32.mrf.mxu0  ;;  %v1710_v12 = vld [vmem:[%s10316_s28 + $0x359] sm:$0xff] }
 0x3ae   : > { %v11488_v3 = vadd.f32 %v3875_v5, %v3251_v23  ;;  %v13399_v23 = vld [vmem:[#allocation10_spill] sm:$0xff] }
 0x3b0   : > { %13396 = vst [vmem:[#allocation6_spill] sm:$0xff] %v11488_v3 }
 0x3b1   : > { %v2187_v60 = vpop.f32.mrf.mxu2 }
 0x3b2   : > { %v3032_v4 = vpop.f32.mrf.mxu3  ;;  %v2407_v33 = vadd.f32 %v2187_v60, %v1472_v54  ;;  %v273_v54 = vld [vmem:[%s10316_s28 + $0x360] sm:$0xff] }
 0x3b3   : > { %v1474_v32 = vpop.f32.mrf.mxu1  ;;  %v1711_v60 = vld [vmem:[%s10316_s28 + $0x361] sm:$0xff] }
 0x3b4   : > { %v3252_v24 = vadd.f32 %v3032_v4, %v2407_v33  ;;  %v1475_v26 = vadd.f32 %v1474_v32, %v13399_v23  ;;  %v13401_v4 = vld [vmem:[#allocation12_spill] sm:$0xff]  ;;  %v357_v23 = vpack.c.bf16 %v273_v54, %v272_v53 }
 0x3b5   : > { %v3880_v5 = vpop.f32.mrf.mxu0 }
 0x3b6   : > { %8735 = vmatmul.msk.bf16.gmra.mxu1 %vm571_vm2, %v356_v16  ;;  %8799 = vmatmul.msk.bf16.gmra.mxu2 %vm571_vm2, %v1794_v25  ;;  %v11499_v52 = vadd.f32 %v3877_v28, %v3252_v24  ;;  %v8907_v24 = vld [vmem:[%s10316_s28 + $0xda8] sm:$0xff]  ;;  %v8908_v28 = vld [vmem:[%s10316_s28 + $0xdb0] sm:$0xff] }
 0x3b7   : > { %8991 = vmatmul.msk.bf16.gmra.mxu3 %vm571_vm2, %v2639_v27  ;;  %v9099_v25 = vld [vmem:[%s10316_s28 + $0x12d0] sm:$0xff]  ;;  %v9100_v27 = vld [vmem:[%s10316_s28 + $0x12d8] sm:$0xff] }
 0x3b8   : > { %13398 = vst [vmem:[#allocation8_spill] sm:$0xff] %v11499_v52  ;;  %9183 = vmatmul.msk.bf16.gmra.mxu0 %vm571_vm2, %v3484_v6 }
 0x3b9   : > { %v2190_v33 = vpop.f32.mrf.mxu2 }
 0x3ba   : > { %v3035_v0 = vpop.f32.mrf.mxu3  ;;  %v2408_v36 = vadd.f32 %v2190_v33, %v1475_v26  ;;  %v1795_v33 = vpack.c.bf16 %v1711_v60, %v1710_v12 }
 0x3bb   : > { %v1476_v37 = vpop.f32.mrf.mxu1 }
 0x3bc   : > { %v3253_v10 = vadd.f32 %v3035_v0, %v2408_v36  ;;  %v1477_v16 = vadd.f32 %v1476_v37, %v13401_v4  ;;  %v2640_v0 = vpack.c.bf16 %v8908_v28, %v8907_v24  ;;  %v3485_v36 = vpack.c.bf16 %v9100_v27, %v9099_v25  ;;  %v274_v4 = vld [vmem:[%s10316_s28 + $0x370] sm:$0xff] }
 0x3bd   : > { %v3882_v55 = vpop.f32.mrf.mxu0  ;;  %v1712_v25 = vld [vmem:[%s10316_s28 + $0x371] sm:$0xff] }
 0x3be   : > { %v11506_v57 = vadd.f32 %v3880_v5, %v3253_v10  ;;  %v13403_v10 = vld [vmem:[#allocation14_spill] sm:$0xff] }
 0x3c0   : > { %13400 = vst [vmem:[#allocation10_spill] sm:$0xff] %v11506_v57 }
 0x3c1   : > { %v2192_v32 = vpop.f32.mrf.mxu2 }
 0x3c2   : > { %v3037_v6 = vpop.f32.mrf.mxu3  ;;  %v2409_v52 = vadd.f32 %v2192_v32, %v1477_v16  ;;  %v275_v16 = vld [vmem:[%s10316_s28 + $0x378] sm:$0xff] }
 0x3c3   : > { %v1479_v26 = vpop.f32.mrf.mxu1  ;;  %v1713_v32 = vld [vmem:[%s10316_s28 + $0x379] sm:$0xff] }
 0x3c4   : > { %v3254_v3 = vadd.f32 %v3037_v6, %v2409_v52  ;;  %v1480_v53 = vadd.f32 %v1479_v26, %v13403_v10  ;;  %v13405_v6 = vld [vmem:[#allocation16_spill] sm:$0xff]  ;;  %v358_v10 = vpack.c.bf16 %v275_v16, %v274_v4 }
 0x3c5   : > { %v3885_v5 = vpop.f32.mrf.mxu0 }
 0x3c6   : > { %8736 = vmatmul.msk.bf16.gmra.mxu1 %vm571_vm2, %v357_v23  ;;  %8800 = vmatmul.msk.bf16.gmra.mxu2 %vm571_vm2, %v1795_v33  ;;  %v11517_v37 = vadd.f32 %v3882_v55, %v3254_v3  ;;  %v8909_v3 = vld [vmem:[%s10316_s28 + $0xdc0] sm:$0xff]  ;;  %v8910_v55 = vld [vmem:[%s10316_s28 + $0xdc8] sm:$0xff] }
 0x3c7   : > { %8992 = vmatmul.msk.bf16.gmra.mxu3 %vm571_vm2, %v2640_v0  ;;  %v9101_v33 = vld [vmem:[%s10316_s28 + $0x12e8] sm:$0xff]  ;;  %v9102_v0 = vld [vmem:[%s10316_s28 + $0x12f0] sm:$0xff] }
 0x3c8   : > { %13402 = vst [vmem:[#allocation12_spill] sm:$0xff] %v11517_v37  ;;  %9184 = vmatmul.msk.bf16.gmra.mxu0 %vm571_vm2, %v3485_v36 }
 0x3c9   : > { %v2195_v52 = vpop.f32.mrf.mxu2 }
 0x3ca   : > { %v3040_v54 = vpop.f32.mrf.mxu3  ;;  %v2410_v12 = vadd.f32 %v2195_v52, %v1480_v53  ;;  %v1796_v52 = vpack.c.bf16 %v1713_v32, %v1712_v25 }
 0x3cb   : > { %v1481_v60 = vpop.f32.mrf.mxu1 }
 0x3cc   : > { %v3255_v24 = vadd.f32 %v3040_v54, %v2410_v12  ;;  %v1482_v23 = vadd.f32 %v1481_v60, %v13405_v6  ;;  %v2641_v54 = vpack.c.bf16 %v8910_v55, %v8909_v3  ;;  %v3486_v12 = vpack.c.bf16 %v9102_v0, %v9101_v33  ;;  %v276_v6 = vld [vmem:[%s10316_s28 + $0x380] sm:$0xff] }
 0x3cd   : > { %v3887_v28 = vpop.f32.mrf.mxu0  ;;  %v1714_v33 = vld [vmem:[%s10316_s28 + $0x381] sm:$0xff] }
 0x3ce   : > { %v11524_v27 = vadd.f32 %v3885_v5, %v3255_v24  ;;  %v13407_v24 = vld [vmem:[#allocation18_spill] sm:$0xff] }
 0x3d0   : > { %13404 = vst [vmem:[#allocation14_spill] sm:$0xff] %v11524_v27 }
 0x3d1   : > { %v2197_v26 = vpop.f32.mrf.mxu2 }
 0x3d2   : > { %v3042_v36 = vpop.f32.mrf.mxu3  ;;  %v2411_v37 = vadd.f32 %v2197_v26, %v1482_v23  ;;  %v277_v23 = vld [vmem:[%s10316_s28 + $0x388] sm:$0xff] }
 0x3d3   : > { %v1484_v53 = vpop.f32.mrf.mxu1  ;;  %v1715_v26 = vld [vmem:[%s10316_s28 + $0x389] sm:$0xff] }
 0x3d4   : > { %v3256_v57 = vadd.f32 %v3042_v36, %v2411_v37  ;;  %v1485_v4 = vadd.f32 %v1484_v53, %v13407_v24  ;;  %v13409_v36 = vld [vmem:[#allocation20_spill] sm:$0xff]  ;;  %v359_v24 = vpack.c.bf16 %v277_v23, %v276_v6 }
 0x3d5   : > { %v3890_v5 = vpop.f32.mrf.mxu0 }
 0x3d6   : > { %8737 = vmatmul.msk.bf16.gmra.mxu1 %vm571_vm2, %v358_v10  ;;  %8801 = vmatmul.msk.bf16.gmra.mxu2 %vm571_vm2, %v1796_v52  ;;  %v11535_v60 = vadd.f32 %v3887_v28, %v3256_v57  ;;  %v8911_v57 = vld [vmem:[%s10316_s28 + $0xdd0] sm:$0xff]  ;;  %v8912_v28 = vld [vmem:[%s10316_s28 + $0xdd8] sm:$0xff] }
 0x3d7   : > { %8993 = vmatmul.msk.bf16.gmra.mxu3 %vm571_vm2, %v2641_v54  ;;  %v9103_v52 = vld [vmem:[%s10316_s28 + $0x12f8] sm:$0xff]  ;;  %v9104_v54 = vld [vmem:[%s10316_s28 + $0x1300] sm:$0xff] }
 0x3d8   : > { %13406 = vst [vmem:[#allocation16_spill] sm:$0xff] %v11535_v60  ;;  %9185 = vmatmul.msk.bf16.gmra.mxu0 %vm571_vm2, %v3486_v12 }
 0x3d9   : > { %v2200_v37 = vpop.f32.mrf.mxu2 }
 0x3da   : > { %v3045_v16 = vpop.f32.mrf.mxu3  ;;  %v2412_v25 = vadd.f32 %v2200_v37, %v1485_v4  ;;  %v1797_v37 = vpack.c.bf16 %v1715_v26, %v1714_v33 }
 0x3db   : > { %v1486_v32 = vpop.f32.mrf.mxu1 }
 0x3dc   : > { %v3257_v3 = vadd.f32 %v3045_v16, %v2412_v25  ;;  %v1487_v10 = vadd.f32 %v1486_v32, %v13409_v36  ;;  %v2642_v16 = vpack.c.bf16 %v8912_v28, %v8911_v57  ;;  %v3487_v25 = vpack.c.bf16 %v9104_v54, %v9103_v52  ;;  %v278_v36 = vld [vmem:[%s10316_s28 + $0x398] sm:$0xff] }
 0x3dd   : > { %v3892_v55 = vpop.f32.mrf.mxu0  ;;  %v1716_v52 = vld [vmem:[%s10316_s28 + $0x399] sm:$0xff] }
 0x3de   : > { %v11542_v0 = vadd.f32 %v3890_v5, %v3257_v3  ;;  %v13411_v3 = vld [vmem:[#allocation23_spill] sm:$0xff] }
 0x3e0   : > { %13408 = vst [vmem:[#allocation18_spill] sm:$0xff] %v11542_v0 }
 0x3e1   : > { %v2202_v53 = vpop.f32.mrf.mxu2 }
 0x3e2   : > { %v3047_v12 = vpop.f32.mrf.mxu3  ;;  %v2413_v60 = vadd.f32 %v2202_v53, %v1487_v10  ;;  %v279_v10 = vld [vmem:[%s10316_s28 + $0x3a0] sm:$0xff] }
 0x3e3   : > { %v1489_v4 = vpop.f32.mrf.mxu1  ;;  %v1717_v53 = vld [vmem:[%s10316_s28 + $0x3a1] sm:$0xff] }
 0x3e4   : > { %v3258_v27 = vadd.f32 %v3047_v12, %v2413_v60  ;;  %v1490_v6 = vadd.f32 %v1489_v4, %v13411_v3  ;;  %v13413_v12 = vld [vmem:[#allocation26_spill] sm:$0xff]  ;;  %v360_v3 = vpack.c.bf16 %v279_v10, %v278_v36 }
 0x3e5   : > { %v3895_v5 = vpop.f32.mrf.mxu0 }
 0x3e6   : > { %8738 = vmatmul.msk.bf16.gmra.mxu1 %vm571_vm2, %v359_v24  ;;  %8802 = vmatmul.msk.bf16.gmra.mxu2 %vm571_vm2, %v1797_v37  ;;  %v11553_v32 = vadd.f32 %v3892_v55, %v3258_v27  ;;  %v8913_v27 = vld [vmem:[%s10316_s28 + $0xde8] sm:$0xff]  ;;  %v8914_v55 = vld [vmem:[%s10316_s28 + $0xdf0] sm:$0xff] }
 0x3e7   : > { %8994 = vmatmul.msk.bf16.gmra.mxu3 %vm571_vm2, %v2642_v16  ;;  %v9105_v37 = vld [vmem:[%s10316_s28 + $0x1310] sm:$0xff]  ;;  %v9106_v16 = vld [vmem:[%s10316_s28 + $0x1318] sm:$0xff] }
 0x3e8   : > { %13410 = vst [vmem:[#allocation20_spill] sm:$0xff] %v11553_v32  ;;  %9186 = vmatmul.msk.bf16.gmra.mxu0 %vm571_vm2, %v3487_v25 }
 0x3e9   : > { %v2205_v60 = vpop.f32.mrf.mxu2 }
 0x3ea   : > { %v3050_v23 = vpop.f32.mrf.mxu3  ;;  %v2414_v33 = vadd.f32 %v2205_v60, %v1490_v6  ;;  %v1798_v60 = vpack.c.bf16 %v1717_v53, %v1716_v52 }
 0x3eb   : > { %v1491_v26 = vpop.f32.mrf.mxu1 }
 0x3ec   : > { %v3259_v57 = vadd.f32 %v3050_v23, %v2414_v33  ;;  %v1492_v24 = vadd.f32 %v1491_v26, %v13413_v12  ;;  %v2643_v23 = vpack.c.bf16 %v8914_v55, %v8913_v27  ;;  %v3488_v33 = vpack.c.bf16 %v9106_v16, %v9105_v37  ;;  %v280_v12 = vld [vmem:[%s10316_s28 + $0x3a8] sm:$0xff] }
 0x3ed   : > { %v3897_v28 = vpop.f32.mrf.mxu0  ;;  %v1718_v37 = vld [vmem:[%s10316_s28 + $0x3a9] sm:$0xff] }
 0x3ee   : > { %v11560_v54 = vadd.f32 %v3895_v5, %v3259_v57  ;;  %v13415_v57 = vld [vmem:[#allocation29_spill] sm:$0xff] }
 0x3f0   : > { %13412 = vst [vmem:[#allocation23_spill] sm:$0xff] %v11560_v54 }
 0x3f1   : > { %v2207_v4 = vpop.f32.mrf.mxu2 }
 0x3f2   : > { %v3052_v25 = vpop.f32.mrf.mxu3  ;;  %v2415_v32 = vadd.f32 %v2207_v4, %v1492_v24  ;;  %v281_v24 = vld [vmem:[%s10316_s28 + $0x3b0] sm:$0xff] }
 0x3f3   : > { %v1494_v6 = vpop.f32.mrf.mxu1  ;;  %v1719_v4 = vld [vmem:[%s10316_s28 + $0x3b1] sm:$0xff] }
 0x3f4   : > { %v3260_v0 = vadd.f32 %v3052_v25, %v2415_v32  ;;  %v1495_v36 = vadd.f32 %v1494_v6, %v13415_v57  ;;  %v13417_v25 = vld [vmem:[#allocation32_spill] sm:$0xff]  ;;  %v361_v57 = vpack.c.bf16 %v281_v24, %v280_v12 }
 0x3f5   : > { %v3900_v5 = vpop.f32.mrf.mxu0 }
 0x3f6   : > { %8739 = vmatmul.msk.bf16.gmra.mxu1 %vm571_vm2, %v360_v3  ;;  %8803 = vmatmul.msk.bf16.gmra.mxu2 %vm571_vm2, %v1798_v60  ;;  %v11571_v26 = vadd.f32 %v3897_v28, %v3260_v0  ;;  %v8915_v0 = vld [vmem:[%s10316_s28 + $0xdf8] sm:$0xff]  ;;  %v8916_v28 = vld [vmem:[%s10316_s28 + $0xe00] sm:$0xff] }
 0x3f7   : > { %8995 = vmatmul.msk.bf16.gmra.mxu3 %vm571_vm2, %v2643_v23  ;;  %v9107_v60 = vld [vmem:[%s10316_s28 + $0x1320] sm:$0xff]  ;;  %v9108_v23 = vld [vmem:[%s10316_s28 + $0x1328] sm:$0xff] }
 0x3f8   : > { %13414 = vst [vmem:[#allocation26_spill] sm:$0xff] %v11571_v26  ;;  %9187 = vmatmul.msk.bf16.gmra.mxu0 %vm571_vm2, %v3488_v33 }
 0x3f9   : > { %v2210_v32 = vpop.f32.mrf.mxu2 }
 0x3fa   : > { %v3055_v10 = vpop.f32.mrf.mxu3  ;;  %v2416_v52 = vadd.f32 %v2210_v32, %v1495_v36  ;;  %v1799_v32 = vpack.c.bf16 %v1719_v4, %v1718_v37 }
 0x3fb   : > { %v1496_v53 = vpop.f32.mrf.mxu1 }
 0x3fc   : > { %v3261_v27 = vadd.f32 %v3055_v10, %v2416_v52  ;;  %v1497_v3 = vadd.f32 %v1496_v53, %v13417_v25  ;;  %v2644_v10 = vpack.c.bf16 %v8916_v28, %v8915_v0  ;;  %v3489_v52 = vpack.c.bf16 %v9108_v23, %v9107_v60  ;;  %v282_v25 = vld [vmem:[%s10316_s28 + $0x3c0] sm:$0xff] }
 0x3fd   : > { %v3902_v55 = vpop.f32.mrf.mxu0  ;;  %v1720_v60 = vld [vmem:[%s10316_s28 + $0x3c1] sm:$0xff] }
 0x3fe   : > { %v11578_v16 = vadd.f32 %v3900_v5, %v3261_v27  ;;  %v13419_v27 = vld [vmem:[#allocation35_spill] sm:$0xff] }
 0x400   : > { %13416 = vst [vmem:[#allocation29_spill] sm:$0xff] %v11578_v16 }
 0x401   : > { %v2212_v6 = vpop.f32.mrf.mxu2 }
 0x402   : > { %v3057_v33 = vpop.f32.mrf.mxu3  ;;  %v2417_v26 = vadd.f32 %v2212_v6, %v1497_v3  ;;  %v283_v3 = vld [vmem:[%s10316_s28 + $0x3c8] sm:$0xff] }
 0x403   : > { %v1499_v36 = vpop.f32.mrf.mxu1  ;;  %v1721_v6 = vld [vmem:[%s10316_s28 + $0x3c9] sm:$0xff] }
 0x404   : > { %v3262_v54 = vadd.f32 %v3057_v33, %v2417_v26  ;;  %v1500_v12 = vadd.f32 %v1499_v36, %v13419_v27  ;;  %v13421_v33 = vld [vmem:[#allocation38_spill] sm:$0xff]  ;;  %v362_v27 = vpack.c.bf16 %v283_v3, %v282_v25 }
 0x405   : > { %v3905_v5 = vpop.f32.mrf.mxu0 }
 0x406   : > { %8740 = vmatmul.msk.bf16.gmra.mxu1 %vm571_vm2, %v361_v57  ;;  %8804 = vmatmul.msk.bf16.gmra.mxu2 %vm571_vm2, %v1799_v32  ;;  %v11589_v53 = vadd.f32 %v3902_v55, %v3262_v54  ;;  %v8917_v54 = vld [vmem:[%s10316_s28 + $0xe10] sm:$0xff]  ;;  %v8918_v55 = vld [vmem:[%s10316_s28 + $0xe18] sm:$0xff] }
 0x407   : > { %8996 = vmatmul.msk.bf16.gmra.mxu3 %vm571_vm2, %v2644_v10  ;;  %v9109_v32 = vld [vmem:[%s10316_s28 + $0x1338] sm:$0xff]  ;;  %v9110_v10 = vld [vmem:[%s10316_s28 + $0x1340] sm:$0xff] }
 0x408   : > { %13418 = vst [vmem:[#allocation32_spill] sm:$0xff] %v11589_v53  ;;  %9188 = vmatmul.msk.bf16.gmra.mxu0 %vm571_vm2, %v3489_v52 }
 0x409   : > { %v2215_v26 = vpop.f32.mrf.mxu2 }
 0x40a   : > { %v3060_v24 = vpop.f32.mrf.mxu3  ;;  %v2418_v37 = vadd.f32 %v2215_v26, %v1500_v12  ;;  %v1800_v26 = vpack.c.bf16 %v1721_v6, %v1720_v60 }
 0x40b   : > { %v1501_v4 = vpop.f32.mrf.mxu1 }
 0x40c   : > { %v3263_v0 = vadd.f32 %v3060_v24, %v2418_v37  ;;  %v1502_v57 = vadd.f32 %v1501_v4, %v13421_v33  ;;  %v2645_v24 = vpack.c.bf16 %v8918_v55, %v8917_v54  ;;  %v3490_v37 = vpack.c.bf16 %v9110_v10, %v9109_v32  ;;  %v284_v33 = vld [vmem:[%s10316_s28 + $0x3d0] sm:$0xff] }
 0x40d   : > { %v3907_v28 = vpop.f32.mrf.mxu0  ;;  %v1722_v32 = vld [vmem:[%s10316_s28 + $0x3d1] sm:$0xff] }
 0x40e   : > { %v11596_v23 = vadd.f32 %v3905_v5, %v3263_v0  ;;  %v13423_v0 = vld [vmem:[#allocation41_spill] sm:$0xff] }
 0x410   : > { %13420 = vst [vmem:[#allocation35_spill] sm:$0xff] %v11596_v23 }
 0x411   : > { %v2217_v36 = vpop.f32.mrf.mxu2 }
 0x412   : > { %v3062_v52 = vpop.f32.mrf.mxu3  ;;  %v2419_v53 = vadd.f32 %v2217_v36, %v1502_v57  ;;  %v285_v57 = vld [vmem:[%s10316_s28 + $0x3d8] sm:$0xff] }
 0x413   : > { %v1504_v12 = vpop.f32.mrf.mxu1  ;;  %v1723_v36 = vld [vmem:[%s10316_s28 + $0x3d9] sm:$0xff] }
 0x414   : > { %v3264_v16 = vadd.f32 %v3062_v52, %v2419_v53  ;;  %v1505_v25 = vadd.f32 %v1504_v12, %v13423_v0  ;;  %v13425_v52 = vld [vmem:[#allocation44_spill] sm:$0xff]  ;;  %v363_v0 = vpack.c.bf16 %v285_v57, %v284_v33 }
 0x415   : > { %v3910_v5 = vpop.f32.mrf.mxu0 }
 0x416   : > { %8741 = vmatmul.msk.bf16.gmra.mxu1 %vm571_vm2, %v362_v27  ;;  %8805 = vmatmul.msk.bf16.gmra.mxu2 %vm571_vm2, %v1800_v26  ;;  %v11607_v4 = vadd.f32 %v3907_v28, %v3264_v16  ;;  %v8919_v16 = vld [vmem:[%s10316_s28 + $0xe20] sm:$0xff]  ;;  %v8920_v28 = vld [vmem:[%s10316_s28 + $0xe28] sm:$0xff] }
 0x417   : > { %8997 = vmatmul.msk.bf16.gmra.mxu3 %vm571_vm2, %v2645_v24  ;;  %v9111_v26 = vld [vmem:[%s10316_s28 + $0x1348] sm:$0xff]  ;;  %v9112_v24 = vld [vmem:[%s10316_s28 + $0x1350] sm:$0xff] }
 0x418   : > { %13422 = vst [vmem:[#allocation38_spill] sm:$0xff] %v11607_v4  ;;  %9189 = vmatmul.msk.bf16.gmra.mxu0 %vm571_vm2, %v3490_v37 }
 0x419   : > { %v2220_v53 = vpop.f32.mrf.mxu2 }
 0x41a   : > { %v3065_v3 = vpop.f32.mrf.mxu3  ;;  %v2420_v60 = vadd.f32 %v2220_v53, %v1505_v25  ;;  %v1801_v53 = vpack.c.bf16 %v1723_v36, %v1722_v32 }
 0x41b   : > { %v1506_v6 = vpop.f32.mrf.mxu1 }
 0x41c   : > { %v3265_v54 = vadd.f32 %v3065_v3, %v2420_v60  ;;  %v1507_v27 = vadd.f32 %v1506_v6, %v13425_v52  ;;  %v2646_v3 = vpack.c.bf16 %v8920_v28, %v8919_v16  ;;  %v3491_v60 = vpack.c.bf16 %v9112_v24, %v9111_v26  ;;  %v286_v52 = vld [vmem:[%s10316_s28 + $0x3e8] sm:$0xff] }
 0x41d   : > { %v3912_v55 = vpop.f32.mrf.mxu0  ;;  %v1724_v26 = vld [vmem:[%s10316_s28 + $0x3e9] sm:$0xff] }
 0x41e   : > { %v11614_v10 = vadd.f32 %v3910_v5, %v3265_v54  ;;  %v13427_v54 = vld [vmem:[#allocation47_spill] sm:$0xff] }
 0x420   : > { %13424 = vst [vmem:[#allocation41_spill] sm:$0xff] %v11614_v10 }
 0x421   : > { %v2222_v12 = vpop.f32.mrf.mxu2 }
 0x422   : > { %v3067_v37 = vpop.f32.mrf.mxu3  ;;  %v2421_v4 = vadd.f32 %v2222_v12, %v1507_v27  ;;  %v287_v27 = vld [vmem:[%s10316_s28 + $0x3f0] sm:$0xff] }
 0x423   : > { %v1509_v25 = vpop.f32.mrf.mxu1  ;;  %v1725_v12 = vld [vmem:[%s10316_s28 + $0x3f1] sm:$0xff] }
 0x424   : > { %v3266_v23 = vadd.f32 %v3067_v37, %v2421_v4  ;;  %v1510_v33 = vadd.f32 %v1509_v25, %v13427_v54  ;;  %v13429_v37 = vld [vmem:[#allocation50_spill] sm:$0xff]  ;;  %v364_v54 = vpack.c.bf16 %v287_v27, %v286_v52 }
 0x425   : > { %v3915_v5 = vpop.f32.mrf.mxu0 }
 0x426   : > { %8742 = vmatmul.msk.bf16.gmra.mxu1 %vm571_vm2, %v363_v0  ;;  %8806 = vmatmul.msk.bf16.gmra.mxu2 %vm571_vm2, %v1801_v53  ;;  %v11625_v6 = vadd.f32 %v3912_v55, %v3266_v23  ;;  %v8921_v23 = vld [vmem:[%s10316_s28 + $0xe38] sm:$0xff]  ;;  %v8922_v55 = vld [vmem:[%s10316_s28 + $0xe40] sm:$0xff] }
 0x427   : > { %8998 = vmatmul.msk.bf16.gmra.mxu3 %vm571_vm2, %v2646_v3  ;;  %v9113_v53 = vld [vmem:[%s10316_s28 + $0x1360] sm:$0xff]  ;;  %v9114_v3 = vld [vmem:[%s10316_s28 + $0x1368] sm:$0xff] }
 0x428   : > { %13426 = vst [vmem:[#allocation44_spill] sm:$0xff] %v11625_v6  ;;  %9190 = vmatmul.msk.bf16.gmra.mxu0 %vm571_vm2, %v3491_v60 }
 0x429   : > { %v2225_v4 = vpop.f32.mrf.mxu2 }
 0x42a   : > { %v3070_v57 = vpop.f32.mrf.mxu3  ;;  %v2422_v32 = vadd.f32 %v2225_v4, %v1510_v33  ;;  %v1802_v4 = vpack.c.bf16 %v1725_v12, %v1724_v26 }
 0x42b   : > { %v1511_v36 = vpop.f32.mrf.mxu1 }
 0x42c   : > { %v3267_v16 = vadd.f32 %v3070_v57, %v2422_v32  ;;  %v1512_v0 = vadd.f32 %v1511_v36, %v13429_v37  ;;  %v2647_v57 = vpack.c.bf16 %v8922_v55, %v8921_v23  ;;  %v3492_v32 = vpack.c.bf16 %v9114_v3, %v9113_v53  ;;  %v288_v37 = vld [vmem:[%s10316_s28 + $0x3f8] sm:$0xff] }
 0x42d   : > { %v3917_v28 = vpop.f32.mrf.mxu0  ;;  %v1726_v53 = vld [vmem:[%s10316_s28 + $0x3f9] sm:$0xff] }
 0x42e   : > { %v11632_v24 = vadd.f32 %v3915_v5, %v3267_v16  ;;  %v13431_v16 = vld [vmem:[#allocation53_spill] sm:$0xff] }
 0x430   : > { %13428 = vst [vmem:[#allocation47_spill] sm:$0xff] %v11632_v24 }
 0x431   : > { %v2227_v25 = vpop.f32.mrf.mxu2 }
 0x432   : > { %v3072_v60 = vpop.f32.mrf.mxu3  ;;  %v2423_v6 = vadd.f32 %v2227_v25, %v1512_v0  ;;  %v289_v0 = vld [vmem:[%s10316_s28 + $0x400] sm:$0xff] }
 0x433   : > { %v1514_v33 = vpop.f32.mrf.mxu1  ;;  %v1727_v25 = vld [vmem:[%s10316_s28 + $0x401] sm:$0xff] }
 0x434   : > { %v3268_v10 = vadd.f32 %v3072_v60, %v2423_v6  ;;  %v1515_v52 = vadd.f32 %v1514_v33, %v13431_v16  ;;  %v13433_v60 = vld [vmem:[#allocation56_spill] sm:$0xff]  ;;  %v365_v16 = vpack.c.bf16 %v289_v0, %v288_v37 }
 0x435   : > { %v3920_v5 = vpop.f32.mrf.mxu0 }
 0x436   : > { %8743 = vmatmul.msk.bf16.gmra.mxu1 %vm571_vm2, %v364_v54  ;;  %8807 = vmatmul.msk.bf16.gmra.mxu2 %vm571_vm2, %v1802_v4  ;;  %v11643_v36 = vadd.f32 %v3917_v28, %v3268_v10  ;;  %v8923_v10 = vld [vmem:[%s10316_s28 + $0xe48] sm:$0xff]  ;;  %v8924_v28 = vld [vmem:[%s10316_s28 + $0xe50] sm:$0xff] }
 0x437   : > { %8999 = vmatmul.msk.bf16.gmra.mxu3 %vm571_vm2, %v2647_v57  ;;  %v9115_v4 = vld [vmem:[%s10316_s28 + $0x1370] sm:$0xff]  ;;  %v9116_v57 = vld [vmem:[%s10316_s28 + $0x1378] sm:$0xff] }
 0x438   : > { %13430 = vst [vmem:[#allocation50_spill] sm:$0xff] %v11643_v36  ;;  %9191 = vmatmul.msk.bf16.gmra.mxu0 %vm571_vm2, %v3492_v32 }
 0x439   : > { %v2230_v6 = vpop.f32.mrf.mxu2 }
 0x43a   : > { %v3075_v27 = vpop.f32.mrf.mxu3  ;;  %v2424_v26 = vadd.f32 %v2230_v6, %v1515_v52  ;;  %v1803_v6 = vpack.c.bf16 %v1727_v25, %v1726_v53 }
 0x43b   : > { %v1516_v12 = vpop.f32.mrf.mxu1 }
 0x43c   : > { %v3269_v23 = vadd.f32 %v3075_v27, %v2424_v26  ;;  %v1517_v54 = vadd.f32 %v1516_v12, %v13433_v60  ;;  %v2648_v27 = vpack.c.bf16 %v8924_v28, %v8923_v10  ;;  %v3493_v26 = vpack.c.bf16 %v9116_v57, %v9115_v4  ;;  %v290_v60 = vld [vmem:[%s10316_s28 + $0x410] sm:$0xff] }
 0x43d   : > { %v3922_v55 = vpop.f32.mrf.mxu0  ;;  %v1728_v4 = vld [vmem:[%s10316_s28 + $0x411] sm:$0xff] }
 0x43e   : > { %v11650_v3 = vadd.f32 %v3920_v5, %v3269_v23  ;;  %v13435_v23 = vld [vmem:[#allocation59_spill] sm:$0xff] }
 0x440   : > { %13432 = vst [vmem:[#allocation53_spill] sm:$0xff] %v11650_v3 }
 0x441   : > { %v2232_v33 = vpop.f32.mrf.mxu2 }
 0x442   : > { %v3077_v32 = vpop.f32.mrf.mxu3  ;;  %v2425_v36 = vadd.f32 %v2232_v33, %v1517_v54  ;;  %v291_v54 = vld [vmem:[%s10316_s28 + $0x418] sm:$0xff] }
 0x443   : > { %v1519_v52 = vpop.f32.mrf.mxu1  ;;  %v1729_v33 = vld [vmem:[%s10316_s28 + $0x419] sm:$0xff] }
 0x444   : > { %v3270_v24 = vadd.f32 %v3077_v32, %v2425_v36  ;;  %v1520_v37 = vadd.f32 %v1519_v52, %v13435_v23  ;;  %v13437_v32 = vld [vmem:[#allocation62_spill] sm:$0xff]  ;;  %v366_v23 = vpack.c.bf16 %v291_v54, %v290_v60 }
 0x445   : > { %v3925_v5 = vpop.f32.mrf.mxu0 }
 0x446   : > { %8744 = vmatmul.msk.bf16.gmra.mxu1 %vm571_vm2, %v365_v16  ;;  %8808 = vmatmul.msk.bf16.gmra.mxu2 %vm571_vm2, %v1803_v6  ;;  %v11661_v12 = vadd.f32 %v3922_v55, %v3270_v24  ;;  %v8925_v24 = vld [vmem:[%s10316_s28 + $0xe60] sm:$0xff]  ;;  %v8926_v55 = vld [vmem:[%s10316_s28 + $0xe68] sm:$0xff] }
 0x447   : > { %9000 = vmatmul.msk.bf16.gmra.mxu3 %vm571_vm2, %v2648_v27  ;;  %v9117_v6 = vld [vmem:[%s10316_s28 + $0x1388] sm:$0xff]  ;;  %v9118_v27 = vld [vmem:[%s10316_s28 + $0x1390] sm:$0xff] }
 0x448   : > { %13434 = vst [vmem:[#allocation56_spill] sm:$0xff] %v11661_v12  ;;  %9192 = vmatmul.msk.bf16.gmra.mxu0 %vm571_vm2, %v3493_v26 }
 0x449   : > { %v2235_v36 = vpop.f32.mrf.mxu2 }
 0x44a   : > { %v3080_v0 = vpop.f32.mrf.mxu3  ;;  %v2426_v53 = vadd.f32 %v2235_v36, %v1520_v37  ;;  %v1804_v36 = vpack.c.bf16 %v1729_v33, %v1728_v4 }
 0x44b   : > { %v1521_v25 = vpop.f32.mrf.mxu1 }
 0x44c   : > { %v3271_v10 = vadd.f32 %v3080_v0, %v2426_v53  ;;  %v1522_v16 = vadd.f32 %v1521_v25, %v13437_v32  ;;  %v2649_v0 = vpack.c.bf16 %v8926_v55, %v8925_v24  ;;  %v3494_v53 = vpack.c.bf16 %v9118_v27, %v9117_v6  ;;  %v292_v32 = vld [vmem:[%s10316_s28 + $0x420] sm:$0xff] }
 0x44d   : > { %v3927_v28 = vpop.f32.mrf.mxu0  ;;  %v1730_v6 = vld [vmem:[%s10316_s28 + $0x421] sm:$0xff] }
 0x44e   : > { %v11668_v57 = vadd.f32 %v3925_v5, %v3271_v10  ;;  %v13439_v10 = vld [vmem:[#allocation65_spill] sm:$0xff] }
 0x450   : > { %13436 = vst [vmem:[#allocation59_spill] sm:$0xff] %v11668_v57 }
 0x451   : > { %v2237_v52 = vpop.f32.mrf.mxu2 }
 0x452   : > { %v3082_v26 = vpop.f32.mrf.mxu3  ;;  %v2427_v12 = vadd.f32 %v2237_v52, %v1522_v16  ;;  %v293_v16 = vld [vmem:[%s10316_s28 + $0x428] sm:$0xff] }
 0x453   : > { %v1524_v37 = vpop.f32.mrf.mxu1  ;;  %v1731_v52 = vld [vmem:[%s10316_s28 + $0x429] sm:$0xff] }
 0x454   : > { %v3272_v3 = vadd.f32 %v3082_v26, %v2427_v12  ;;  %v1525_v60 = vadd.f32 %v1524_v37, %v13439_v10  ;;  %v13441_v26 = vld [vmem:[#allocation68_spill] sm:$0xff]  ;;  %v367_v10 = vpack.c.bf16 %v293_v16, %v292_v32 }
 0x455   : > { %v3930_v5 = vpop.f32.mrf.mxu0 }
 0x456   : > { %8745 = vmatmul.msk.bf16.gmra.mxu1 %vm571_vm2, %v366_v23  ;;  %8809 = vmatmul.msk.bf16.gmra.mxu2 %vm571_vm2, %v1804_v36  ;;  %v11679_v25 = vadd.f32 %v3927_v28, %v3272_v3  ;;  %v8927_v3 = vld [vmem:[%s10316_s28 + $0xe70] sm:$0xff]  ;;  %v8928_v28 = vld [vmem:[%s10316_s28 + $0xe78] sm:$0xff] }
 0x457   : > { %9001 = vmatmul.msk.bf16.gmra.mxu3 %vm571_vm2, %v2649_v0  ;;  %v9119_v36 = vld [vmem:[%s10316_s28 + $0x1398] sm:$0xff]  ;;  %v9120_v0 = vld [vmem:[%s10316_s28 + $0x13a0] sm:$0xff] }
 0x458   : > { %13438 = vst [vmem:[#allocation62_spill] sm:$0xff] %v11679_v25  ;;  %9193 = vmatmul.msk.bf16.gmra.mxu0 %vm571_vm2, %v3494_v53 }
 0x459   : > { %v2240_v12 = vpop.f32.mrf.mxu2 }
 0x45a   : > { %v3085_v54 = vpop.f32.mrf.mxu3  ;;  %v2428_v4 = vadd.f32 %v2240_v12, %v1525_v60  ;;  %v1805_v12 = vpack.c.bf16 %v1731_v52, %v1730_v6 }
 0x45b   : > { %v1526_v33 = vpop.f32.mrf.mxu1 }
 0x45c   : > { %v3273_v24 = vadd.f32 %v3085_v54, %v2428_v4  ;;  %v1527_v23 = vadd.f32 %v1526_v33, %v13441_v26  ;;  %v2650_v54 = vpack.c.bf16 %v8928_v28, %v8927_v3  ;;  %v3495_v4 = vpack.c.bf16 %v9120_v0, %v9119_v36  ;;  %v294_v26 = vld [vmem:[%s10316_s28 + $0x438] sm:$0xff] }
 0x45d   : > { %v3932_v55 = vpop.f32.mrf.mxu0  ;;  %v1732_v36 = vld [vmem:[%s10316_s28 + $0x439] sm:$0xff] }
 0x45e   : > { %v11686_v27 = vadd.f32 %v3930_v5, %v3273_v24  ;;  %v13443_v24 = vld [vmem:[#allocation71_spill] sm:$0xff] }
 0x460   : > { %13440 = vst [vmem:[#allocation65_spill] sm:$0xff] %v11686_v27 }
 0x461   : > { %v2242_v37 = vpop.f32.mrf.mxu2 }
 0x462   : > { %v3087_v53 = vpop.f32.mrf.mxu3  ;;  %v2429_v25 = vadd.f32 %v2242_v37, %v1527_v23  ;;  %v295_v23 = vld [vmem:[%s10316_s28 + $0x440] sm:$0xff] }
 0x463   : > { %v1529_v60 = vpop.f32.mrf.mxu1  ;;  %v1733_v37 = vld [vmem:[%s10316_s28 + $0x441] sm:$0xff] }
 0x464   : > { %v3274_v57 = vadd.f32 %v3087_v53, %v2429_v25  ;;  %v1530_v32 = vadd.f32 %v1529_v60, %v13443_v24  ;;  %v13445_v53 = vld [vmem:[#allocation74_spill] sm:$0xff]  ;;  %v368_v24 = vpack.c.bf16 %v295_v23, %v294_v26 }
 0x465   : > { %v3935_v5 = vpop.f32.mrf.mxu0 }
 0x466   : > { %8746 = vmatmul.msk.bf16.gmra.mxu1 %vm571_vm2, %v367_v10  ;;  %8810 = vmatmul.msk.bf16.gmra.mxu2 %vm571_vm2, %v1805_v12  ;;  %v11697_v33 = vadd.f32 %v3932_v55, %v3274_v57  ;;  %v8929_v57 = vld [vmem:[%s10316_s28 + $0xe88] sm:$0xff]  ;;  %v8930_v55 = vld [vmem:[%s10316_s28 + $0xe90] sm:$0xff] }
 0x467   : > { %9002 = vmatmul.msk.bf16.gmra.mxu3 %vm571_vm2, %v2650_v54  ;;  %v9121_v12 = vld [vmem:[%s10316_s28 + $0x13b0] sm:$0xff]  ;;  %v9122_v54 = vld [vmem:[%s10316_s28 + $0x13b8] sm:$0xff] }
 0x468   : > { %13442 = vst [vmem:[#allocation68_spill] sm:$0xff] %v11697_v33  ;;  %9194 = vmatmul.msk.bf16.gmra.mxu0 %vm571_vm2, %v3495_v4 }
 0x469   : > { %v2245_v25 = vpop.f32.mrf.mxu2 }
 0x46a   : > { %v3090_v16 = vpop.f32.mrf.mxu3  ;;  %v2430_v6 = vadd.f32 %v2245_v25, %v1530_v32  ;;  %v1806_v25 = vpack.c.bf16 %v1733_v37, %v1732_v36 }
 0x46b   : > { %v1531_v52 = vpop.f32.mrf.mxu1 }
 0x46c   : > { %v3275_v3 = vadd.f32 %v3090_v16, %v2430_v6  ;;  %v1532_v10 = vadd.f32 %v1531_v52, %v13445_v53  ;;  %v2651_v16 = vpack.c.bf16 %v8930_v55, %v8929_v57  ;;  %v3496_v6 = vpack.c.bf16 %v9122_v54, %v9121_v12  ;;  %v296_v53 = vld [vmem:[%s10316_s28 + $0x448] sm:$0xff] }
 0x46d   : > { %v3937_v28 = vpop.f32.mrf.mxu0  ;;  %v1734_v12 = vld [vmem:[%s10316_s28 + $0x449] sm:$0xff] }
 0x46e   : > { %v11704_v0 = vadd.f32 %v3935_v5, %v3275_v3  ;;  %v13447_v3 = vld [vmem:[#allocation77_spill] sm:$0xff] }
 0x470   : > { %13444 = vst [vmem:[#allocation71_spill] sm:$0xff] %v11704_v0 }
 0x471   : > { %v2247_v60 = vpop.f32.mrf.mxu2 }
 0x472   : > { %v3092_v4 = vpop.f32.mrf.mxu3  ;;  %v2431_v33 = vadd.f32 %v2247_v60, %v1532_v10  ;;  %v297_v10 = vld [vmem:[%s10316_s28 + $0x450] sm:$0xff] }
 0x473   : > { %v1534_v32 = vpop.f32.mrf.mxu1  ;;  %v1735_v60 = vld [vmem:[%s10316_s28 + $0x451] sm:$0xff] }
 0x474   : > { %v3276_v27 = vadd.f32 %v3092_v4, %v2431_v33  ;;  %v1535_v26 = vadd.f32 %v1534_v32, %v13447_v3  ;;  %v13449_v4 = vld [vmem:[#allocation80_spill] sm:$0xff]  ;;  %v369_v3 = vpack.c.bf16 %v297_v10, %v296_v53 }
 0x475   : > { %v3940_v5 = vpop.f32.mrf.mxu0 }
 0x476   : > { %8747 = vmatmul.msk.bf16.gmra.mxu1 %vm571_vm2, %v368_v24  ;;  %8811 = vmatmul.msk.bf16.gmra.mxu2 %vm571_vm2, %v1806_v25  ;;  %v11715_v52 = vadd.f32 %v3937_v28, %v3276_v27  ;;  %v8931_v27 = vld [vmem:[%s10316_s28 + $0xe98] sm:$0xff]  ;;  %v8932_v28 = vld [vmem:[%s10316_s28 + $0xea0] sm:$0xff] }
 0x477   : > { %9003 = vmatmul.msk.bf16.gmra.mxu3 %vm571_vm2, %v2651_v16  ;;  %v9123_v25 = vld [vmem:[%s10316_s28 + $0x13c0] sm:$0xff]  ;;  %v9124_v16 = vld [vmem:[%s10316_s28 + $0x13c8] sm:$0xff] }
 0x478   : > { %13446 = vst [vmem:[#allocation74_spill] sm:$0xff] %v11715_v52  ;;  %9195 = vmatmul.msk.bf16.gmra.mxu0 %vm571_vm2, %v3496_v6 }
 0x479   : > { %v2250_v33 = vpop.f32.mrf.mxu2 }
 0x47a   : > { %v3095_v23 = vpop.f32.mrf.mxu3  ;;  %v2432_v36 = vadd.f32 %v2250_v33, %v1535_v26  ;;  %v1807_v33 = vpack.c.bf16 %v1735_v60, %v1734_v12 }
 0x47b   : > { %v1536_v37 = vpop.f32.mrf.mxu1 }
 0x47c   : > { %v3277_v57 = vadd.f32 %v3095_v23, %v2432_v36  ;;  %v1537_v24 = vadd.f32 %v1536_v37, %v13449_v4  ;;  %v2652_v23 = vpack.c.bf16 %v8932_v28, %v8931_v27  ;;  %v3497_v36 = vpack.c.bf16 %v9124_v16, %v9123_v25  ;;  %v298_v4 = vld [vmem:[%s10316_s28 + $0x460] sm:$0xff] }
 0x47d   : > { %v3942_v55 = vpop.f32.mrf.mxu0  ;;  %v1736_v25 = vld [vmem:[%s10316_s28 + $0x461] sm:$0xff] }
 0x47e   : > { %v11722_v54 = vadd.f32 %v3940_v5, %v3277_v57  ;;  %v13451_v57 = vld [vmem:[#allocation83_spill] sm:$0xff] }
 0x480   : > { %13448 = vst [vmem:[#allocation77_spill] sm:$0xff] %v11722_v54 }
 0x481   : > { %v2252_v32 = vpop.f32.mrf.mxu2 }
 0x482   : > { %v3097_v6 = vpop.f32.mrf.mxu3  ;;  %v2433_v52 = vadd.f32 %v2252_v32, %v1537_v24  ;;  %v299_v24 = vld [vmem:[%s10316_s28 + $0x468] sm:$0xff] }
 0x483   : > { %v1539_v26 = vpop.f32.mrf.mxu1  ;;  %v1737_v32 = vld [vmem:[%s10316_s28 + $0x469] sm:$0xff] }
 0x484   : > { %v3278_v0 = vadd.f32 %v3097_v6, %v2433_v52  ;;  %v1540_v53 = vadd.f32 %v1539_v26, %v13451_v57  ;;  %v13453_v6 = vld [vmem:[#allocation86_spill] sm:$0xff]  ;;  %v370_v57 = vpack.c.bf16 %v299_v24, %v298_v4 }
 0x485   : > { %v3945_v5 = vpop.f32.mrf.mxu0 }
 0x486   : > { %8748 = vmatmul.msk.bf16.gmra.mxu1 %vm571_vm2, %v369_v3  ;;  %8812 = vmatmul.msk.bf16.gmra.mxu2 %vm571_vm2, %v1807_v33  ;;  %v11733_v37 = vadd.f32 %v3942_v55, %v3278_v0  ;;  %v8933_v0 = vld [vmem:[%s10316_s28 + $0xeb0] sm:$0xff]  ;;  %v8934_v55 = vld [vmem:[%s10316_s28 + $0xeb8] sm:$0xff] }
 0x487   : > { %9004 = vmatmul.msk.bf16.gmra.mxu3 %vm571_vm2, %v2652_v23  ;;  %v9125_v33 = vld [vmem:[%s10316_s28 + $0x13d8] sm:$0xff]  ;;  %v9126_v23 = vld [vmem:[%s10316_s28 + $0x13e0] sm:$0xff] }
 0x488   : > { %13450 = vst [vmem:[#allocation80_spill] sm:$0xff] %v11733_v37  ;;  %9196 = vmatmul.msk.bf16.gmra.mxu0 %vm571_vm2, %v3497_v36 }
 0x489   : > { %v2255_v52 = vpop.f32.mrf.mxu2 }
 0x48a   : > { %v3100_v10 = vpop.f32.mrf.mxu3  ;;  %v2434_v12 = vadd.f32 %v2255_v52, %v1540_v53  ;;  %v1808_v52 = vpack.c.bf16 %v1737_v32, %v1736_v25 }
 0x48b   : > { %v1541_v60 = vpop.f32.mrf.mxu1 }
 0x48c   : > { %v3279_v27 = vadd.f32 %v3100_v10, %v2434_v12  ;;  %v1542_v3 = vadd.f32 %v1541_v60, %v13453_v6  ;;  %v2653_v10 = vpack.c.bf16 %v8934_v55, %v8933_v0  ;;  %v3498_v12 = vpack.c.bf16 %v9126_v23, %v9125_v33  ;;  %v300_v6 = vld [vmem:[%s10316_s28 + $0x470] sm:$0xff] }
 0x48d   : > { %v3947_v28 = vpop.f32.mrf.mxu0  ;;  %v1738_v33 = vld [vmem:[%s10316_s28 + $0x471] sm:$0xff] }
 0x48e   : > { %v11740_v16 = vadd.f32 %v3945_v5, %v3279_v27  ;;  %v13455_v27 = vld [vmem:[#allocation3_spill] sm:$0xff] }
 0x490   : > { %13452 = vst [vmem:[#allocation83_spill] sm:$0xff] %v11740_v16 }
 0x491   : > { %v2257_v26 = vpop.f32.mrf.mxu2 }
 0x492   : > { %v3102_v36 = vpop.f32.mrf.mxu3  ;;  %v2435_v37 = vadd.f32 %v2257_v26, %v1542_v3  ;;  %v301_v3 = vld [vmem:[%s10316_s28 + $0x478] sm:$0xff] }
 0x493   : > { %v1544_v53 = vpop.f32.mrf.mxu1  ;;  %v1739_v26 = vld [vmem:[%s10316_s28 + $0x479] sm:$0xff] }
 0x494   : > { %v3280_v54 = vadd.f32 %v3102_v36, %v2435_v37  ;;  %v1545_v4 = vadd.f32 %v1544_v53, %v13455_v27  ;;  %v13457_v36 = vld [vmem:[#allocation5_spill] sm:$0xff]  ;;  %v371_v27 = vpack.c.bf16 %v301_v3, %v300_v6 }
 0x495   : > { %v3950_v5 = vpop.f32.mrf.mxu0 }
 0x496   : > { %8749 = vmatmul.msk.bf16.gmra.mxu1 %vm571_vm2, %v370_v57  ;;  %8813 = vmatmul.msk.bf16.gmra.mxu2 %vm571_vm2, %v1808_v52  ;;  %v11751_v60 = vadd.f32 %v3947_v28, %v3280_v54  ;;  %v8935_v54 = vld [vmem:[%s10316_s28 + $0xec0] sm:$0xff]  ;;  %v8936_v28 = vld [vmem:[%s10316_s28 + $0xec8] sm:$0xff] }
 0x497   : > { %9005 = vmatmul.msk.bf16.gmra.mxu3 %vm571_vm2, %v2653_v10  ;;  %v9127_v52 = vld [vmem:[%s10316_s28 + $0x13e8] sm:$0xff]  ;;  %v9128_v10 = vld [vmem:[%s10316_s28 + $0x13f0] sm:$0xff] }
 0x498   : > { %13454 = vst [vmem:[#allocation86_spill] sm:$0xff] %v11751_v60  ;;  %9197 = vmatmul.msk.bf16.gmra.mxu0 %vm571_vm2, %v3498_v12 }
 0x499   : > { %v2260_v37 = vpop.f32.mrf.mxu2 }
 0x49a   : > { %v3105_v24 = vpop.f32.mrf.mxu3  ;;  %v2436_v25 = vadd.f32 %v2260_v37, %v1545_v4  ;;  %v1809_v37 = vpack.c.bf16 %v1739_v26, %v1738_v33 }
 0x49b   : > { %v1546_v32 = vpop.f32.mrf.mxu1 }
 0x49c   : > { %v3281_v0 = vadd.f32 %v3105_v24, %v2436_v25  ;;  %v1547_v57 = vadd.f32 %v1546_v32, %v13457_v36  ;;  %v2654_v24 = vpack.c.bf16 %v8936_v28, %v8935_v54  ;;  %v3499_v25 = vpack.c.bf16 %v9128_v10, %v9127_v52  ;;  %v302_v36 = vld [vmem:[%s10316_s28 + $0x488] sm:$0xff] }
 0x49d   : > { %v3952_v55 = vpop.f32.mrf.mxu0  ;;  %v1740_v52 = vld [vmem:[%s10316_s28 + $0x489] sm:$0xff] }
 0x49e   : > { %v11758_v23 = vadd.f32 %v3950_v5, %v3281_v0  ;;  %v13459_v0 = vld [vmem:[#allocation7_spill] sm:$0xff] }
 0x4a0   : > { %13456 = vst [vmem:[#allocation3_spill] sm:$0xff] %v11758_v23 }
 0x4a1   : > { %v2262_v53 = vpop.f32.mrf.mxu2 }
 0x4a2   : > { %v3107_v12 = vpop.f32.mrf.mxu3  ;;  %v2437_v60 = vadd.f32 %v2262_v53, %v1547_v57  ;;  %v303_v57 = vld [vmem:[%s10316_s28 + $0x490] sm:$0xff] }
 0x4a3   : > { %v1549_v4 = vpop.f32.mrf.mxu1  ;;  %v1741_v53 = vld [vmem:[%s10316_s28 + $0x491] sm:$0xff] }
 0x4a4   : > { %v3282_v16 = vadd.f32 %v3107_v12, %v2437_v60  ;;  %v1550_v6 = vadd.f32 %v1549_v4, %v13459_v0  ;;  %v13461_v12 = vld [vmem:[#allocation9_spill] sm:$0xff]  ;;  %v372_v0 = vpack.c.bf16 %v303_v57, %v302_v36 }
 0x4a5   : > { %v3955_v5 = vpop.f32.mrf.mxu0 }
 0x4a6   : > { %8750 = vmatmul.msk.bf16.gmra.mxu1 %vm571_vm2, %v371_v27  ;;  %8814 = vmatmul.msk.bf16.gmra.mxu2 %vm571_vm2, %v1809_v37  ;;  %v11769_v32 = vadd.f32 %v3952_v55, %v3282_v16  ;;  %v8937_v16 = vld [vmem:[%s10316_s28 + $0xed8] sm:$0xff]  ;;  %v8938_v55 = vld [vmem:[%s10316_s28 + $0xee0] sm:$0xff] }
 0x4a7   : > { %9006 = vmatmul.msk.bf16.gmra.mxu3 %vm571_vm2, %v2654_v24  ;;  %v9129_v37 = vld [vmem:[%s10316_s28 + $0x1400] sm:$0xff]  ;;  %v9130_v24 = vld [vmem:[%s10316_s28 + $0x1408] sm:$0xff] }
 0x4a8   : > { %13458 = vst [vmem:[#allocation5_spill] sm:$0xff] %v11769_v32  ;;  %9198 = vmatmul.msk.bf16.gmra.mxu0 %vm571_vm2, %v3499_v25 }
 0x4a9   : > { %v2265_v60 = vpop.f32.mrf.mxu2 }
 0x4aa   : > { %v3110_v3 = vpop.f32.mrf.mxu3  ;;  %v2438_v33 = vadd.f32 %v2265_v60, %v1550_v6  ;;  %v1810_v60 = vpack.c.bf16 %v1741_v53, %v1740_v52 }
 0x4ab   : > { %v1551_v26 = vpop.f32.mrf.mxu1 }
 0x4ac   : > { %v3283_v54 = vadd.f32 %v3110_v3, %v2438_v33  ;;  %v1552_v27 = vadd.f32 %v1551_v26, %v13461_v12  ;;  %v2655_v3 = vpack.c.bf16 %v8938_v55, %v8937_v16  ;;  %v3500_v33 = vpack.c.bf16 %v9130_v24, %v9129_v37  ;;  %v304_v12 = vld [vmem:[%s10316_s28 + $0x498] sm:$0xff] }
 0x4ad   : > { %v3957_v28 = vpop.f32.mrf.mxu0  ;;  %v1742_v37 = vld [vmem:[%s10316_s28 + $0x499] sm:$0xff] }
 0x4ae   : > { %v11776_v10 = vadd.f32 %v3955_v5, %v3283_v54  ;;  %v13463_v54 = vld [vmem:[#allocation11_spill] sm:$0xff] }
 0x4b0   : > { %13460 = vst [vmem:[#allocation7_spill] sm:$0xff] %v11776_v10 }
 0x4b1   : > { %v2267_v4 = vpop.f32.mrf.mxu2 }
 0x4b2   : > { %v3112_v25 = vpop.f32.mrf.mxu3  ;;  %v2439_v32 = vadd.f32 %v2267_v4, %v1552_v27  ;;  %v305_v27 = vld [vmem:[%s10316_s28 + $0x4a0] sm:$0xff] }
 0x4b3   : > { %v1554_v6 = vpop.f32.mrf.mxu1  ;;  %v1743_v4 = vld [vmem:[%s10316_s28 + $0x4a1] sm:$0xff] }
 0x4b4   : > { %v3284_v23 = vadd.f32 %v3112_v25, %v2439_v32  ;;  %v1555_v36 = vadd.f32 %v1554_v6, %v13463_v54  ;;  %v13465_v25 = vld [vmem:[#allocation13_spill] sm:$0xff]  ;;  %v373_v54 = vpack.c.bf16 %v305_v27, %v304_v12 }
 0x4b5   : > { %v3960_v5 = vpop.f32.mrf.mxu0 }
 0x4b6   : > { %8751 = vmatmul.msk.bf16.gmra.mxu1 %vm571_vm2, %v372_v0  ;;  %8815 = vmatmul.msk.bf16.gmra.mxu2 %vm571_vm2, %v1810_v60  ;;  %v11787_v26 = vadd.f32 %v3957_v28, %v3284_v23  ;;  %v8939_v23 = vld [vmem:[%s10316_s28 + $0xee8] sm:$0xff]  ;;  %v8940_v28 = vld [vmem:[%s10316_s28 + $0xef0] sm:$0xff] }
 0x4b7   : > { %9007 = vmatmul.msk.bf16.gmra.mxu3 %vm571_vm2, %v2655_v3  ;;  %v9131_v60 = vld [vmem:[%s10316_s28 + $0x1410] sm:$0xff]  ;;  %v9132_v3 = vld [vmem:[%s10316_s28 + $0x1418] sm:$0xff] }
 0x4b8   : > { %13462 = vst [vmem:[#allocation9_spill] sm:$0xff] %v11787_v26  ;;  %9199 = vmatmul.msk.bf16.gmra.mxu0 %vm571_vm2, %v3500_v33 }
 0x4b9   : > { %v2270_v32 = vpop.f32.mrf.mxu2 }
 0x4ba   : > { %v3115_v57 = vpop.f32.mrf.mxu3  ;;  %v2440_v52 = vadd.f32 %v2270_v32, %v1555_v36  ;;  %v1811_v32 = vpack.c.bf16 %v1743_v4, %v1742_v37 }
 0x4bb   : > { %v1556_v53 = vpop.f32.mrf.mxu1 }
 0x4bc   : > { %v3285_v16 = vadd.f32 %v3115_v57, %v2440_v52  ;;  %v1557_v0 = vadd.f32 %v1556_v53, %v13465_v25  ;;  %v2656_v57 = vpack.c.bf16 %v8940_v28, %v8939_v23  ;;  %v3501_v52 = vpack.c.bf16 %v9132_v3, %v9131_v60  ;;  %v306_v25 = vld [vmem:[%s10316_s28 + $0x4b0] sm:$0xff] }
 0x4bd   : > { %v3962_v55 = vpop.f32.mrf.mxu0  ;;  %v1744_v60 = vld [vmem:[%s10316_s28 + $0x4b1] sm:$0xff] }
 0x4be   : > { %v11794_v24 = vadd.f32 %v3960_v5, %v3285_v16  ;;  %v13467_v16 = vld [vmem:[#allocation15_spill] sm:$0xff] }
 0x4c0   : > { %13464 = vst [vmem:[#allocation11_spill] sm:$0xff] %v11794_v24 }
 0x4c1   : > { %v2272_v6 = vpop.f32.mrf.mxu2 }
 0x4c2   : > { %v3117_v33 = vpop.f32.mrf.mxu3  ;;  %v2441_v26 = vadd.f32 %v2272_v6, %v1557_v0  ;;  %v307_v0 = vld [vmem:[%s10316_s28 + $0x4b8] sm:$0xff] }
 0x4c3   : > { %v1559_v36 = vpop.f32.mrf.mxu1  ;;  %v1745_v6 = vld [vmem:[%s10316_s28 + $0x4b9] sm:$0xff] }
 0x4c4   : > { %v3286_v10 = vadd.f32 %v3117_v33, %v2441_v26  ;;  %v1560_v12 = vadd.f32 %v1559_v36, %v13467_v16  ;;  %v13469_v33 = vld [vmem:[#allocation17_spill] sm:$0xff]  ;;  %v374_v16 = vpack.c.bf16 %v307_v0, %v306_v25 }
 0x4c5   : > { %v3965_v5 = vpop.f32.mrf.mxu0 }
 0x4c6   : > { %8752 = vmatmul.msk.bf16.gmra.mxu1 %vm571_vm2, %v373_v54  ;;  %8816 = vmatmul.msk.bf16.gmra.mxu2 %vm571_vm2, %v1811_v32  ;;  %v11805_v53 = vadd.f32 %v3962_v55, %v3286_v10  ;;  %v8941_v10 = vld [vmem:[%s10316_s28 + $0xf00] sm:$0xff]  ;;  %v8942_v55 = vld [vmem:[%s10316_s28 + $0xf08] sm:$0xff] }
 0x4c7   : > { %9008 = vmatmul.msk.bf16.gmra.mxu3 %vm571_vm2, %v2656_v57  ;;  %v9133_v32 = vld [vmem:[%s10316_s28 + $0x1428] sm:$0xff]  ;;  %v9134_v57 = vld [vmem:[%s10316_s28 + $0x1430] sm:$0xff] }
 0x4c8   : > { %13466 = vst [vmem:[#allocation13_spill] sm:$0xff] %v11805_v53  ;;  %9200 = vmatmul.msk.bf16.gmra.mxu0 %vm571_vm2, %v3501_v52 }
 0x4c9   : > { %v2275_v26 = vpop.f32.mrf.mxu2 }
 0x4ca   : > { %v3120_v27 = vpop.f32.mrf.mxu3  ;;  %v2442_v37 = vadd.f32 %v2275_v26, %v1560_v12  ;;  %v1812_v26 = vpack.c.bf16 %v1745_v6, %v1744_v60 }
 0x4cb   : > { %v1561_v4 = vpop.f32.mrf.mxu1 }
 0x4cc   : > { %v3287_v23 = vadd.f32 %v3120_v27, %v2442_v37  ;;  %v1562_v54 = vadd.f32 %v1561_v4, %v13469_v33  ;;  %v2657_v27 = vpack.c.bf16 %v8942_v55, %v8941_v10  ;;  %v3502_v37 = vpack.c.bf16 %v9134_v57, %v9133_v32  ;;  %v308_v33 = vld [vmem:[%s10316_s28 + $0x4c0] sm:$0xff] }
 0x4cd   : > { %v3967_v28 = vpop.f32.mrf.mxu0  ;;  %v1746_v32 = vld [vmem:[%s10316_s28 + $0x4c1] sm:$0xff] }
 0x4ce   : > { %v11812_v3 = vadd.f32 %v3965_v5, %v3287_v23  ;;  %v13471_v23 = vld [vmem:[#allocation19_spill] sm:$0xff] }
 0x4d0   : > { %13468 = vst [vmem:[#allocation15_spill] sm:$0xff] %v11812_v3 }
 0x4d1   : > { %v2277_v36 = vpop.f32.mrf.mxu2 }
 0x4d2   : > { %v3122_v52 = vpop.f32.mrf.mxu3  ;;  %v2443_v53 = vadd.f32 %v2277_v36, %v1562_v54  ;;  %v309_v54 = vld [vmem:[%s10316_s28 + $0x4c8] sm:$0xff] }
 0x4d3   : > { %v1564_v12 = vpop.f32.mrf.mxu1  ;;  %v1747_v36 = vld [vmem:[%s10316_s28 + $0x4c9] sm:$0xff] }
 0x4d4   : > { %v3288_v24 = vadd.f32 %v3122_v52, %v2443_v53  ;;  %v1565_v25 = vadd.f32 %v1564_v12, %v13471_v23  ;;  %v13473_v52 = vld [vmem:[#allocation21_spill] sm:$0xff]  ;;  %v375_v23 = vpack.c.bf16 %v309_v54, %v308_v33 }
 0x4d5   : > { %v3970_v5 = vpop.f32.mrf.mxu0 }
 0x4d6   : > { %8753 = vmatmul.msk.bf16.gmra.mxu1 %vm571_vm2, %v374_v16  ;;  %8817 = vmatmul.msk.bf16.gmra.mxu2 %vm571_vm2, %v1812_v26  ;;  %v11823_v4 = vadd.f32 %v3967_v28, %v3288_v24  ;;  %v8943_v24 = vld [vmem:[%s10316_s28 + $0xf10] sm:$0xff]  ;;  %v8944_v28 = vld [vmem:[%s10316_s28 + $0xf18] sm:$0xff] }
 0x4d7   : > { %9009 = vmatmul.msk.bf16.gmra.mxu3 %vm571_vm2, %v2657_v27  ;;  %v9135_v26 = vld [vmem:[%s10316_s28 + $0x1438] sm:$0xff]  ;;  %v9136_v27 = vld [vmem:[%s10316_s28 + $0x1440] sm:$0xff] }
 0x4d8   : > { %13470 = vst [vmem:[#allocation17_spill] sm:$0xff] %v11823_v4  ;;  %9201 = vmatmul.msk.bf16.gmra.mxu0 %vm571_vm2, %v3502_v37 }
 0x4d9   : > { %v2280_v53 = vpop.f32.mrf.mxu2 }
 0x4da   : > { %v3125_v0 = vpop.f32.mrf.mxu3  ;;  %v2444_v60 = vadd.f32 %v2280_v53, %v1565_v25  ;;  %v1813_v53 = vpack.c.bf16 %v1747_v36, %v1746_v32 }
 0x4db   : > { %v1566_v6 = vpop.f32.mrf.mxu1 }
 0x4dc   : > { %v3289_v10 = vadd.f32 %v3125_v0, %v2444_v60  ;;  %v1567_v16 = vadd.f32 %v1566_v6, %v13473_v52  ;;  %v2658_v0 = vpack.c.bf16 %v8944_v28, %v8943_v24  ;;  %v3503_v60 = vpack.c.bf16 %v9136_v27, %v9135_v26  ;;  %v310_v52 = vld [vmem:[%s10316_s28 + $0x4d8] sm:$0xff] }
 0x4dd   : > { %v3972_v55 = vpop.f32.mrf.mxu0  ;;  %v1748_v26 = vld [vmem:[%s10316_s28 + $0x4d9] sm:$0xff] }
 0x4de   : > { %v11830_v57 = vadd.f32 %v3970_v5, %v3289_v10  ;;  %v13475_v10 = vld [vmem:[#allocation24_spill] sm:$0xff] }
 0x4e0   : > { %13472 = vst [vmem:[#allocation19_spill] sm:$0xff] %v11830_v57 }
 0x4e1   : > { %v2282_v12 = vpop.f32.mrf.mxu2 }
 0x4e2   : > { %v3127_v37 = vpop.f32.mrf.mxu3  ;;  %v2445_v4 = vadd.f32 %v2282_v12, %v1567_v16  ;;  %v311_v16 = vld [vmem:[%s10316_s28 + $0x4e0] sm:$0xff] }
 0x4e3   : > { %v1569_v25 = vpop.f32.mrf.mxu1  ;;  %v1749_v12 = vld [vmem:[%s10316_s28 + $0x4e1] sm:$0xff] }
 0x4e4   : > { %v3290_v3 = vadd.f32 %v3127_v37, %v2445_v4  ;;  %v1570_v33 = vadd.f32 %v1569_v25, %v13475_v10  ;;  %v13477_v37 = vld [vmem:[#allocation27_spill] sm:$0xff]  ;;  %v376_v10 = vpack.c.bf16 %v311_v16, %v310_v52 }
 0x4e5   : > { %v3975_v5 = vpop.f32.mrf.mxu0 }
 0x4e6   : > { %8754 = vmatmul.msk.bf16.gmra.mxu1 %vm571_vm2, %v375_v23  ;;  %8818 = vmatmul.msk.bf16.gmra.mxu2 %vm571_vm2, %v1813_v53  ;;  %v11841_v6 = vadd.f32 %v3972_v55, %v3290_v3  ;;  %v8945_v3 = vld [vmem:[%s10316_s28 + $0xf28] sm:$0xff]  ;;  %v8946_v55 = vld [vmem:[%s10316_s28 + $0xf30] sm:$0xff] }
 0x4e7   : > { %9010 = vmatmul.msk.bf16.gmra.mxu3 %vm571_vm2, %v2658_v0  ;;  %v9137_v53 = vld [vmem:[%s10316_s28 + $0x1450] sm:$0xff]  ;;  %v9138_v0 = vld [vmem:[%s10316_s28 + $0x1458] sm:$0xff] }
 0x4e8   : > { %13474 = vst [vmem:[#allocation21_spill] sm:$0xff] %v11841_v6  ;;  %9202 = vmatmul.msk.bf16.gmra.mxu0 %vm571_vm2, %v3503_v60 }
 0x4e9   : > { %v2285_v4 = vpop.f32.mrf.mxu2 }
 0x4ea   : > { %v3130_v54 = vpop.f32.mrf.mxu3  ;;  %v2446_v32 = vadd.f32 %v2285_v4, %v1570_v33  ;;  %v1814_v4 = vpack.c.bf16 %v1749_v12, %v1748_v26 }
 0x4eb   : > { %v1571_v36 = vpop.f32.mrf.mxu1 }
 0x4ec   : > { %v3291_v24 = vadd.f32 %v3130_v54, %v2446_v32  ;;  %v1572_v23 = vadd.f32 %v1571_v36, %v13477_v37  ;;  %v2659_v54 = vpack.c.bf16 %v8946_v55, %v8945_v3  ;;  %v3504_v32 = vpack.c.bf16 %v9138_v0, %v9137_v53  ;;  %v312_v37 = vld [vmem:[%s10316_s28 + $0x4e8] sm:$0xff] }
 0x4ed   : > { %v3977_v28 = vpop.f32.mrf.mxu0  ;;  %v1750_v53 = vld [vmem:[%s10316_s28 + $0x4e9] sm:$0xff] }
 0x4ee   : > { %v11848_v27 = vadd.f32 %v3975_v5, %v3291_v24  ;;  %v13479_v24 = vld [vmem:[#allocation30_spill] sm:$0xff] }
 0x4f0   : > { %13476 = vst [vmem:[#allocation24_spill] sm:$0xff] %v11848_v27 }
 0x4f1   : > { %v2287_v25 = vpop.f32.mrf.mxu2 }
 0x4f2   : > { %v3132_v60 = vpop.f32.mrf.mxu3  ;;  %v2447_v6 = vadd.f32 %v2287_v25, %v1572_v23  ;;  %v313_v23 = vld [vmem:[%s10316_s28 + $0x4f0] sm:$0xff] }
 0x4f3   : > { %v1574_v33 = vpop.f32.mrf.mxu1  ;;  %v1751_v25 = vld [vmem:[%s10316_s28 + $0x4f1] sm:$0xff] }
 0x4f4   : > { %v3292_v57 = vadd.f32 %v3132_v60, %v2447_v6  ;;  %v1575_v52 = vadd.f32 %v1574_v33, %v13479_v24  ;;  %v13481_v60 = vld [vmem:[#allocation33_spill] sm:$0xff]  ;;  %v377_v24 = vpack.c.bf16 %v313_v23, %v312_v37 }
 0x4f5   : > { %v3980_v5 = vpop.f32.mrf.mxu0 }
 0x4f6   : > { %8755 = vmatmul.msk.bf16.gmra.mxu1 %vm571_vm2, %v376_v10  ;;  %8819 = vmatmul.msk.bf16.gmra.mxu2 %vm571_vm2, %v1814_v4  ;;  %v11859_v36 = vadd.f32 %v3977_v28, %v3292_v57  ;;  %v8947_v57 = vld [vmem:[%s10316_s28 + $0xf38] sm:$0xff]  ;;  %v8948_v28 = vld [vmem:[%s10316_s28 + $0xf40] sm:$0xff] }
 0x4f7   : > { %9011 = vmatmul.msk.bf16.gmra.mxu3 %vm571_vm2, %v2659_v54  ;;  %v9139_v4 = vld [vmem:[%s10316_s28 + $0x1460] sm:$0xff]  ;;  %v9140_v54 = vld [vmem:[%s10316_s28 + $0x1468] sm:$0xff] }
 0x4f8   : > { %13478 = vst [vmem:[#allocation27_spill] sm:$0xff] %v11859_v36  ;;  %9203 = vmatmul.msk.bf16.gmra.mxu0 %vm571_vm2, %v3504_v32 }
 0x4f9   : > { %v2290_v6 = vpop.f32.mrf.mxu2 }
 0x4fa   : > { %v3135_v16 = vpop.f32.mrf.mxu3  ;;  %v2448_v26 = vadd.f32 %v2290_v6, %v1575_v52  ;;  %v1815_v6 = vpack.c.bf16 %v1751_v25, %v1750_v53 }
 0x4fb   : > { %v1576_v12 = vpop.f32.mrf.mxu1 }
 0x4fc   : > { %v3293_v3 = vadd.f32 %v3135_v16, %v2448_v26  ;;  %v1577_v10 = vadd.f32 %v1576_v12, %v13481_v60  ;;  %v2660_v16 = vpack.c.bf16 %v8948_v28, %v8947_v57  ;;  %v3505_v26 = vpack.c.bf16 %v9140_v54, %v9139_v4  ;;  %v9205_v60 = vld [vmem:[%s10316_s28 + $0xa51] sm:$0xff]  ;;  %v9397_v4 = vld [vmem:[%s10316_s28 + $0x28] sm:$0xff] }
 0x4fd   : > { %v3982_v55 = vpop.f32.mrf.mxu0 }
 0x4fe   : > { %v11866_v0 = vadd.f32 %v3980_v5, %v3293_v3  ;;  %v13483_v3 = vld [vmem:[#allocation36_spill] sm:$0xff] }
 0x500   : > { %13480 = vst [vmem:[#allocation30_spill] sm:$0xff] %v11866_v0 }
 0x501   : > { %v2292_v33 = vpop.f32.mrf.mxu2 }
 0x502   : > { %v3137_v32 = vpop.f32.mrf.mxu3  ;;  %v2449_v36 = vadd.f32 %v2292_v33, %v1577_v10  ;;  %v9206_v10 = vld [vmem:[%s10316_s28 + $0xa59] sm:$0xff]  ;;  %v9398_v33 = vld [vmem:[%s10316_s28 + $0x30] sm:$0xff] }
 0x503   : > { %v1579_v52 = vpop.f32.mrf.mxu1 }
 0x504   : > { %v3294_v27 = vadd.f32 %v3137_v32, %v2449_v36  ;;  %v1580_v37 = vadd.f32 %v1579_v52, %v13483_v3  ;;  %v13485_v32 = vld [vmem:[#allocation39_spill] sm:$0xff]  ;;  %v4286_v3 = vpack.c.bf16 %v9206_v10, %v9205_v60 }
 0x505   : > { %v3985_v5 = vpop.f32.mrf.mxu0 }
 0x506   : > { %8756 = vmatmul.msk.bf16.gmra.mxu1 %vm571_vm2, %v377_v24  ;;  %8820 = vmatmul.msk.bf16.gmra.mxu2 %vm571_vm2, %v1815_v6  ;;  %v11877_v12 = vadd.f32 %v3982_v55, %v3294_v27  ;;  %v9589_v27 = vld [vmem:[%s10316_s28 + $0x550] sm:$0xff]  ;;  %v9590_v55 = vld [vmem:[%s10316_s28 + $0x558] sm:$0xff] }
 0x507   : > { %9012 = vmatmul.msk.bf16.gmra.mxu3 %vm571_vm2, %v2660_v16  ;;  %v9781_v6 = vld [vmem:[%s10316_s28 + $0x29] sm:$0xff]  ;;  %v9782_v16 = vld [vmem:[%s10316_s28 + $0x31] sm:$0xff] }
 0x508   : > { %13482 = vst [vmem:[#allocation33_spill] sm:$0xff] %v11877_v12  ;;  %9204 = vmatmul.msk.bf16.gmra.mxu0 %vm571_vm2, %v3505_v26 }
 0x509   : > { %v2295_v36 = vpop.f32.mrf.mxu2 }
 0x50a   : > { %v3140_v23 = vpop.f32.mrf.mxu3  ;;  %v2450_v53 = vadd.f32 %v2295_v36, %v1580_v37  ;;  %v5131_v36 = vpack.c.bf16 %v9398_v33, %v9397_v4 }
 0x50b   : > { %v1581_v25 = vpop.f32.mrf.mxu1 }
 0x50c   : > { %v3295_v57 = vadd.f32 %v3140_v23, %v2450_v53  ;;  %v1582_v24 = vadd.f32 %v1581_v25, %v13485_v32  ;;  %v5976_v23 = vpack.c.bf16 %v9590_v55, %v9589_v27  ;;  %v6820_v53 = vpack.c.bf16 %v9782_v16, %v9781_v6  ;;  %v9207_v32 = vld [vmem:[%s10316_s28 + $0xa61] sm:$0xff]  ;;  %v9399_v6 = vld [vmem:[%s10316_s28 + $0x38] sm:$0xff] }
 0x50d   : > { %v3987_v28 = vpop.f32.mrf.mxu0 }
 0x50e   : > { %v11884_v54 = vadd.f32 %v3985_v5, %v3295_v57  ;;  %v13487_v57 = vld [vmem:[#allocation42_spill] sm:$0xff] }
 0x510   : > { %13484 = vst [vmem:[#allocation36_spill] sm:$0xff] %v11884_v54 }
 0x511   : > { %v2297_v52 = vpop.f32.mrf.mxu2 }
 0x512   : > { %v3142_v26 = vpop.f32.mrf.mxu3  ;;  %v2451_v12 = vadd.f32 %v2297_v52, %v1582_v24  ;;  %v9208_v24 = vld [vmem:[%s10316_s28 + $0xa69] sm:$0xff]  ;;  %v9400_v52 = vld [vmem:[%s10316_s28 + $0x40] sm:$0xff] }
 0x513   : > { %v1584_v37 = vpop.f32.mrf.mxu1 }
 0x514   : > { %v3296_v0 = vadd.f32 %v3142_v26, %v2451_v12  ;;  %v1585_v60 = vadd.f32 %v1584_v37, %v13487_v57  ;;  %v13489_v26 = vld [vmem:[#allocation45_spill] sm:$0xff]  ;;  %v4287_v57 = vpack.c.bf16 %v9208_v24, %v9207_v32 }
 0x515   : > { %v3990_v5 = vpop.f32.mrf.mxu0 }
 0x516   : > { %9333 = vmatmul.msk.bf16.vlgmr.msra.gmra.mxu1 %vm571_vm2, %v4286_v3  ;;  %9525 = vmatmul.msk.bf16.vlgmr.msra.gmra.mxu2 %vm571_vm2, %v5131_v36  ;;  %v11895_v25 = vadd.f32 %v3987_v28, %v3296_v0  ;;  %v9591_v0 = vld [vmem:[%s10316_s28 + $0x560] sm:$0xff]  ;;  %v9592_v28 = vld [vmem:[%s10316_s28 + $0x568] sm:$0xff] }
 0x517   : > { %9717 = vmatmul.msk.bf16.vlgmr.msra.gmra.mxu3 %vm571_vm2, %v5976_v23  ;;  %v9783_v36 = vld [vmem:[%s10316_s28 + $0x39] sm:$0xff]  ;;  %v9784_v23 = vld [vmem:[%s10316_s28 + $0x41] sm:$0xff] }
 0x518   : > { %13486 = vst [vmem:[#allocation39_spill] sm:$0xff] %v11895_v25  ;;  %9909 = vmatmul.msk.bf16.vlgmr.msra.gmra.mxu0 %vm571_vm2, %v6820_v53 }
 0x519   : > { %v2300_v12 = vpop.f32.mrf.mxu2 }
 0x51a   : > { %v3145_v10 = vpop.f32.mrf.mxu3  ;;  %v2452_v4 = vadd.f32 %v2300_v12, %v1585_v60  ;;  %v5132_v12 = vpack.c.bf16 %v9400_v52, %v9399_v6 }
 0x51b   : > { %v1586_v33 = vpop.f32.mrf.mxu1 }
 0x51c   : > { %v3297_v27 = vadd.f32 %v3145_v10, %v2452_v4  ;;  %v1587_v3 = vadd.f32 %v1586_v33, %v13489_v26  ;;  %v5977_v10 = vpack.c.bf16 %v9592_v28, %v9591_v0  ;;  %v6821_v4 = vpack.c.bf16 %v9784_v23, %v9783_v36  ;;  %v9209_v26 = vld [vmem:[%s10316_s28 + $0xa79] sm:$0xff]  ;;  %v9401_v36 = vld [vmem:[%s10316_s28 + $0x50] sm:$0xff] }
 0x51d   : > { %v3992_v55 = vpop.f32.mrf.mxu0 }
 0x51e   : > { %v11902_v16 = vadd.f32 %v3990_v5, %v3297_v27  ;;  %v13491_v27 = vld [vmem:[#allocation48_spill] sm:$0xff] }
 0x520   : > { %13488 = vst [vmem:[#allocation42_spill] sm:$0xff] %v11902_v16 }
 0x521   : > { %v2302_v37 = vpop.f32.mrf.mxu2 }
 0x522   : > { %v3147_v53 = vpop.f32.mrf.mxu3  ;;  %v2453_v25 = vadd.f32 %v2302_v37, %v1587_v3  ;;  %v9210_v3 = vld [vmem:[%s10316_s28 + $0xa81] sm:$0xff]  ;;  %v9402_v37 = vld [vmem:[%s10316_s28 + $0x58] sm:$0xff] }
 0x523   : > { %v1589_v60 = vpop.f32.mrf.mxu1 }
 0x524   : > { %v3298_v54 = vadd.f32 %v3147_v53, %v2453_v25  ;;  %v1590_v32 = vadd.f32 %v1589_v60, %v13491_v27  ;;  %v13493_v53 = vld [vmem:[#allocation51_spill] sm:$0xff]  ;;  %v4288_v27 = vpack.c.bf16 %v9210_v3, %v9209_v26 }
 0x525   : > { %v3995_v5 = vpop.f32.mrf.mxu0 }
 0x526   : > { %9334 = vmatmul.msk.bf16.gmra.mxu1 %vm571_vm2, %v4287_v57  ;;  %9526 = vmatmul.msk.bf16.gmra.mxu2 %vm571_vm2, %v5132_v12  ;;  %v11913_v33 = vadd.f32 %v3992_v55, %v3298_v54  ;;  %v9593_v54 = vld [vmem:[%s10316_s28 + $0x578] sm:$0xff]  ;;  %v9594_v55 = vld [vmem:[%s10316_s28 + $0x580] sm:$0xff] }
 0x527   : > { %9718 = vmatmul.msk.bf16.gmra.mxu3 %vm571_vm2, %v5977_v10  ;;  %v9785_v12 = vld [vmem:[%s10316_s28 + $0x51] sm:$0xff]  ;;  %v9786_v10 = vld [vmem:[%s10316_s28 + $0x59] sm:$0xff] }
 0x528   : > { %13490 = vst [vmem:[#allocation45_spill] sm:$0xff] %v11913_v33  ;;  %9910 = vmatmul.msk.bf16.gmra.mxu0 %vm571_vm2, %v6821_v4 }
 0x529   : > { %v2305_v25 = vpop.f32.mrf.mxu2 }
 0x52a   : > { %v3150_v24 = vpop.f32.mrf.mxu3  ;;  %v2454_v6 = vadd.f32 %v2305_v25, %v1590_v32  ;;  %v5133_v25 = vpack.c.bf16 %v9402_v37, %v9401_v36 }
 0x52b   : > { %v1591_v52 = vpop.f32.mrf.mxu1 }
 0x52c   : > { %v3299_v0 = vadd.f32 %v3150_v24, %v2454_v6  ;;  %v1592_v57 = vadd.f32 %v1591_v52, %v13493_v53  ;;  %v5978_v24 = vpack.c.bf16 %v9594_v55, %v9593_v54  ;;  %v6822_v6 = vpack.c.bf16 %v9786_v10, %v9785_v12  ;;  %v9211_v53 = vld [vmem:[%s10316_s28 + $0xa89] sm:$0xff]  ;;  %v9403_v12 = vld [vmem:[%s10316_s28 + $0x60] sm:$0xff] }
 0x52d   : > { %v3997_v28 = vpop.f32.mrf.mxu0 }
 0x52e   : > { %v11920_v23 = vadd.f32 %v3995_v5, %v3299_v0  ;;  %v13495_v0 = vld [vmem:[#allocation54_spill] sm:$0xff] }
 0x530   : > { %13492 = vst [vmem:[#allocation48_spill] sm:$0xff] %v11920_v23 }
 0x531   : > { %v2307_v60 = vpop.f32.mrf.mxu2 }
 0x532   : > { %v3152_v4 = vpop.f32.mrf.mxu3  ;;  %v2455_v33 = vadd.f32 %v2307_v60, %v1592_v57  ;;  %v9212_v57 = vld [vmem:[%s10316_s28 + $0xa91] sm:$0xff]  ;;  %v9404_v60 = vld [vmem:[%s10316_s28 + $0x68] sm:$0xff] }
 0x533   : > { %v1594_v32 = vpop.f32.mrf.mxu1 }
 0x534   : > { %v3300_v16 = vadd.f32 %v3152_v4, %v2455_v33  ;;  %v1595_v26 = vadd.f32 %v1594_v32, %v13495_v0  ;;  %v13497_v4 = vld [vmem:[#allocation57_spill] sm:$0xff]  ;;  %v4289_v0 = vpack.c.bf16 %v9212_v57, %v9211_v53 }
 0x535   : > { %v4000_v5 = vpop.f32.mrf.mxu0 }
 0x536   : > { %9335 = vmatmul.msk.bf16.gmra.mxu1 %vm571_vm2, %v4288_v27  ;;  %9527 = vmatmul.msk.bf16.gmra.mxu2 %vm571_vm2, %v5133_v25  ;;  %v11931_v52 = vadd.f32 %v3997_v28, %v3300_v16  ;;  %v9595_v16 = vld [vmem:[%s10316_s28 + $0x588] sm:$0xff]  ;;  %v9596_v28 = vld [vmem:[%s10316_s28 + $0x590] sm:$0xff] }
 0x537   : > { %9719 = vmatmul.msk.bf16.gmra.mxu3 %vm571_vm2, %v5978_v24  ;;  %v9787_v25 = vld [vmem:[%s10316_s28 + $0x61] sm:$0xff]  ;;  %v9788_v24 = vld [vmem:[%s10316_s28 + $0x69] sm:$0xff] }
 0x538   : > { %13494 = vst [vmem:[#allocation51_spill] sm:$0xff] %v11931_v52  ;;  %9911 = vmatmul.msk.bf16.gmra.mxu0 %vm571_vm2, %v6822_v6 }
 0x539   : > { %v2310_v33 = vpop.f32.mrf.mxu2 }
 0x53a   : > { %v3155_v3 = vpop.f32.mrf.mxu3  ;;  %v2456_v36 = vadd.f32 %v2310_v33, %v1595_v26  ;;  %v5134_v33 = vpack.c.bf16 %v9404_v60, %v9403_v12 }
 0x53b   : > { %v1596_v37 = vpop.f32.mrf.mxu1 }
 0x53c   : > { %v3301_v54 = vadd.f32 %v3155_v3, %v2456_v36  ;;  %v1597_v27 = vadd.f32 %v1596_v37, %v13497_v4  ;;  %v5979_v3 = vpack.c.bf16 %v9596_v28, %v9595_v16  ;;  %v6823_v36 = vpack.c.bf16 %v9788_v24, %v9787_v25  ;;  %v9213_v4 = vld [vmem:[%s10316_s28 + $0xaa1] sm:$0xff]  ;;  %v9405_v25 = vld [vmem:[%s10316_s28 + $0x78] sm:$0xff] }
 0x53d   : > { %v4002_v55 = vpop.f32.mrf.mxu0 }
 0x53e   : > { %v11938_v10 = vadd.f32 %v4000_v5, %v3301_v54  ;;  %v13499_v54 = vld [vmem:[#allocation60_spill] sm:$0xff] }
 0x540   : > { %13496 = vst [vmem:[#allocation54_spill] sm:$0xff] %v11938_v10 }
 0x541   : > { %v2312_v32 = vpop.f32.mrf.mxu2 }
 0x542   : > { %v3157_v6 = vpop.f32.mrf.mxu3  ;;  %v2457_v52 = vadd.f32 %v2312_v32, %v1597_v27  ;;  %v9214_v27 = vld [vmem:[%s10316_s28 + $0xaa9] sm:$0xff]  ;;  %v9406_v32 = vld [vmem:[%s10316_s28 + $0x80] sm:$0xff] }
 0x543   : > { %v1599_v26 = vpop.f32.mrf.mxu1 }
 0x544   : > { %v3302_v23 = vadd.f32 %v3157_v6, %v2457_v52  ;;  %v1600_v53 = vadd.f32 %v1599_v26, %v13499_v54  ;;  %v13501_v6 = vld [vmem:[#allocation63_spill] sm:$0xff]  ;;  %v4290_v54 = vpack.c.bf16 %v9214_v27, %v9213_v4 }
 0x545   : > { %v4005_v5 = vpop.f32.mrf.mxu0 }
 0x546   : > { %9336 = vmatmul.msk.bf16.gmra.mxu1 %vm571_vm2, %v4289_v0  ;;  %9528 = vmatmul.msk.bf16.gmra.mxu2 %vm571_vm2, %v5134_v33  ;;  %v11949_v37 = vadd.f32 %v4002_v55, %v3302_v23  ;;  %v9597_v23 = vld [vmem:[%s10316_s28 + $0x5a0] sm:$0xff]  ;;  %v9598_v55 = vld [vmem:[%s10316_s28 + $0x5a8] sm:$0xff] }
 0x547   : > { %9720 = vmatmul.msk.bf16.gmra.mxu3 %vm571_vm2, %v5979_v3  ;;  %v9789_v33 = vld [vmem:[%s10316_s28 + $0x79] sm:$0xff]  ;;  %v9790_v3 = vld [vmem:[%s10316_s28 + $0x81] sm:$0xff] }
 0x548   : > { %13498 = vst [vmem:[#allocation57_spill] sm:$0xff] %v11949_v37  ;;  %9912 = vmatmul.msk.bf16.gmra.mxu0 %vm571_vm2, %v6823_v36 }
 0x549   : > { %v2315_v52 = vpop.f32.mrf.mxu2 }
 0x54a   : > { %v3160_v57 = vpop.f32.mrf.mxu3  ;;  %v2458_v12 = vadd.f32 %v2315_v52, %v1600_v53  ;;  %v5135_v52 = vpack.c.bf16 %v9406_v32, %v9405_v25 }
 0x54b   : > { %v1601_v60 = vpop.f32.mrf.mxu1 }
 0x54c   : > { %v3303_v16 = vadd.f32 %v3160_v57, %v2458_v12  ;;  %v1602_v0 = vadd.f32 %v1601_v60, %v13501_v6  ;;  %v5980_v57 = vpack.c.bf16 %v9598_v55, %v9597_v23  ;;  %v6824_v12 = vpack.c.bf16 %v9790_v3, %v9789_v33  ;;  %v9215_v6 = vld [vmem:[%s10316_s28 + $0xab1] sm:$0xff]  ;;  %v9407_v33 = vld [vmem:[%s10316_s28 + $0x88] sm:$0xff] }
 0x54d   : > { %v4007_v28 = vpop.f32.mrf.mxu0 }
 0x54e   : > { %v11956_v24 = vadd.f32 %v4005_v5, %v3303_v16  ;;  %v13503_v16 = vld [vmem:[#allocation66_spill] sm:$0xff] }
 0x550   : > { %13500 = vst [vmem:[#allocation60_spill] sm:$0xff] %v11956_v24 }
 0x551   : > { %v2317_v26 = vpop.f32.mrf.mxu2 }
 0x552   : > { %v3162_v36 = vpop.f32.mrf.mxu3  ;;  %v2459_v37 = vadd.f32 %v2317_v26, %v1602_v0  ;;  %v9216_v0 = vld [vmem:[%s10316_s28 + $0xab9] sm:$0xff]  ;;  %v9408_v26 = vld [vmem:[%s10316_s28 + $0x90] sm:$0xff] }
 0x553   : > { %v1604_v53 = vpop.f32.mrf.mxu1 }
 0x554   : > { %v3304_v10 = vadd.f32 %v3162_v36, %v2459_v37  ;;  %v1605_v4 = vadd.f32 %v1604_v53, %v13503_v16  ;;  %v13505_v36 = vld [vmem:[#allocation69_spill] sm:$0xff]  ;;  %v4291_v16 = vpack.c.bf16 %v9216_v0, %v9215_v6 }
 0x555   : > { %v4010_v5 = vpop.f32.mrf.mxu0 }
 0x556   : > { %9337 = vmatmul.msk.bf16.gmra.mxu1 %vm571_vm2, %v4290_v54  ;;  %9529 = vmatmul.msk.bf16.gmra.mxu2 %vm571_vm2, %v5135_v52  ;;  %v11967_v60 = vadd.f32 %v4007_v28, %v3304_v10  ;;  %v9599_v10 = vld [vmem:[%s10316_s28 + $0x5b0] sm:$0xff]  ;;  %v9600_v28 = vld [vmem:[%s10316_s28 + $0x5b8] sm:$0xff] }
 0x557   : > { %9721 = vmatmul.msk.bf16.gmra.mxu3 %vm571_vm2, %v5980_v57  ;;  %v9791_v52 = vld [vmem:[%s10316_s28 + $0x89] sm:$0xff]  ;;  %v9792_v57 = vld [vmem:[%s10316_s28 + $0x91] sm:$0xff] }
 0x558   : > { %13502 = vst [vmem:[#allocation63_spill] sm:$0xff] %v11967_v60  ;;  %9913 = vmatmul.msk.bf16.gmra.mxu0 %vm571_vm2, %v6824_v12 }
 0x559   : > { %v2320_v37 = vpop.f32.mrf.mxu2 }
 0x55a   : > { %v3165_v27 = vpop.f32.mrf.mxu3  ;;  %v2460_v25 = vadd.f32 %v2320_v37, %v1605_v4  ;;  %v5136_v37 = vpack.c.bf16 %v9408_v26, %v9407_v33 }
 0x55b   : > { %v1606_v32 = vpop.f32.mrf.mxu1 }
 0x55c   : > { %v3305_v23 = vadd.f32 %v3165_v27, %v2460_v25  ;;  %v1607_v54 = vadd.f32 %v1606_v32, %v13505_v36  ;;  %v5981_v27 = vpack.c.bf16 %v9600_v28, %v9599_v10  ;;  %v6825_v25 = vpack.c.bf16 %v9792_v57, %v9791_v52  ;;  %v9217_v36 = vld [vmem:[%s10316_s28 + $0xac9] sm:$0xff]  ;;  %v9409_v52 = vld [vmem:[%s10316_s28 + $0xa0] sm:$0xff] }
 0x55d   : > { %v4012_v55 = vpop.f32.mrf.mxu0 }
 0x55e   : > { %v11974_v3 = vadd.f32 %v4010_v5, %v3305_v23  ;;  %v13507_v23 = vld [vmem:[#allocation72_spill] sm:$0xff] }
 0x560   : > { %13504 = vst [vmem:[#allocation66_spill] sm:$0xff] %v11974_v3 }
 0x561   : > { %v2322_v53 = vpop.f32.mrf.mxu2 }
 0x562   : > { %v3167_v12 = vpop.f32.mrf.mxu3  ;;  %v2461_v60 = vadd.f32 %v2322_v53, %v1607_v54  ;;  %v9218_v54 = vld [vmem:[%s10316_s28 + $0xad1] sm:$0xff]  ;;  %v9410_v53 = vld [vmem:[%s10316_s28 + $0xa8] sm:$0xff] }
 0x563   : > { %v1609_v4 = vpop.f32.mrf.mxu1 }
 0x564   : > { %v3306_v24 = vadd.f32 %v3167_v12, %v2461_v60  ;;  %v1610_v6 = vadd.f32 %v1609_v4, %v13507_v23  ;;  %v13509_v12 = vld [vmem:[#allocation75_spill] sm:$0xff]  ;;  %v4292_v23 = vpack.c.bf16 %v9218_v54, %v9217_v36 }
 0x565   : > { %v4015_v5 = vpop.f32.mrf.mxu0 }
 0x566   : > { %9338 = vmatmul.msk.bf16.gmra.mxu1 %vm571_vm2, %v4291_v16  ;;  %9530 = vmatmul.msk.bf16.gmra.mxu2 %vm571_vm2, %v5136_v37  ;;  %v11985_v32 = vadd.f32 %v4012_v55, %v3306_v24  ;;  %v9601_v24 = vld [vmem:[%s10316_s28 + $0x5c8] sm:$0xff]  ;;  %v9602_v55 = vld [vmem:[%s10316_s28 + $0x5d0] sm:$0xff] }
 0x567   : > { %9722 = vmatmul.msk.bf16.gmra.mxu3 %vm571_vm2, %v5981_v27  ;;  %v9793_v37 = vld [vmem:[%s10316_s28 + $0xa1] sm:$0xff]  ;;  %v9794_v27 = vld [vmem:[%s10316_s28 + $0xa9] sm:$0xff] }
 0x568   : > { %13506 = vst [vmem:[#allocation69_spill] sm:$0xff] %v11985_v32  ;;  %9914 = vmatmul.msk.bf16.gmra.mxu0 %vm571_vm2, %v6825_v25 }
 0x569   : > { %v2325_v60 = vpop.f32.mrf.mxu2 }
 0x56a   : > { %v3170_v0 = vpop.f32.mrf.mxu3  ;;  %v2462_v33 = vadd.f32 %v2325_v60, %v1610_v6  ;;  %v5137_v60 = vpack.c.bf16 %v9410_v53, %v9409_v52 }
 0x56b   : > { %v1611_v26 = vpop.f32.mrf.mxu1 }
 0x56c   : > { %v3307_v10 = vadd.f32 %v3170_v0, %v2462_v33  ;;  %v1612_v16 = vadd.f32 %v1611_v26, %v13509_v12  ;;  %v5982_v0 = vpack.c.bf16 %v9602_v55, %v9601_v24  ;;  %v6826_v33 = vpack.c.bf16 %v9794_v27, %v9793_v37  ;;  %v9219_v12 = vld [vmem:[%s10316_s28 + $0xad9] sm:$0xff]  ;;  %v9411_v37 = vld [vmem:[%s10316_s28 + $0xb0] sm:$0xff] }
 0x56d   : > { %v4017_v28 = vpop.f32.mrf.mxu0 }
 0x56e   : > { %v11992_v57 = vadd.f32 %v4015_v5, %v3307_v10  ;;  %v13511_v10 = vld [vmem:[#allocation78_spill] sm:$0xff] }
 0x570   : > { %13508 = vst [vmem:[#allocation72_spill] sm:$0xff] %v11992_v57 }
 0x571   : > { %v2327_v4 = vpop.f32.mrf.mxu2 }
 0x572   : > { %v3172_v25 = vpop.f32.mrf.mxu3  ;;  %v2463_v32 = vadd.f32 %v2327_v4, %v1612_v16  ;;  %v9220_v16 = vld [vmem:[%s10316_s28 + $0xae1] sm:$0xff]  ;;  %v9412_v4 = vld [vmem:[%s10316_s28 + $0xb8] sm:$0xff] }
 0x573   : > { %v1614_v6 = vpop.f32.mrf.mxu1 }
 0x574   : > { %v3308_v3 = vadd.f32 %v3172_v25, %v2463_v32  ;;  %v1615_v36 = vadd.f32 %v1614_v6, %v13511_v10  ;;  %v13513_v25 = vld [vmem:[#allocation81_spill] sm:$0xff]  ;;  %v4293_v10 = vpack.c.bf16 %v9220_v16, %v9219_v12 }
 0x575   : > { %v4020_v5 = vpop.f32.mrf.mxu0 }
 0x576   : > { %9339 = vmatmul.msk.bf16.gmra.mxu1 %vm571_vm2, %v4292_v23  ;;  %9531 = vmatmul.msk.bf16.gmra.mxu2 %vm571_vm2, %v5137_v60  ;;  %v12003_v26 = vadd.f32 %v4017_v28, %v3308_v3  ;;  %v9603_v3 = vld [vmem:[%s10316_s28 + $0x5d8] sm:$0xff]  ;;  %v9604_v28 = vld [vmem:[%s10316_s28 + $0x5e0] sm:$0xff] }
 0x577   : > { %9723 = vmatmul.msk.bf16.gmra.mxu3 %vm571_vm2, %v5982_v0  ;;  %v9795_v60 = vld [vmem:[%s10316_s28 + $0xb1] sm:$0xff]  ;;  %v9796_v0 = vld [vmem:[%s10316_s28 + $0xb9] sm:$0xff] }
 0x578   : > { %13510 = vst [vmem:[#allocation75_spill] sm:$0xff] %v12003_v26  ;;  %9915 = vmatmul.msk.bf16.gmra.mxu0 %vm571_vm2, %v6826_v33 }
 0x579   : > { %v2330_v32 = vpop.f32.mrf.mxu2 }
 0x57a   : > { %v3175_v54 = vpop.f32.mrf.mxu3  ;;  %v2464_v52 = vadd.f32 %v2330_v32, %v1615_v36  ;;  %v5138_v32 = vpack.c.bf16 %v9412_v4, %v9411_v37 }
 0x57b   : > { %v1616_v53 = vpop.f32.mrf.mxu1 }
 0x57c   : > { %v3309_v24 = vadd.f32 %v3175_v54, %v2464_v52  ;;  %v1617_v23 = vadd.f32 %v1616_v53, %v13513_v25  ;;  %v5983_v54 = vpack.c.bf16 %v9604_v28, %v9603_v3  ;;  %v6827_v52 = vpack.c.bf16 %v9796_v0, %v9795_v60  ;;  %v9221_v25 = vld [vmem:[%s10316_s28 + $0xaf1] sm:$0xff]  ;;  %v9413_v60 = vld [vmem:[%s10316_s28 + $0xc8] sm:$0xff] }
 0x57d   : > { %v4022_v55 = vpop.f32.mrf.mxu0 }
 0x57e   : > { %v12010_v27 = vadd.f32 %v4020_v5, %v3309_v24  ;;  %v13515_v24 = vld [vmem:[#allocation84_spill] sm:$0xff] }
 0x580   : > { %13512 = vst [vmem:[#allocation78_spill] sm:$0xff] %v12010_v27 }
 0x581   : > { %v2332_v6 = vpop.f32.mrf.mxu2 }
 0x582   : > { %v3177_v33 = vpop.f32.mrf.mxu3  ;;  %v2465_v26 = vadd.f32 %v2332_v6, %v1617_v23  ;;  %v9222_v23 = vld [vmem:[%s10316_s28 + $0xaf9] sm:$0xff]  ;;  %v9414_v6 = vld [vmem:[%s10316_s28 + $0xd0] sm:$0xff] }
 0x583   : > { %v1619_v36 = vpop.f32.mrf.mxu1 }
 0x584   : > { %v3310_v57 = vadd.f32 %v3177_v33, %v2465_v26  ;;  %v1620_v12 = vadd.f32 %v1619_v36, %v13515_v24  ;;  %v13517_v33 = vld [vmem:[#allocation87_spill] sm:$0xff]  ;;  %v4294_v24 = vpack.c.bf16 %v9222_v23, %v9221_v25 }
 0x585   : > { %v4025_v5 = vpop.f32.mrf.mxu0 }
 0x586   : > { %9340 = vmatmul.msk.bf16.gmra.mxu1 %vm571_vm2, %v4293_v10  ;;  %9532 = vmatmul.msk.bf16.gmra.mxu2 %vm571_vm2, %v5138_v32  ;;  %v12021_v53 = vadd.f32 %v4022_v55, %v3310_v57  ;;  %v9605_v57 = vld [vmem:[%s10316_s28 + $0x5f0] sm:$0xff]  ;;  %v9606_v55 = vld [vmem:[%s10316_s28 + $0x5f8] sm:$0xff] }
 0x587   : > { %9724 = vmatmul.msk.bf16.gmra.mxu3 %vm571_vm2, %v5983_v54  ;;  %v9797_v32 = vld [vmem:[%s10316_s28 + $0xc9] sm:$0xff]  ;;  %v9798_v54 = vld [vmem:[%s10316_s28 + $0xd1] sm:$0xff] }
 0x588   : > { %13514 = vst [vmem:[#allocation81_spill] sm:$0xff] %v12021_v53  ;;  %9916 = vmatmul.msk.bf16.gmra.mxu0 %vm571_vm2, %v6827_v52 }
 0x589   : > { %v2335_v26 = vpop.f32.mrf.mxu2 }
 0x58a   : > { %v3180_v16 = vpop.f32.mrf.mxu3  ;;  %v2466_v37 = vadd.f32 %v2335_v26, %v1620_v12  ;;  %v5139_v26 = vpack.c.bf16 %v9414_v6, %v9413_v60  ;;  %v12046_v6 = vld [vmem:[%s13256_s2] ss:$0 sm:$0xff] }
 0x58b   : > { %v1621_v4 = vpop.f32.mrf.mxu1 }
 0x58c   : > { %v3311_v3 = vadd.f32 %v3180_v16, %v2466_v37  ;;  %v1622_v10 = vadd.f32 %v1621_v4, %v13517_v33  ;;  %v5984_v16 = vpack.c.bf16 %v9606_v55, %v9605_v57  ;;  %v6828_v37 = vpack.c.bf16 %v9798_v54, %v9797_v32  ;;  %v9224_v55 = vld [vmem:[%s10316_s28 + $0xb09] sm:$0xff]  ;;  %v9415_v33 = vld [vmem:[%s10316_s28 + $0xd8] sm:$0xff] }
 0x58d   : > { %v4027_v28 = vpop.f32.mrf.mxu0  ;;  %v9608_v32 = vld [vmem:[%s10316_s28 + $0x608] sm:$0xff] }
 0x58e   : > { %v12028_v0 = vadd.f32 %v4025_v5, %v3311_v3 }
 0x590   : > { %13516 = vst [vmem:[#allocation84_spill] sm:$0xff] %v12028_v0 }
 0x591   : > { %v2337_v36 = vpop.f32.mrf.mxu2 }
 0x592   : > { %v3182_v52 = vpop.f32.mrf.mxu3  ;;  %v2467_v53 = vadd.f32 %v2337_v36, %v1622_v10  ;;  %v9416_v10 = vld [vmem:[%s10316_s28 + $0xe0] sm:$0xff] }
 0x593   : > { %v4554_v12 = vpop.f32.mrf.mxu1 }
 0x594   : > { %v3312_v27 = vadd.f32 %v3182_v52, %v2467_v53  ;;  %v4874_v4 = vadd.f32 %v4554_v12, %v10894_v61  ;;  %v9607_v61 = vld [vmem:[%s10316_s28 + $0x600] sm:$0xff] }
 0x595   : > { %v7088_v1 = vpop.f32.mrf.mxu0  ;;  %v9799_v52 = vld [vmem:[%s10316_s28 + $0xd9] sm:$0xff] }
 0x596   : > { %9341 = vmatmul.msk.bf16.gmra.mxu1 %vm571_vm2, %v4294_v24  ;;  %9533 = vmatmul.msk.bf16.gmra.mxu2 %vm571_vm2, %v5139_v26  ;;  %v12039_v5 = vadd.f32 %v4027_v28, %v3312_v27  ;;  %v9223_v28 = vld [vmem:[%s10316_s28 + $0xb01] sm:$0xff] }
 0x597   : > { %9725 = vmatmul.msk.bf16.gmra.mxu3 %vm571_vm2, %v5984_v16  ;;  %v9800_v24 = vld [vmem:[%s10316_s28 + $0xe1] sm:$0xff]  ;;  %v4295_v16 = vpack.c.bf16 %v9224_v55, %v9223_v28 }
 0x598   : > { %13518 = vst [vmem:[#allocation87_spill] sm:$0xff] %v12039_v5  ;;  %9917 = vmatmul.msk.bf16.gmra.mxu0 %vm571_vm2, %v6828_v37 }
 0x599   : > { %v5399_v53 = vpop.f32.mrf.mxu2 }
 0x59a   : > { %v6244_v3 = vpop.f32.mrf.mxu3  ;;  %v5719_v25 = vadd.f32 %v5399_v53, %v4874_v4  ;;  %v5140_v53 = vpack.c.bf16 %v9416_v10, %v9415_v33 }
 0x59b   : > { %v4556_v23 = vpop.f32.mrf.mxu1 }
 0x59c   : > { %v6564_v60 = vadd.f32 %v6244_v3, %v5719_v25  ;;  %v4875_v36 = vadd.f32 %v4556_v23, %v10905_v63  ;;  %v5985_v3 = vpack.c.bf16 %v9608_v32, %v9607_v61  ;;  %v6829_v25 = vpack.c.bf16 %v9800_v24, %v9799_v52 }
 0x59d   : > { %v7090_v57 = vpop.f32.mrf.mxu0 }
 0x59e   : > { %v7408_v27 = vadd.f32 %v7088_v1, %v6564_v60 }
 0x5a0   : > { %v7540_v54 = vadd.f32 %v12046_v6, %v7408_v27 }
 0x5a1   : > { %v5401_v12 = vpop.f32.mrf.mxu2 }
 0x5a2   : > { %v6246_v26 = vpop.f32.mrf.mxu3  ;;  %v7668_v37 = vmul.f32 0.5, %v7540_v54  ;;  %v5720_v4 = vadd.f32 %v5401_v12, %v4875_v36  ;;  %v9225_v12 = vld [vmem:[%s10316_s28 + $0xb19] sm:$0xff] }
 0x5a3   : > { %v4559_v1 = vpop.f32.mrf.mxu1 }
 0x5a4   : > { %9990 = vtanh.f32 %v7668_v37  ;;  %v6565_v60 = vadd.f32 %v6246_v26, %v5720_v4  ;;  %v4876_v23 = vadd.f32 %v4559_v1, %v10912_v50  ;;  %v9226_v26 = vld [vmem:[%s10316_s28 + $0xb21] sm:$0xff]  ;;  %v9418_v4 = vld [vmem:[%s10316_s28 + $0xf8] sm:$0xff] }
 0x5a5   : > { %v7093_v5 = vpop.f32.mrf.mxu0  ;;  %v9609_v1 = vld [vmem:[%s10316_s28 + $0x618] sm:$0xff] }
 0x5a6   : > { %9342 = vmatmul.msk.bf16.gmra.mxu1 %vm571_vm2, %v4295_v16  ;;  %v7409_v27 = vadd.f32 %v7090_v57, %v6565_v60  ;;  %9534 = vmatmul.msk.bf16.gmra.mxu2 %vm571_vm2, %v5140_v53  ;;  %v9417_v16 = vld [vmem:[%s10316_s28 + $0xf0] sm:$0xff]  ;;  %v9610_v53 = vld [vmem:[%s10316_s28 + $0x620] sm:$0xff] }
 0x5a7   : > { %9726 = vmatmul.msk.bf16.gmra.mxu3 %vm571_vm2, %v5985_v3  ;;  %v9801_v60 = vld [vmem:[%s10316_s28 + $0xf1] sm:$0xff] }
 0x5a8   : > { %9918 = vmatmul.msk.bf16.gmra.mxu0 %vm571_vm2, %v6829_v25  ;;  %v7541_v63 = vadd.f32 %v12046_v6, %v7409_v27  ;;  %v9802_v27 = vld [vmem:[%s10316_s28 + $0xf9] sm:$0xff] }
 0x5a9   : > { %v5404_v28 = vpop.f32.mrf.mxu2 }
 0x5aa   : > { %v6249_v55 = vpop.f32.mrf.mxu3  ;;  %v9991_v33 = vpop.eup %9990  ;;  %v7669_v10 = vmul.f32 0.5, %v7541_v63  ;;  %v5721_v57 = vadd.f32 %v5404_v28, %v4876_v23 }
 0x5ab   : > { %v4561_v61 = vpop.f32.mrf.mxu1  ;;  %v7924_v32 = vmul.f32 0.5, %v9991_v33 }
 0x5ac   : > { %9992 = vtanh.f32 %v7669_v10  ;;  %v6566_v36 = vadd.f32 %v6249_v55, %v5721_v57  ;;  %v4877_v25 = vadd.f32 %v4561_v61, %v10923_v20  ;;  %v4296_v55 = vpack.c.bf16 %v9226_v26, %v9225_v12 }
 0x5ad   : > { %v7095_v52 = vpop.f32.mrf.mxu0  ;;  %v8052_v50 = vadd.f32 0.5, %v7924_v32  ;;  %v5141_v32 = vpack.c.bf16 %v9418_v4, %v9417_v16 }
 0x5ae   : > { %v7410_v24 = vadd.f32 %v7093_v5, %v6566_v36 }
 0x5af   : > { %v8180_v37 = vmul.f32 %v8052_v50, %v7540_v54  ;;  %v5986_v54 = vpack.c.bf16 %v9610_v53, %v9609_v1  ;;  %v6830_v50 = vpack.c.bf16 %v9802_v27, %v9801_v60 }
 0x5b0   : > { %v7542_v3 = vadd.f32 %v12046_v6, %v7410_v24 }
 0x5b1   : > { %8309 = vst.msk [vmem:[%s12069_s17] sm:$0xff] %vm8308_vm3, %v8180_v37  ;;  %v5406_v23 = vpop.f32.mrf.mxu2 }
 0x5b2   : > { %v6251_v28 = vpop.f32.mrf.mxu3  ;;  %v9993_v33 = vpop.eup %9992  ;;  %v7670_v5 = vmul.f32 0.5, %v7542_v3  ;;  %v5722_v10 = vadd.f32 %v5406_v23, %v4877_v25 }
 0x5b3   : > { %v4564_v57 = vpop.f32.mrf.mxu1  ;;  %v7925_v36 = vmul.f32 0.5, %v9993_v33  ;;  %v9419_v33 = vld [vmem:[%s10316_s28 + $0x100] sm:$0xff] }
 0x5b4   : > { %9994 = vtanh.f32 %v7670_v5  ;;  %v6567_v24 = vadd.f32 %v6251_v28, %v5722_v10  ;;  %v4878_v16 = vadd.f32 %v4564_v57, %v10930_v38  ;;  %v9227_v28 = vld [vmem:[%s10316_s28 + $0xb29] sm:$0xff] }
 0x5b5   : > { %v7098_v0 = vpop.f32.mrf.mxu0  ;;  %v8053_v20 = vadd.f32 0.5, %v7925_v36  ;;  %v9420_v10 = vld [vmem:[%s10316_s28 + $0x108] sm:$0xff] }
 0x5b6   : > { %9343 = vmatmul.msk.bf16.gmra.mxu1 %vm571_vm2, %v4296_v55  ;;  %v7411_v61 = vadd.f32 %v7095_v52, %v6567_v24  ;;  %9535 = vmatmul.msk.bf16.gmra.mxu2 %vm571_vm2, %v5141_v32  ;;  %v9228_v55 = vld [vmem:[%s10316_s28 + $0xb31] sm:$0xff]  ;;  %v9611_v57 = vld [vmem:[%s10316_s28 + $0x628] sm:$0xff] }
 0x5b7   : > { %9727 = vmatmul.msk.bf16.gmra.mxu3 %vm571_vm2, %v5986_v54  ;;  %v8181_v12 = vmul.f32 %v8053_v20, %v7541_v63  ;;  %v9612_v32 = vld [vmem:[%s10316_s28 + $0x630] sm:$0xff] }
 0x5b8   : > { %9919 = vmatmul.msk.bf16.gmra.mxu0 %vm571_vm2, %v6830_v50  ;;  %v7543_v26 = vadd.f32 %v12046_v6, %v7411_v61  ;;  %v9803_v50 = vld [vmem:[%s10316_s28 + $0x101] sm:$0xff]  ;;  %v9804_v24 = vld [vmem:[%s10316_s28 + $0x109] sm:$0xff] }
 0x5b9   : > { %8310 = vst.msk [vmem:[%s12069_s17 + $0x8] sm:$0xff] %vm8308_vm3, %v8181_v12  ;;  %v5409_v37 = vpop.f32.mrf.mxu2  ;;  %v4297_v12 = vpack.c.bf16 %v9228_v55, %v9227_v28 }
 0x5ba   : > { %v6254_v4 = vpop.f32.mrf.mxu3  ;;  %v9995_v52 = vpop.eup %9994  ;;  %v7671_v1 = vmul.f32 0.5, %v7543_v26  ;;  %v5723_v53 = vadd.f32 %v5409_v37, %v4878_v16 }
 0x5bb   : > { %v4566_v63 = vpop.f32.mrf.mxu1  ;;  %v7926_v25 = vmul.f32 0.5, %v9995_v52  ;;  %v5142_v52 = vpack.c.bf16 %v9420_v10, %v9419_v33 }
 0x5bc   : > { %9996 = vtanh.f32 %v7671_v1  ;;  %v6568_v60 = vadd.f32 %v6254_v4, %v5723_v53  ;;  %v4879_v36 = vadd.f32 %v4566_v63, %v10941_v40  ;;  %v6831_v53 = vpack.c.bf16 %v9804_v24, %v9803_v50  ;;  %v9229_v24 = vld [vmem:[%s10316_s28 + $0xb41] sm:$0xff] }
 0x5bd   : > { %v7100_v27 = vpop.f32.mrf.mxu0  ;;  %v8054_v38 = vadd.f32 0.5, %v7926_v25 }
 0x5be   : > { %v7412_v23 = vadd.f32 %v7098_v0, %v6568_v60 }
 0x5bf   : > { %v8182_v5 = vmul.f32 %v8054_v38, %v7542_v3  ;;  %v5987_v3 = vpack.c.bf16 %v9612_v32, %v9611_v57 }
 0x5c0   : > { %v7544_v54 = vadd.f32 %v12046_v6, %v7412_v23 }
 0x5c1   : > { %8311 = vst.msk [vmem:[%s12069_s17 + $0x10] sm:$0xff] %vm8308_vm3, %v8182_v5  ;;  %v5411_v20 = vpop.f32.mrf.mxu2 }
 0x5c2   : > { %v6256_v61 = vpop.f32.mrf.mxu3  ;;  %v9997_v16 = vpop.eup %9996  ;;  %v7672_v0 = vmul.f32 0.5, %v7544_v54  ;;  %v5724_v37 = vadd.f32 %v5411_v20, %v4879_v36  ;;  %v9230_v20 = vld [vmem:[%s10316_s28 + $0xb49] sm:$0xff] }
 0x5c3   : > { %v4569_v4 = vpop.f32.mrf.mxu1  ;;  %v7927_v1 = vmul.f32 0.5, %v9997_v16  ;;  %v9422_v16 = vld [vmem:[%s10316_s28 + $0x120] sm:$0xff] }
 0x5c4   : > { %9998 = vtanh.f32 %v7672_v0  ;;  %v6569_v25 = vadd.f32 %v6256_v61, %v5724_v37  ;;  %v4880_v28 = vadd.f32 %v4569_v4, %v10948_v31  ;;  %v9421_v61 = vld [vmem:[%s10316_s28 + $0x118] sm:$0xff]  ;;  %v9613_v0 = vld [vmem:[%s10316_s28 + $0x640] sm:$0xff]  ;;  %v9614_v37 = vld [vmem:[%s10316_s28 + $0x648] sm:$0xff] }
 0x5c5   : > { %v7103_v60 = vpop.f32.mrf.mxu0  ;;  %v8055_v40 = vadd.f32 0.5, %v7927_v1  ;;  %v9806_v1 = vld [vmem:[%s10316_s28 + $0x121] sm:$0xff] }
 0x5c6   : > { %9344 = vmatmul.msk.bf16.gmra.mxu1 %vm571_vm2, %v4297_v12  ;;  %v7413_v63 = vadd.f32 %v7100_v27, %v6569_v25  ;;  %9536 = vmatmul.msk.bf16.gmra.mxu2 %vm571_vm2, %v5142_v52 }
 0x5c7   : > { %9728 = vmatmul.msk.bf16.gmra.mxu3 %vm571_vm2, %v5987_v3  ;;  %v8183_v38 = vmul.f32 %v8055_v40, %v7543_v26  ;;  %v9805_v3 = vld [vmem:[%s10316_s28 + $0x119] sm:$0xff]  ;;  %v4298_v40 = vpack.c.bf16 %v9230_v20, %v9229_v24 }
 0x5c8   : > { %9920 = vmatmul.msk.bf16.gmra.mxu0 %vm571_vm2, %v6831_v53  ;;  %v7545_v23 = vadd.f32 %v12046_v6, %v7413_v63 }
 0x5c9   : > { %8312 = vst.msk [vmem:[%s12069_s17 + $0x18] sm:$0xff] %vm8308_vm3, %v8183_v38  ;;  %v5414_v55 = vpop.f32.mrf.mxu2 }
 0x5ca   : > { %v6259_v33 = vpop.f32.mrf.mxu3  ;;  %v9999_v27 = vpop.eup %9998  ;;  %v7673_v5 = vmul.f32 0.5, %v7545_v23  ;;  %v5725_v10 = vadd.f32 %v5414_v55, %v4880_v28  ;;  %v5143_v55 = vpack.c.bf16 %v9422_v16, %v9421_v61 }
 0x5cb   : > { %v4571_v26 = vpop.f32.mrf.mxu1  ;;  %v7928_v57 = vmul.f32 0.5, %v9999_v27  ;;  %v6832_v27 = vpack.c.bf16 %v9806_v1, %v9805_v3  ;;  %v9232_v3 = vld [vmem:[%s10316_s28 + $0xb59] sm:$0xff]  ;;  %v9423_v1 = vld [vmem:[%s10316_s28 + $0x128] sm:$0xff] }
 0x5cc   : > { %10000 = vtanh.f32 %v7673_v5  ;;  %v6570_v32 = vadd.f32 %v6259_v33, %v5725_v10  ;;  %v4881_v52 = vadd.f32 %v4571_v26, %v10959_v2 }
 0x5cd   : > { %v7105_v36 = vpop.f32.mrf.mxu0  ;;  %v8056_v31 = vadd.f32 0.5, %v7928_v57 }
 0x5ce   : > { %v7414_v50 = vadd.f32 %v7103_v60, %v6570_v32 }
 0x5cf   : > { %v8184_v12 = vmul.f32 %v8056_v31, %v7544_v54  ;;  %v5988_v54 = vpack.c.bf16 %v9614_v37, %v9613_v0 }
 0x5d0   : > { %v7546_v4 = vadd.f32 %v12046_v6, %v7414_v50 }
 0x5d1   : > { %8313 = vst.msk [vmem:[%s12069_s17 + $0x20] sm:$0xff] %vm8308_vm3, %v8184_v12  ;;  %v5416_v53 = vpop.f32.mrf.mxu2 }
 0x5d2   : > { %v6261_v25 = vpop.f32.mrf.mxu3  ;;  %v10001_v63 = vpop.eup %10000  ;;  %v7674_v60 = vmul.f32 0.5, %v7546_v4  ;;  %v5726_v38 = vadd.f32 %v5416_v53, %v4881_v52  ;;  %v9231_v52 = vld [vmem:[%s10316_s28 + $0xb51] sm:$0xff] }
 0x5d3   : > { %v4574_v28 = vpop.f32.mrf.mxu1  ;;  %v7929_v33 = vmul.f32 0.5, %v10001_v63  ;;  %v9616_v63 = vld [vmem:[%s10316_s28 + $0x658] sm:$0xff] }
 0x5d4   : > { %10002 = vtanh.f32 %v7674_v60  ;;  %v6571_v5 = vadd.f32 %v6261_v25, %v5726_v38  ;;  %v4882_v31 = vadd.f32 %v4574_v28, %v10966_v58  ;;  %v9424_v25 = vld [vmem:[%s10316_s28 + $0x130] sm:$0xff] }
 0x5d5   : > { %v7108_v10 = vpop.f32.mrf.mxu0  ;;  %v8057_v2 = vadd.f32 0.5, %v7929_v33  ;;  %v9807_v28 = vld [vmem:[%s10316_s28 + $0x129] sm:$0xff] }
 0x5d6   : > { %9345 = vmatmul.msk.bf16.gmra.mxu1 %vm571_vm2, %v4298_v40  ;;  %v7415_v26 = vadd.f32 %v7105_v36, %v6571_v5  ;;  %9537 = vmatmul.msk.bf16.gmra.mxu2 %vm571_vm2, %v5143_v55  ;;  %v9615_v40 = vld [vmem:[%s10316_s28 + $0x650] sm:$0xff] }
 0x5d7   : > { %9729 = vmatmul.msk.bf16.gmra.mxu3 %vm571_vm2, %v5988_v54  ;;  %v8185_v57 = vmul.f32 %v8057_v2, %v7545_v23  ;;  %v9808_v55 = vld [vmem:[%s10316_s28 + $0x131] sm:$0xff] }
 0x5d8   : > { %9921 = vmatmul.msk.bf16.gmra.mxu0 %vm571_vm2, %v6832_v27  ;;  %v7547_v32 = vadd.f32 %v12046_v6, %v7415_v26  ;;  %v4299_v27 = vpack.c.bf16 %v9232_v3, %v9231_v52 }
 0x5d9   : > { %8314 = vst.msk [vmem:[%s12069_s17 + $0x28] sm:$0xff] %vm8308_vm3, %v8185_v57  ;;  %v5419_v50 = vpop.f32.mrf.mxu2  ;;  %v5144_v57 = vpack.c.bf16 %v9424_v25, %v9423_v1 }
 0x5da   : > { %v6264_v24 = vpop.f32.mrf.mxu3  ;;  %v10003_v36 = vpop.eup %10002  ;;  %v7675_v20 = vmul.f32 0.5, %v7547_v32  ;;  %v5727_v61 = vadd.f32 %v5419_v50, %v4882_v31  ;;  %v6833_v50 = vpack.c.bf16 %v9808_v55, %v9807_v28  ;;  %v9426_v55 = vld [vmem:[%s10316_s28 + $0x148] sm:$0xff] }
 0x5db   : > { %v4576_v23 = vpop.f32.mrf.mxu1  ;;  %v7930_v12 = vmul.f32 0.5, %v10003_v36 }
 0x5dc   : > { %10004 = vtanh.f32 %v7675_v20  ;;  %v6572_v16 = vadd.f32 %v6264_v24, %v5727_v61  ;;  %v4883_v38 = vadd.f32 %v4576_v23, %v10977_v34 }
 0x5dd   : > { %v7110_v0 = vpop.f32.mrf.mxu0  ;;  %v8058_v58 = vadd.f32 0.5, %v7930_v12 }
 0x5de   : > { %v7416_v37 = vadd.f32 %v7108_v10, %v6572_v16 }
 0x5df   : > { %v8186_v53 = vmul.f32 %v8058_v58, %v7546_v4  ;;  %v5989_v4 = vpack.c.bf16 %v9616_v63, %v9615_v40  ;;  %v9233_v40 = vld [vmem:[%s10316_s28 + $0xb69] sm:$0xff]  ;;  %v9234_v63 = vld [vmem:[%s10316_s28 + $0xb71] sm:$0xff] }
 0x5e0   : > { %v7548_v60 = vadd.f32 %v12046_v6, %v7416_v37 }
 0x5e1   : > { %8315 = vst.msk [vmem:[%s12069_s17 + $0x30] sm:$0xff] %vm8308_vm3, %v8186_v53  ;;  %v5421_v54 = vpop.f32.mrf.mxu2 }
 0x5e2   : > { %v6266_v33 = vpop.f32.mrf.mxu3  ;;  %v10005_v5 = vpop.eup %10004  ;;  %v7676_v10 = vmul.f32 0.5, %v7548_v60  ;;  %v5728_v2 = vadd.f32 %v5421_v54, %v4883_v38  ;;  %v9425_v38 = vld [vmem:[%s10316_s28 + $0x140] sm:$0xff]  ;;  %v9617_v54 = vld [vmem:[%s10316_s28 + $0x668] sm:$0xff] }
 0x5e3   : > { %v4579_v26 = vpop.f32.mrf.mxu1  ;;  %v7931_v31 = vmul.f32 0.5, %v10005_v5 }
 0x5e4   : > { %10006 = vtanh.f32 %v7676_v10  ;;  %v6573_v24 = vadd.f32 %v6266_v33, %v5728_v2  ;;  %v4884_v12 = vadd.f32 %v4579_v26, %v10984_v42  ;;  %v9618_v33 = vld [vmem:[%s10316_s28 + $0x670] sm:$0xff]  ;;  %v9809_v10 = vld [vmem:[%s10316_s28 + $0x141] sm:$0xff] }
 0x5e5   : > { %v7113_v36 = vpop.f32.mrf.mxu0  ;;  %v8059_v34 = vadd.f32 0.5, %v7931_v31  ;;  %v9810_v2 = vld [vmem:[%s10316_s28 + $0x149] sm:$0xff] }
 0x5e6   : > { %9346 = vmatmul.msk.bf16.gmra.mxu1 %vm571_vm2, %v4299_v27  ;;  %v7417_v20 = vadd.f32 %v7110_v0, %v6573_v24  ;;  %9538 = vmatmul.msk.bf16.gmra.mxu2 %vm571_vm2, %v5144_v57 }
 0x5e7   : > { %9730 = vmatmul.msk.bf16.gmra.mxu3 %vm571_vm2, %v5989_v4  ;;  %v8187_v61 = vmul.f32 %v8059_v34, %v7547_v32  ;;  %v4300_v4 = vpack.c.bf16 %v9234_v63, %v9233_v40  ;;  %v5145_v34 = vpack.c.bf16 %v9426_v55, %v9425_v38  ;;  %v9236_v55 = vld [vmem:[%s10316_s28 + $0xb81] sm:$0xff] }
 0x5e8   : > { %9922 = vmatmul.msk.bf16.gmra.mxu0 %vm571_vm2, %v6833_v50  ;;  %v7549_v23 = vadd.f32 %v12046_v6, %v7417_v20 }
 0x5e9   : > { %8316 = vst.msk [vmem:[%s12069_s17 + $0x38] sm:$0xff] %vm8308_vm3, %v8187_v61  ;;  %v5424_v16 = vpop.f32.mrf.mxu2  ;;  %v6834_v61 = vpack.c.bf16 %v9810_v2, %v9809_v10  ;;  %v9619_v10 = vld [vmem:[%s10316_s28 + $0x678] sm:$0xff]  ;;  %v9620_v2 = vld [vmem:[%s10316_s28 + $0x680] sm:$0xff] }
 0x5ea   : > { %v6269_v58 = vpop.f32.mrf.mxu3  ;;  %v10007_v0 = vpop.eup %10006  ;;  %v7677_v37 = vmul.f32 0.5, %v7549_v23  ;;  %v5729_v52 = vadd.f32 %v5424_v16, %v4884_v12 }
 0x5eb   : > { %v4581_v32 = vpop.f32.mrf.mxu1  ;;  %v7932_v3 = vmul.f32 0.5, %v10007_v0 }
 0x5ec   : > { %10008 = vtanh.f32 %v7677_v37  ;;  %v6574_v1 = vadd.f32 %v6269_v58, %v5729_v52  ;;  %v4885_v5 = vadd.f32 %v4581_v32, %v10995_v13 }
 0x5ed   : > { %v7115_v53 = vpop.f32.mrf.mxu0  ;;  %v8060_v42 = vadd.f32 0.5, %v7932_v3 }
 0x5ee   : > { %v7418_v25 = vadd.f32 %v7113_v36, %v6574_v1 }
 0x5ef   : > { %v8188_v28 = vmul.f32 %v8060_v42, %v7548_v60  ;;  %v5990_v60 = vpack.c.bf16 %v9618_v33, %v9617_v54  ;;  %v9427_v54 = vld [vmem:[%s10316_s28 + $0x150] sm:$0xff] }
 0x5f0   : > { %v7550_v27 = vadd.f32 %v12046_v6, %v7418_v25 }
 0x5f1   : > { %8317 = vst.msk [vmem:[%s12069_s17 + $0x40] sm:$0xff] %vm8308_vm3, %v8188_v28  ;;  %v5426_v26 = vpop.f32.mrf.mxu2  ;;  %v9235_v28 = vld [vmem:[%s10316_s28 + $0xb79] sm:$0xff] }
 0x5f2   : > { %v6271_v57 = vpop.f32.mrf.mxu3  ;;  %v10009_v31 = vpop.eup %10008  ;;  %v7678_v50 = vmul.f32 0.5, %v7550_v27  ;;  %v5730_v24 = vadd.f32 %v5426_v26, %v4885_v5  ;;  %v9428_v5 = vld [vmem:[%s10316_s28 + $0x158] sm:$0xff] }
 0x5f3   : > { %v4584_v36 = vpop.f32.mrf.mxu1  ;;  %v7933_v20 = vmul.f32 0.5, %v10009_v31  ;;  %v9812_v31 = vld [vmem:[%s10316_s28 + $0x159] sm:$0xff] }
 0x5f4   : > { %10010 = vtanh.f32 %v7678_v50  ;;  %v6575_v12 = vadd.f32 %v6271_v57, %v5730_v24  ;;  %v4886_v52 = vadd.f32 %v4584_v36, %v11002_v59  ;;  %v4301_v36 = vpack.c.bf16 %v9236_v55, %v9235_v28  ;;  %v9237_v55 = vld [vmem:[%s10316_s28 + $0xb91] sm:$0xff] }
 0x5f5   : > { %v7118_v16 = vpop.f32.mrf.mxu0  ;;  %v8061_v13 = vadd.f32 0.5, %v7933_v20 }
 0x5f6   : > { %9347 = vmatmul.msk.bf16.gmra.mxu1 %vm571_vm2, %v4300_v4  ;;  %v7419_v58 = vadd.f32 %v7115_v53, %v6575_v12  ;;  %9539 = vmatmul.msk.bf16.gmra.mxu2 %vm571_vm2, %v5145_v34  ;;  %v9811_v4 = vld [vmem:[%s10316_s28 + $0x151] sm:$0xff]  ;;  %v5146_v12 = vpack.c.bf16 %v9428_v5, %v9427_v54  ;;  %v9238_v54 = vld [vmem:[%s10316_s28 + $0xb99] sm:$0xff] }
 0x5f7   : > { %9731 = vmatmul.msk.bf16.gmra.mxu3 %vm571_vm2, %v5990_v60  ;;  %v8189_v0 = vmul.f32 %v8061_v13, %v7549_v23  ;;  %v6835_v13 = vpack.c.bf16 %v9812_v31, %v9811_v4 }
 0x5f8   : > { %9923 = vmatmul.msk.bf16.gmra.mxu0 %vm571_vm2, %v6834_v61  ;;  %v7551_v37 = vadd.f32 %v12046_v6, %v7419_v58 }
 0x5f9   : > { %8318 = vst.msk [vmem:[%s12069_s17 + $0x48] sm:$0xff] %vm8308_vm3, %v8189_v0  ;;  %v5429_v32 = vpop.f32.mrf.mxu2 }
 0x5fa   : > { %v6274_v3 = vpop.f32.mrf.mxu3  ;;  %v10011_v1 = vpop.eup %10010  ;;  %v7679_v53 = vmul.f32 0.5, %v7551_v37  ;;  %v5731_v42 = vadd.f32 %v5429_v32, %v4886_v52 }
 0x5fb   : > { %v4586_v23 = vpop.f32.mrf.mxu1  ;;  %v7934_v25 = vmul.f32 0.5, %v10011_v1 }
 0x5fc   : > { %10012 = vtanh.f32 %v7679_v53  ;;  %v6576_v40 = vadd.f32 %v6274_v3, %v5731_v42  ;;  %v4887_v57 = vadd.f32 %v4586_v23, %v11013_v45 }
 0x5fd   : > { %v7120_v63 = vpop.f32.mrf.mxu0  ;;  %v8062_v59 = vadd.f32 0.5, %v7934_v25 }
 0x5fe   : > { %v7420_v38 = vadd.f32 %v7118_v16, %v6576_v40 }
 0x5ff   : > { %v8190_v33 = vmul.f32 %v8062_v59, %v7550_v27  ;;  %v5991_v27 = vpack.c.bf16 %v9620_v2, %v9619_v10  ;;  %v9430_v10 = vld [vmem:[%s10316_s28 + $0x170] sm:$0xff] }
 0x600   : > { %v7552_v26 = vadd.f32 %v12046_v6, %v7420_v38  ;;  %v9621_v2 = vld [vmem:[%s10316_s28 + $0x690] sm:$0xff] }
 0x601   : > { %8319 = vst.msk [vmem:[%s12069_s17 + $0x50] sm:$0xff] %vm8308_vm3, %v8190_v33  ;;  %v5431_v50 = vpop.f32.mrf.mxu2  ;;  %v9429_v33 = vld [vmem:[%s10316_s28 + $0x168] sm:$0xff] }
 0x602   : > { %v6276_v24 = vpop.f32.mrf.mxu3  ;;  %v10013_v34 = vpop.eup %10012  ;;  %v7680_v60 = vmul.f32 0.5, %v7552_v26  ;;  %v5732_v20 = vadd.f32 %v5431_v50, %v4887_v57  ;;  %v9622_v57 = vld [vmem:[%s10316_s28 + $0x698] sm:$0xff]  ;;  %v9813_v50 = vld [vmem:[%s10316_s28 + $0x169] sm:$0xff] }
 0x603   : > { %v4589_v61 = vpop.f32.mrf.mxu1  ;;  %v7935_v16 = vmul.f32 0.5, %v10013_v34 }
 0x604   : > { %10014 = vtanh.f32 %v7680_v60  ;;  %v6577_v58 = vadd.f32 %v6276_v24, %v5732_v20  ;;  %v4888_v1 = vadd.f32 %v4589_v61, %v11020_v47  ;;  %v9814_v24 = vld [vmem:[%s10316_s28 + $0x171] sm:$0xff]  ;;  %v4302_v60 = vpack.c.bf16 %v9238_v54, %v9237_v55  ;;  %v9240_v55 = vld [vmem:[%s10316_s28 + $0xba9] sm:$0xff] }
 0x605   : > { %v7123_v0 = vpop.f32.mrf.mxu0  ;;  %v8063_v45 = vadd.f32 0.5, %v7935_v16  ;;  %v5147_v16 = vpack.c.bf16 %v9430_v10, %v9429_v33  ;;  %v9431_v54 = vld [vmem:[%s10316_s28 + $0x178] sm:$0xff]  ;;  %v9623_v10 = vld [vmem:[%s10316_s28 + $0x6a0] sm:$0xff] }
 0x606   : > { %9348 = vmatmul.msk.bf16.gmra.mxu1 %vm571_vm2, %v4301_v36  ;;  %v7421_v52 = vadd.f32 %v7120_v63, %v6577_v58  ;;  %9540 = vmatmul.msk.bf16.gmra.mxu2 %vm571_vm2, %v5146_v12  ;;  %v6836_v58 = vpack.c.bf16 %v9814_v24, %v9813_v50  ;;  %v9815_v50 = vld [vmem:[%s10316_s28 + $0x179] sm:$0xff]  ;;  %v9816_v24 = vld [vmem:[%s10316_s28 + $0x181] sm:$0xff] }
 0x607   : > { %9732 = vmatmul.msk.bf16.gmra.mxu3 %vm571_vm2, %v5991_v27  ;;  %v8191_v32 = vmul.f32 %v8063_v45, %v7551_v37 }
 0x608   : > { %9924 = vmatmul.msk.bf16.gmra.mxu0 %vm571_vm2, %v6835_v13  ;;  %v7553_v3 = vadd.f32 %v12046_v6, %v7421_v52 }
 0x609   : > { %8320 = vst.msk [vmem:[%s12069_s17 + $0x58] sm:$0xff] %vm8308_vm3, %v8191_v32  ;;  %v5434_v53 = vpop.f32.mrf.mxu2 }
 0x60a   : > { %v6279_v42 = vpop.f32.mrf.mxu3  ;;  %v10015_v23 = vpop.eup %10014  ;;  %v7681_v25 = vmul.f32 0.5, %v7553_v3  ;;  %v5733_v40 = vadd.f32 %v5434_v53, %v4888_v1 }
 0x60b   : > { %v4591_v37 = vpop.f32.mrf.mxu1  ;;  %v7936_v63 = vmul.f32 0.5, %v10015_v23 }
 0x60c   : > { %10016 = vtanh.f32 %v7681_v25  ;;  %v6578_v59 = vadd.f32 %v6279_v42, %v5733_v40  ;;  %v4889_v31 = vadd.f32 %v4591_v37, %v11031_v44 }
 0x60d   : > { %v7125_v38 = vpop.f32.mrf.mxu0  ;;  %v8064_v47 = vadd.f32 0.5, %v7936_v63 }
 0x60e   : > { %v7422_v28 = vadd.f32 %v7123_v0, %v6578_v59 }
 0x60f   : > { %v8192_v5 = vmul.f32 %v8064_v47, %v7552_v26  ;;  %v5992_v26 = vpack.c.bf16 %v9622_v57, %v9621_v2  ;;  %v9624_v2 = vld [vmem:[%s10316_s28 + $0x6a8] sm:$0xff] }
 0x610   : > { %v7554_v4 = vadd.f32 %v12046_v6, %v7422_v28  ;;  %v9239_v28 = vld [vmem:[%s10316_s28 + $0xba1] sm:$0xff] }
 0x611   : > { %8321 = vst.msk [vmem:[%s12069_s17 + $0x60] sm:$0xff] %vm8308_vm3, %v8192_v5  ;;  %v5436_v36 = vpop.f32.mrf.mxu2  ;;  %v9432_v5 = vld [vmem:[%s10316_s28 + $0x180] sm:$0xff] }
 0x612   : > { %v6281_v34 = vpop.f32.mrf.mxu3  ;;  %v10017_v20 = vpop.eup %10016  ;;  %v7682_v61 = vmul.f32 0.5, %v7554_v4  ;;  %v5734_v12 = vadd.f32 %v5436_v36, %v4889_v31 }
 0x613   : > { %v4594_v27 = vpop.f32.mrf.mxu1  ;;  %v7937_v13 = vmul.f32 0.5, %v10017_v20 }
 0x614   : > { %10018 = vtanh.f32 %v7682_v61  ;;  %v6579_v0 = vadd.f32 %v6281_v34, %v5734_v12  ;;  %v4890_v53 = vadd.f32 %v4594_v27, %v11038_v41 }
 0x615   : > { %v7128_v45 = vpop.f32.mrf.mxu0  ;;  %v8065_v44 = vadd.f32 0.5, %v7937_v13  ;;  %v6837_v13 = vpack.c.bf16 %v9816_v24, %v9815_v50 }
 0x616   : > { %9349 = vmatmul.msk.bf16.gmra.mxu1 %vm571_vm2, %v4302_v60  ;;  %v7423_v52 = vadd.f32 %v7125_v38, %v6579_v0  ;;  %9541 = vmatmul.msk.bf16.gmra.mxu2 %vm571_vm2, %v5147_v16  ;;  %v4303_v60 = vpack.c.bf16 %v9240_v55, %v9239_v28  ;;  %v5148_v16 = vpack.c.bf16 %v9432_v5, %v9431_v54  ;;  %v9434_v55 = vld [vmem:[%s10316_s28 + $0x198] sm:$0xff] }
 0x617   : > { %9733 = vmatmul.msk.bf16.gmra.mxu3 %vm571_vm2, %v5992_v26  ;;  %v8193_v32 = vmul.f32 %v8065_v44, %v7553_v3  ;;  %v9625_v54 = vld [vmem:[%s10316_s28 + $0x6b8] sm:$0xff] }
 0x618   : > { %9925 = vmatmul.msk.bf16.gmra.mxu0 %vm571_vm2, %v6836_v58  ;;  %v7555_v1 = vadd.f32 %v12046_v6, %v7423_v52 }
 0x619   : > { %8322 = vst.msk [vmem:[%s12069_s17 + $0x68] sm:$0xff] %vm8308_vm3, %v8193_v32  ;;  %v5439_v42 = vpop.f32.mrf.mxu2 }
 0x61a   : > { %v6284_v23 = vpop.f32.mrf.mxu3  ;;  %v10019_v25 = vpop.eup %10018  ;;  %v7683_v40 = vmul.f32 0.5, %v7555_v1  ;;  %v5735_v37 = vadd.f32 %v5439_v42, %v4890_v53 }
 0x61b   : > { %v4596_v3 = vpop.f32.mrf.mxu1  ;;  %v7938_v63 = vmul.f32 0.5, %v10019_v25 }
 0x61c   : > { %10020 = vtanh.f32 %v7683_v40  ;;  %v6580_v59 = vadd.f32 %v6284_v23, %v5735_v37  ;;  %v4891_v31 = vadd.f32 %v4596_v3, %v11049_v35 }
 0x61d   : > { %v7130_v38 = vpop.f32.mrf.mxu0  ;;  %v8066_v41 = vadd.f32 0.5, %v7938_v63 }
 0x61e   : > { %v7424_v47 = vadd.f32 %v7128_v45, %v6580_v59 }
 0x61f   : > { %v8194_v33 = vmul.f32 %v8066_v41, %v7554_v4  ;;  %v5993_v4 = vpack.c.bf16 %v9624_v2, %v9623_v10  ;;  %v9242_v41 = vld [vmem:[%s10316_s28 + $0xbc1] sm:$0xff]  ;;  %v9817_v2 = vld [vmem:[%s10316_s28 + $0x191] sm:$0xff] }
 0x620   : > { %v7556_v57 = vadd.f32 %v12046_v6, %v7424_v47  ;;  %v9433_v47 = vld [vmem:[%s10316_s28 + $0x190] sm:$0xff] }
 0x621   : > { %8323 = vst.msk [vmem:[%s12069_s17 + $0x70] sm:$0xff] %vm8308_vm3, %v8194_v33  ;;  %v5441_v36 = vpop.f32.mrf.mxu2  ;;  %v9626_v33 = vld [vmem:[%s10316_s28 + $0x6c0] sm:$0xff] }
 0x622   : > { %v6286_v34 = vpop.f32.mrf.mxu3  ;;  %v10021_v20 = vpop.eup %10020  ;;  %v7684_v61 = vmul.f32 0.5, %v7556_v57  ;;  %v5736_v12 = vadd.f32 %v5441_v36, %v4891_v31  ;;  %v9818_v31 = vld [vmem:[%s10316_s28 + $0x199] sm:$0xff] }
 0x623   : > { %v4599_v27 = vpop.f32.mrf.mxu1  ;;  %v7939_v26 = vmul.f32 0.5, %v10021_v20 }
 0x624   : > { %10022 = vtanh.f32 %v7684_v61  ;;  %v6581_v58 = vadd.f32 %v6286_v34, %v5736_v12  ;;  %v4892_v32 = vadd.f32 %v4599_v27, %v11056_v15  ;;  %v5149_v12 = vpack.c.bf16 %v9434_v55, %v9433_v47  ;;  %v9819_v55 = vld [vmem:[%s10316_s28 + $0x1a1] sm:$0xff] }
 0x625   : > { %v7133_v0 = vpop.f32.mrf.mxu0  ;;  %v8067_v35 = vadd.f32 0.5, %v7939_v26 }
 0x626   : > { %9350 = vmatmul.msk.bf16.gmra.mxu1 %vm571_vm2, %v4303_v60  ;;  %v7425_v45 = vadd.f32 %v7130_v38, %v6581_v58  ;;  %9542 = vmatmul.msk.bf16.gmra.mxu2 %vm571_vm2, %v5148_v16  ;;  %v9241_v38 = vld [vmem:[%s10316_s28 + $0xbb9] sm:$0xff]  ;;  %v6838_v16 = vpack.c.bf16 %v9818_v31, %v9817_v2 }
 0x627   : > { %9734 = vmatmul.msk.bf16.gmra.mxu3 %vm571_vm2, %v5993_v4  ;;  %v8195_v44 = vmul.f32 %v8067_v35, %v7555_v1  ;;  %v4304_v36 = vpack.c.bf16 %v9242_v41, %v9241_v38  ;;  %v9627_v38 = vld [vmem:[%s10316_s28 + $0x6c8] sm:$0xff]  ;;  %v9628_v41 = vld [vmem:[%s10316_s28 + $0x6d0] sm:$0xff] }
 0x628   : > { %9926 = vmatmul.msk.bf16.gmra.mxu0 %vm571_vm2, %v6837_v13  ;;  %v7557_v52 = vadd.f32 %v12046_v6, %v7425_v45 }
 0x629   : > { %8324 = vst.msk [vmem:[%s12069_s17 + $0x78] sm:$0xff] %vm8308_vm3, %v8195_v44  ;;  %v5444_v53 = vpop.f32.mrf.mxu2 }
 0x62a   : > { %v6289_v42 = vpop.f32.mrf.mxu3  ;;  %v10023_v23 = vpop.eup %10022  ;;  %v7685_v25 = vmul.f32 0.5, %v7557_v52  ;;  %v5737_v40 = vadd.f32 %v5444_v53, %v4892_v32 }
 0x62b   : > { %v4601_v1 = vpop.f32.mrf.mxu1  ;;  %v7940_v37 = vmul.f32 0.5, %v10023_v23 }
 0x62c   : > { %10024 = vtanh.f32 %v7685_v25  ;;  %v6582_v3 = vadd.f32 %v6289_v42, %v5737_v40  ;;  %v4893_v10 = vadd.f32 %v4601_v1, %v11067_v21 }
 0x62d   : > { %v7135_v63 = vpop.f32.mrf.mxu0  ;;  %v8068_v15 = vadd.f32 0.5, %v7940_v37  ;;  %v9243_v37 = vld [vmem:[%s10316_s28 + $0xbc9] sm:$0xff] }
 0x62e   : > { %v7426_v59 = vadd.f32 %v7133_v0, %v6582_v3  ;;  %v9244_v3 = vld [vmem:[%s10316_s28 + $0xbd1] sm:$0xff] }
 0x62f   : > { %v8196_v28 = vmul.f32 %v8068_v15, %v7556_v57  ;;  %v5994_v57 = vpack.c.bf16 %v9626_v33, %v9625_v54  ;;  %v9820_v54 = vld [vmem:[%s10316_s28 + $0x1a9] sm:$0xff]  ;;  %v4305_v2 = vpack.c.bf16 %v9244_v3, %v9243_v37 }
 0x630   : > { %v7558_v5 = vadd.f32 %v12046_v6, %v7426_v59  ;;  %v9436_v59 = vld [vmem:[%s10316_s28 + $0x1a8] sm:$0xff] }
 0x631   : > { %8325 = vst.msk [vmem:[%s12069_s17 + $0x80] sm:$0xff] %vm8308_vm3, %v8196_v28  ;;  %v5446_v50 = vpop.f32.mrf.mxu2 }
 0x632   : > { %v6291_v24 = vpop.f32.mrf.mxu3  ;;  %v10025_v34 = vpop.eup %10024  ;;  %v7686_v60 = vmul.f32 0.5, %v7558_v5  ;;  %v5738_v20 = vadd.f32 %v5446_v50, %v4893_v10 }
 0x633   : > { %v4604_v61 = vpop.f32.mrf.mxu1  ;;  %v7941_v27 = vmul.f32 0.5, %v10025_v34 }
 0x634   : > { %10026 = vtanh.f32 %v7686_v60  ;;  %v6583_v4 = vadd.f32 %v6291_v24, %v5738_v20  ;;  %v4894_v35 = vadd.f32 %v4604_v61, %v11074_v7  ;;  %v6839_v20 = vpack.c.bf16 %v9820_v54, %v9819_v55 }
 0x635   : > { %v7138_v26 = vpop.f32.mrf.mxu0  ;;  %v8069_v21 = vadd.f32 0.5, %v7941_v27  ;;  %v12270_v27 = vld [vmem:[%s13256_s2] ss:$0 sm:$0xff] }
 0x636   : > { %9351 = vmatmul.msk.bf16.gmra.mxu1 %vm571_vm2, %v4304_v36  ;;  %v7427_v13 = vadd.f32 %v7135_v63, %v6583_v4  ;;  %9543 = vmatmul.msk.bf16.gmra.mxu2 %vm571_vm2, %v5149_v12  ;;  %v9435_v63 = vld [vmem:[%s10316_s28 + $0x1a0] sm:$0xff] }
 0x637   : > { %9735 = vmatmul.msk.bf16.gmra.mxu3 %vm571_vm2, %v5994_v57  ;;  %v8197_v58 = vmul.f32 %v8069_v21, %v7557_v52  ;;  %v5150_v34 = vpack.c.bf16 %v9436_v59, %v9435_v63  ;;  %v9821_v63 = vld [vmem:[%s10316_s28 + $0x1b9] sm:$0xff] }
 0x638   : > { %9927 = vmatmul.msk.bf16.gmra.mxu0 %vm571_vm2, %v6838_v16  ;;  %v7559_v0 = vadd.f32 %v12046_v6, %v7427_v13 }
 0x639   : > { %8326 = vst.msk [vmem:[%s12069_s17 + $0x88] sm:$0xff] %vm8308_vm3, %v8197_v58  ;;  %v5449_v45 = vpop.f32.mrf.mxu2 }
 0x63a   : > { %v6294_v44 = vpop.f32.mrf.mxu3  ;;  %v10027_v32 = vpop.eup %10026  ;;  %v7687_v53 = vmul.f32 0.5, %v7559_v0  ;;  %v5739_v42 = vadd.f32 %v5449_v45, %v4894_v35 }
 0x63b   : > { %v4606_v52 = vpop.f32.mrf.mxu1  ;;  %v7942_v23 = vmul.f32 0.5, %v10027_v32 }
 0x63c   : > { %10028 = vtanh.f32 %v7687_v53  ;;  %v6584_v25 = vadd.f32 %v6294_v44, %v5739_v42  ;;  %v4895_v28 = vadd.f32 %v4606_v52, %v11085_v18  ;;  %v9245_v42 = vld [vmem:[%s10316_s28 + $0xbe1] sm:$0xff]  ;;  %v9246_v52 = vld [vmem:[%s10316_s28 + $0xbe9] sm:$0xff] }
 0x63d   : > { %v7140_v40 = vpop.f32.mrf.mxu0  ;;  %v8070_v7 = vadd.f32 0.5, %v7942_v23  ;;  %v9437_v23 = vld [vmem:[%s10316_s28 + $0x1b8] sm:$0xff] }
 0x63e   : > { %v7428_v1 = vadd.f32 %v7138_v26, %v6584_v25 }
 0x63f   : > { %v8198_v15 = vmul.f32 %v8070_v7, %v7558_v5  ;;  %v5995_v5 = vpack.c.bf16 %v9628_v41, %v9627_v38  ;;  %v9629_v7 = vld [vmem:[%s10316_s28 + $0x6e0] sm:$0xff]  ;;  %v4306_v41 = vpack.c.bf16 %v9246_v52, %v9245_v42  ;;  %v9823_v42 = vld [vmem:[%s10316_s28 + $0x1c9] sm:$0xff]  ;;  %v9824_v52 = vld [vmem:[%s10316_s28 + $0x1d1] sm:$0xff] }
 0x640   : > { %v7560_v47 = vadd.f32 %v12046_v6, %v7428_v1  ;;  %v9630_v1 = vld [vmem:[%s10316_s28 + $0x6e8] sm:$0xff] }
 0x641   : > { %8327 = vst.msk [vmem:[%s12069_s17 + $0x90] sm:$0xff] %vm8308_vm3, %v8198_v15  ;;  %v5451_v33 = vpop.f32.mrf.mxu2  ;;  %v9822_v15 = vld [vmem:[%s10316_s28 + $0x1c1] sm:$0xff] }
 0x642   : > { %v6296_v10 = vpop.f32.mrf.mxu3  ;;  %v10029_v31 = vpop.eup %10028  ;;  %v7688_v50 = vmul.f32 0.5, %v7560_v47  ;;  %v5740_v24 = vadd.f32 %v5451_v33, %v4895_v28 }
 0x643   : > { %v4609_v36 = vpop.f32.mrf.mxu1  ;;  %v7943_v60 = vmul.f32 0.5, %v10029_v31  ;;  %v6840_v31 = vpack.c.bf16 %v9822_v15, %v9821_v63 }
 0x644   : > { %10030 = vtanh.f32 %v7688_v50  ;;  %v6585_v6 = vadd.f32 %v6296_v10, %v5740_v24  ;;  %v4896_v4 = vadd.f32 %v4609_v36, %v11092_v8 }
 0x645   : > { %v7143_v61 = vpop.f32.mrf.mxu0  ;;  %v8071_v18 = vadd.f32 0.5, %v7943_v60 }
 0x646   : > { %9352 = vmatmul.msk.bf16.gmra.mxu1 %vm571_vm2, %v4305_v2  ;;  %v7429_v12 = vadd.f32 %v7140_v40, %v6585_v6  ;;  %9544 = vmatmul.msk.bf16.gmra.mxu2 %vm571_vm2, %v5150_v34  ;;  %v9438_v40 = vld [vmem:[%s10316_s28 + $0x1c0] sm:$0xff] }
 0x647   : > { %9736 = vmatmul.msk.bf16.gmra.mxu3 %vm571_vm2, %v5995_v5  ;;  %v8199_v57 = vmul.f32 %v8071_v18, %v7559_v0  ;;  %v5151_v10 = vpack.c.bf16 %v9438_v40, %v9437_v23 }
 0x648   : > { %9928 = vmatmul.msk.bf16.gmra.mxu0 %vm571_vm2, %v6839_v20  ;;  %v7561_v16 = vadd.f32 %v12270_v27, %v7429_v12 }
 0x649   : > { %8328 = vst.msk [vmem:[%s12069_s17 + $0x98] sm:$0xff] %vm8308_vm3, %v8199_v57  ;;  %v5454_v26 = vpop.f32.mrf.mxu2 }
 0x64a   : > { %v6299_v21 = vpop.f32.mrf.mxu3  ;;  %v10031_v13 = vpop.eup %10030  ;;  %v7689_v58 = vmul.f32 0.5, %v7561_v16  ;;  %v5741_v0 = vadd.f32 %v5454_v26, %v4896_v4 }
 0x64b   : > { %v4611_v35 = vpop.f32.mrf.mxu1  ;;  %v7944_v45 = vmul.f32 0.5, %v10031_v13  ;;  %v9247_v13 = vld [vmem:[%s10316_s28 + $0xbf1] sm:$0xff] }
 0x64c   : > { %10032 = vtanh.f32 %v7689_v58  ;;  %v6586_v44 = vadd.f32 %v6299_v21, %v5741_v0  ;;  %v4897_v3 = vadd.f32 %v4611_v35, %v11103_v51  ;;  %v9248_v58 = vld [vmem:[%s10316_s28 + $0xbf9] sm:$0xff]  ;;  %v9439_v0 = vld [vmem:[%s10316_s28 + $0x1c8] sm:$0xff] }
 0x64d   : > { %v7145_v32 = vpop.f32.mrf.mxu0  ;;  %v8072_v8 = vadd.f32 0.5, %v7944_v45  ;;  %v9440_v45 = vld [vmem:[%s10316_s28 + $0x1d0] sm:$0xff]  ;;  %v4307_v40 = vpack.c.bf16 %v9248_v58, %v9247_v13 }
 0x64e   : > { %v7430_v53 = vadd.f32 %v7143_v61, %v6586_v44  ;;  %v9631_v44 = vld [vmem:[%s10316_s28 + $0x6f0] sm:$0xff]  ;;  %v5152_v15 = vpack.c.bf16 %v9440_v45, %v9439_v0 }
 0x64f   : > { %v8200_v25 = vmul.f32 %v8072_v8, %v7560_v47  ;;  %v5996_v47 = vpack.c.bf16 %v9630_v1, %v9629_v7 }
 0x650   : > { %v7562_v37 = vadd.f32 %v12270_v27, %v7430_v53 }
 0x651   : > { %8329 = vst.msk [vmem:[%s12069_s17 + $0xa0] sm:$0xff] %vm8308_vm3, %v8200_v25  ;;  %v5456_v59 = vpop.f32.mrf.mxu2 }
 0x652   : > { %v6301_v38 = vpop.f32.mrf.mxu3  ;;  %v10033_v28 = vpop.eup %10032  ;;  %v7690_v55 = vmul.f32 0.5, %v7562_v37  ;;  %v5742_v54 = vadd.f32 %v5456_v59, %v4897_v3 }
 0x653   : > { %v4614_v33 = vpop.f32.mrf.mxu1  ;;  %v7945_v2 = vmul.f32 0.5, %v10033_v28 }
 0x654   : > { %10034 = vtanh.f32 %v7690_v55  ;;  %v6587_v50 = vadd.f32 %v6301_v38, %v5742_v54  ;;  %v4898_v60 = vadd.f32 %v4614_v33, %v11110_v56  ;;  %v6841_v38 = vpack.c.bf16 %v9824_v52, %v9823_v42 }
 0x655   : > { %v7148_v24 = vpop.f32.mrf.mxu0  ;;  %v8073_v51 = vadd.f32 0.5, %v7945_v2 }
 0x656   : > { %9353 = vmatmul.msk.bf16.gmra.mxu1 %vm571_vm2, %v4306_v41  ;;  %v7431_v36 = vadd.f32 %v7145_v32, %v6587_v50  ;;  %9545 = vmatmul.msk.bf16.gmra.mxu2 %vm571_vm2, %v5151_v10  ;;  %v9632_v32 = vld [vmem:[%s10316_s28 + $0x6f8] sm:$0xff] }
 0x657   : > { %9737 = vmatmul.msk.bf16.gmra.mxu3 %vm571_vm2, %v5996_v47  ;;  %v8201_v34 = vmul.f32 %v8073_v51, %v7561_v16 }
 0x658   : > { %9929 = vmatmul.msk.bf16.gmra.mxu0 %vm571_vm2, %v6840_v31  ;;  %v7563_v5 = vadd.f32 %v12270_v27, %v7431_v36 }
 0x659   : > { %8330 = vst.msk [vmem:[%s12069_s17 + $0xa8] sm:$0xff] %vm8308_vm3, %v8201_v34  ;;  %v5459_v20 = vpop.f32.mrf.mxu2 }
 0x65a   : > { %v6304_v6 = vpop.f32.mrf.mxu3  ;;  %v10035_v61 = vpop.eup %10034  ;;  %v7691_v18 = vmul.f32 0.5, %v7563_v5  ;;  %v5743_v12 = vadd.f32 %v5459_v20, %v4898_v60  ;;  %v9249_v20 = vld [vmem:[%s10316_s28 + $0xc09] sm:$0xff] }
 0x65b   : > { %v4616_v57 = vpop.f32.mrf.mxu1  ;;  %v7946_v16 = vmul.f32 0.5, %v10035_v61  ;;  %v9441_v61 = vld [vmem:[%s10316_s28 + $0x1e0] sm:$0xff] }
 0x65c   : > { %10036 = vtanh.f32 %v7691_v18  ;;  %v6588_v4 = vadd.f32 %v6304_v6, %v5743_v12  ;;  %v4899_v53 = vadd.f32 %v4616_v57, %v11121_v48  ;;  %v9250_v6 = vld [vmem:[%s10316_s28 + $0xc11] sm:$0xff]  ;;  %v9442_v12 = vld [vmem:[%s10316_s28 + $0x1e8] sm:$0xff] }
 0x65d   : > { %v7150_v26 = vpop.f32.mrf.mxu0  ;;  %v8074_v56 = vadd.f32 0.5, %v7946_v16  ;;  %v9633_v57 = vld [vmem:[%s10316_s28 + $0x708] sm:$0xff]  ;;  %v9634_v16 = vld [vmem:[%s10316_s28 + $0x710] sm:$0xff]  ;;  %v4308_v0 = vpack.c.bf16 %v9250_v6, %v9249_v20 }
 0x65e   : > { %v7432_v21 = vadd.f32 %v7148_v24, %v6588_v4 }
 0x65f   : > { %v8202_v35 = vmul.f32 %v8074_v56, %v7562_v37  ;;  %v5997_v37 = vpack.c.bf16 %v9632_v32, %v9631_v44  ;;  %v9825_v56 = vld [vmem:[%s10316_s28 + $0x1e1] sm:$0xff] }
 0x660   : > { %v7564_v8 = vadd.f32 %v12270_v27, %v7432_v21  ;;  %v9826_v21 = vld [vmem:[%s10316_s28 + $0x1e9] sm:$0xff] }
 0x661   : > { %8331 = vst.msk [vmem:[%s12069_s17 + $0xb0] sm:$0xff] %vm8308_vm3, %v8202_v35  ;;  %v5461_v23 = vpop.f32.mrf.mxu2  ;;  %v6842_v52 = vpack.c.bf16 %v9826_v21, %v9825_v56 }
 0x662   : > { %v6306_v25 = vpop.f32.mrf.mxu3  ;;  %v10037_v7 = vpop.eup %10036  ;;  %v7692_v1 = vmul.f32 0.5, %v7564_v8  ;;  %v5744_v3 = vadd.f32 %v5461_v23, %v4899_v53  ;;  %v5153_v53 = vpack.c.bf16 %v9442_v12, %v9441_v61 }
 0x663   : > { %v4619_v63 = vpop.f32.mrf.mxu1  ;;  %v7947_v59 = vmul.f32 0.5, %v10037_v7 }
 0x664   : > { %10038 = vtanh.f32 %v7692_v1  ;;  %v6589_v41 = vadd.f32 %v6306_v25, %v5744_v3  ;;  %v4900_v10 = vadd.f32 %v4619_v63, %v11128_v14 }
 0x665   : > { %v7153_v28 = vpop.f32.mrf.mxu0  ;;  %v8075_v48 = vadd.f32 0.5, %v7947_v59 }
 0x666   : > { %9354 = vmatmul.msk.bf16.gmra.mxu1 %vm571_vm2, %v4307_v40  ;;  %v7433_v55 = vadd.f32 %v7150_v26, %v6589_v41  ;;  %9546 = vmatmul.msk.bf16.gmra.mxu2 %vm571_vm2, %v5152_v15 }
 0x667   : > { %9738 = vmatmul.msk.bf16.gmra.mxu3 %vm571_vm2, %v5997_v37  ;;  %v8203_v54 = vmul.f32 %v8075_v48, %v7563_v5 }
 0x668   : > { %9930 = vmatmul.msk.bf16.gmra.mxu0 %vm571_vm2, %v6841_v38  ;;  %v7565_v33 = vadd.f32 %v12270_v27, %v7433_v55 }
 0x669   : > { %8332 = vst.msk [vmem:[%s12069_s17 + $0xb8] sm:$0xff] %vm8308_vm3, %v8203_v54  ;;  %v5464_v47 = vpop.f32.mrf.mxu2 }
 0x66a   : > { %v6309_v2 = vpop.f32.mrf.mxu3  ;;  %v10039_v31 = vpop.eup %10038  ;;  %v7693_v50 = vmul.f32 0.5, %v7565_v33  ;;  %v5745_v24 = vadd.f32 %v5464_v47, %v4900_v10  ;;  %v9252_v10 = vld [vmem:[%s10316_s28 + $0xc21] sm:$0xff]  ;;  %v9443_v47 = vld [vmem:[%s10316_s28 + $0x1f0] sm:$0xff] }
 0x66b   : > { %v4621_v51 = vpop.f32.mrf.mxu1  ;;  %v7948_v36 = vmul.f32 0.5, %v10039_v31  ;;  %v9444_v31 = vld [vmem:[%s10316_s28 + $0x1f8] sm:$0xff] }
 0x66c   : > { %10040 = vtanh.f32 %v7693_v50  ;;  %v6590_v34 = vadd.f32 %v6309_v2, %v5745_v24  ;;  %v4901_v26 = vadd.f32 %v4621_v51, %v11139_v49  ;;  %v9635_v50 = vld [vmem:[%s10316_s28 + $0x718] sm:$0xff]  ;;  %v9636_v24 = vld [vmem:[%s10316_s28 + $0x720] sm:$0xff] }
 0x66d   : > { %v7155_v5 = vpop.f32.mrf.mxu0  ;;  %v8076_v14 = vadd.f32 0.5, %v7948_v36 }
 0x66e   : > { %v7434_v60 = vadd.f32 %v7153_v28, %v6590_v34  ;;  %v9827_v34 = vld [vmem:[%s10316_s28 + $0x1f1] sm:$0xff] }
 0x66f   : > { %v8204_v18 = vmul.f32 %v8076_v14, %v7564_v8  ;;  %v5998_v8 = vpack.c.bf16 %v9634_v16, %v9633_v57  ;;  %v5154_v57 = vpack.c.bf16 %v9444_v31, %v9443_v47  ;;  %v5999_v16 = vpack.c.bf16 %v9636_v24, %v9635_v50 }
 0x670   : > { %v7566_v4 = vadd.f32 %v12270_v27, %v7434_v60 }
 0x671   : > { %8333 = vst.msk [vmem:[%s12069_s17 + $0xc0] sm:$0xff] %vm8308_vm3, %v8204_v18  ;;  %v5466_v13 = vpop.f32.mrf.mxu2 }
 0x672   : > { %v6311_v58 = vpop.f32.mrf.mxu3  ;;  %v10041_v35 = vpop.eup %10040  ;;  %v7694_v45 = vmul.f32 0.5, %v7566_v4  ;;  %v5746_v44 = vadd.f32 %v5466_v13, %v4901_v26 }
 0x673   : > { %v4624_v32 = vpop.f32.mrf.mxu1  ;;  %v7949_v42 = vmul.f32 0.5, %v10041_v35 }
 0x674   : > { %10042 = vtanh.f32 %v7694_v45  ;;  %v6591_v23 = vadd.f32 %v6311_v58, %v5746_v44  ;;  %v4902_v3 = vadd.f32 %v4624_v32, %v11146_v29 }
 0x675   : > { %v7158_v25 = vpop.f32.mrf.mxu0  ;;  %v8077_v49 = vadd.f32 0.5, %v7949_v42 }
 0x676   : > { %9355 = vmatmul.msk.bf16.gmra.mxu1 %vm571_vm2, %v4308_v0  ;;  %v7435_v40 = vadd.f32 %v7155_v5, %v6591_v23  ;;  %9547 = vmatmul.msk.bf16.gmra.mxu2 %vm571_vm2, %v5153_v53  ;;  %v9828_v5 = vld [vmem:[%s10316_s28 + $0x1f9] sm:$0xff] }
 0x677   : > { %9739 = vmatmul.msk.bf16.gmra.mxu3 %vm571_vm2, %v5998_v8  ;;  %v8205_v7 = vmul.f32 %v8077_v49, %v7565_v33  ;;  %v9251_v33 = vld [vmem:[%s10316_s28 + $0xc19] sm:$0xff]  ;;  %v6843_v26 = vpack.c.bf16 %v9828_v5, %v9827_v34 }
 0x678   : > { %9931 = vmatmul.msk.bf16.gmra.mxu0 %vm571_vm2, %v6842_v52  ;;  %v7567_v1 = vadd.f32 %v12270_v27, %v7435_v40  ;;  %v4309_v20 = vpack.c.bf16 %v9252_v10, %v9251_v33  ;;  %v9253_v40 = vld [vmem:[%s10316_s28 + $0xc31] sm:$0xff] }
 0x679   : > { %8334 = vst.msk [vmem:[%s12069_s17 + $0xc8] sm:$0xff] %vm8308_vm3, %v8205_v7  ;;  %v5469_v63 = vpop.f32.mrf.mxu2  ;;  %v9254_v7 = vld [vmem:[%s10316_s28 + $0xc39] sm:$0xff] }
 0x67a   : > { %v6314_v15 = vpop.f32.mrf.mxu3  ;;  %v10043_v37 = vpop.eup %10042  ;;  %v7695_v59 = vmul.f32 0.5, %v7567_v1  ;;  %v5747_v38 = vadd.f32 %v5469_v63, %v4902_v3  ;;  %v9446_v63 = vld [vmem:[%s10316_s28 + $0x210] sm:$0xff] }
 0x67b   : > { %v4626_v41 = vpop.f32.mrf.mxu1  ;;  %v7950_v28 = vmul.f32 0.5, %v10043_v37  ;;  %v9638_v37 = vld [vmem:[%s10316_s28 + $0x738] sm:$0xff] }
 0x67c   : > { %10044 = vtanh.f32 %v7695_v59  ;;  %v6592_v48 = vadd.f32 %v6314_v15, %v5747_v38  ;;  %v4903_v36 = vadd.f32 %v4626_v41, %v11157_v9  ;;  %v9637_v15 = vld [vmem:[%s10316_s28 + $0x730] sm:$0xff] }
 0x67d   : > { %v7160_v55 = vpop.f32.mrf.mxu0  ;;  %v8078_v29 = vadd.f32 0.5, %v7950_v28  ;;  %v9829_v41 = vld [vmem:[%s10316_s28 + $0x209] sm:$0xff]  ;;  %v9830_v28 = vld [vmem:[%s10316_s28 + $0x211] sm:$0xff]  ;;  %v6000_v31 = vpack.c.bf16 %v9638_v37, %v9637_v15 }
 0x67e   : > { %v7436_v54 = vadd.f32 %v7158_v25, %v6592_v48  ;;  %v6844_v24 = vpack.c.bf16 %v9830_v28, %v9829_v41 }
 0x67f   : > { %v8206_v2 = vmul.f32 %v8078_v29, %v7566_v4  ;;  %v4310_v29 = vpack.c.bf16 %v9254_v7, %v9253_v40 }
 0x680   : > { %v7568_v51 = vadd.f32 %v12270_v27, %v7436_v54 }
 0x681   : > { %8335 = vst.msk [vmem:[%s12069_s17 + $0xd0] sm:$0xff] %vm8308_vm3, %v8206_v2  ;;  %v5471_v14 = vpop.f32.mrf.mxu2 }
 0x682   : > { %v6316_v60 = vpop.f32.mrf.mxu3  ;;  %v10045_v6 = vpop.eup %10044  ;;  %v7696_v61 = vmul.f32 0.5, %v7568_v51  ;;  %v5748_v18 = vadd.f32 %v5471_v14, %v4903_v36 }
 0x683   : > { %v4629_v12 = vpop.f32.mrf.mxu1  ;;  %v7951_v4 = vmul.f32 0.5, %v10045_v6 }
 0x684   : > { %10046 = vtanh.f32 %v7696_v61  ;;  %v6593_v56 = vadd.f32 %v6316_v60, %v5748_v18  ;;  %v4904_v35 = vadd.f32 %v4629_v12, %v11164_v22 }
 0x685   : > { %v7163_v21 = vpop.f32.mrf.mxu0  ;;  %v8079_v9 = vadd.f32 0.5, %v7951_v4 }
 0x686   : > { %9356 = vmatmul.msk.bf16.gmra.mxu1 %vm571_vm2, %v4309_v20  ;;  %v7437_v13 = vadd.f32 %v7160_v55, %v6593_v56  ;;  %9548 = vmatmul.msk.bf16.gmra.mxu2 %vm571_vm2, %v5154_v57 }
 0x687   : > { %9740 = vmatmul.msk.bf16.gmra.mxu3 %vm571_vm2, %v5999_v16  ;;  %v8207_v58 = vmul.f32 %v8079_v9, %v7567_v1  ;;  %v9445_v1 = vld [vmem:[%s10316_s28 + $0x208] sm:$0xff] }
 0x688   : > { %9932 = vmatmul.msk.bf16.gmra.mxu0 %vm571_vm2, %v6843_v26  ;;  %v7569_v0 = vadd.f32 %v12270_v27, %v7437_v13  ;;  %v5155_v2 = vpack.c.bf16 %v9446_v63, %v9445_v1  ;;  %v9256_v9 = vld [vmem:[%s10316_s28 + $0xc49] sm:$0xff]  ;;  %v9447_v13 = vld [vmem:[%s10316_s28 + $0x218] sm:$0xff] }
 0x689   : > { %8336 = vst.msk [vmem:[%s12069_s17 + $0xd8] sm:$0xff] %vm8308_vm3, %v8207_v58  ;;  %v5474_v45 = vpop.f32.mrf.mxu2 }
 0x68a   : > { %v6319_v44 = vpop.f32.mrf.mxu3  ;;  %v10047_v32 = vpop.eup %10046  ;;  %v7697_v53 = vmul.f32 0.5, %v7569_v0  ;;  %v5749_v8 = vadd.f32 %v5474_v45, %v4904_v35  ;;  %v9639_v35 = vld [vmem:[%s10316_s28 + $0x740] sm:$0xff]  ;;  %v9640_v45 = vld [vmem:[%s10316_s28 + $0x748] sm:$0xff] }
 0x68b   : > { %v4631_v42 = vpop.f32.mrf.mxu1  ;;  %v7952_v52 = vmul.f32 0.5, %v10047_v32  ;;  %v6001_v1 = vpack.c.bf16 %v9640_v45, %v9639_v35 }
 0x68c   : > { %10048 = vtanh.f32 %v7697_v53  ;;  %v6594_v23 = vadd.f32 %v6319_v44, %v5749_v8  ;;  %v4905_v38 = vadd.f32 %v4631_v42, %v11175_v30  ;;  %v9831_v53 = vld [vmem:[%s10316_s28 + $0x219] sm:$0xff]  ;;  %v9832_v8 = vld [vmem:[%s10316_s28 + $0x221] sm:$0xff] }
 0x68d   : > { %v7165_v25 = vpop.f32.mrf.mxu0  ;;  %v8080_v22 = vadd.f32 0.5, %v7952_v52  ;;  %v6845_v63 = vpack.c.bf16 %v9832_v8, %v9831_v53 }
 0x68e   : > { %v7438_v49 = vadd.f32 %v7163_v21, %v6594_v23  ;;  %v9255_v21 = vld [vmem:[%s10316_s28 + $0xc41] sm:$0xff] }
 0x68f   : > { %v8208_v3 = vmul.f32 %v8080_v22, %v7568_v51  ;;  %v4311_v23 = vpack.c.bf16 %v9256_v9, %v9255_v21 }
 0x690   : > { %v7570_v59 = vadd.f32 %v12270_v27, %v7438_v49 }
 0x691   : > { %8337 = vst.msk [vmem:[%s12069_s17 + $0xe0] sm:$0xff] %vm8308_vm3, %v8208_v3  ;;  %v5476_v48 = vpop.f32.mrf.mxu2 }
 0x692   : > { %v6321_v55 = vpop.f32.mrf.mxu3  ;;  %v10049_v54 = vpop.eup %10048  ;;  %v7698_v33 = vmul.f32 0.5, %v7570_v59  ;;  %v5750_v10 = vadd.f32 %v5476_v48, %v4905_v38 }
 0x693   : > { %v4634_v47 = vpop.f32.mrf.mxu1  ;;  %v7953_v50 = vmul.f32 0.5, %v10049_v54 }
 0x694   : > { %10050 = vtanh.f32 %v7698_v33  ;;  %v6595_v51 = vadd.f32 %v6321_v55, %v5750_v10  ;;  %v4906_v60 = vadd.f32 %v4634_v47, %v11182_v43 }
 0x695   : > { %v7168_v36 = vpop.f32.mrf.mxu0  ;;  %v8081_v30 = vadd.f32 0.5, %v7953_v50 }
 0x696   : > { %9357 = vmatmul.msk.bf16.gmra.mxu1 %vm571_vm2, %v4310_v29  ;;  %v7439_v34 = vadd.f32 %v7165_v25, %v6595_v51  ;;  %9549 = vmatmul.msk.bf16.gmra.mxu2 %vm571_vm2, %v5155_v2  ;;  %v9258_v51 = vld [vmem:[%s10316_s28 + $0xc61] sm:$0xff] }
 0x697   : > { %9741 = vmatmul.msk.bf16.gmra.mxu3 %vm571_vm2, %v6000_v31  ;;  %v8209_v5 = vmul.f32 %v8081_v30, %v7569_v0  ;;  %v9448_v0 = vld [vmem:[%s10316_s28 + $0x220] sm:$0xff] }
 0x698   : > { %9933 = vmatmul.msk.bf16.gmra.mxu0 %vm571_vm2, %v6844_v24  ;;  %v7571_v14 = vadd.f32 %v12270_v27, %v7439_v34  ;;  %v5156_v7 = vpack.c.bf16 %v9448_v0, %v9447_v13  ;;  %v9257_v24 = vld [vmem:[%s10316_s28 + $0xc59] sm:$0xff] }
 0x699   : > { %8338 = vst.msk [vmem:[%s12069_s17 + $0xe8] sm:$0xff] %vm8308_vm3, %v8209_v5  ;;  %v5479_v20 = vpop.f32.mrf.mxu2  ;;  %v9450_v34 = vld [vmem:[%s10316_s28 + $0x238] sm:$0xff] }
 0x69a   : > { %v6324_v6 = vpop.f32.mrf.mxu3  ;;  %v10051_v61 = vpop.eup %10050  ;;  %v7699_v18 = vmul.f32 0.5, %v7571_v14  ;;  %v5751_v12 = vadd.f32 %v5479_v20, %v4906_v60  ;;  %v9641_v5 = vld [vmem:[%s10316_s28 + $0x758] sm:$0xff] }
 0x69b   : > { %v4636_v57 = vpop.f32.mrf.mxu1  ;;  %v7954_v16 = vmul.f32 0.5, %v10051_v61  ;;  %v9834_v61 = vld [vmem:[%s10316_s28 + $0x239] sm:$0xff] }
 0x69c   : > { %10052 = vtanh.f32 %v7699_v18  ;;  %v6596_v4 = vadd.f32 %v6324_v6, %v5751_v12  ;;  %v4907_v32 = vadd.f32 %v4636_v57, %v11193_v62  ;;  %v9833_v6 = vld [vmem:[%s10316_s28 + $0x231] sm:$0xff]  ;;  %v4312_v57 = vpack.c.bf16 %v9258_v51, %v9257_v24 }
 0x69d   : > { %v7170_v26 = vpop.f32.mrf.mxu0  ;;  %v8082_v43 = vadd.f32 0.5, %v7954_v16  ;;  %v6846_v13 = vpack.c.bf16 %v9834_v61, %v9833_v6 }
 0x69e   : > { %v7440_v56 = vadd.f32 %v7168_v36, %v6596_v4  ;;  %v9449_v36 = vld [vmem:[%s10316_s28 + $0x230] sm:$0xff] }
 0x69f   : > { %v8210_v58 = vmul.f32 %v8082_v43, %v7570_v59 }
 0x6a0   : > { %v7572_v44 = vadd.f32 %v12270_v27, %v7440_v56  ;;  %v5157_v56 = vpack.c.bf16 %v9450_v34, %v9449_v36 }
 0x6a1   : > { %8339 = vst.msk [vmem:[%s12069_s17 + $0xf0] sm:$0xff] %vm8308_vm3, %v8210_v58  ;;  %v5481_v42 = vpop.f32.mrf.mxu2 }
 0x6a2   : > { %v6326_v52 = vpop.f32.mrf.mxu3  ;;  %v10053_v25 = vpop.eup %10052  ;;  %v7700_v22 = vmul.f32 0.5, %v7572_v44  ;;  %v5752_v49 = vadd.f32 %v5481_v42, %v4907_v32 }
 0x6a3   : > { %v4639_v40 = vpop.f32.mrf.mxu1  ;;  %v7955_v3 = vmul.f32 0.5, %v10053_v25 }
 0x6a4   : > { %10054 = vtanh.f32 %v7700_v22  ;;  %v6597_v15 = vadd.f32 %v6326_v52, %v5752_v49  ;;  %v4908_v28 = vadd.f32 %v4639_v40, %v11200_v11 }
 0x6a5   : > { %v7173_v37 = vpop.f32.mrf.mxu0  ;;  %v8083_v62 = vadd.f32 0.5, %v7955_v3  ;;  %v9260_v3 = vld [vmem:[%s10316_s28 + $0xc71] sm:$0xff] }
 0x6a6   : > { %9358 = vmatmul.msk.bf16.gmra.mxu1 %vm571_vm2, %v4311_v23  ;;  %v7441_v59 = vadd.f32 %v7170_v26, %v6597_v15  ;;  %9550 = vmatmul.msk.bf16.gmra.mxu2 %vm571_vm2, %v5156_v7 }
 0x6a7   : > { %9742 = vmatmul.msk.bf16.gmra.mxu3 %vm571_vm2, %v6001_v1  ;;  %v8211_v38 = vmul.f32 %v8083_v62, %v7571_v14  ;;  %v9642_v14 = vld [vmem:[%s10316_s28 + $0x760] sm:$0xff]  ;;  %v9259_v1 = vld [vmem:[%s10316_s28 + $0xc69] sm:$0xff] }
 0x6a8   : > { %9934 = vmatmul.msk.bf16.gmra.mxu0 %vm571_vm2, %v6845_v63  ;;  %v7573_v41 = vadd.f32 %v12270_v27, %v7441_v59  ;;  %v6002_v21 = vpack.c.bf16 %v9642_v14, %v9641_v5  ;;  %v9451_v63 = vld [vmem:[%s10316_s28 + $0x240] sm:$0xff]  ;;  %v9643_v62 = vld [vmem:[%s10316_s28 + $0x768] sm:$0xff]  ;;  %v9644_v59 = vld [vmem:[%s10316_s28 + $0x770] sm:$0xff] }
 0x6a9   : > { %8340 = vst.msk [vmem:[%s12069_s17 + $0xf8] sm:$0xff] %vm8308_vm3, %v8211_v38  ;;  %v5484_v48 = vpop.f32.mrf.mxu2 }
 0x6aa   : > { %v6329_v55 = vpop.f32.mrf.mxu3  ;;  %v10055_v29 = vpop.eup %10054  ;;  %v7701_v54 = vmul.f32 0.5, %v7573_v41  ;;  %v5753_v33 = vadd.f32 %v5484_v48, %v4908_v28  ;;  %v9835_v28 = vld [vmem:[%s10316_s28 + $0x241] sm:$0xff]  ;;  %v9836_v48 = vld [vmem:[%s10316_s28 + $0x249] sm:$0xff] }
 0x6ab   : > { %v4641_v10 = vpop.f32.mrf.mxu1  ;;  %v7956_v47 = vmul.f32 0.5, %v10055_v29  ;;  %v6847_v24 = vpack.c.bf16 %v9836_v48, %v9835_v28 }
 0x6ac   : > { %10056 = vtanh.f32 %v7701_v54  ;;  %v6598_v2 = vadd.f32 %v6329_v55, %v5753_v33  ;;  %v4909_v20 = vadd.f32 %v4641_v10, %v11211_v19  ;;  %v4313_v54 = vpack.c.bf16 %v9260_v3, %v9259_v1 }
 0x6ad   : > { %v7175_v31 = vpop.f32.mrf.mxu0  ;;  %v8084_v11 = vadd.f32 0.5, %v7956_v47 }
 0x6ae   : > { %v7442_v50 = vadd.f32 %v7173_v37, %v6598_v2  ;;  %v9452_v37 = vld [vmem:[%s10316_s28 + $0x248] sm:$0xff] }
 0x6af   : > { %v8212_v30 = vmul.f32 %v8084_v11, %v7572_v44  ;;  %v6003_v11 = vpack.c.bf16 %v9644_v59, %v9643_v62  ;;  %v13520_v59 = vld [vmem:[#allocation89_spill] sm:$0xff] }
 0x6b0   : > { %v7574_v60 = vadd.f32 %v12270_v27, %v7442_v50 }
 0x6b1   : > { %8341 = vst.msk [vmem:[%s12069_s17 + $0x100] sm:$0xff] %vm8308_vm3, %v8212_v30  ;;  %v5486_v18 = vpop.f32.mrf.mxu2 }
 0x6b2   : > { %v6331_v12 = vpop.f32.mrf.mxu3  ;;  %v10057_v16 = vpop.eup %10056  ;;  %v7702_v4 = vmul.f32 0.5, %v7574_v60  ;;  %v5754_v26 = vadd.f32 %v5486_v18, %v4909_v20 }
 0x6b3   : > { %v4644_v43 = vpop.f32.mrf.mxu1  ;;  %v7957_v9 = vmul.f32 0.5, %v10057_v16 }
 0x6b4   : > { %10058 = vtanh.f32 %v7702_v4  ;;  %v6599_v58 = vadd.f32 %v6331_v12, %v5754_v26  ;;  %v4910_v32 = vadd.f32 %v4644_v43, %v11218_v46  ;;  %v9261_v43 = vld [vmem:[%s10316_s28 + $0xc81] sm:$0xff] }
 0x6b5   : > { %v7178_v0 = vpop.f32.mrf.mxu0  ;;  %v8085_v19 = vadd.f32 0.5, %v7957_v9 }
 0x6b6   : > { %9359 = vmatmul.msk.bf16.gmra.mxu1 %vm571_vm2, %v4312_v57  ;;  %v7443_v35 = vadd.f32 %v7175_v31, %v6599_v58  ;;  %9551 = vmatmul.msk.bf16.gmra.mxu2 %vm571_vm2, %v5157_v56  ;;  %v5158_v31 = vpack.c.bf16 %v9452_v37, %v9451_v63  ;;  %v9262_v56 = vld [vmem:[%s10316_s28 + $0xc89] sm:$0xff]  ;;  %v9645_v58 = vld [vmem:[%s10316_s28 + $0x780] sm:$0xff] }
 0x6b7   : > { %9743 = vmatmul.msk.bf16.gmra.mxu3 %vm571_vm2, %v6002_v21  ;;  %v8213_v45 = vmul.f32 %v8085_v19, %v7573_v41  ;;  %v9453_v21 = vld [vmem:[%s10316_s28 + $0x258] sm:$0xff] }
 0x6b8   : > { %9935 = vmatmul.msk.bf16.gmra.mxu0 %vm571_vm2, %v6846_v13  ;;  %v7575_v44 = vadd.f32 %v12270_v27, %v7443_v35  ;;  %v9454_v13 = vld [vmem:[%s10316_s28 + $0x260] sm:$0xff]  ;;  %v13519_v35 = vld [vmem:[#allocation88_spill] sm:$0xff] }
 0x6b9   : > { %8342 = vst.msk [vmem:[%s12069_s17 + $0x108] sm:$0xff] %vm8308_vm3, %v8213_v45  ;;  %v5489_v53 = vpop.f32.mrf.mxu2 }
 0x6ba   : > { %v6334_v8 = vpop.f32.mrf.mxu3  ;;  %v10059_v42 = vpop.eup %10058  ;;  %v7703_v52 = vmul.f32 0.5, %v7575_v44  ;;  %v5755_v23 = vadd.f32 %v5489_v53, %v4910_v32  ;;  %v9838_v32 = vld [vmem:[%s10316_s28 + $0x261] sm:$0xff] }
 0x6bb   : > { %v4646_v25 = vpop.f32.mrf.mxu1  ;;  %v7958_v22 = vmul.f32 0.5, %v10059_v42  ;;  %v4314_v42 = vpack.c.bf16 %v9262_v56, %v9261_v43 }
 0x6bc   : > { %10060 = vtanh.f32 %v7703_v52  ;;  %v6600_v49 = vadd.f32 %v6334_v8, %v5755_v23  ;;  %v4911_v41 = vadd.f32 %v4646_v25, %v11229_v39 }
 0x6bd   : > { %v7180_v40 = vpop.f32.mrf.mxu0  ;;  %v8086_v46 = vadd.f32 0.5, %v7958_v22 }
 0x6be   : > { %v7444_v7 = vadd.f32 %v7178_v0, %v6600_v49  ;;  %v9646_v0 = vld [vmem:[%s10316_s28 + $0x788] sm:$0xff]  ;;  %v5159_v49 = vpack.c.bf16 %v9454_v13, %v9453_v21 }
 0x6bf   : > { %v8214_v15 = vmul.f32 %v8086_v46, %v7574_v60 }
 0x6c0   : > { %v7576_v38 = vadd.f32 %v12270_v27, %v7444_v7 }
 0x6c1   : > { %8343 = vst.msk [vmem:[%s12069_s17 + $0x110] sm:$0xff] %vm8308_vm3, %v8214_v15  ;;  %v5491_v55 = vpop.f32.mrf.mxu2 }
 0x6c2   : > { %v6336_v29 = vpop.f32.mrf.mxu3  ;;  %v10061_v33 = vpop.eup %10060  ;;  %v7704_v10 = vmul.f32 0.5, %v7576_v38  ;;  %v5756_v47 = vadd.f32 %v5491_v55, %v4911_v41 }
 0x6c3   : > { %v4649_v2 = vpop.f32.mrf.mxu1  ;;  %v7959_v50 = vmul.f32 0.5, %v10061_v33 }
 0x6c4   : > { %10062 = vtanh.f32 %v7704_v10  ;;  %v6601_v51 = vadd.f32 %v6336_v29, %v5756_v47  ;;  %v4912_v14 = vadd.f32 %v4649_v2, %v11236_v17 }
 0x6c5   : > { %v7183_v36 = vpop.f32.mrf.mxu0  ;;  %v8087_v39 = vadd.f32 0.5, %v7959_v50  ;;  %v9264_v50 = vld [vmem:[%s10316_s28 + $0xc99] sm:$0xff] }
 0x6c6   : > { %9360 = vmatmul.msk.bf16.gmra.mxu1 %vm571_vm2, %v4313_v54  ;;  %v7445_v30 = vadd.f32 %v7180_v40, %v6601_v51  ;;  %9552 = vmatmul.msk.bf16.gmra.mxu2 %vm571_vm2, %v5158_v31  ;;  %v6004_v40 = vpack.c.bf16 %v9646_v0, %v9645_v58 }
 0x6c7   : > { %9744 = vmatmul.msk.bf16.gmra.mxu3 %vm571_vm2, %v6003_v11  ;;  %v8215_v34 = vmul.f32 %v8087_v39, %v7575_v44  ;;  %v9837_v44 = vld [vmem:[%s10316_s28 + $0x259] sm:$0xff]  ;;  %v9263_v11 = vld [vmem:[%s10316_s28 + $0xc91] sm:$0xff] }
 0x6c8   : > { %9936 = vmatmul.msk.bf16.gmra.mxu0 %vm571_vm2, %v6847_v24  ;;  %v7577_v5 = vadd.f32 %v12270_v27, %v7445_v30  ;;  %v6848_v7 = vpack.c.bf16 %v9838_v32, %v9837_v44  ;;  %v9455_v24 = vld [vmem:[%s10316_s28 + $0x268] sm:$0xff]  ;;  %v9647_v39 = vld [vmem:[%s10316_s28 + $0x790] sm:$0xff]  ;;  %v9648_v30 = vld [vmem:[%s10316_s28 + $0x798] sm:$0xff] }
 0x6c9   : > { %8344 = vst.msk [vmem:[%s12069_s17 + $0x118] sm:$0xff] %vm8308_vm3, %v8215_v34  ;;  %v5494_v60 = vpop.f32.mrf.mxu2 }
 0x6ca   : > { %v6339_v20 = vpop.f32.mrf.mxu3  ;;  %v10063_v6 = vpop.eup %10062  ;;  %v7705_v61 = vmul.f32 0.5, %v7577_v5  ;;  %v5757_v18 = vadd.f32 %v5494_v60, %v4912_v14  ;;  %v9839_v60 = vld [vmem:[%s10316_s28 + $0x269] sm:$0xff] }
 0x6cb   : > { %v4651_v12 = vpop.f32.mrf.mxu1  ;;  %v7960_v57 = vmul.f32 0.5, %v10063_v6 }
 0x6cc   : > { %10064 = vtanh.f32 %v7705_v61  ;;  %v6602_v16 = vadd.f32 %v6339_v20, %v5757_v18  ;;  %v4913_v45 = vadd.f32 %v4651_v12, %v13519_v35  ;;  %v9840_v20 = vld [vmem:[%s10316_s28 + $0x271] sm:$0xff]  ;;  %v4315_v18 = vpack.c.bf16 %v9264_v50, %v9263_v11  ;;  %v13522_v35 = vld [vmem:[#allocation22_spill] sm:$0xff] }
 0x6cd   : > { %v7185_v4 = vpop.f32.mrf.mxu0  ;;  %v8088_v17 = vadd.f32 0.5, %v7960_v57  ;;  %v6849_v56 = vpack.c.bf16 %v9840_v20, %v9839_v60 }
 0x6ce   : > { %v7446_v26 = vadd.f32 %v7183_v36, %v6602_v16  ;;  %v9456_v36 = vld [vmem:[%s10316_s28 + $0x270] sm:$0xff] }
 0x6cf   : > { %v8216_v9 = vmul.f32 %v8088_v17, %v7576_v38  ;;  %v5160_v17 = vpack.c.bf16 %v9456_v36, %v9455_v24 }
 0x6d0   : > { %v7578_v19 = vadd.f32 %v12270_v27, %v7446_v26  ;;  %v6005_v26 = vpack.c.bf16 %v9648_v30, %v9647_v39  ;;  %v12495_v30 = vld [vmem:[%s13256_s2] ss:$0 sm:$0xff] }
 0x6d1   : > { %8345 = vst.msk [vmem:[%s12069_s17 + $0x120] sm:$0xff] %vm8308_vm3, %v8216_v9  ;;  %v5496_v53 = vpop.f32.mrf.mxu2 }
 0x6d2   : > { %v6341_v8 = vpop.f32.mrf.mxu3  ;;  %v10065_v52 = vpop.eup %10064  ;;  %v7706_v23 = vmul.f32 0.5, %v7578_v19  ;;  %v5758_v25 = vadd.f32 %v5496_v53, %v4913_v45 }
 0x6d3   : > { %v4654_v22 = vpop.f32.mrf.mxu1  ;;  %v7961_v46 = vmul.f32 0.5, %v10065_v52 }
 0x6d4   : > { %10066 = vtanh.f32 %v7706_v23  ;;  %v6603_v1 = vadd.f32 %v6341_v8, %v5758_v25  ;;  %v4914_v38 = vadd.f32 %v4654_v22, %v13520_v59  ;;  %v13523_v59 = vld [vmem:[#allocation25_spill] sm:$0xff] }
 0x6d5   : > { %v7188_v3 = vpop.f32.mrf.mxu0  ;;  %v8089_v63 = vadd.f32 0.5, %v7961_v46  ;;  %v9265_v46 = vld [vmem:[%s10316_s28 + $0xca9] sm:$0xff] }
 0x6d6   : > { %9361 = vmatmul.msk.bf16.gmra.mxu1 %vm571_vm2, %v4314_v42  ;;  %v7447_v15 = vadd.f32 %v7185_v4, %v6603_v1  ;;  %9553 = vmatmul.msk.bf16.gmra.mxu2 %vm571_vm2, %v5159_v49  ;;  %v9457_v1 = vld [vmem:[%s10316_s28 + $0x280] sm:$0xff] }
 0x6d7   : > { %9745 = vmatmul.msk.bf16.gmra.mxu3 %vm571_vm2, %v6004_v40  ;;  %v8217_v37 = vmul.f32 %v8089_v63, %v7577_v5  ;;  %v13521_v5 = vld [vmem:[#allocation90_spill] sm:$0xff]  ;;  %v9458_v63 = vld [vmem:[%s10316_s28 + $0x288] sm:$0xff] }
 0x6d8   : > { %9937 = vmatmul.msk.bf16.gmra.mxu0 %vm571_vm2, %v6848_v7  ;;  %v7579_v62 = vadd.f32 %v12270_v27, %v7447_v15  ;;  %v9266_v7 = vld [vmem:[%s10316_s28 + $0xcb1] sm:$0xff]  ;;  %v9649_v15 = vld [vmem:[%s10316_s28 + $0x7a8] sm:$0xff] }
 0x6d9   : > { %8346 = vst.msk [vmem:[%s12069_s17 + $0x128] sm:$0xff] %vm8308_vm3, %v8217_v37  ;;  %v5499_v41 = vpop.f32.mrf.mxu2  ;;  %v9650_v37 = vld [vmem:[%s10316_s28 + $0x7b0] sm:$0xff] }
 0x6da   : > { %v6344_v28 = vpop.f32.mrf.mxu3  ;;  %v10067_v48 = vpop.eup %10066  ;;  %v7707_v55 = vmul.f32 0.5, %v7579_v62  ;;  %v5759_v29 = vadd.f32 %v5499_v41, %v4914_v38  ;;  %v9841_v41 = vld [vmem:[%s10316_s28 + $0x281] sm:$0xff] }
 0x6db   : > { %v4656_v54 = vpop.f32.mrf.mxu1  ;;  %v7962_v33 = vmul.f32 0.5, %v10067_v48 }
 0x6dc   : > { %10068 = vtanh.f32 %v7707_v55  ;;  %v6604_v10 = vadd.f32 %v6344_v28, %v5759_v29  ;;  %v4915_v14 = vadd.f32 %v4656_v54, %v13521_v5  ;;  %v9842_v28 = vld [vmem:[%s10316_s28 + $0x289] sm:$0xff]  ;;  %v4316_v29 = vpack.c.bf16 %v9266_v7, %v9265_v46 }
 0x6dd   : > { %v7190_v47 = vpop.f32.mrf.mxu0  ;;  %v8090_v2 = vadd.f32 0.5, %v7962_v33  ;;  %v6850_v50 = vpack.c.bf16 %v9842_v28, %v9841_v41  ;;  %v13524_v5 = vld [vmem:[#allocation28_spill] sm:$0xff] }
 0x6de   : > { %v7448_v31 = vadd.f32 %v7188_v3, %v6604_v10 }
 0x6df   : > { %v8218_v51 = vmul.f32 %v8090_v2, %v7578_v19  ;;  %v5161_v2 = vpack.c.bf16 %v9458_v63, %v9457_v1 }
 0x6e0   : > { %v7580_v34 = vadd.f32 %v12270_v27, %v7448_v31  ;;  %v6006_v31 = vpack.c.bf16 %v9650_v37, %v9649_v15 }
 0x6e1   : > { %8347 = vst.msk [vmem:[%s12069_s17 + $0x130] sm:$0xff] %vm8308_vm3, %v8218_v51  ;;  %v5501_v6 = vpop.f32.mrf.mxu2 }
 0x6e2   : > { %v6346_v61 = vpop.f32.mrf.mxu3  ;;  %v10069_v12 = vpop.eup %10068  ;;  %v7708_v57 = vmul.f32 0.5, %v7580_v34  ;;  %v5760_v16 = vadd.f32 %v5501_v6, %v4915_v14 }
 0x6e3   : > { %v4659_v4 = vpop.f32.mrf.mxu1  ;;  %v7963_v43 = vmul.f32 0.5, %v10069_v12 }
 0x6e4   : > { %10070 = vtanh.f32 %v7708_v57  ;;  %v6605_v21 = vadd.f32 %v6346_v61, %v5760_v16  ;;  %v4916_v45 = vadd.f32 %v4659_v4, %v13522_v35  ;;  %v13525_v35 = vld [vmem:[#allocation31_spill] sm:$0xff] }
 0x6e5   : > { %v7193_v9 = vpop.f32.mrf.mxu0  ;;  %v8091_v13 = vadd.f32 0.5, %v7963_v43  ;;  %v9267_v43 = vld [vmem:[%s10316_s28 + $0xcb9] sm:$0xff] }
 0x6e6   : > { %9362 = vmatmul.msk.bf16.gmra.mxu1 %vm571_vm2, %v4315_v18  ;;  %v7449_v58 = vadd.f32 %v7190_v47, %v6605_v21  ;;  %9554 = vmatmul.msk.bf16.gmra.mxu2 %vm571_vm2, %v5160_v17  ;;  %v9459_v21 = vld [vmem:[%s10316_s28 + $0x290] sm:$0xff] }
 0x6e7   : > { %9746 = vmatmul.msk.bf16.gmra.mxu3 %vm571_vm2, %v6005_v26  ;;  %v8219_v0 = vmul.f32 %v8091_v13, %v7579_v62  ;;  %v9460_v13 = vld [vmem:[%s10316_s28 + $0x298] sm:$0xff] }
 0x6e8   : > { %9938 = vmatmul.msk.bf16.gmra.mxu0 %vm571_vm2, %v6849_v56  ;;  %v7581_v19 = vadd.f32 %v12270_v27, %v7449_v58  ;;  %v9268_v56 = vld [vmem:[%s10316_s28 + $0xcc1] sm:$0xff]  ;;  %v9651_v58 = vld [vmem:[%s10316_s28 + $0x7b8] sm:$0xff] }
 0x6e9   : > { %8348 = vst.msk [vmem:[%s12069_s17 + $0x138] sm:$0xff] %vm8308_vm3, %v8219_v0  ;;  %v5504_v44 = vpop.f32.mrf.mxu2  ;;  %v9652_v0 = vld [vmem:[%s10316_s28 + $0x7c0] sm:$0xff] }
 0x6ea   : > { %v6349_v32 = vpop.f32.mrf.mxu3  ;;  %v10071_v53 = vpop.eup %10070  ;;  %v7709_v8 = vmul.f32 0.5, %v7581_v19  ;;  %v5761_v42 = vadd.f32 %v5504_v44, %v4916_v45  ;;  %v9843_v44 = vld [vmem:[%s10316_s28 + $0x291] sm:$0xff] }
 0x6eb   : > { %v4661_v52 = vpop.f32.mrf.mxu1  ;;  %v7964_v23 = vmul.f32 0.5, %v10071_v53 }
 0x6ec   : > { %10072 = vtanh.f32 %v7709_v8  ;;  %v6606_v25 = vadd.f32 %v6349_v32, %v5761_v42  ;;  %v4917_v38 = vadd.f32 %v4661_v52, %v13523_v59  ;;  %v9844_v32 = vld [vmem:[%s10316_s28 + $0x299] sm:$0xff]  ;;  %v4317_v42 = vpack.c.bf16 %v9268_v56, %v9267_v43 }
 0x6ed   : > { %v7195_v22 = vpop.f32.mrf.mxu0  ;;  %v8092_v49 = vadd.f32 0.5, %v7964_v23  ;;  %v6851_v7 = vpack.c.bf16 %v9844_v32, %v9843_v44  ;;  %v13526_v59 = vld [vmem:[#allocation34_spill] sm:$0xff] }
 0x6ee   : > { %v7450_v40 = vadd.f32 %v7193_v9, %v6606_v25 }
 0x6ef   : > { %v8220_v3 = vmul.f32 %v8092_v49, %v7580_v34  ;;  %v5162_v49 = vpack.c.bf16 %v9460_v13, %v9459_v21 }
 0x6f0   : > { %v7582_v62 = vadd.f32 %v12270_v27, %v7450_v40  ;;  %v6007_v40 = vpack.c.bf16 %v9652_v0, %v9651_v58 }
 0x6f1   : > { %8349 = vst.msk [vmem:[%s12069_s17 + $0x140] sm:$0xff] %vm8308_vm3, %v8220_v3  ;;  %v5506_v48 = vpop.f32.mrf.mxu2 }
 0x6f2   : > { %v6351_v55 = vpop.f32.mrf.mxu3  ;;  %v10073_v54 = vpop.eup %10072  ;;  %v7710_v33 = vmul.f32 0.5, %v7582_v62  ;;  %v5762_v10 = vadd.f32 %v5506_v48, %v4917_v38 }
 0x6f3   : > { %v4664_v47 = vpop.f32.mrf.mxu1  ;;  %v7965_v11 = vmul.f32 0.5, %v10073_v54 }
 0x6f4   : > { %10074 = vtanh.f32 %v7710_v33  ;;  %v6607_v27 = vadd.f32 %v6351_v55, %v5762_v10  ;;  %v4918_v14 = vadd.f32 %v4664_v47, %v13524_v5  ;;  %v13527_v5 = vld [vmem:[#allocation37_spill] sm:$0xff] }
 0x6f5   : > { %v7198_v24 = vpop.f32.mrf.mxu0  ;;  %v8093_v51 = vadd.f32 0.5, %v7965_v11  ;;  %v9269_v11 = vld [vmem:[%s10316_s28 + $0xcd1] sm:$0xff] }
 0x6f6   : > { %9363 = vmatmul.msk.bf16.gmra.mxu1 %vm571_vm2, %v4316_v29  ;;  %v7451_v36 = vadd.f32 %v7195_v22, %v6607_v27  ;;  %9555 = vmatmul.msk.bf16.gmra.mxu2 %vm571_vm2, %v5161_v2  ;;  %v9461_v27 = vld [vmem:[%s10316_s28 + $0x2a8] sm:$0xff] }
 0x6f7   : > { %9747 = vmatmul.msk.bf16.gmra.mxu3 %vm571_vm2, %v6006_v31  ;;  %v8221_v39 = vmul.f32 %v8093_v51, %v7581_v19  ;;  %v9462_v51 = vld [vmem:[%s10316_s28 + $0x2b0] sm:$0xff] }
 0x6f8   : > { %9939 = vmatmul.msk.bf16.gmra.mxu0 %vm571_vm2, %v6850_v50  ;;  %v7583_v34 = vadd.f32 %v12495_v30, %v7451_v36  ;;  %v9270_v50 = vld [vmem:[%s10316_s28 + $0xcd9] sm:$0xff]  ;;  %v9653_v36 = vld [vmem:[%s10316_s28 + $0x7d0] sm:$0xff] }
 0x6f9   : > { %8350 = vst.msk [vmem:[%s12069_s17 + $0x148] sm:$0xff] %vm8308_vm3, %v8221_v39  ;;  %v5509_v60 = vpop.f32.mrf.mxu2  ;;  %v9654_v39 = vld [vmem:[%s10316_s28 + $0x7d8] sm:$0xff] }
 0x6fa   : > { %v6354_v20 = vpop.f32.mrf.mxu3  ;;  %v10075_v6 = vpop.eup %10074  ;;  %v7711_v61 = vmul.f32 0.5, %v7583_v34  ;;  %v5763_v18 = vadd.f32 %v5509_v60, %v4918_v14  ;;  %v9845_v60 = vld [vmem:[%s10316_s28 + $0x2a9] sm:$0xff] }
 0x6fb   : > { %v4666_v12 = vpop.f32.mrf.mxu1  ;;  %v7966_v57 = vmul.f32 0.5, %v10075_v6 }
 0x6fc   : > { %10076 = vtanh.f32 %v7711_v61  ;;  %v6608_v16 = vadd.f32 %v6354_v20, %v5763_v18  ;;  %v4919_v45 = vadd.f32 %v4666_v12, %v13525_v35  ;;  %v9846_v20 = vld [vmem:[%s10316_s28 + $0x2b1] sm:$0xff]  ;;  %v4318_v18 = vpack.c.bf16 %v9270_v50, %v9269_v11 }
 0x6fd   : > { %v7200_v4 = vpop.f32.mrf.mxu0  ;;  %v8094_v17 = vadd.f32 0.5, %v7966_v57  ;;  %v6852_v56 = vpack.c.bf16 %v9846_v20, %v9845_v60  ;;  %v13528_v35 = vld [vmem:[#allocation40_spill] sm:$0xff] }
 0x6fe   : > { %v7452_v26 = vadd.f32 %v7198_v24, %v6608_v16 }
 0x6ff   : > { %v8222_v9 = vmul.f32 %v8094_v17, %v7582_v62  ;;  %v5163_v17 = vpack.c.bf16 %v9462_v51, %v9461_v27 }
 0x700   : > { %v7584_v19 = vadd.f32 %v12495_v30, %v7452_v26  ;;  %v6008_v26 = vpack.c.bf16 %v9654_v39, %v9653_v36 }
 0x701   : > { %8351 = vst.msk [vmem:[%s12069_s17 + $0x150] sm:$0xff] %vm8308_vm3, %v8222_v9  ;;  %v5511_v53 = vpop.f32.mrf.mxu2 }
 0x702   : > { %v6356_v8 = vpop.f32.mrf.mxu3  ;;  %v10077_v52 = vpop.eup %10076  ;;  %v7712_v23 = vmul.f32 0.5, %v7584_v19  ;;  %v5764_v25 = vadd.f32 %v5511_v53, %v4919_v45 }
 0x703   : > { %v4669_v22 = vpop.f32.mrf.mxu1  ;;  %v7967_v46 = vmul.f32 0.5, %v10077_v52 }
 0x704   : > { %10078 = vtanh.f32 %v7712_v23  ;;  %v6609_v1 = vadd.f32 %v6356_v8, %v5764_v25  ;;  %v4920_v38 = vadd.f32 %v4669_v22, %v13526_v59  ;;  %v13529_v59 = vld [vmem:[#allocation43_spill] sm:$0xff] }
 0x705   : > { %v7203_v3 = vpop.f32.mrf.mxu0  ;;  %v8095_v63 = vadd.f32 0.5, %v7967_v46  ;;  %v9271_v46 = vld [vmem:[%s10316_s28 + $0xce1] sm:$0xff] }
 0x706   : > { %9364 = vmatmul.msk.bf16.gmra.mxu1 %vm571_vm2, %v4317_v42  ;;  %v7453_v15 = vadd.f32 %v7200_v4, %v6609_v1  ;;  %9556 = vmatmul.msk.bf16.gmra.mxu2 %vm571_vm2, %v5162_v49  ;;  %v9463_v1 = vld [vmem:[%s10316_s28 + $0x2b8] sm:$0xff] }
 0x707   : > { %9748 = vmatmul.msk.bf16.gmra.mxu3 %vm571_vm2, %v6007_v40  ;;  %v8223_v37 = vmul.f32 %v8095_v63, %v7583_v34  ;;  %v9464_v63 = vld [vmem:[%s10316_s28 + $0x2c0] sm:$0xff] }
 0x708   : > { %9940 = vmatmul.msk.bf16.gmra.mxu0 %vm571_vm2, %v6851_v7  ;;  %v7585_v62 = vadd.f32 %v12495_v30, %v7453_v15  ;;  %v9272_v7 = vld [vmem:[%s10316_s28 + $0xce9] sm:$0xff]  ;;  %v9655_v15 = vld [vmem:[%s10316_s28 + $0x7e0] sm:$0xff] }
 0x709   : > { %8352 = vst.msk [vmem:[%s12069_s17 + $0x158] sm:$0xff] %vm8308_vm3, %v8223_v37  ;;  %v5514_v41 = vpop.f32.mrf.mxu2  ;;  %v9656_v37 = vld [vmem:[%s10316_s28 + $0x7e8] sm:$0xff] }
 0x70a   : > { %v6359_v28 = vpop.f32.mrf.mxu3  ;;  %v10079_v48 = vpop.eup %10078  ;;  %v7713_v55 = vmul.f32 0.5, %v7585_v62  ;;  %v5765_v29 = vadd.f32 %v5514_v41, %v4920_v38  ;;  %v9847_v41 = vld [vmem:[%s10316_s28 + $0x2b9] sm:$0xff] }
 0x70b   : > { %v4671_v54 = vpop.f32.mrf.mxu1  ;;  %v7968_v33 = vmul.f32 0.5, %v10079_v48 }
 0x70c   : > { %10080 = vtanh.f32 %v7713_v55  ;;  %v6610_v10 = vadd.f32 %v6359_v28, %v5765_v29  ;;  %v4921_v14 = vadd.f32 %v4671_v54, %v13527_v5  ;;  %v9848_v28 = vld [vmem:[%s10316_s28 + $0x2c1] sm:$0xff]  ;;  %v4319_v29 = vpack.c.bf16 %v9272_v7, %v9271_v46 }
 0x70d   : > { %v7205_v47 = vpop.f32.mrf.mxu0  ;;  %v8096_v2 = vadd.f32 0.5, %v7968_v33  ;;  %v6853_v50 = vpack.c.bf16 %v9848_v28, %v9847_v41  ;;  %v13530_v5 = vld [vmem:[#allocation46_spill] sm:$0xff] }
 0x70e   : > { %v7454_v31 = vadd.f32 %v7203_v3, %v6610_v10 }
 0x70f   : > { %v8224_v24 = vmul.f32 %v8096_v2, %v7584_v19  ;;  %v5164_v2 = vpack.c.bf16 %v9464_v63, %v9463_v1 }
 0x710   : > { %v7586_v34 = vadd.f32 %v12495_v30, %v7454_v31  ;;  %v6009_v31 = vpack.c.bf16 %v9656_v37, %v9655_v15 }
 0x711   : > { %8353 = vst.msk [vmem:[%s12069_s17 + $0x160] sm:$0xff] %vm8308_vm3, %v8224_v24  ;;  %v5516_v6 = vpop.f32.mrf.mxu2 }
 0x712   : > { %v6361_v61 = vpop.f32.mrf.mxu3  ;;  %v10081_v12 = vpop.eup %10080  ;;  %v7714_v57 = vmul.f32 0.5, %v7586_v34  ;;  %v5766_v16 = vadd.f32 %v5516_v6, %v4921_v14 }
 0x713   : > { %v4674_v4 = vpop.f32.mrf.mxu1  ;;  %v7969_v43 = vmul.f32 0.5, %v10081_v12 }
 0x714   : > { %10082 = vtanh.f32 %v7714_v57  ;;  %v6611_v21 = vadd.f32 %v6361_v61, %v5766_v16  ;;  %v4922_v45 = vadd.f32 %v4674_v4, %v13528_v35  ;;  %v13531_v35 = vld [vmem:[#allocation49_spill] sm:$0xff] }
 0x715   : > { %v7208_v9 = vpop.f32.mrf.mxu0  ;;  %v8097_v13 = vadd.f32 0.5, %v7969_v43  ;;  %v9273_v43 = vld [vmem:[%s10316_s28 + $0xcf9] sm:$0xff] }
 0x716   : > { %9365 = vmatmul.msk.bf16.gmra.mxu1 %vm571_vm2, %v4318_v18  ;;  %v7455_v58 = vadd.f32 %v7205_v47, %v6611_v21  ;;  %9557 = vmatmul.msk.bf16.gmra.mxu2 %vm571_vm2, %v5163_v17  ;;  %v9465_v21 = vld [vmem:[%s10316_s28 + $0x2d0] sm:$0xff] }
 0x717   : > { %9749 = vmatmul.msk.bf16.gmra.mxu3 %vm571_vm2, %v6008_v26  ;;  %v8225_v0 = vmul.f32 %v8097_v13, %v7585_v62  ;;  %v9466_v13 = vld [vmem:[%s10316_s28 + $0x2d8] sm:$0xff] }
 0x718   : > { %9941 = vmatmul.msk.bf16.gmra.mxu0 %vm571_vm2, %v6852_v56  ;;  %v7587_v19 = vadd.f32 %v12495_v30, %v7455_v58  ;;  %v9274_v56 = vld [vmem:[%s10316_s28 + $0xd01] sm:$0xff]  ;;  %v9657_v58 = vld [vmem:[%s10316_s28 + $0x7f8] sm:$0xff] }
 0x719   : > { %8354 = vst.msk [vmem:[%s12069_s17 + $0x168] sm:$0xff] %vm8308_vm3, %v8225_v0  ;;  %v5519_v44 = vpop.f32.mrf.mxu2  ;;  %v9658_v0 = vld [vmem:[%s10316_s28 + $0x800] sm:$0xff] }
 0x71a   : > { %v6364_v32 = vpop.f32.mrf.mxu3  ;;  %v10083_v53 = vpop.eup %10082  ;;  %v7715_v8 = vmul.f32 0.5, %v7587_v19  ;;  %v5767_v42 = vadd.f32 %v5519_v44, %v4922_v45  ;;  %v9849_v44 = vld [vmem:[%s10316_s28 + $0x2d1] sm:$0xff] }
 0x71b   : > { %v4676_v52 = vpop.f32.mrf.mxu1  ;;  %v7970_v23 = vmul.f32 0.5, %v10083_v53 }
 0x71c   : > { %10084 = vtanh.f32 %v7715_v8  ;;  %v6612_v25 = vadd.f32 %v6364_v32, %v5767_v42  ;;  %v4923_v38 = vadd.f32 %v4676_v52, %v13529_v59  ;;  %v9850_v32 = vld [vmem:[%s10316_s28 + $0x2d9] sm:$0xff]  ;;  %v4320_v42 = vpack.c.bf16 %v9274_v56, %v9273_v43  ;;  %v13532_v59 = vld [vmem:[#allocation52_spill] sm:$0xff] }
 0x71d   : > { %v7210_v22 = vpop.f32.mrf.mxu0  ;;  %v8098_v49 = vadd.f32 0.5, %v7970_v23  ;;  %v6854_v7 = vpack.c.bf16 %v9850_v32, %v9849_v44 }
 0x71e   : > { %v7456_v40 = vadd.f32 %v7208_v9, %v6612_v25 }
 0x71f   : > { %v8226_v3 = vmul.f32 %v8098_v49, %v7586_v34  ;;  %v5165_v49 = vpack.c.bf16 %v9466_v13, %v9465_v21 }
 0x720   : > { %v7588_v62 = vadd.f32 %v12495_v30, %v7456_v40  ;;  %v6010_v40 = vpack.c.bf16 %v9658_v0, %v9657_v58 }
 0x721   : > { %8355 = vst.msk [vmem:[%s12069_s17 + $0x170] sm:$0xff] %vm8308_vm3, %v8226_v3  ;;  %v5521_v48 = vpop.f32.mrf.mxu2 }
 0x722   : > { %v6366_v55 = vpop.f32.mrf.mxu3  ;;  %v10085_v54 = vpop.eup %10084  ;;  %v7716_v33 = vmul.f32 0.5, %v7588_v62  ;;  %v5768_v10 = vadd.f32 %v5521_v48, %v4923_v38 }
 0x723   : > { %v4679_v47 = vpop.f32.mrf.mxu1  ;;  %v7971_v11 = vmul.f32 0.5, %v10085_v54 }
 0x724   : > { %10086 = vtanh.f32 %v7716_v33  ;;  %v6613_v27 = vadd.f32 %v6366_v55, %v5768_v10  ;;  %v4924_v14 = vadd.f32 %v4679_v47, %v13530_v5  ;;  %v13533_v5 = vld [vmem:[#allocation55_spill] sm:$0xff] }
 0x725   : > { %v7213_v24 = vpop.f32.mrf.mxu0  ;;  %v8099_v51 = vadd.f32 0.5, %v7971_v11  ;;  %v9275_v11 = vld [vmem:[%s10316_s28 + $0xd09] sm:$0xff] }
 0x726   : > { %9366 = vmatmul.msk.bf16.gmra.mxu1 %vm571_vm2, %v4319_v29  ;;  %v7457_v36 = vadd.f32 %v7210_v22, %v6613_v27  ;;  %9558 = vmatmul.msk.bf16.gmra.mxu2 %vm571_vm2, %v5164_v2  ;;  %v9467_v27 = vld [vmem:[%s10316_s28 + $0x2e0] sm:$0xff] }
 0x727   : > { %9750 = vmatmul.msk.bf16.gmra.mxu3 %vm571_vm2, %v6009_v31  ;;  %v8227_v39 = vmul.f32 %v8099_v51, %v7587_v19  ;;  %v9468_v51 = vld [vmem:[%s10316_s28 + $0x2e8] sm:$0xff] }
 0x728   : > { %9942 = vmatmul.msk.bf16.gmra.mxu0 %vm571_vm2, %v6853_v50  ;;  %v7589_v34 = vadd.f32 %v12495_v30, %v7457_v36  ;;  %v9276_v50 = vld [vmem:[%s10316_s28 + $0xd11] sm:$0xff]  ;;  %v9659_v36 = vld [vmem:[%s10316_s28 + $0x808] sm:$0xff] }
 0x729   : > { %8356 = vst.msk [vmem:[%s12069_s17 + $0x178] sm:$0xff] %vm8308_vm3, %v8227_v39  ;;  %v5524_v60 = vpop.f32.mrf.mxu2  ;;  %v9660_v39 = vld [vmem:[%s10316_s28 + $0x810] sm:$0xff] }
 0x72a   : > { %v6369_v20 = vpop.f32.mrf.mxu3  ;;  %v10087_v6 = vpop.eup %10086  ;;  %v7717_v61 = vmul.f32 0.5, %v7589_v34  ;;  %v5769_v18 = vadd.f32 %v5524_v60, %v4924_v14  ;;  %v9851_v60 = vld [vmem:[%s10316_s28 + $0x2e1] sm:$0xff] }
 0x72b   : > { %v4681_v12 = vpop.f32.mrf.mxu1  ;;  %v7972_v57 = vmul.f32 0.5, %v10087_v6 }
 0x72c   : > { %10088 = vtanh.f32 %v7717_v61  ;;  %v6614_v16 = vadd.f32 %v6369_v20, %v5769_v18  ;;  %v4925_v45 = vadd.f32 %v4681_v12, %v13531_v35  ;;  %v9852_v20 = vld [vmem:[%s10316_s28 + $0x2e9] sm:$0xff]  ;;  %v4321_v18 = vpack.c.bf16 %v9276_v50, %v9275_v11  ;;  %v13534_v35 = vld [vmem:[#allocation58_spill] sm:$0xff] }
 0x72d   : > { %v7215_v4 = vpop.f32.mrf.mxu0  ;;  %v8100_v17 = vadd.f32 0.5, %v7972_v57  ;;  %v6855_v56 = vpack.c.bf16 %v9852_v20, %v9851_v60 }
 0x72e   : > { %v7458_v26 = vadd.f32 %v7213_v24, %v6614_v16 }
 0x72f   : > { %v8228_v9 = vmul.f32 %v8100_v17, %v7588_v62  ;;  %v5166_v17 = vpack.c.bf16 %v9468_v51, %v9467_v27 }
 0x730   : > { %v7590_v19 = vadd.f32 %v12495_v30, %v7458_v26  ;;  %v6011_v26 = vpack.c.bf16 %v9660_v39, %v9659_v36 }
 0x731   : > { %8357 = vst.msk [vmem:[%s12069_s17 + $0x180] sm:$0xff] %vm8308_vm3, %v8228_v9  ;;  %v5526_v53 = vpop.f32.mrf.mxu2 }
 0x732   : > { %v6371_v8 = vpop.f32.mrf.mxu3  ;;  %v10089_v52 = vpop.eup %10088  ;;  %v7718_v23 = vmul.f32 0.5, %v7590_v19  ;;  %v5770_v25 = vadd.f32 %v5526_v53, %v4925_v45 }
 0x733   : > { %v4684_v22 = vpop.f32.mrf.mxu1  ;;  %v7973_v46 = vmul.f32 0.5, %v10089_v52 }
 0x734   : > { %10090 = vtanh.f32 %v7718_v23  ;;  %v6615_v1 = vadd.f32 %v6371_v8, %v5770_v25  ;;  %v4926_v38 = vadd.f32 %v4684_v22, %v13532_v59  ;;  %v13535_v59 = vld [vmem:[#allocation61_spill] sm:$0xff] }
 0x735   : > { %v7218_v3 = vpop.f32.mrf.mxu0  ;;  %v8101_v63 = vadd.f32 0.5, %v7973_v46  ;;  %v9277_v46 = vld [vmem:[%s10316_s28 + $0xd21] sm:$0xff] }
 0x736   : > { %9367 = vmatmul.msk.bf16.gmra.mxu1 %vm571_vm2, %v4320_v42  ;;  %v7459_v15 = vadd.f32 %v7215_v4, %v6615_v1  ;;  %9559 = vmatmul.msk.bf16.gmra.mxu2 %vm571_vm2, %v5165_v49  ;;  %v9469_v1 = vld [vmem:[%s10316_s28 + $0x2f8] sm:$0xff] }
 0x737   : > { %9751 = vmatmul.msk.bf16.gmra.mxu3 %vm571_vm2, %v6010_v40  ;;  %v8229_v37 = vmul.f32 %v8101_v63, %v7589_v34  ;;  %v9470_v63 = vld [vmem:[%s10316_s28 + $0x300] sm:$0xff] }
 0x738   : > { %9943 = vmatmul.msk.bf16.gmra.mxu0 %vm571_vm2, %v6854_v7  ;;  %v7591_v62 = vadd.f32 %v12495_v30, %v7459_v15  ;;  %v9278_v7 = vld [vmem:[%s10316_s28 + $0xd29] sm:$0xff]  ;;  %v9661_v15 = vld [vmem:[%s10316_s28 + $0x820] sm:$0xff] }
 0x739   : > { %8358 = vst.msk [vmem:[%s12069_s17 + $0x188] sm:$0xff] %vm8308_vm3, %v8229_v37  ;;  %v5529_v41 = vpop.f32.mrf.mxu2  ;;  %v9662_v37 = vld [vmem:[%s10316_s28 + $0x828] sm:$0xff] }
 0x73a   : > { %v6374_v28 = vpop.f32.mrf.mxu3  ;;  %v10091_v48 = vpop.eup %10090  ;;  %v7719_v55 = vmul.f32 0.5, %v7591_v62  ;;  %v5771_v29 = vadd.f32 %v5529_v41, %v4926_v38  ;;  %v9853_v41 = vld [vmem:[%s10316_s28 + $0x2f9] sm:$0xff] }
 0x73b   : > { %v4686_v54 = vpop.f32.mrf.mxu1  ;;  %v7974_v33 = vmul.f32 0.5, %v10091_v48 }
 0x73c   : > { %10092 = vtanh.f32 %v7719_v55  ;;  %v6616_v10 = vadd.f32 %v6374_v28, %v5771_v29  ;;  %v4927_v14 = vadd.f32 %v4686_v54, %v13533_v5  ;;  %v9854_v28 = vld [vmem:[%s10316_s28 + $0x301] sm:$0xff]  ;;  %v4322_v29 = vpack.c.bf16 %v9278_v7, %v9277_v46  ;;  %v13536_v5 = vld [vmem:[#allocation64_spill] sm:$0xff] }
 0x73d   : > { %v7220_v47 = vpop.f32.mrf.mxu0  ;;  %v8102_v2 = vadd.f32 0.5, %v7974_v33  ;;  %v6856_v50 = vpack.c.bf16 %v9854_v28, %v9853_v41 }
 0x73e   : > { %v7460_v31 = vadd.f32 %v7218_v3, %v6616_v10 }
 0x73f   : > { %v8230_v24 = vmul.f32 %v8102_v2, %v7590_v19  ;;  %v5167_v2 = vpack.c.bf16 %v9470_v63, %v9469_v1 }
 0x740   : > { %v7592_v34 = vadd.f32 %v12495_v30, %v7460_v31  ;;  %v6012_v31 = vpack.c.bf16 %v9662_v37, %v9661_v15 }
 0x741   : > { %8359 = vst.msk [vmem:[%s12069_s17 + $0x190] sm:$0xff] %vm8308_vm3, %v8230_v24  ;;  %v5531_v6 = vpop.f32.mrf.mxu2 }
 0x742   : > { %v6376_v61 = vpop.f32.mrf.mxu3  ;;  %v10093_v12 = vpop.eup %10092  ;;  %v7720_v57 = vmul.f32 0.5, %v7592_v34  ;;  %v5772_v16 = vadd.f32 %v5531_v6, %v4927_v14 }
 0x743   : > { %v4689_v4 = vpop.f32.mrf.mxu1  ;;  %v7975_v43 = vmul.f32 0.5, %v10093_v12 }
 0x744   : > { %10094 = vtanh.f32 %v7720_v57  ;;  %v6617_v21 = vadd.f32 %v6376_v61, %v5772_v16  ;;  %v4928_v45 = vadd.f32 %v4689_v4, %v13534_v35  ;;  %v13537_v35 = vld [vmem:[#allocation67_spill] sm:$0xff] }
 0x745   : > { %v7223_v9 = vpop.f32.mrf.mxu0  ;;  %v8103_v13 = vadd.f32 0.5, %v7975_v43  ;;  %v9279_v43 = vld [vmem:[%s10316_s28 + $0xd31] sm:$0xff] }
 0x746   : > { %9368 = vmatmul.msk.bf16.gmra.mxu1 %vm571_vm2, %v4321_v18  ;;  %v7461_v58 = vadd.f32 %v7220_v47, %v6617_v21  ;;  %9560 = vmatmul.msk.bf16.gmra.mxu2 %vm571_vm2, %v5166_v17  ;;  %v9471_v21 = vld [vmem:[%s10316_s28 + $0x308] sm:$0xff] }
 0x747   : > { %9752 = vmatmul.msk.bf16.gmra.mxu3 %vm571_vm2, %v6011_v26  ;;  %v8231_v0 = vmul.f32 %v8103_v13, %v7591_v62  ;;  %v9472_v13 = vld [vmem:[%s10316_s28 + $0x310] sm:$0xff] }
 0x748   : > { %9944 = vmatmul.msk.bf16.gmra.mxu0 %vm571_vm2, %v6855_v56  ;;  %v7593_v19 = vadd.f32 %v12495_v30, %v7461_v58  ;;  %v9280_v56 = vld [vmem:[%s10316_s28 + $0xd39] sm:$0xff]  ;;  %v9663_v58 = vld [vmem:[%s10316_s28 + $0x830] sm:$0xff] }
 0x749   : > { %8360 = vst.msk [vmem:[%s12069_s17 + $0x198] sm:$0xff] %vm8308_vm3, %v8231_v0  ;;  %v5534_v44 = vpop.f32.mrf.mxu2  ;;  %v9664_v0 = vld [vmem:[%s10316_s28 + $0x838] sm:$0xff] }
 0x74a   : > { %v6379_v32 = vpop.f32.mrf.mxu3  ;;  %v10095_v53 = vpop.eup %10094  ;;  %v7721_v8 = vmul.f32 0.5, %v7593_v19  ;;  %v5773_v42 = vadd.f32 %v5534_v44, %v4928_v45  ;;  %v9855_v44 = vld [vmem:[%s10316_s28 + $0x309] sm:$0xff] }
 0x74b   : > { %v4691_v52 = vpop.f32.mrf.mxu1  ;;  %v7976_v23 = vmul.f32 0.5, %v10095_v53 }
 0x74c   : > { %10096 = vtanh.f32 %v7721_v8  ;;  %v6618_v25 = vadd.f32 %v6379_v32, %v5773_v42  ;;  %v4929_v38 = vadd.f32 %v4691_v52, %v13535_v59  ;;  %v9856_v32 = vld [vmem:[%s10316_s28 + $0x311] sm:$0xff]  ;;  %v4323_v42 = vpack.c.bf16 %v9280_v56, %v9279_v43  ;;  %v13538_v59 = vld [vmem:[#allocation70_spill] sm:$0xff] }
 0x74d   : > { %v7225_v22 = vpop.f32.mrf.mxu0  ;;  %v8104_v49 = vadd.f32 0.5, %v7976_v23  ;;  %v6857_v7 = vpack.c.bf16 %v9856_v32, %v9855_v44 }
 0x74e   : > { %v7462_v40 = vadd.f32 %v7223_v9, %v6618_v25 }
 0x74f   : > { %v8232_v3 = vmul.f32 %v8104_v49, %v7592_v34  ;;  %v5168_v49 = vpack.c.bf16 %v9472_v13, %v9471_v21 }
 0x750   : > { %v7594_v62 = vadd.f32 %v12495_v30, %v7462_v40  ;;  %v6013_v40 = vpack.c.bf16 %v9664_v0, %v9663_v58 }
 0x751   : > { %8361 = vst.msk [vmem:[%s12069_s17 + $0x1a0] sm:$0xff] %vm8308_vm3, %v8232_v3  ;;  %v5536_v48 = vpop.f32.mrf.mxu2 }
 0x752   : > { %v6381_v55 = vpop.f32.mrf.mxu3  ;;  %v10097_v54 = vpop.eup %10096  ;;  %v7722_v33 = vmul.f32 0.5, %v7594_v62  ;;  %v5774_v10 = vadd.f32 %v5536_v48, %v4929_v38 }
 0x753   : > { %v4694_v47 = vpop.f32.mrf.mxu1  ;;  %v7977_v11 = vmul.f32 0.5, %v10097_v54 }
 0x754   : > { %10098 = vtanh.f32 %v7722_v33  ;;  %v6619_v27 = vadd.f32 %v6381_v55, %v5774_v10  ;;  %v4930_v14 = vadd.f32 %v4694_v47, %v13536_v5  ;;  %v13539_v5 = vld [vmem:[#allocation73_spill] sm:$0xff] }
 0x755   : > { %v7228_v24 = vpop.f32.mrf.mxu0  ;;  %v8105_v51 = vadd.f32 0.5, %v7977_v11  ;;  %v9281_v11 = vld [vmem:[%s10316_s28 + $0xd49] sm:$0xff] }
 0x756   : > { %9369 = vmatmul.msk.bf16.gmra.mxu1 %vm571_vm2, %v4322_v29  ;;  %v7463_v36 = vadd.f32 %v7225_v22, %v6619_v27  ;;  %9561 = vmatmul.msk.bf16.gmra.mxu2 %vm571_vm2, %v5167_v2  ;;  %v9473_v27 = vld [vmem:[%s10316_s28 + $0x320] sm:$0xff] }
 0x757   : > { %9753 = vmatmul.msk.bf16.gmra.mxu3 %vm571_vm2, %v6012_v31  ;;  %v8233_v39 = vmul.f32 %v8105_v51, %v7593_v19  ;;  %v9474_v51 = vld [vmem:[%s10316_s28 + $0x328] sm:$0xff] }
 0x758   : > { %9945 = vmatmul.msk.bf16.gmra.mxu0 %vm571_vm2, %v6856_v50  ;;  %v7595_v34 = vadd.f32 %v12495_v30, %v7463_v36  ;;  %v9282_v50 = vld [vmem:[%s10316_s28 + $0xd51] sm:$0xff]  ;;  %v9665_v36 = vld [vmem:[%s10316_s28 + $0x848] sm:$0xff] }
 0x759   : > { %8362 = vst.msk [vmem:[%s12069_s17 + $0x1a8] sm:$0xff] %vm8308_vm3, %v8233_v39  ;;  %v5539_v60 = vpop.f32.mrf.mxu2  ;;  %v9666_v39 = vld [vmem:[%s10316_s28 + $0x850] sm:$0xff] }
 0x75a   : > { %v6384_v20 = vpop.f32.mrf.mxu3  ;;  %v10099_v6 = vpop.eup %10098  ;;  %v7723_v61 = vmul.f32 0.5, %v7595_v34  ;;  %v5775_v18 = vadd.f32 %v5539_v60, %v4930_v14  ;;  %v9857_v60 = vld [vmem:[%s10316_s28 + $0x321] sm:$0xff] }
 0x75b   : > { %v4696_v12 = vpop.f32.mrf.mxu1  ;;  %v7978_v57 = vmul.f32 0.5, %v10099_v6 }
 0x75c   : > { %10100 = vtanh.f32 %v7723_v61  ;;  %v6620_v16 = vadd.f32 %v6384_v20, %v5775_v18  ;;  %v4931_v45 = vadd.f32 %v4696_v12, %v13537_v35  ;;  %v9858_v20 = vld [vmem:[%s10316_s28 + $0x329] sm:$0xff]  ;;  %v4324_v18 = vpack.c.bf16 %v9282_v50, %v9281_v11 }
 0x75d   : > { %v7230_v4 = vpop.f32.mrf.mxu0  ;;  %v8106_v17 = vadd.f32 0.5, %v7978_v57  ;;  %v6858_v56 = vpack.c.bf16 %v9858_v20, %v9857_v60  ;;  %v13540_v35 = vld [vmem:[#allocation76_spill] sm:$0xff] }
 0x75e   : > { %v7464_v26 = vadd.f32 %v7228_v24, %v6620_v16 }
 0x75f   : > { %v8234_v9 = vmul.f32 %v8106_v17, %v7594_v62  ;;  %v5169_v17 = vpack.c.bf16 %v9474_v51, %v9473_v27 }
 0x760   : > { %v7596_v19 = vadd.f32 %v12495_v30, %v7464_v26  ;;  %v6014_v26 = vpack.c.bf16 %v9666_v39, %v9665_v36 }
 0x761   : > { %8363 = vst.msk [vmem:[%s12069_s17 + $0x1b0] sm:$0xff] %vm8308_vm3, %v8234_v9  ;;  %v5541_v53 = vpop.f32.mrf.mxu2 }
 0x762   : > { %v6386_v8 = vpop.f32.mrf.mxu3  ;;  %v10101_v52 = vpop.eup %10100  ;;  %v7724_v23 = vmul.f32 0.5, %v7596_v19  ;;  %v5776_v25 = vadd.f32 %v5541_v53, %v4931_v45 }
 0x763   : > { %v4699_v22 = vpop.f32.mrf.mxu1  ;;  %v7979_v46 = vmul.f32 0.5, %v10101_v52 }
 0x764   : > { %10102 = vtanh.f32 %v7724_v23  ;;  %v6621_v1 = vadd.f32 %v6386_v8, %v5776_v25  ;;  %v4932_v38 = vadd.f32 %v4699_v22, %v13538_v59  ;;  %v13541_v59 = vld [vmem:[#allocation79_spill] sm:$0xff] }
 0x765   : > { %v7233_v3 = vpop.f32.mrf.mxu0  ;;  %v8107_v63 = vadd.f32 0.5, %v7979_v46  ;;  %v9283_v46 = vld [vmem:[%s10316_s28 + $0xd59] sm:$0xff] }
 0x766   : > { %9370 = vmatmul.msk.bf16.gmra.mxu1 %vm571_vm2, %v4323_v42  ;;  %v7465_v15 = vadd.f32 %v7230_v4, %v6621_v1  ;;  %9562 = vmatmul.msk.bf16.gmra.mxu2 %vm571_vm2, %v5168_v49  ;;  %v9475_v1 = vld [vmem:[%s10316_s28 + $0x330] sm:$0xff] }
 0x767   : > { %9754 = vmatmul.msk.bf16.gmra.mxu3 %vm571_vm2, %v6013_v40  ;;  %v8235_v37 = vmul.f32 %v8107_v63, %v7595_v34  ;;  %v9476_v63 = vld [vmem:[%s10316_s28 + $0x338] sm:$0xff] }
 0x768   : > { %9946 = vmatmul.msk.bf16.gmra.mxu0 %vm571_vm2, %v6857_v7  ;;  %v7597_v62 = vadd.f32 %v12495_v30, %v7465_v15  ;;  %v9284_v7 = vld [vmem:[%s10316_s28 + $0xd61] sm:$0xff]  ;;  %v9667_v15 = vld [vmem:[%s10316_s28 + $0x858] sm:$0xff] }
 0x769   : > { %8364 = vst.msk [vmem:[%s12069_s17 + $0x1b8] sm:$0xff] %vm8308_vm3, %v8235_v37  ;;  %v5544_v41 = vpop.f32.mrf.mxu2  ;;  %v9668_v37 = vld [vmem:[%s10316_s28 + $0x860] sm:$0xff] }
 0x76a   : > { %v6389_v28 = vpop.f32.mrf.mxu3  ;;  %v10103_v48 = vpop.eup %10102  ;;  %v7725_v55 = vmul.f32 0.5, %v7597_v62  ;;  %v5777_v29 = vadd.f32 %v5544_v41, %v4932_v38  ;;  %v9859_v41 = vld [vmem:[%s10316_s28 + $0x331] sm:$0xff] }
 0x76b   : > { %v4701_v54 = vpop.f32.mrf.mxu1  ;;  %v7980_v33 = vmul.f32 0.5, %v10103_v48 }
 0x76c   : > { %10104 = vtanh.f32 %v7725_v55  ;;  %v6622_v10 = vadd.f32 %v6389_v28, %v5777_v29  ;;  %v4933_v14 = vadd.f32 %v4701_v54, %v13539_v5  ;;  %v9860_v28 = vld [vmem:[%s10316_s28 + $0x339] sm:$0xff]  ;;  %v4325_v29 = vpack.c.bf16 %v9284_v7, %v9283_v46 }
 0x76d   : > { %v7235_v47 = vpop.f32.mrf.mxu0  ;;  %v8108_v2 = vadd.f32 0.5, %v7980_v33  ;;  %v6859_v50 = vpack.c.bf16 %v9860_v28, %v9859_v41  ;;  %v13542_v5 = vld [vmem:[#allocation82_spill] sm:$0xff] }
 0x76e   : > { %v7466_v31 = vadd.f32 %v7233_v3, %v6622_v10 }
 0x76f   : > { %v8236_v24 = vmul.f32 %v8108_v2, %v7596_v19  ;;  %v5170_v2 = vpack.c.bf16 %v9476_v63, %v9475_v1 }
 0x770   : > { %v7598_v34 = vadd.f32 %v12495_v30, %v7466_v31  ;;  %v6015_v31 = vpack.c.bf16 %v9668_v37, %v9667_v15 }
 0x771   : > { %8365 = vst.msk [vmem:[%s12069_s17 + $0x1c0] sm:$0xff] %vm8308_vm3, %v8236_v24  ;;  %v5546_v6 = vpop.f32.mrf.mxu2 }
 0x772   : > { %v6391_v61 = vpop.f32.mrf.mxu3  ;;  %v10105_v12 = vpop.eup %10104  ;;  %v7726_v57 = vmul.f32 0.5, %v7598_v34  ;;  %v5778_v16 = vadd.f32 %v5546_v6, %v4933_v14 }
 0x773   : > { %v4704_v4 = vpop.f32.mrf.mxu1  ;;  %v7981_v43 = vmul.f32 0.5, %v10105_v12 }
 0x774   : > { %10106 = vtanh.f32 %v7726_v57  ;;  %v6623_v21 = vadd.f32 %v6391_v61, %v5778_v16  ;;  %v4934_v45 = vadd.f32 %v4704_v4, %v13540_v35  ;;  %v13543_v35 = vld [vmem:[#allocation85_spill] sm:$0xff] }
 0x775   : > { %v7238_v9 = vpop.f32.mrf.mxu0  ;;  %v8109_v13 = vadd.f32 0.5, %v7981_v43  ;;  %v9285_v43 = vld [vmem:[%s10316_s28 + $0xd71] sm:$0xff] }
 0x776   : > { %9371 = vmatmul.msk.bf16.gmra.mxu1 %vm571_vm2, %v4324_v18  ;;  %v7467_v58 = vadd.f32 %v7235_v47, %v6623_v21  ;;  %9563 = vmatmul.msk.bf16.gmra.mxu2 %vm571_vm2, %v5169_v17  ;;  %v9477_v21 = vld [vmem:[%s10316_s28 + $0x348] sm:$0xff] }
 0x777   : > { %9755 = vmatmul.msk.bf16.gmra.mxu3 %vm571_vm2, %v6014_v26  ;;  %v8237_v0 = vmul.f32 %v8109_v13, %v7597_v62  ;;  %v9478_v13 = vld [vmem:[%s10316_s28 + $0x350] sm:$0xff] }
 0x778   : > { %9947 = vmatmul.msk.bf16.gmra.mxu0 %vm571_vm2, %v6858_v56  ;;  %v7599_v19 = vadd.f32 %v12495_v30, %v7467_v58  ;;  %v9286_v56 = vld [vmem:[%s10316_s28 + $0xd79] sm:$0xff]  ;;  %v9669_v58 = vld [vmem:[%s10316_s28 + $0x870] sm:$0xff] }
 0x779   : > { %8366 = vst.msk [vmem:[%s12069_s17 + $0x1c8] sm:$0xff] %vm8308_vm3, %v8237_v0  ;;  %v5549_v44 = vpop.f32.mrf.mxu2  ;;  %v9670_v0 = vld [vmem:[%s10316_s28 + $0x878] sm:$0xff] }
 0x77a   : > { %v6394_v32 = vpop.f32.mrf.mxu3  ;;  %v10107_v53 = vpop.eup %10106  ;;  %v7727_v8 = vmul.f32 0.5, %v7599_v19  ;;  %v5779_v42 = vadd.f32 %v5549_v44, %v4934_v45  ;;  %v9861_v44 = vld [vmem:[%s10316_s28 + $0x349] sm:$0xff] }
 0x77b   : > { %v4706_v52 = vpop.f32.mrf.mxu1  ;;  %v7982_v23 = vmul.f32 0.5, %v10107_v53 }
 0x77c   : > { %10108 = vtanh.f32 %v7727_v8  ;;  %v6624_v25 = vadd.f32 %v6394_v32, %v5779_v42  ;;  %v4935_v38 = vadd.f32 %v4706_v52, %v13541_v59  ;;  %v9862_v32 = vld [vmem:[%s10316_s28 + $0x351] sm:$0xff]  ;;  %v4326_v42 = vpack.c.bf16 %v9286_v56, %v9285_v43  ;;  %v13544_v59 = vld [vmem:[#allocation2_spill] sm:$0xff] }
 0x77d   : > { %v7240_v22 = vpop.f32.mrf.mxu0  ;;  %v8110_v49 = vadd.f32 0.5, %v7982_v23  ;;  %v6860_v7 = vpack.c.bf16 %v9862_v32, %v9861_v44 }
 0x77e   : > { %v7468_v40 = vadd.f32 %v7238_v9, %v6624_v25 }
 0x77f   : > { %v8238_v3 = vmul.f32 %v8110_v49, %v7598_v34  ;;  %v5171_v49 = vpack.c.bf16 %v9478_v13, %v9477_v21 }
 0x780   : > { %v7600_v62 = vadd.f32 %v12495_v30, %v7468_v40  ;;  %v6016_v40 = vpack.c.bf16 %v9670_v0, %v9669_v58  ;;  %v12720_v0 = vld [vmem:[%s13256_s2] ss:$0 sm:$0xff] }
 0x781   : > { %8367 = vst.msk [vmem:[%s12069_s17 + $0x1d0] sm:$0xff] %vm8308_vm3, %v8238_v3  ;;  %v5551_v48 = vpop.f32.mrf.mxu2 }
 0x782   : > { %v6396_v55 = vpop.f32.mrf.mxu3  ;;  %v10109_v54 = vpop.eup %10108  ;;  %v7728_v33 = vmul.f32 0.5, %v7600_v62  ;;  %v5780_v10 = vadd.f32 %v5551_v48, %v4935_v38 }
 0x783   : > { %v4709_v47 = vpop.f32.mrf.mxu1  ;;  %v7983_v11 = vmul.f32 0.5, %v10109_v54 }
 0x784   : > { %10110 = vtanh.f32 %v7728_v33  ;;  %v6625_v27 = vadd.f32 %v6396_v55, %v5780_v10  ;;  %v4936_v14 = vadd.f32 %v4709_v47, %v13542_v5  ;;  %v13545_v5 = vld [vmem:[#allocation4_spill] sm:$0xff] }
 0x785   : > { %v7243_v24 = vpop.f32.mrf.mxu0  ;;  %v8111_v51 = vadd.f32 0.5, %v7983_v11  ;;  %v9287_v11 = vld [vmem:[%s10316_s28 + $0xd81] sm:$0xff] }
 0x786   : > { %9372 = vmatmul.msk.bf16.gmra.mxu1 %vm571_vm2, %v4325_v29  ;;  %v7469_v36 = vadd.f32 %v7240_v22, %v6625_v27  ;;  %9564 = vmatmul.msk.bf16.gmra.mxu2 %vm571_vm2, %v5170_v2  ;;  %v9479_v27 = vld [vmem:[%s10316_s28 + $0x358] sm:$0xff] }
 0x787   : > { %9756 = vmatmul.msk.bf16.gmra.mxu3 %vm571_vm2, %v6015_v31  ;;  %v8239_v39 = vmul.f32 %v8111_v51, %v7599_v19  ;;  %v9480_v51 = vld [vmem:[%s10316_s28 + $0x360] sm:$0xff] }
 0x788   : > { %9948 = vmatmul.msk.bf16.gmra.mxu0 %vm571_vm2, %v6859_v50  ;;  %v7601_v34 = vadd.f32 %v12495_v30, %v7469_v36  ;;  %v9288_v50 = vld [vmem:[%s10316_s28 + $0xd89] sm:$0xff]  ;;  %v9671_v36 = vld [vmem:[%s10316_s28 + $0x880] sm:$0xff] }
 0x789   : > { %8368 = vst.msk [vmem:[%s12069_s17 + $0x1d8] sm:$0xff] %vm8308_vm3, %v8239_v39  ;;  %v5554_v60 = vpop.f32.mrf.mxu2  ;;  %v9672_v39 = vld [vmem:[%s10316_s28 + $0x888] sm:$0xff] }
 0x78a   : > { %v6399_v20 = vpop.f32.mrf.mxu3  ;;  %v10111_v6 = vpop.eup %10110  ;;  %v7729_v61 = vmul.f32 0.5, %v7601_v34  ;;  %v5781_v18 = vadd.f32 %v5554_v60, %v4936_v14  ;;  %v9863_v60 = vld [vmem:[%s10316_s28 + $0x359] sm:$0xff] }
 0x78b   : > { %v4711_v12 = vpop.f32.mrf.mxu1  ;;  %v7984_v57 = vmul.f32 0.5, %v10111_v6 }
 0x78c   : > { %10112 = vtanh.f32 %v7729_v61  ;;  %v6626_v16 = vadd.f32 %v6399_v20, %v5781_v18  ;;  %v4937_v45 = vadd.f32 %v4711_v12, %v13543_v35  ;;  %v9864_v20 = vld [vmem:[%s10316_s28 + $0x361] sm:$0xff]  ;;  %v4327_v18 = vpack.c.bf16 %v9288_v50, %v9287_v11 }
 0x78d   : > { %v7245_v4 = vpop.f32.mrf.mxu0  ;;  %v8112_v17 = vadd.f32 0.5, %v7984_v57  ;;  %v6861_v56 = vpack.c.bf16 %v9864_v20, %v9863_v60  ;;  %v13546_v35 = vld [vmem:[#allocation6_spill] sm:$0xff] }
 0x78e   : > { %v7470_v26 = vadd.f32 %v7243_v24, %v6626_v16 }
 0x78f   : > { %v8240_v9 = vmul.f32 %v8112_v17, %v7600_v62  ;;  %v5172_v17 = vpack.c.bf16 %v9480_v51, %v9479_v27 }
 0x790   : > { %v7602_v19 = vadd.f32 %v12495_v30, %v7470_v26  ;;  %v6017_v26 = vpack.c.bf16 %v9672_v39, %v9671_v36 }
 0x791   : > { %8369 = vst.msk [vmem:[%s12069_s17 + $0x1e0] sm:$0xff] %vm8308_vm3, %v8240_v9  ;;  %v5556_v53 = vpop.f32.mrf.mxu2 }
 0x792   : > { %v6401_v8 = vpop.f32.mrf.mxu3  ;;  %v10113_v52 = vpop.eup %10112  ;;  %v7730_v23 = vmul.f32 0.5, %v7602_v19  ;;  %v5782_v25 = vadd.f32 %v5556_v53, %v4937_v45 }
 0x793   : > { %v4714_v22 = vpop.f32.mrf.mxu1  ;;  %v7985_v46 = vmul.f32 0.5, %v10113_v52 }
 0x794   : > { %10114 = vtanh.f32 %v7730_v23  ;;  %v6627_v1 = vadd.f32 %v6401_v8, %v5782_v25  ;;  %v4938_v38 = vadd.f32 %v4714_v22, %v13544_v59  ;;  %v13547_v59 = vld [vmem:[#allocation8_spill] sm:$0xff] }
 0x795   : > { %v7248_v3 = vpop.f32.mrf.mxu0  ;;  %v8113_v63 = vadd.f32 0.5, %v7985_v46  ;;  %v9289_v46 = vld [vmem:[%s10316_s28 + $0xd99] sm:$0xff] }
 0x796   : > { %9373 = vmatmul.msk.bf16.gmra.mxu1 %vm571_vm2, %v4326_v42  ;;  %v7471_v15 = vadd.f32 %v7245_v4, %v6627_v1  ;;  %9565 = vmatmul.msk.bf16.gmra.mxu2 %vm571_vm2, %v5171_v49  ;;  %v9481_v1 = vld [vmem:[%s10316_s28 + $0x370] sm:$0xff] }
 0x797   : > { %9757 = vmatmul.msk.bf16.gmra.mxu3 %vm571_vm2, %v6016_v40  ;;  %v8241_v37 = vmul.f32 %v8113_v63, %v7601_v34  ;;  %v9482_v63 = vld [vmem:[%s10316_s28 + $0x378] sm:$0xff] }
 0x798   : > { %9949 = vmatmul.msk.bf16.gmra.mxu0 %vm571_vm2, %v6860_v7  ;;  %v7603_v62 = vadd.f32 %v12495_v30, %v7471_v15  ;;  %v9290_v7 = vld [vmem:[%s10316_s28 + $0xda1] sm:$0xff]  ;;  %v9673_v15 = vld [vmem:[%s10316_s28 + $0x898] sm:$0xff] }
 0x799   : > { %8370 = vst.msk [vmem:[%s12069_s17 + $0x1e8] sm:$0xff] %vm8308_vm3, %v8241_v37  ;;  %v5559_v41 = vpop.f32.mrf.mxu2  ;;  %v9674_v37 = vld [vmem:[%s10316_s28 + $0x8a0] sm:$0xff] }
 0x79a   : > { %v6404_v28 = vpop.f32.mrf.mxu3  ;;  %v10115_v48 = vpop.eup %10114  ;;  %v7731_v55 = vmul.f32 0.5, %v7603_v62  ;;  %v5783_v29 = vadd.f32 %v5559_v41, %v4938_v38  ;;  %v9865_v41 = vld [vmem:[%s10316_s28 + $0x371] sm:$0xff] }
 0x79b   : > { %v4716_v54 = vpop.f32.mrf.mxu1  ;;  %v7986_v33 = vmul.f32 0.5, %v10115_v48 }
 0x79c   : > { %10116 = vtanh.f32 %v7731_v55  ;;  %v6628_v10 = vadd.f32 %v6404_v28, %v5783_v29  ;;  %v4939_v14 = vadd.f32 %v4716_v54, %v13545_v5  ;;  %v9866_v28 = vld [vmem:[%s10316_s28 + $0x379] sm:$0xff]  ;;  %v4328_v29 = vpack.c.bf16 %v9290_v7, %v9289_v46 }
 0x79d   : > { %v7250_v47 = vpop.f32.mrf.mxu0  ;;  %v8114_v2 = vadd.f32 0.5, %v7986_v33  ;;  %v6862_v50 = vpack.c.bf16 %v9866_v28, %v9865_v41  ;;  %v13548_v5 = vld [vmem:[#allocation10_spill] sm:$0xff] }
 0x79e   : > { %v7472_v31 = vadd.f32 %v7248_v3, %v6628_v10 }
 0x79f   : > { %v8242_v24 = vmul.f32 %v8114_v2, %v7602_v19  ;;  %v5173_v2 = vpack.c.bf16 %v9482_v63, %v9481_v1 }
 0x7a0   : > { %v7604_v34 = vadd.f32 %v12495_v30, %v7472_v31  ;;  %v6018_v31 = vpack.c.bf16 %v9674_v37, %v9673_v15 }
 0x7a1   : > { %8371 = vst.msk [vmem:[%s12069_s17 + $0x1f0] sm:$0xff] %vm8308_vm3, %v8242_v24  ;;  %v5561_v6 = vpop.f32.mrf.mxu2 }
 0x7a2   : > { %v6406_v61 = vpop.f32.mrf.mxu3  ;;  %v10117_v12 = vpop.eup %10116  ;;  %v7732_v57 = vmul.f32 0.5, %v7604_v34  ;;  %v5784_v16 = vadd.f32 %v5561_v6, %v4939_v14 }
 0x7a3   : > { %v4719_v4 = vpop.f32.mrf.mxu1  ;;  %v7987_v43 = vmul.f32 0.5, %v10117_v12 }
 0x7a4   : > { %10118 = vtanh.f32 %v7732_v57  ;;  %v6629_v30 = vadd.f32 %v6406_v61, %v5784_v16  ;;  %v4940_v45 = vadd.f32 %v4719_v4, %v13546_v35  ;;  %v13549_v35 = vld [vmem:[#allocation12_spill] sm:$0xff] }
 0x7a5   : > { %v7253_v21 = vpop.f32.mrf.mxu0  ;;  %v8115_v9 = vadd.f32 0.5, %v7987_v43  ;;  %v9291_v43 = vld [vmem:[%s10316_s28 + $0xda9] sm:$0xff] }
 0x7a6   : > { %9374 = vmatmul.msk.bf16.gmra.mxu1 %vm571_vm2, %v4327_v18  ;;  %v7473_v13 = vadd.f32 %v7250_v47, %v6629_v30  ;;  %9566 = vmatmul.msk.bf16.gmra.mxu2 %vm571_vm2, %v5172_v17  ;;  %v9483_v30 = vld [vmem:[%s10316_s28 + $0x380] sm:$0xff] }
 0x7a7   : > { %9758 = vmatmul.msk.bf16.gmra.mxu3 %vm571_vm2, %v6017_v26  ;;  %v8243_v58 = vmul.f32 %v8115_v9, %v7603_v62  ;;  %v9484_v9 = vld [vmem:[%s10316_s28 + $0x388] sm:$0xff] }
 0x7a8   : > { %9950 = vmatmul.msk.bf16.gmra.mxu0 %vm571_vm2, %v6861_v56  ;;  %v7605_v19 = vadd.f32 %v12720_v0, %v7473_v13  ;;  %v9292_v56 = vld [vmem:[%s10316_s28 + $0xdb1] sm:$0xff]  ;;  %v9675_v13 = vld [vmem:[%s10316_s28 + $0x8a8] sm:$0xff] }
 0x7a9   : > { %8372 = vst.msk [vmem:[%s12069_s17 + $0x1f8] sm:$0xff] %vm8308_vm3, %v8243_v58  ;;  %v5564_v44 = vpop.f32.mrf.mxu2  ;;  %v9676_v58 = vld [vmem:[%s10316_s28 + $0x8b0] sm:$0xff] }
 0x7aa   : > { %v6409_v32 = vpop.f32.mrf.mxu3  ;;  %v10119_v53 = vpop.eup %10118  ;;  %v7733_v8 = vmul.f32 0.5, %v7605_v19  ;;  %v5785_v42 = vadd.f32 %v5564_v44, %v4940_v45  ;;  %v9867_v44 = vld [vmem:[%s10316_s28 + $0x381] sm:$0xff] }
 0x7ab   : > { %v4721_v52 = vpop.f32.mrf.mxu1  ;;  %v7988_v23 = vmul.f32 0.5, %v10119_v53 }
 0x7ac   : > { %10120 = vtanh.f32 %v7733_v8  ;;  %v6630_v25 = vadd.f32 %v6409_v32, %v5785_v42  ;;  %v4941_v38 = vadd.f32 %v4721_v52, %v13547_v59  ;;  %v9868_v32 = vld [vmem:[%s10316_s28 + $0x389] sm:$0xff]  ;;  %v4329_v42 = vpack.c.bf16 %v9292_v56, %v9291_v43  ;;  %v13550_v59 = vld [vmem:[#allocation14_spill] sm:$0xff] }
 0x7ad   : > { %v7255_v22 = vpop.f32.mrf.mxu0  ;;  %v8116_v49 = vadd.f32 0.5, %v7988_v23  ;;  %v6863_v7 = vpack.c.bf16 %v9868_v32, %v9867_v44 }
 0x7ae   : > { %v7474_v40 = vadd.f32 %v7253_v21, %v6630_v25 }
 0x7af   : > { %v8244_v3 = vmul.f32 %v8116_v49, %v7604_v34  ;;  %v5174_v49 = vpack.c.bf16 %v9484_v9, %v9483_v30 }
 0x7b0   : > { %v7606_v62 = vadd.f32 %v12720_v0, %v7474_v40  ;;  %v6019_v40 = vpack.c.bf16 %v9676_v58, %v9675_v13 }
 0x7b1   : > { %8373 = vst.msk [vmem:[%s12069_s17 + $0x200] sm:$0xff] %vm8308_vm3, %v8244_v3  ;;  %v5566_v48 = vpop.f32.mrf.mxu2 }
 0x7b2   : > { %v6411_v55 = vpop.f32.mrf.mxu3  ;;  %v10121_v54 = vpop.eup %10120  ;;  %v7734_v33 = vmul.f32 0.5, %v7606_v62  ;;  %v5786_v10 = vadd.f32 %v5566_v48, %v4941_v38 }
 0x7b3   : > { %v4724_v47 = vpop.f32.mrf.mxu1  ;;  %v7989_v11 = vmul.f32 0.5, %v10121_v54 }
 0x7b4   : > { %10122 = vtanh.f32 %v7734_v33  ;;  %v6631_v27 = vadd.f32 %v6411_v55, %v5786_v10  ;;  %v4942_v14 = vadd.f32 %v4724_v47, %v13548_v5  ;;  %v13551_v5 = vld [vmem:[#allocation16_spill] sm:$0xff] }
 0x7b5   : > { %v7258_v24 = vpop.f32.mrf.mxu0  ;;  %v8117_v51 = vadd.f32 0.5, %v7989_v11  ;;  %v9293_v11 = vld [vmem:[%s10316_s28 + $0xdc1] sm:$0xff] }
 0x7b6   : > { %9375 = vmatmul.msk.bf16.gmra.mxu1 %vm571_vm2, %v4328_v29  ;;  %v7475_v36 = vadd.f32 %v7255_v22, %v6631_v27  ;;  %9567 = vmatmul.msk.bf16.gmra.mxu2 %vm571_vm2, %v5173_v2  ;;  %v9485_v27 = vld [vmem:[%s10316_s28 + $0x398] sm:$0xff] }
 0x7b7   : > { %9759 = vmatmul.msk.bf16.gmra.mxu3 %vm571_vm2, %v6018_v31  ;;  %v8245_v39 = vmul.f32 %v8117_v51, %v7605_v19  ;;  %v9486_v51 = vld [vmem:[%s10316_s28 + $0x3a0] sm:$0xff] }
 0x7b8   : > { %9951 = vmatmul.msk.bf16.gmra.mxu0 %vm571_vm2, %v6862_v50  ;;  %v7607_v34 = vadd.f32 %v12720_v0, %v7475_v36  ;;  %v9294_v50 = vld [vmem:[%s10316_s28 + $0xdc9] sm:$0xff]  ;;  %v9677_v36 = vld [vmem:[%s10316_s28 + $0x8c0] sm:$0xff] }
 0x7b9   : > { %8374 = vst.msk [vmem:[%s12069_s17 + $0x208] sm:$0xff] %vm8308_vm3, %v8245_v39  ;;  %v5569_v60 = vpop.f32.mrf.mxu2  ;;  %v9678_v39 = vld [vmem:[%s10316_s28 + $0x8c8] sm:$0xff] }
 0x7ba   : > { %v6414_v20 = vpop.f32.mrf.mxu3  ;;  %v10123_v6 = vpop.eup %10122  ;;  %v7735_v61 = vmul.f32 0.5, %v7607_v34  ;;  %v5787_v18 = vadd.f32 %v5569_v60, %v4942_v14  ;;  %v9869_v60 = vld [vmem:[%s10316_s28 + $0x399] sm:$0xff] }
 0x7bb   : > { %v4726_v12 = vpop.f32.mrf.mxu1  ;;  %v7990_v57 = vmul.f32 0.5, %v10123_v6 }
 0x7bc   : > { %10124 = vtanh.f32 %v7735_v61  ;;  %v6632_v16 = vadd.f32 %v6414_v20, %v5787_v18  ;;  %v4943_v45 = vadd.f32 %v4726_v12, %v13549_v35  ;;  %v9870_v20 = vld [vmem:[%s10316_s28 + $0x3a1] sm:$0xff]  ;;  %v4330_v18 = vpack.c.bf16 %v9294_v50, %v9293_v11 }
 0x7bd   : > { %v7260_v4 = vpop.f32.mrf.mxu0  ;;  %v8118_v17 = vadd.f32 0.5, %v7990_v57  ;;  %v6864_v56 = vpack.c.bf16 %v9870_v20, %v9869_v60  ;;  %v13552_v35 = vld [vmem:[#allocation18_spill] sm:$0xff] }
 0x7be   : > { %v7476_v26 = vadd.f32 %v7258_v24, %v6632_v16 }
 0x7bf   : > { %v8246_v21 = vmul.f32 %v8118_v17, %v7606_v62  ;;  %v5175_v17 = vpack.c.bf16 %v9486_v51, %v9485_v27 }
 0x7c0   : > { %v7608_v19 = vadd.f32 %v12720_v0, %v7476_v26  ;;  %v6020_v26 = vpack.c.bf16 %v9678_v39, %v9677_v36 }
 0x7c1   : > { %8375 = vst.msk [vmem:[%s12069_s17 + $0x210] sm:$0xff] %vm8308_vm3, %v8246_v21  ;;  %v5571_v53 = vpop.f32.mrf.mxu2 }
 0x7c2   : > { %v6416_v8 = vpop.f32.mrf.mxu3  ;;  %v10125_v52 = vpop.eup %10124  ;;  %v7736_v23 = vmul.f32 0.5, %v7608_v19  ;;  %v5788_v25 = vadd.f32 %v5571_v53, %v4943_v45 }
 0x7c3   : > { %v4729_v22 = vpop.f32.mrf.mxu1  ;;  %v7991_v46 = vmul.f32 0.5, %v10125_v52 }
 0x7c4   : > { %10126 = vtanh.f32 %v7736_v23  ;;  %v6633_v1 = vadd.f32 %v6416_v8, %v5788_v25  ;;  %v4944_v38 = vadd.f32 %v4729_v22, %v13550_v59  ;;  %v13553_v59 = vld [vmem:[#allocation20_spill] sm:$0xff] }
 0x7c5   : > { %v7263_v3 = vpop.f32.mrf.mxu0  ;;  %v8119_v63 = vadd.f32 0.5, %v7991_v46  ;;  %v9295_v46 = vld [vmem:[%s10316_s28 + $0xdd1] sm:$0xff] }
 0x7c6   : > { %9376 = vmatmul.msk.bf16.gmra.mxu1 %vm571_vm2, %v4329_v42  ;;  %v7477_v15 = vadd.f32 %v7260_v4, %v6633_v1  ;;  %9568 = vmatmul.msk.bf16.gmra.mxu2 %vm571_vm2, %v5174_v49  ;;  %v9487_v1 = vld [vmem:[%s10316_s28 + $0x3a8] sm:$0xff] }
 0x7c7   : > { %9760 = vmatmul.msk.bf16.gmra.mxu3 %vm571_vm2, %v6019_v40  ;;  %v8247_v37 = vmul.f32 %v8119_v63, %v7607_v34  ;;  %v9488_v63 = vld [vmem:[%s10316_s28 + $0x3b0] sm:$0xff] }
 0x7c8   : > { %9952 = vmatmul.msk.bf16.gmra.mxu0 %vm571_vm2, %v6863_v7  ;;  %v7609_v62 = vadd.f32 %v12720_v0, %v7477_v15  ;;  %v9296_v7 = vld [vmem:[%s10316_s28 + $0xdd9] sm:$0xff]  ;;  %v9679_v15 = vld [vmem:[%s10316_s28 + $0x8d0] sm:$0xff] }
 0x7c9   : > { %8376 = vst.msk [vmem:[%s12069_s17 + $0x218] sm:$0xff] %vm8308_vm3, %v8247_v37  ;;  %v5574_v41 = vpop.f32.mrf.mxu2  ;;  %v9680_v37 = vld [vmem:[%s10316_s28 + $0x8d8] sm:$0xff] }
 0x7ca   : > { %v6419_v28 = vpop.f32.mrf.mxu3  ;;  %v10127_v48 = vpop.eup %10126  ;;  %v7737_v55 = vmul.f32 0.5, %v7609_v62  ;;  %v5789_v29 = vadd.f32 %v5574_v41, %v4944_v38  ;;  %v9871_v41 = vld [vmem:[%s10316_s28 + $0x3a9] sm:$0xff] }
 0x7cb   : > { %v4731_v54 = vpop.f32.mrf.mxu1  ;;  %v7992_v33 = vmul.f32 0.5, %v10127_v48 }
 0x7cc   : > { %10128 = vtanh.f32 %v7737_v55  ;;  %v6634_v10 = vadd.f32 %v6419_v28, %v5789_v29  ;;  %v4945_v14 = vadd.f32 %v4731_v54, %v13551_v5  ;;  %v9872_v28 = vld [vmem:[%s10316_s28 + $0x3b1] sm:$0xff]  ;;  %v4331_v29 = vpack.c.bf16 %v9296_v7, %v9295_v46  ;;  %v13554_v5 = vld [vmem:[#allocation23_spill] sm:$0xff] }
 0x7cd   : > { %v7265_v47 = vpop.f32.mrf.mxu0  ;;  %v8120_v2 = vadd.f32 0.5, %v7992_v33  ;;  %v6865_v50 = vpack.c.bf16 %v9872_v28, %v9871_v41 }
 0x7ce   : > { %v7478_v31 = vadd.f32 %v7263_v3, %v6634_v10 }
 0x7cf   : > { %v8248_v24 = vmul.f32 %v8120_v2, %v7608_v19  ;;  %v5176_v2 = vpack.c.bf16 %v9488_v63, %v9487_v1 }
 0x7d0   : > { %v7610_v34 = vadd.f32 %v12720_v0, %v7478_v31  ;;  %v6021_v31 = vpack.c.bf16 %v9680_v37, %v9679_v15 }
 0x7d1   : > { %8377 = vst.msk [vmem:[%s12069_s17 + $0x220] sm:$0xff] %vm8308_vm3, %v8248_v24  ;;  %v5576_v6 = vpop.f32.mrf.mxu2 }
 0x7d2   : > { %v6421_v61 = vpop.f32.mrf.mxu3  ;;  %v10129_v12 = vpop.eup %10128  ;;  %v7738_v57 = vmul.f32 0.5, %v7610_v34  ;;  %v5790_v16 = vadd.f32 %v5576_v6, %v4945_v14 }
 0x7d3   : > { %v4734_v4 = vpop.f32.mrf.mxu1  ;;  %v7993_v43 = vmul.f32 0.5, %v10129_v12 }
 0x7d4   : > { %10130 = vtanh.f32 %v7738_v57  ;;  %v6635_v30 = vadd.f32 %v6421_v61, %v5790_v16  ;;  %v4946_v45 = vadd.f32 %v4734_v4, %v13552_v35  ;;  %v13555_v35 = vld [vmem:[#allocation26_spill] sm:$0xff] }
 0x7d5   : > { %v7268_v21 = vpop.f32.mrf.mxu0  ;;  %v8121_v9 = vadd.f32 0.5, %v7993_v43  ;;  %v9297_v43 = vld [vmem:[%s10316_s28 + $0xde9] sm:$0xff] }
 0x7d6   : > { %9377 = vmatmul.msk.bf16.gmra.mxu1 %vm571_vm2, %v4330_v18  ;;  %v7479_v13 = vadd.f32 %v7265_v47, %v6635_v30  ;;  %9569 = vmatmul.msk.bf16.gmra.mxu2 %vm571_vm2, %v5175_v17  ;;  %v9489_v30 = vld [vmem:[%s10316_s28 + $0x3c0] sm:$0xff] }
 0x7d7   : > { %9761 = vmatmul.msk.bf16.gmra.mxu3 %vm571_vm2, %v6020_v26  ;;  %v8249_v58 = vmul.f32 %v8121_v9, %v7609_v62  ;;  %v9490_v9 = vld [vmem:[%s10316_s28 + $0x3c8] sm:$0xff] }
 0x7d8   : > { %9953 = vmatmul.msk.bf16.gmra.mxu0 %vm571_vm2, %v6864_v56  ;;  %v7611_v19 = vadd.f32 %v12720_v0, %v7479_v13  ;;  %v9298_v56 = vld [vmem:[%s10316_s28 + $0xdf1] sm:$0xff]  ;;  %v9681_v13 = vld [vmem:[%s10316_s28 + $0x8e8] sm:$0xff] }
 0x7d9   : > { %8378 = vst.msk [vmem:[%s12069_s17 + $0x228] sm:$0xff] %vm8308_vm3, %v8249_v58  ;;  %v5579_v44 = vpop.f32.mrf.mxu2  ;;  %v9682_v58 = vld [vmem:[%s10316_s28 + $0x8f0] sm:$0xff] }
 0x7da   : > { %v6424_v32 = vpop.f32.mrf.mxu3  ;;  %v10131_v53 = vpop.eup %10130  ;;  %v7739_v8 = vmul.f32 0.5, %v7611_v19  ;;  %v5791_v42 = vadd.f32 %v5579_v44, %v4946_v45  ;;  %v9873_v44 = vld [vmem:[%s10316_s28 + $0x3c1] sm:$0xff] }
 0x7db   : > { %v4736_v52 = vpop.f32.mrf.mxu1  ;;  %v7994_v23 = vmul.f32 0.5, %v10131_v53 }
 0x7dc   : > { %10132 = vtanh.f32 %v7739_v8  ;;  %v6636_v25 = vadd.f32 %v6424_v32, %v5791_v42  ;;  %v4947_v38 = vadd.f32 %v4736_v52, %v13553_v59  ;;  %v9874_v32 = vld [vmem:[%s10316_s28 + $0x3c9] sm:$0xff]  ;;  %v4332_v42 = vpack.c.bf16 %v9298_v56, %v9297_v43  ;;  %v13556_v59 = vld [vmem:[#allocation29_spill] sm:$0xff] }
 0x7dd   : > { %v7270_v22 = vpop.f32.mrf.mxu0  ;;  %v8122_v49 = vadd.f32 0.5, %v7994_v23  ;;  %v6866_v7 = vpack.c.bf16 %v9874_v32, %v9873_v44 }
 0x7de   : > { %v7480_v40 = vadd.f32 %v7268_v21, %v6636_v25 }
 0x7df   : > { %v8250_v3 = vmul.f32 %v8122_v49, %v7610_v34  ;;  %v5177_v49 = vpack.c.bf16 %v9490_v9, %v9489_v30 }
 0x7e0   : > { %v7612_v62 = vadd.f32 %v12720_v0, %v7480_v40  ;;  %v6022_v40 = vpack.c.bf16 %v9682_v58, %v9681_v13 }
 0x7e1   : > { %8379 = vst.msk [vmem:[%s12069_s17 + $0x230] sm:$0xff] %vm8308_vm3, %v8250_v3  ;;  %v5581_v48 = vpop.f32.mrf.mxu2 }
 0x7e2   : > { %v6426_v55 = vpop.f32.mrf.mxu3  ;;  %v10133_v54 = vpop.eup %10132  ;;  %v7740_v33 = vmul.f32 0.5, %v7612_v62  ;;  %v5792_v10 = vadd.f32 %v5581_v48, %v4947_v38 }
 0x7e3   : > { %v4739_v47 = vpop.f32.mrf.mxu1  ;;  %v7995_v11 = vmul.f32 0.5, %v10133_v54 }
 0x7e4   : > { %10134 = vtanh.f32 %v7740_v33  ;;  %v6637_v27 = vadd.f32 %v6426_v55, %v5792_v10  ;;  %v4948_v14 = vadd.f32 %v4739_v47, %v13554_v5  ;;  %v13557_v5 = vld [vmem:[#allocation32_spill] sm:$0xff] }
 0x7e5   : > { %v7273_v24 = vpop.f32.mrf.mxu0  ;;  %v8123_v51 = vadd.f32 0.5, %v7995_v11  ;;  %v9299_v11 = vld [vmem:[%s10316_s28 + $0xdf9] sm:$0xff] }
 0x7e6   : > { %9378 = vmatmul.msk.bf16.gmra.mxu1 %vm571_vm2, %v4331_v29  ;;  %v7481_v36 = vadd.f32 %v7270_v22, %v6637_v27  ;;  %9570 = vmatmul.msk.bf16.gmra.mxu2 %vm571_vm2, %v5176_v2  ;;  %v9491_v27 = vld [vmem:[%s10316_s28 + $0x3d0] sm:$0xff] }
 0x7e7   : > { %9762 = vmatmul.msk.bf16.gmra.mxu3 %vm571_vm2, %v6021_v31  ;;  %v8251_v39 = vmul.f32 %v8123_v51, %v7611_v19  ;;  %v9492_v51 = vld [vmem:[%s10316_s28 + $0x3d8] sm:$0xff] }
 0x7e8   : > { %9954 = vmatmul.msk.bf16.gmra.mxu0 %vm571_vm2, %v6865_v50  ;;  %v7613_v34 = vadd.f32 %v12720_v0, %v7481_v36  ;;  %v9300_v50 = vld [vmem:[%s10316_s28 + $0xe01] sm:$0xff]  ;;  %v9683_v36 = vld [vmem:[%s10316_s28 + $0x8f8] sm:$0xff] }
 0x7e9   : > { %8380 = vst.msk [vmem:[%s12069_s17 + $0x238] sm:$0xff] %vm8308_vm3, %v8251_v39  ;;  %v5584_v60 = vpop.f32.mrf.mxu2  ;;  %v9684_v39 = vld [vmem:[%s10316_s28 + $0x900] sm:$0xff] }
 0x7ea   : > { %v6429_v20 = vpop.f32.mrf.mxu3  ;;  %v10135_v6 = vpop.eup %10134  ;;  %v7741_v61 = vmul.f32 0.5, %v7613_v34  ;;  %v5793_v18 = vadd.f32 %v5584_v60, %v4948_v14  ;;  %v9875_v60 = vld [vmem:[%s10316_s28 + $0x3d1] sm:$0xff] }
 0x7eb   : > { %v4741_v12 = vpop.f32.mrf.mxu1  ;;  %v7996_v57 = vmul.f32 0.5, %v10135_v6 }
 0x7ec   : > { %10136 = vtanh.f32 %v7741_v61  ;;  %v6638_v16 = vadd.f32 %v6429_v20, %v5793_v18  ;;  %v4949_v45 = vadd.f32 %v4741_v12, %v13555_v35  ;;  %v9876_v20 = vld [vmem:[%s10316_s28 + $0x3d9] sm:$0xff]  ;;  %v4333_v18 = vpack.c.bf16 %v9300_v50, %v9299_v11  ;;  %v13558_v35 = vld [vmem:[#allocation35_spill] sm:$0xff] }
 0x7ed   : > { %v7275_v4 = vpop.f32.mrf.mxu0  ;;  %v8124_v17 = vadd.f32 0.5, %v7996_v57  ;;  %v6867_v56 = vpack.c.bf16 %v9876_v20, %v9875_v60 }
 0x7ee   : > { %v7482_v26 = vadd.f32 %v7273_v24, %v6638_v16 }
 0x7ef   : > { %v8252_v21 = vmul.f32 %v8124_v17, %v7612_v62  ;;  %v5178_v17 = vpack.c.bf16 %v9492_v51, %v9491_v27 }
 0x7f0   : > { %v7614_v19 = vadd.f32 %v12720_v0, %v7482_v26  ;;  %v6023_v26 = vpack.c.bf16 %v9684_v39, %v9683_v36 }
 0x7f1   : > { %8381 = vst.msk [vmem:[%s12069_s17 + $0x240] sm:$0xff] %vm8308_vm3, %v8252_v21  ;;  %v5586_v53 = vpop.f32.mrf.mxu2 }
 0x7f2   : > { %v6431_v8 = vpop.f32.mrf.mxu3  ;;  %v10137_v52 = vpop.eup %10136  ;;  %v7742_v23 = vmul.f32 0.5, %v7614_v19  ;;  %v5794_v25 = vadd.f32 %v5586_v53, %v4949_v45 }
 0x7f3   : > { %v4744_v22 = vpop.f32.mrf.mxu1  ;;  %v7997_v46 = vmul.f32 0.5, %v10137_v52 }
 0x7f4   : > { %10138 = vtanh.f32 %v7742_v23  ;;  %v6639_v1 = vadd.f32 %v6431_v8, %v5794_v25  ;;  %v4950_v38 = vadd.f32 %v4744_v22, %v13556_v59  ;;  %v13559_v59 = vld [vmem:[#allocation38_spill] sm:$0xff] }
 0x7f5   : > { %v7278_v3 = vpop.f32.mrf.mxu0  ;;  %v8125_v63 = vadd.f32 0.5, %v7997_v46  ;;  %v9301_v46 = vld [vmem:[%s10316_s28 + $0xe11] sm:$0xff] }
 0x7f6   : > { %9379 = vmatmul.msk.bf16.gmra.mxu1 %vm571_vm2, %v4332_v42  ;;  %v7483_v15 = vadd.f32 %v7275_v4, %v6639_v1  ;;  %9571 = vmatmul.msk.bf16.gmra.mxu2 %vm571_vm2, %v5177_v49  ;;  %v9493_v1 = vld [vmem:[%s10316_s28 + $0x3e8] sm:$0xff] }
 0x7f7   : > { %9763 = vmatmul.msk.bf16.gmra.mxu3 %vm571_vm2, %v6022_v40  ;;  %v8253_v37 = vmul.f32 %v8125_v63, %v7613_v34  ;;  %v9494_v63 = vld [vmem:[%s10316_s28 + $0x3f0] sm:$0xff] }
 0x7f8   : > { %9955 = vmatmul.msk.bf16.gmra.mxu0 %vm571_vm2, %v6866_v7  ;;  %v7615_v62 = vadd.f32 %v12720_v0, %v7483_v15  ;;  %v9302_v7 = vld [vmem:[%s10316_s28 + $0xe19] sm:$0xff]  ;;  %v9685_v15 = vld [vmem:[%s10316_s28 + $0x910] sm:$0xff] }
 0x7f9   : > { %8382 = vst.msk [vmem:[%s12069_s17 + $0x248] sm:$0xff] %vm8308_vm3, %v8253_v37  ;;  %v5589_v41 = vpop.f32.mrf.mxu2  ;;  %v9686_v37 = vld [vmem:[%s10316_s28 + $0x918] sm:$0xff] }
 0x7fa   : > { %v6434_v28 = vpop.f32.mrf.mxu3  ;;  %v10139_v48 = vpop.eup %10138  ;;  %v7743_v55 = vmul.f32 0.5, %v7615_v62  ;;  %v5795_v29 = vadd.f32 %v5589_v41, %v4950_v38  ;;  %v9877_v41 = vld [vmem:[%s10316_s28 + $0x3e9] sm:$0xff] }
 0x7fb   : > { %v4746_v54 = vpop.f32.mrf.mxu1  ;;  %v7998_v33 = vmul.f32 0.5, %v10139_v48 }
 0x7fc   : > { %10140 = vtanh.f32 %v7743_v55  ;;  %v6640_v10 = vadd.f32 %v6434_v28, %v5795_v29  ;;  %v4951_v14 = vadd.f32 %v4746_v54, %v13557_v5  ;;  %v9878_v28 = vld [vmem:[%s10316_s28 + $0x3f1] sm:$0xff]  ;;  %v4334_v29 = vpack.c.bf16 %v9302_v7, %v9301_v46 }
 0x7fd   : > { %v7280_v47 = vpop.f32.mrf.mxu0  ;;  %v8126_v2 = vadd.f32 0.5, %v7998_v33  ;;  %v6868_v50 = vpack.c.bf16 %v9878_v28, %v9877_v41  ;;  %v13560_v5 = vld [vmem:[#allocation41_spill] sm:$0xff] }
 0x7fe   : > { %v7484_v31 = vadd.f32 %v7278_v3, %v6640_v10 }
 0x7ff   : > { %v8254_v24 = vmul.f32 %v8126_v2, %v7614_v19  ;;  %v5179_v2 = vpack.c.bf16 %v9494_v63, %v9493_v1 }
 0x800   : > { %v7616_v34 = vadd.f32 %v12720_v0, %v7484_v31  ;;  %v6024_v31 = vpack.c.bf16 %v9686_v37, %v9685_v15 }
 0x801   : > { %8383 = vst.msk [vmem:[%s12069_s17 + $0x250] sm:$0xff] %vm8308_vm3, %v8254_v24  ;;  %v5591_v6 = vpop.f32.mrf.mxu2 }
 0x802   : > { %v6436_v61 = vpop.f32.mrf.mxu3  ;;  %v10141_v12 = vpop.eup %10140  ;;  %v7744_v57 = vmul.f32 0.5, %v7616_v34  ;;  %v5796_v16 = vadd.f32 %v5591_v6, %v4951_v14 }
 0x803   : > { %v4749_v4 = vpop.f32.mrf.mxu1  ;;  %v7999_v43 = vmul.f32 0.5, %v10141_v12 }
 0x804   : > { %10142 = vtanh.f32 %v7744_v57  ;;  %v6641_v30 = vadd.f32 %v6436_v61, %v5796_v16  ;;  %v4952_v45 = vadd.f32 %v4749_v4, %v13558_v35  ;;  %v13561_v35 = vld [vmem:[#allocation44_spill] sm:$0xff] }
 0x805   : > { %v7283_v21 = vpop.f32.mrf.mxu0  ;;  %v8127_v9 = vadd.f32 0.5, %v7999_v43  ;;  %v9303_v43 = vld [vmem:[%s10316_s28 + $0xe21] sm:$0xff] }
 0x806   : > { %9380 = vmatmul.msk.bf16.gmra.mxu1 %vm571_vm2, %v4333_v18  ;;  %v7485_v13 = vadd.f32 %v7280_v47, %v6641_v30  ;;  %9572 = vmatmul.msk.bf16.gmra.mxu2 %vm571_vm2, %v5178_v17  ;;  %v9495_v30 = vld [vmem:[%s10316_s28 + $0x3f8] sm:$0xff] }
 0x807   : > { %9764 = vmatmul.msk.bf16.gmra.mxu3 %vm571_vm2, %v6023_v26  ;;  %v8255_v58 = vmul.f32 %v8127_v9, %v7615_v62  ;;  %v9496_v9 = vld [vmem:[%s10316_s28 + $0x400] sm:$0xff] }
 0x808   : > { %9956 = vmatmul.msk.bf16.gmra.mxu0 %vm571_vm2, %v6867_v56  ;;  %v7617_v19 = vadd.f32 %v12720_v0, %v7485_v13  ;;  %v9304_v56 = vld [vmem:[%s10316_s28 + $0xe29] sm:$0xff]  ;;  %v9687_v13 = vld [vmem:[%s10316_s28 + $0x920] sm:$0xff] }
 0x809   : > { %8384 = vst.msk [vmem:[%s12069_s17 + $0x258] sm:$0xff] %vm8308_vm3, %v8255_v58  ;;  %v5594_v44 = vpop.f32.mrf.mxu2  ;;  %v9688_v58 = vld [vmem:[%s10316_s28 + $0x928] sm:$0xff] }
 0x80a   : > { %v6439_v32 = vpop.f32.mrf.mxu3  ;;  %v10143_v53 = vpop.eup %10142  ;;  %v7745_v8 = vmul.f32 0.5, %v7617_v19  ;;  %v5797_v42 = vadd.f32 %v5594_v44, %v4952_v45  ;;  %v9879_v44 = vld [vmem:[%s10316_s28 + $0x3f9] sm:$0xff] }
 0x80b   : > { %v4751_v52 = vpop.f32.mrf.mxu1  ;;  %v8000_v23 = vmul.f32 0.5, %v10143_v53 }
 0x80c   : > { %10144 = vtanh.f32 %v7745_v8  ;;  %v6642_v25 = vadd.f32 %v6439_v32, %v5797_v42  ;;  %v4953_v38 = vadd.f32 %v4751_v52, %v13559_v59  ;;  %v9880_v32 = vld [vmem:[%s10316_s28 + $0x401] sm:$0xff]  ;;  %v4335_v42 = vpack.c.bf16 %v9304_v56, %v9303_v43 }
 0x80d   : > { %v7285_v22 = vpop.f32.mrf.mxu0  ;;  %v8128_v49 = vadd.f32 0.5, %v8000_v23  ;;  %v6869_v7 = vpack.c.bf16 %v9880_v32, %v9879_v44  ;;  %v13562_v59 = vld [vmem:[#allocation47_spill] sm:$0xff] }
 0x80e   : > { %v7486_v40 = vadd.f32 %v7283_v21, %v6642_v25 }
 0x80f   : > { %v8256_v3 = vmul.f32 %v8128_v49, %v7616_v34  ;;  %v5180_v49 = vpack.c.bf16 %v9496_v9, %v9495_v30 }
 0x810   : > { %v7618_v62 = vadd.f32 %v12720_v0, %v7486_v40  ;;  %v6025_v40 = vpack.c.bf16 %v9688_v58, %v9687_v13 }
 0x811   : > { %8385 = vst.msk [vmem:[%s12069_s17 + $0x260] sm:$0xff] %vm8308_vm3, %v8256_v3  ;;  %v5596_v48 = vpop.f32.mrf.mxu2 }
 0x812   : > { %v6441_v55 = vpop.f32.mrf.mxu3  ;;  %v10145_v54 = vpop.eup %10144  ;;  %v7746_v33 = vmul.f32 0.5, %v7618_v62  ;;  %v5798_v10 = vadd.f32 %v5596_v48, %v4953_v38 }
 0x813   : > { %v4754_v47 = vpop.f32.mrf.mxu1  ;;  %v8001_v11 = vmul.f32 0.5, %v10145_v54 }
 0x814   : > { %10146 = vtanh.f32 %v7746_v33  ;;  %v6643_v27 = vadd.f32 %v6441_v55, %v5798_v10  ;;  %v4954_v14 = vadd.f32 %v4754_v47, %v13560_v5  ;;  %v13563_v5 = vld [vmem:[#allocation50_spill] sm:$0xff] }
 0x815   : > { %v7288_v24 = vpop.f32.mrf.mxu0  ;;  %v8129_v51 = vadd.f32 0.5, %v8001_v11  ;;  %v9305_v11 = vld [vmem:[%s10316_s28 + $0xe39] sm:$0xff] }
 0x816   : > { %9381 = vmatmul.msk.bf16.gmra.mxu1 %vm571_vm2, %v4334_v29  ;;  %v7487_v36 = vadd.f32 %v7285_v22, %v6643_v27  ;;  %9573 = vmatmul.msk.bf16.gmra.mxu2 %vm571_vm2, %v5179_v2  ;;  %v9497_v27 = vld [vmem:[%s10316_s28 + $0x410] sm:$0xff] }
 0x817   : > { %9765 = vmatmul.msk.bf16.gmra.mxu3 %vm571_vm2, %v6024_v31  ;;  %v8257_v39 = vmul.f32 %v8129_v51, %v7617_v19  ;;  %v9498_v51 = vld [vmem:[%s10316_s28 + $0x418] sm:$0xff] }
 0x818   : > { %9957 = vmatmul.msk.bf16.gmra.mxu0 %vm571_vm2, %v6868_v50  ;;  %v7619_v34 = vadd.f32 %v12720_v0, %v7487_v36  ;;  %v9306_v50 = vld [vmem:[%s10316_s28 + $0xe41] sm:$0xff]  ;;  %v9689_v36 = vld [vmem:[%s10316_s28 + $0x938] sm:$0xff] }
 0x819   : > { %8386 = vst.msk [vmem:[%s12069_s17 + $0x268] sm:$0xff] %vm8308_vm3, %v8257_v39  ;;  %v5599_v60 = vpop.f32.mrf.mxu2  ;;  %v9690_v39 = vld [vmem:[%s10316_s28 + $0x940] sm:$0xff] }
 0x81a   : > { %v6444_v20 = vpop.f32.mrf.mxu3  ;;  %v10147_v6 = vpop.eup %10146  ;;  %v7747_v61 = vmul.f32 0.5, %v7619_v34  ;;  %v5799_v18 = vadd.f32 %v5599_v60, %v4954_v14  ;;  %v9881_v60 = vld [vmem:[%s10316_s28 + $0x411] sm:$0xff] }
 0x81b   : > { %v4756_v12 = vpop.f32.mrf.mxu1  ;;  %v8002_v57 = vmul.f32 0.5, %v10147_v6 }
 0x81c   : > { %10148 = vtanh.f32 %v7747_v61  ;;  %v6644_v16 = vadd.f32 %v6444_v20, %v5799_v18  ;;  %v4955_v45 = vadd.f32 %v4756_v12, %v13561_v35  ;;  %v9882_v20 = vld [vmem:[%s10316_s28 + $0x419] sm:$0xff]  ;;  %v4336_v18 = vpack.c.bf16 %v9306_v50, %v9305_v11 }
 0x81d   : > { %v7290_v4 = vpop.f32.mrf.mxu0  ;;  %v8130_v17 = vadd.f32 0.5, %v8002_v57  ;;  %v6870_v56 = vpack.c.bf16 %v9882_v20, %v9881_v60  ;;  %v13564_v35 = vld [vmem:[#allocation53_spill] sm:$0xff] }
 0x81e   : > { %v7488_v26 = vadd.f32 %v7288_v24, %v6644_v16 }
 0x81f   : > { %v8258_v21 = vmul.f32 %v8130_v17, %v7618_v62  ;;  %v5181_v17 = vpack.c.bf16 %v9498_v51, %v9497_v27 }
 0x820   : > { %v7620_v19 = vadd.f32 %v12720_v0, %v7488_v26  ;;  %v6026_v26 = vpack.c.bf16 %v9690_v39, %v9689_v36 }
 0x821   : > { %8387 = vst.msk [vmem:[%s12069_s17 + $0x270] sm:$0xff] %vm8308_vm3, %v8258_v21  ;;  %v5601_v53 = vpop.f32.mrf.mxu2 }
 0x822   : > { %v6446_v8 = vpop.f32.mrf.mxu3  ;;  %v10149_v52 = vpop.eup %10148  ;;  %v7748_v23 = vmul.f32 0.5, %v7620_v19  ;;  %v5800_v25 = vadd.f32 %v5601_v53, %v4955_v45 }
 0x823   : > { %v4759_v22 = vpop.f32.mrf.mxu1  ;;  %v8003_v46 = vmul.f32 0.5, %v10149_v52 }
 0x824   : > { %10150 = vtanh.f32 %v7748_v23  ;;  %v6645_v1 = vadd.f32 %v6446_v8, %v5800_v25  ;;  %v4956_v38 = vadd.f32 %v4759_v22, %v13562_v59  ;;  %v13565_v59 = vld [vmem:[#allocation56_spill] sm:$0xff] }
 0x825   : > { %v7293_v3 = vpop.f32.mrf.mxu0  ;;  %v8131_v63 = vadd.f32 0.5, %v8003_v46  ;;  %v9307_v46 = vld [vmem:[%s10316_s28 + $0xe49] sm:$0xff] }
 0x826   : > { %9382 = vmatmul.msk.bf16.gmra.mxu1 %vm571_vm2, %v4335_v42  ;;  %v7489_v15 = vadd.f32 %v7290_v4, %v6645_v1  ;;  %9574 = vmatmul.msk.bf16.gmra.mxu2 %vm571_vm2, %v5180_v49  ;;  %v9499_v1 = vld [vmem:[%s10316_s28 + $0x420] sm:$0xff] }
 0x827   : > { %9766 = vmatmul.msk.bf16.gmra.mxu3 %vm571_vm2, %v6025_v40  ;;  %v8259_v37 = vmul.f32 %v8131_v63, %v7619_v34  ;;  %v9500_v63 = vld [vmem:[%s10316_s28 + $0x428] sm:$0xff] }
 0x828   : > { %9958 = vmatmul.msk.bf16.gmra.mxu0 %vm571_vm2, %v6869_v7  ;;  %v7621_v62 = vadd.f32 %v12720_v0, %v7489_v15  ;;  %v9308_v7 = vld [vmem:[%s10316_s28 + $0xe51] sm:$0xff]  ;;  %v9691_v15 = vld [vmem:[%s10316_s28 + $0x948] sm:$0xff] }
 0x829   : > { %8388 = vst.msk [vmem:[%s12069_s17 + $0x278] sm:$0xff] %vm8308_vm3, %v8259_v37  ;;  %v5604_v41 = vpop.f32.mrf.mxu2  ;;  %v9692_v37 = vld [vmem:[%s10316_s28 + $0x950] sm:$0xff] }
 0x82a   : > { %v6449_v28 = vpop.f32.mrf.mxu3  ;;  %v10151_v48 = vpop.eup %10150  ;;  %v7749_v55 = vmul.f32 0.5, %v7621_v62  ;;  %v5801_v29 = vadd.f32 %v5604_v41, %v4956_v38  ;;  %v9883_v41 = vld [vmem:[%s10316_s28 + $0x421] sm:$0xff] }
 0x82b   : > { %v4761_v54 = vpop.f32.mrf.mxu1  ;;  %v8004_v33 = vmul.f32 0.5, %v10151_v48 }
 0x82c   : > { %10152 = vtanh.f32 %v7749_v55  ;;  %v6646_v10 = vadd.f32 %v6449_v28, %v5801_v29  ;;  %v4957_v14 = vadd.f32 %v4761_v54, %v13563_v5  ;;  %v9884_v28 = vld [vmem:[%s10316_s28 + $0x429] sm:$0xff]  ;;  %v4337_v29 = vpack.c.bf16 %v9308_v7, %v9307_v46 }
 0x82d   : > { %v7295_v47 = vpop.f32.mrf.mxu0  ;;  %v8132_v2 = vadd.f32 0.5, %v8004_v33  ;;  %v6871_v50 = vpack.c.bf16 %v9884_v28, %v9883_v41  ;;  %v13566_v5 = vld [vmem:[#allocation59_spill] sm:$0xff] }
 0x82e   : > { %v7490_v31 = vadd.f32 %v7293_v3, %v6646_v10 }
 0x82f   : > { %v8260_v24 = vmul.f32 %v8132_v2, %v7620_v19  ;;  %v5182_v2 = vpack.c.bf16 %v9500_v63, %v9499_v1 }
 0x830   : > { %v7622_v34 = vadd.f32 %v12720_v0, %v7490_v31  ;;  %v6027_v31 = vpack.c.bf16 %v9692_v37, %v9691_v15  ;;  %v12945_v37 = vld [vmem:[%s13256_s2] ss:$0 sm:$0xff] }
 0x831   : > { %8389 = vst.msk [vmem:[%s12069_s17 + $0x280] sm:$0xff] %vm8308_vm3, %v8260_v24  ;;  %v5606_v6 = vpop.f32.mrf.mxu2 }
 0x832   : > { %v6451_v61 = vpop.f32.mrf.mxu3  ;;  %v10153_v12 = vpop.eup %10152  ;;  %v7750_v57 = vmul.f32 0.5, %v7622_v34  ;;  %v5802_v16 = vadd.f32 %v5606_v6, %v4957_v14 }
 0x833   : > { %v4764_v4 = vpop.f32.mrf.mxu1  ;;  %v8005_v43 = vmul.f32 0.5, %v10153_v12 }
 0x834   : > { %10154 = vtanh.f32 %v7750_v57  ;;  %v6647_v30 = vadd.f32 %v6451_v61, %v5802_v16  ;;  %v4958_v45 = vadd.f32 %v4764_v4, %v13564_v35  ;;  %v13567_v35 = vld [vmem:[#allocation62_spill] sm:$0xff] }
 0x835   : > { %v7298_v21 = vpop.f32.mrf.mxu0  ;;  %v8133_v9 = vadd.f32 0.5, %v8005_v43  ;;  %v9309_v43 = vld [vmem:[%s10316_s28 + $0xe61] sm:$0xff] }
 0x836   : > { %9383 = vmatmul.msk.bf16.gmra.mxu1 %vm571_vm2, %v4336_v18  ;;  %v7491_v13 = vadd.f32 %v7295_v47, %v6647_v30  ;;  %9575 = vmatmul.msk.bf16.gmra.mxu2 %vm571_vm2, %v5181_v17  ;;  %v9501_v30 = vld [vmem:[%s10316_s28 + $0x438] sm:$0xff] }
 0x837   : > { %9767 = vmatmul.msk.bf16.gmra.mxu3 %vm571_vm2, %v6026_v26  ;;  %v8261_v58 = vmul.f32 %v8133_v9, %v7621_v62  ;;  %v9502_v9 = vld [vmem:[%s10316_s28 + $0x440] sm:$0xff] }
 0x838   : > { %9959 = vmatmul.msk.bf16.gmra.mxu0 %vm571_vm2, %v6870_v56  ;;  %v7623_v19 = vadd.f32 %v12720_v0, %v7491_v13  ;;  %v9310_v56 = vld [vmem:[%s10316_s28 + $0xe69] sm:$0xff]  ;;  %v9693_v13 = vld [vmem:[%s10316_s28 + $0x960] sm:$0xff] }
 0x839   : > { %8390 = vst.msk [vmem:[%s12069_s17 + $0x288] sm:$0xff] %vm8308_vm3, %v8261_v58  ;;  %v5609_v44 = vpop.f32.mrf.mxu2  ;;  %v9694_v58 = vld [vmem:[%s10316_s28 + $0x968] sm:$0xff] }
 0x83a   : > { %v6454_v32 = vpop.f32.mrf.mxu3  ;;  %v10155_v53 = vpop.eup %10154  ;;  %v7751_v8 = vmul.f32 0.5, %v7623_v19  ;;  %v5803_v42 = vadd.f32 %v5609_v44, %v4958_v45  ;;  %v9885_v44 = vld [vmem:[%s10316_s28 + $0x439] sm:$0xff] }
 0x83b   : > { %v4766_v52 = vpop.f32.mrf.mxu1  ;;  %v8006_v23 = vmul.f32 0.5, %v10155_v53 }
 0x83c   : > { %10156 = vtanh.f32 %v7751_v8  ;;  %v6648_v25 = vadd.f32 %v6454_v32, %v5803_v42  ;;  %v4959_v38 = vadd.f32 %v4766_v52, %v13565_v59  ;;  %v9886_v32 = vld [vmem:[%s10316_s28 + $0x441] sm:$0xff]  ;;  %v4338_v42 = vpack.c.bf16 %v9310_v56, %v9309_v43  ;;  %v13568_v59 = vld [vmem:[#allocation65_spill] sm:$0xff] }
 0x83d   : > { %v7300_v22 = vpop.f32.mrf.mxu0  ;;  %v8134_v49 = vadd.f32 0.5, %v8006_v23  ;;  %v6872_v7 = vpack.c.bf16 %v9886_v32, %v9885_v44 }
 0x83e   : > { %v7492_v40 = vadd.f32 %v7298_v21, %v6648_v25 }
 0x83f   : > { %v8262_v3 = vmul.f32 %v8134_v49, %v7622_v34  ;;  %v5183_v49 = vpack.c.bf16 %v9502_v9, %v9501_v30 }
 0x840   : > { %v7624_v62 = vadd.f32 %v12720_v0, %v7492_v40  ;;  %v6028_v40 = vpack.c.bf16 %v9694_v58, %v9693_v13 }
 0x841   : > { %8391 = vst.msk [vmem:[%s12069_s17 + $0x290] sm:$0xff] %vm8308_vm3, %v8262_v3  ;;  %v5611_v48 = vpop.f32.mrf.mxu2 }
 0x842   : > { %v6456_v55 = vpop.f32.mrf.mxu3  ;;  %v10157_v54 = vpop.eup %10156  ;;  %v7752_v33 = vmul.f32 0.5, %v7624_v62  ;;  %v5804_v10 = vadd.f32 %v5611_v48, %v4959_v38 }
 0x843   : > { %v4769_v47 = vpop.f32.mrf.mxu1  ;;  %v8007_v11 = vmul.f32 0.5, %v10157_v54 }
 0x844   : > { %10158 = vtanh.f32 %v7752_v33  ;;  %v6649_v27 = vadd.f32 %v6456_v55, %v5804_v10  ;;  %v4960_v14 = vadd.f32 %v4769_v47, %v13566_v5  ;;  %v13569_v5 = vld [vmem:[#allocation68_spill] sm:$0xff] }
 0x845   : > { %v7303_v24 = vpop.f32.mrf.mxu0  ;;  %v8135_v51 = vadd.f32 0.5, %v8007_v11  ;;  %v9311_v11 = vld [vmem:[%s10316_s28 + $0xe71] sm:$0xff] }
 0x846   : > { %9384 = vmatmul.msk.bf16.gmra.mxu1 %vm571_vm2, %v4337_v29  ;;  %v7493_v36 = vadd.f32 %v7300_v22, %v6649_v27  ;;  %9576 = vmatmul.msk.bf16.gmra.mxu2 %vm571_vm2, %v5182_v2  ;;  %v9503_v27 = vld [vmem:[%s10316_s28 + $0x448] sm:$0xff] }
 0x847   : > { %9768 = vmatmul.msk.bf16.gmra.mxu3 %vm571_vm2, %v6027_v31  ;;  %v8263_v39 = vmul.f32 %v8135_v51, %v7623_v19  ;;  %v9504_v51 = vld [vmem:[%s10316_s28 + $0x450] sm:$0xff] }
 0x848   : > { %9960 = vmatmul.msk.bf16.gmra.mxu0 %vm571_vm2, %v6871_v50  ;;  %v7625_v34 = vadd.f32 %v12720_v0, %v7493_v36  ;;  %v9312_v50 = vld [vmem:[%s10316_s28 + $0xe79] sm:$0xff]  ;;  %v9695_v36 = vld [vmem:[%s10316_s28 + $0x970] sm:$0xff] }
 0x849   : > { %8392 = vst.msk [vmem:[%s12069_s17 + $0x298] sm:$0xff] %vm8308_vm3, %v8263_v39  ;;  %v5614_v60 = vpop.f32.mrf.mxu2  ;;  %v9696_v39 = vld [vmem:[%s10316_s28 + $0x978] sm:$0xff] }
 0x84a   : > { %v6459_v20 = vpop.f32.mrf.mxu3  ;;  %v10159_v6 = vpop.eup %10158  ;;  %v7753_v61 = vmul.f32 0.5, %v7625_v34  ;;  %v5805_v18 = vadd.f32 %v5614_v60, %v4960_v14  ;;  %v9887_v60 = vld [vmem:[%s10316_s28 + $0x449] sm:$0xff] }
 0x84b   : > { %v4771_v12 = vpop.f32.mrf.mxu1  ;;  %v8008_v57 = vmul.f32 0.5, %v10159_v6 }
 0x84c   : > { %10160 = vtanh.f32 %v7753_v61  ;;  %v6650_v16 = vadd.f32 %v6459_v20, %v5805_v18  ;;  %v4961_v45 = vadd.f32 %v4771_v12, %v13567_v35  ;;  %v9888_v20 = vld [vmem:[%s10316_s28 + $0x451] sm:$0xff]  ;;  %v4339_v18 = vpack.c.bf16 %v9312_v50, %v9311_v11  ;;  %v13570_v35 = vld [vmem:[#allocation71_spill] sm:$0xff] }
 0x84d   : > { %v7305_v4 = vpop.f32.mrf.mxu0  ;;  %v8136_v17 = vadd.f32 0.5, %v8008_v57  ;;  %v6873_v56 = vpack.c.bf16 %v9888_v20, %v9887_v60 }
 0x84e   : > { %v7494_v26 = vadd.f32 %v7303_v24, %v6650_v16 }
 0x84f   : > { %v8264_v21 = vmul.f32 %v8136_v17, %v7624_v62  ;;  %v5184_v17 = vpack.c.bf16 %v9504_v51, %v9503_v27 }
 0x850   : > { %v7626_v19 = vadd.f32 %v12720_v0, %v7494_v26  ;;  %v6029_v26 = vpack.c.bf16 %v9696_v39, %v9695_v36 }
 0x851   : > { %8393 = vst.msk [vmem:[%s12069_s17 + $0x2a0] sm:$0xff] %vm8308_vm3, %v8264_v21  ;;  %v5616_v53 = vpop.f32.mrf.mxu2 }
 0x852   : > { %v6461_v8 = vpop.f32.mrf.mxu3  ;;  %v10161_v52 = vpop.eup %10160  ;;  %v7754_v23 = vmul.f32 0.5, %v7626_v19  ;;  %v5806_v25 = vadd.f32 %v5616_v53, %v4961_v45 }
 0x853   : > { %v4774_v22 = vpop.f32.mrf.mxu1  ;;  %v8009_v46 = vmul.f32 0.5, %v10161_v52 }
 0x854   : > { %10162 = vtanh.f32 %v7754_v23  ;;  %v6651_v0 = vadd.f32 %v6461_v8, %v5806_v25  ;;  %v4962_v38 = vadd.f32 %v4774_v22, %v13568_v59  ;;  %v13571_v59 = vld [vmem:[#allocation74_spill] sm:$0xff] }
 0x855   : > { %v7308_v1 = vpop.f32.mrf.mxu0  ;;  %v8137_v3 = vadd.f32 0.5, %v8009_v46  ;;  %v9313_v46 = vld [vmem:[%s10316_s28 + $0xe89] sm:$0xff] }
 0x856   : > { %9385 = vmatmul.msk.bf16.gmra.mxu1 %vm571_vm2, %v4338_v42  ;;  %v7495_v63 = vadd.f32 %v7305_v4, %v6651_v0  ;;  %9577 = vmatmul.msk.bf16.gmra.mxu2 %vm571_vm2, %v5183_v49  ;;  %v9505_v0 = vld [vmem:[%s10316_s28 + $0x460] sm:$0xff] }
 0x857   : > { %9769 = vmatmul.msk.bf16.gmra.mxu3 %vm571_vm2, %v6028_v40  ;;  %v8265_v15 = vmul.f32 %v8137_v3, %v7625_v34  ;;  %v9506_v3 = vld [vmem:[%s10316_s28 + $0x468] sm:$0xff] }
 0x858   : > { %9961 = vmatmul.msk.bf16.gmra.mxu0 %vm571_vm2, %v6872_v7  ;;  %v7627_v62 = vadd.f32 %v12945_v37, %v7495_v63  ;;  %v9314_v7 = vld [vmem:[%s10316_s28 + $0xe91] sm:$0xff]  ;;  %v9697_v63 = vld [vmem:[%s10316_s28 + $0x988] sm:$0xff] }
 0x859   : > { %8394 = vst.msk [vmem:[%s12069_s17 + $0x2a8] sm:$0xff] %vm8308_vm3, %v8265_v15  ;;  %v5619_v41 = vpop.f32.mrf.mxu2  ;;  %v9698_v15 = vld [vmem:[%s10316_s28 + $0x990] sm:$0xff] }
 0x85a   : > { %v6464_v28 = vpop.f32.mrf.mxu3  ;;  %v10163_v48 = vpop.eup %10162  ;;  %v7755_v55 = vmul.f32 0.5, %v7627_v62  ;;  %v5807_v29 = vadd.f32 %v5619_v41, %v4962_v38  ;;  %v9889_v41 = vld [vmem:[%s10316_s28 + $0x461] sm:$0xff] }
 0x85b   : > { %v4776_v54 = vpop.f32.mrf.mxu1  ;;  %v8010_v33 = vmul.f32 0.5, %v10163_v48 }
 0x85c   : > { %10164 = vtanh.f32 %v7755_v55  ;;  %v6652_v10 = vadd.f32 %v6464_v28, %v5807_v29  ;;  %v4963_v14 = vadd.f32 %v4776_v54, %v13569_v5  ;;  %v9890_v28 = vld [vmem:[%s10316_s28 + $0x469] sm:$0xff]  ;;  %v4340_v29 = vpack.c.bf16 %v9314_v7, %v9313_v46  ;;  %v13572_v5 = vld [vmem:[#allocation77_spill] sm:$0xff] }
 0x85d   : > { %v7310_v47 = vpop.f32.mrf.mxu0  ;;  %v8138_v2 = vadd.f32 0.5, %v8010_v33  ;;  %v6874_v50 = vpack.c.bf16 %v9890_v28, %v9889_v41 }
 0x85e   : > { %v7496_v31 = vadd.f32 %v7308_v1, %v6652_v10 }
 0x85f   : > { %v8266_v24 = vmul.f32 %v8138_v2, %v7626_v19  ;;  %v5185_v2 = vpack.c.bf16 %v9506_v3, %v9505_v0 }
 0x860   : > { %v7628_v34 = vadd.f32 %v12945_v37, %v7496_v31  ;;  %v6030_v31 = vpack.c.bf16 %v9698_v15, %v9697_v63 }
 0x861   : > { %8395 = vst.msk [vmem:[%s12069_s17 + $0x2b0] sm:$0xff] %vm8308_vm3, %v8266_v24  ;;  %v5621_v6 = vpop.f32.mrf.mxu2 }
 0x862   : > { %v6466_v61 = vpop.f32.mrf.mxu3  ;;  %v10165_v12 = vpop.eup %10164  ;;  %v7756_v57 = vmul.f32 0.5, %v7628_v34  ;;  %v5808_v16 = vadd.f32 %v5621_v6, %v4963_v14 }
 0x863   : > { %v4779_v4 = vpop.f32.mrf.mxu1  ;;  %v8011_v43 = vmul.f32 0.5, %v10165_v12 }
 0x864   : > { %10166 = vtanh.f32 %v7756_v57  ;;  %v6653_v30 = vadd.f32 %v6466_v61, %v5808_v16  ;;  %v4964_v45 = vadd.f32 %v4779_v4, %v13570_v35  ;;  %v13573_v35 = vld [vmem:[#allocation80_spill] sm:$0xff] }
 0x865   : > { %v7313_v21 = vpop.f32.mrf.mxu0  ;;  %v8139_v9 = vadd.f32 0.5, %v8011_v43  ;;  %v9315_v43 = vld [vmem:[%s10316_s28 + $0xe99] sm:$0xff] }
 0x866   : > { %9386 = vmatmul.msk.bf16.gmra.mxu1 %vm571_vm2, %v4339_v18  ;;  %v7497_v13 = vadd.f32 %v7310_v47, %v6653_v30  ;;  %9578 = vmatmul.msk.bf16.gmra.mxu2 %vm571_vm2, %v5184_v17  ;;  %v9507_v30 = vld [vmem:[%s10316_s28 + $0x470] sm:$0xff] }
 0x867   : > { %9770 = vmatmul.msk.bf16.gmra.mxu3 %vm571_vm2, %v6029_v26  ;;  %v8267_v58 = vmul.f32 %v8139_v9, %v7627_v62  ;;  %v9508_v9 = vld [vmem:[%s10316_s28 + $0x478] sm:$0xff] }
 0x868   : > { %9962 = vmatmul.msk.bf16.gmra.mxu0 %vm571_vm2, %v6873_v56  ;;  %v7629_v19 = vadd.f32 %v12945_v37, %v7497_v13  ;;  %v9316_v56 = vld [vmem:[%s10316_s28 + $0xea1] sm:$0xff]  ;;  %v9699_v13 = vld [vmem:[%s10316_s28 + $0x998] sm:$0xff] }
 0x869   : > { %8396 = vst.msk [vmem:[%s12069_s17 + $0x2b8] sm:$0xff] %vm8308_vm3, %v8267_v58  ;;  %v5624_v44 = vpop.f32.mrf.mxu2  ;;  %v9700_v58 = vld [vmem:[%s10316_s28 + $0x9a0] sm:$0xff] }
 0x86a   : > { %v6469_v32 = vpop.f32.mrf.mxu3  ;;  %v10167_v53 = vpop.eup %10166  ;;  %v7757_v8 = vmul.f32 0.5, %v7629_v19  ;;  %v5809_v42 = vadd.f32 %v5624_v44, %v4964_v45  ;;  %v9891_v44 = vld [vmem:[%s10316_s28 + $0x471] sm:$0xff] }
 0x86b   : > { %v4781_v52 = vpop.f32.mrf.mxu1  ;;  %v8012_v23 = vmul.f32 0.5, %v10167_v53 }
 0x86c   : > { %10168 = vtanh.f32 %v7757_v8  ;;  %v6654_v25 = vadd.f32 %v6469_v32, %v5809_v42  ;;  %v4965_v38 = vadd.f32 %v4781_v52, %v13571_v59  ;;  %v9892_v32 = vld [vmem:[%s10316_s28 + $0x479] sm:$0xff]  ;;  %v4341_v42 = vpack.c.bf16 %v9316_v56, %v9315_v43  ;;  %v13574_v59 = vld [vmem:[#allocation83_spill] sm:$0xff] }
 0x86d   : > { %v7315_v22 = vpop.f32.mrf.mxu0  ;;  %v8140_v49 = vadd.f32 0.5, %v8012_v23  ;;  %v6875_v7 = vpack.c.bf16 %v9892_v32, %v9891_v44 }
 0x86e   : > { %v7498_v40 = vadd.f32 %v7313_v21, %v6654_v25 }
 0x86f   : > { %v8268_v1 = vmul.f32 %v8140_v49, %v7628_v34  ;;  %v5186_v49 = vpack.c.bf16 %v9508_v9, %v9507_v30 }
 0x870   : > { %v7630_v62 = vadd.f32 %v12945_v37, %v7498_v40  ;;  %v6031_v40 = vpack.c.bf16 %v9700_v58, %v9699_v13 }
 0x871   : > { %8397 = vst.msk [vmem:[%s12069_s17 + $0x2c0] sm:$0xff] %vm8308_vm3, %v8268_v1  ;;  %v5626_v48 = vpop.f32.mrf.mxu2 }
 0x872   : > { %v6471_v55 = vpop.f32.mrf.mxu3  ;;  %v10169_v54 = vpop.eup %10168  ;;  %v7758_v33 = vmul.f32 0.5, %v7630_v62  ;;  %v5810_v10 = vadd.f32 %v5626_v48, %v4965_v38 }
 0x873   : > { %v4784_v47 = vpop.f32.mrf.mxu1  ;;  %v8013_v11 = vmul.f32 0.5, %v10169_v54 }
 0x874   : > { %10170 = vtanh.f32 %v7758_v33  ;;  %v6655_v27 = vadd.f32 %v6471_v55, %v5810_v10  ;;  %v4966_v14 = vadd.f32 %v4784_v47, %v13572_v5  ;;  %v13575_v5 = vld [vmem:[#allocation86_spill] sm:$0xff] }
 0x875   : > { %v7318_v24 = vpop.f32.mrf.mxu0  ;;  %v8141_v51 = vadd.f32 0.5, %v8013_v11  ;;  %v9317_v11 = vld [vmem:[%s10316_s28 + $0xeb1] sm:$0xff] }
 0x876   : > { %9387 = vmatmul.msk.bf16.gmra.mxu1 %vm571_vm2, %v4340_v29  ;;  %v7499_v36 = vadd.f32 %v7315_v22, %v6655_v27  ;;  %9579 = vmatmul.msk.bf16.gmra.mxu2 %vm571_vm2, %v5185_v2  ;;  %v9509_v27 = vld [vmem:[%s10316_s28 + $0x488] sm:$0xff] }
 0x877   : > { %9771 = vmatmul.msk.bf16.gmra.mxu3 %vm571_vm2, %v6030_v31  ;;  %v8269_v39 = vmul.f32 %v8141_v51, %v7629_v19  ;;  %v9510_v51 = vld [vmem:[%s10316_s28 + $0x490] sm:$0xff] }
 0x878   : > { %9963 = vmatmul.msk.bf16.gmra.mxu0 %vm571_vm2, %v6874_v50  ;;  %v7631_v34 = vadd.f32 %v12945_v37, %v7499_v36  ;;  %v9318_v50 = vld [vmem:[%s10316_s28 + $0xeb9] sm:$0xff]  ;;  %v9701_v36 = vld [vmem:[%s10316_s28 + $0x9b0] sm:$0xff] }
 0x879   : > { %8398 = vst.msk [vmem:[%s12069_s17 + $0x2c8] sm:$0xff] %vm8308_vm3, %v8269_v39  ;;  %v5629_v60 = vpop.f32.mrf.mxu2  ;;  %v9702_v39 = vld [vmem:[%s10316_s28 + $0x9b8] sm:$0xff] }
 0x87a   : > { %v6474_v20 = vpop.f32.mrf.mxu3  ;;  %v10171_v6 = vpop.eup %10170  ;;  %v7759_v61 = vmul.f32 0.5, %v7631_v34  ;;  %v5811_v18 = vadd.f32 %v5629_v60, %v4966_v14  ;;  %v9893_v60 = vld [vmem:[%s10316_s28 + $0x489] sm:$0xff] }
 0x87b   : > { %v4786_v12 = vpop.f32.mrf.mxu1  ;;  %v8014_v57 = vmul.f32 0.5, %v10171_v6 }
 0x87c   : > { %10172 = vtanh.f32 %v7759_v61  ;;  %v6656_v16 = vadd.f32 %v6474_v20, %v5811_v18  ;;  %v4967_v45 = vadd.f32 %v4786_v12, %v13573_v35  ;;  %v9894_v20 = vld [vmem:[%s10316_s28 + $0x491] sm:$0xff]  ;;  %v4342_v18 = vpack.c.bf16 %v9318_v50, %v9317_v11  ;;  %v13576_v35 = vld [vmem:[#allocation3_spill] sm:$0xff] }
 0x87d   : > { %v7320_v4 = vpop.f32.mrf.mxu0  ;;  %v8142_v17 = vadd.f32 0.5, %v8014_v57  ;;  %v6876_v56 = vpack.c.bf16 %v9894_v20, %v9893_v60 }
 0x87e   : > { %v7500_v26 = vadd.f32 %v7318_v24, %v6656_v16 }
 0x87f   : > { %v8270_v21 = vmul.f32 %v8142_v17, %v7630_v62  ;;  %v5187_v17 = vpack.c.bf16 %v9510_v51, %v9509_v27 }
 0x880   : > { %v7632_v19 = vadd.f32 %v12945_v37, %v7500_v26  ;;  %v6032_v26 = vpack.c.bf16 %v9702_v39, %v9701_v36 }
 0x881   : > { %8399 = vst.msk [vmem:[%s12069_s17 + $0x2d0] sm:$0xff] %vm8308_vm3, %v8270_v21  ;;  %v5631_v53 = vpop.f32.mrf.mxu2 }
 0x882   : > { %v6476_v8 = vpop.f32.mrf.mxu3  ;;  %v10173_v52 = vpop.eup %10172  ;;  %v7760_v23 = vmul.f32 0.5, %v7632_v19  ;;  %v5812_v25 = vadd.f32 %v5631_v53, %v4967_v45 }
 0x883   : > { %v4789_v22 = vpop.f32.mrf.mxu1  ;;  %v8015_v46 = vmul.f32 0.5, %v10173_v52 }
 0x884   : > { %10174 = vtanh.f32 %v7760_v23  ;;  %v6657_v0 = vadd.f32 %v6476_v8, %v5812_v25  ;;  %v4968_v38 = vadd.f32 %v4789_v22, %v13574_v59  ;;  %v13577_v59 = vld [vmem:[#allocation5_spill] sm:$0xff] }
 0x885   : > { %v7323_v1 = vpop.f32.mrf.mxu0  ;;  %v8143_v3 = vadd.f32 0.5, %v8015_v46  ;;  %v9319_v46 = vld [vmem:[%s10316_s28 + $0xec1] sm:$0xff] }
 0x886   : > { %9388 = vmatmul.msk.bf16.gmra.mxu1 %vm571_vm2, %v4341_v42  ;;  %v7501_v63 = vadd.f32 %v7320_v4, %v6657_v0  ;;  %9580 = vmatmul.msk.bf16.gmra.mxu2 %vm571_vm2, %v5186_v49  ;;  %v9511_v0 = vld [vmem:[%s10316_s28 + $0x498] sm:$0xff] }
 0x887   : > { %9772 = vmatmul.msk.bf16.gmra.mxu3 %vm571_vm2, %v6031_v40  ;;  %v8271_v15 = vmul.f32 %v8143_v3, %v7631_v34  ;;  %v9512_v3 = vld [vmem:[%s10316_s28 + $0x4a0] sm:$0xff] }
 0x888   : > { %9964 = vmatmul.msk.bf16.gmra.mxu0 %vm571_vm2, %v6875_v7  ;;  %v7633_v62 = vadd.f32 %v12945_v37, %v7501_v63  ;;  %v9320_v7 = vld [vmem:[%s10316_s28 + $0xec9] sm:$0xff]  ;;  %v9703_v63 = vld [vmem:[%s10316_s28 + $0x9c0] sm:$0xff] }
 0x889   : > { %8400 = vst.msk [vmem:[%s12069_s17 + $0x2d8] sm:$0xff] %vm8308_vm3, %v8271_v15  ;;  %v5634_v41 = vpop.f32.mrf.mxu2  ;;  %v9704_v15 = vld [vmem:[%s10316_s28 + $0x9c8] sm:$0xff] }
 0x88a   : > { %v6479_v28 = vpop.f32.mrf.mxu3  ;;  %v10175_v48 = vpop.eup %10174  ;;  %v7761_v55 = vmul.f32 0.5, %v7633_v62  ;;  %v5813_v29 = vadd.f32 %v5634_v41, %v4968_v38  ;;  %v9895_v41 = vld [vmem:[%s10316_s28 + $0x499] sm:$0xff] }
 0x88b   : > { %v4791_v54 = vpop.f32.mrf.mxu1  ;;  %v8016_v33 = vmul.f32 0.5, %v10175_v48 }
 0x88c   : > { %10176 = vtanh.f32 %v7761_v55  ;;  %v6658_v10 = vadd.f32 %v6479_v28, %v5813_v29  ;;  %v4969_v14 = vadd.f32 %v4791_v54, %v13575_v5  ;;  %v9896_v28 = vld [vmem:[%s10316_s28 + $0x4a1] sm:$0xff]  ;;  %v4343_v29 = vpack.c.bf16 %v9320_v7, %v9319_v46 }
 0x88d   : > { %v7325_v47 = vpop.f32.mrf.mxu0  ;;  %v8144_v2 = vadd.f32 0.5, %v8016_v33  ;;  %v6877_v50 = vpack.c.bf16 %v9896_v28, %v9895_v41  ;;  %v13578_v5 = vld [vmem:[#allocation7_spill] sm:$0xff] }
 0x88e   : > { %v7502_v31 = vadd.f32 %v7323_v1, %v6658_v10 }
 0x88f   : > { %v8272_v24 = vmul.f32 %v8144_v2, %v7632_v19  ;;  %v5188_v2 = vpack.c.bf16 %v9512_v3, %v9511_v0 }
 0x890   : > { %v7634_v34 = vadd.f32 %v12945_v37, %v7502_v31  ;;  %v6033_v31 = vpack.c.bf16 %v9704_v15, %v9703_v63 }
 0x891   : > { %8401 = vst.msk [vmem:[%s12069_s17 + $0x2e0] sm:$0xff] %vm8308_vm3, %v8272_v24  ;;  %v5636_v6 = vpop.f32.mrf.mxu2 }
 0x892   : > { %v6481_v61 = vpop.f32.mrf.mxu3  ;;  %v10177_v12 = vpop.eup %10176  ;;  %v7762_v57 = vmul.f32 0.5, %v7634_v34  ;;  %v5814_v16 = vadd.f32 %v5636_v6, %v4969_v14 }
 0x893   : > { %v4794_v4 = vpop.f32.mrf.mxu1  ;;  %v8017_v43 = vmul.f32 0.5, %v10177_v12 }
 0x894   : > { %10178 = vtanh.f32 %v7762_v57  ;;  %v6659_v30 = vadd.f32 %v6481_v61, %v5814_v16  ;;  %v4970_v45 = vadd.f32 %v4794_v4, %v13576_v35  ;;  %v13579_v35 = vld [vmem:[#allocation9_spill] sm:$0xff] }
 0x895   : > { %v7328_v21 = vpop.f32.mrf.mxu0  ;;  %v8145_v9 = vadd.f32 0.5, %v8017_v43  ;;  %v9321_v43 = vld [vmem:[%s10316_s28 + $0xed9] sm:$0xff] }
 0x896   : > { %9389 = vmatmul.msk.bf16.gmra.mxu1 %vm571_vm2, %v4342_v18  ;;  %v7503_v13 = vadd.f32 %v7325_v47, %v6659_v30  ;;  %9581 = vmatmul.msk.bf16.gmra.mxu2 %vm571_vm2, %v5187_v17  ;;  %v9513_v30 = vld [vmem:[%s10316_s28 + $0x4b0] sm:$0xff] }
 0x897   : > { %9773 = vmatmul.msk.bf16.gmra.mxu3 %vm571_vm2, %v6032_v26  ;;  %v8273_v58 = vmul.f32 %v8145_v9, %v7633_v62  ;;  %v9514_v9 = vld [vmem:[%s10316_s28 + $0x4b8] sm:$0xff] }
 0x898   : > { %9965 = vmatmul.msk.bf16.gmra.mxu0 %vm571_vm2, %v6876_v56  ;;  %v7635_v19 = vadd.f32 %v12945_v37, %v7503_v13  ;;  %v9322_v56 = vld [vmem:[%s10316_s28 + $0xee1] sm:$0xff]  ;;  %v9705_v13 = vld [vmem:[%s10316_s28 + $0x9d8] sm:$0xff] }
 0x899   : > { %8402 = vst.msk [vmem:[%s12069_s17 + $0x2e8] sm:$0xff] %vm8308_vm3, %v8273_v58  ;;  %v5639_v44 = vpop.f32.mrf.mxu2  ;;  %v9706_v58 = vld [vmem:[%s10316_s28 + $0x9e0] sm:$0xff] }
 0x89a   : > { %v6484_v32 = vpop.f32.mrf.mxu3  ;;  %v10179_v53 = vpop.eup %10178  ;;  %v7763_v8 = vmul.f32 0.5, %v7635_v19  ;;  %v5815_v42 = vadd.f32 %v5639_v44, %v4970_v45  ;;  %v9897_v44 = vld [vmem:[%s10316_s28 + $0x4b1] sm:$0xff] }
 0x89b   : > { %v4796_v52 = vpop.f32.mrf.mxu1  ;;  %v8018_v23 = vmul.f32 0.5, %v10179_v53 }
 0x89c   : > { %10180 = vtanh.f32 %v7763_v8  ;;  %v6660_v25 = vadd.f32 %v6484_v32, %v5815_v42  ;;  %v4971_v38 = vadd.f32 %v4796_v52, %v13577_v59  ;;  %v9898_v32 = vld [vmem:[%s10316_s28 + $0x4b9] sm:$0xff]  ;;  %v4344_v42 = vpack.c.bf16 %v9322_v56, %v9321_v43  ;;  %v13580_v59 = vld [vmem:[#allocation11_spill] sm:$0xff] }
 0x89d   : > { %v7330_v22 = vpop.f32.mrf.mxu0  ;;  %v8146_v49 = vadd.f32 0.5, %v8018_v23  ;;  %v6878_v7 = vpack.c.bf16 %v9898_v32, %v9897_v44 }
 0x89e   : > { %v7504_v40 = vadd.f32 %v7328_v21, %v6660_v25 }
 0x89f   : > { %v8274_v1 = vmul.f32 %v8146_v49, %v7634_v34  ;;  %v5189_v49 = vpack.c.bf16 %v9514_v9, %v9513_v30 }
 0x8a0   : > { %v7636_v62 = vadd.f32 %v12945_v37, %v7504_v40  ;;  %v6034_v40 = vpack.c.bf16 %v9706_v58, %v9705_v13 }
 0x8a1   : > { %8403 = vst.msk [vmem:[%s12069_s17 + $0x2f0] sm:$0xff] %vm8308_vm3, %v8274_v1  ;;  %v5641_v48 = vpop.f32.mrf.mxu2 }
 0x8a2   : > { %v6486_v55 = vpop.f32.mrf.mxu3  ;;  %v10181_v54 = vpop.eup %10180  ;;  %v7764_v33 = vmul.f32 0.5, %v7636_v62  ;;  %v5816_v10 = vadd.f32 %v5641_v48, %v4971_v38 }
 0x8a3   : > { %v4799_v47 = vpop.f32.mrf.mxu1  ;;  %v8019_v11 = vmul.f32 0.5, %v10181_v54 }
 0x8a4   : > { %10182 = vtanh.f32 %v7764_v33  ;;  %v6661_v27 = vadd.f32 %v6486_v55, %v5816_v10  ;;  %v4972_v14 = vadd.f32 %v4799_v47, %v13578_v5  ;;  %v13581_v5 = vld [vmem:[#allocation13_spill] sm:$0xff] }
 0x8a5   : > { %v7333_v24 = vpop.f32.mrf.mxu0  ;;  %v8147_v51 = vadd.f32 0.5, %v8019_v11  ;;  %v9323_v11 = vld [vmem:[%s10316_s28 + $0xee9] sm:$0xff] }
 0x8a6   : > { %9390 = vmatmul.msk.bf16.gmra.mxu1 %vm571_vm2, %v4343_v29  ;;  %v7505_v36 = vadd.f32 %v7330_v22, %v6661_v27  ;;  %9582 = vmatmul.msk.bf16.gmra.mxu2 %vm571_vm2, %v5188_v2  ;;  %v9515_v27 = vld [vmem:[%s10316_s28 + $0x4c0] sm:$0xff] }
 0x8a7   : > { %9774 = vmatmul.msk.bf16.gmra.mxu3 %vm571_vm2, %v6033_v31  ;;  %v8275_v39 = vmul.f32 %v8147_v51, %v7635_v19  ;;  %v9516_v51 = vld [vmem:[%s10316_s28 + $0x4c8] sm:$0xff] }
 0x8a8   : > { %9966 = vmatmul.msk.bf16.gmra.mxu0 %vm571_vm2, %v6877_v50  ;;  %v7637_v34 = vadd.f32 %v12945_v37, %v7505_v36  ;;  %v9324_v50 = vld [vmem:[%s10316_s28 + $0xef1] sm:$0xff]  ;;  %v9707_v36 = vld [vmem:[%s10316_s28 + $0x9e8] sm:$0xff] }
 0x8a9   : > { %8404 = vst.msk [vmem:[%s12069_s17 + $0x2f8] sm:$0xff] %vm8308_vm3, %v8275_v39  ;;  %v5644_v60 = vpop.f32.mrf.mxu2  ;;  %v9708_v39 = vld [vmem:[%s10316_s28 + $0x9f0] sm:$0xff] }
 0x8aa   : > { %v6489_v20 = vpop.f32.mrf.mxu3  ;;  %v10183_v6 = vpop.eup %10182  ;;  %v7765_v61 = vmul.f32 0.5, %v7637_v34  ;;  %v5817_v18 = vadd.f32 %v5644_v60, %v4972_v14  ;;  %v9899_v60 = vld [vmem:[%s10316_s28 + $0x4c1] sm:$0xff] }
 0x8ab   : > { %v4801_v12 = vpop.f32.mrf.mxu1  ;;  %v8020_v57 = vmul.f32 0.5, %v10183_v6 }
 0x8ac   : > { %10184 = vtanh.f32 %v7765_v61  ;;  %v6662_v16 = vadd.f32 %v6489_v20, %v5817_v18  ;;  %v4973_v45 = vadd.f32 %v4801_v12, %v13579_v35  ;;  %v9900_v20 = vld [vmem:[%s10316_s28 + $0x4c9] sm:$0xff]  ;;  %v4345_v18 = vpack.c.bf16 %v9324_v50, %v9323_v11 }
 0x8ad   : > { %v7335_v4 = vpop.f32.mrf.mxu0  ;;  %v8148_v17 = vadd.f32 0.5, %v8020_v57  ;;  %v6879_v56 = vpack.c.bf16 %v9900_v20, %v9899_v60  ;;  %v13582_v35 = vld [vmem:[#allocation15_spill] sm:$0xff] }
 0x8ae   : > { %v7506_v26 = vadd.f32 %v7333_v24, %v6662_v16 }
 0x8af   : > { %v8276_v21 = vmul.f32 %v8148_v17, %v7636_v62  ;;  %v5190_v17 = vpack.c.bf16 %v9516_v51, %v9515_v27 }
 0x8b0   : > { %v7638_v19 = vadd.f32 %v12945_v37, %v7506_v26  ;;  %v6035_v26 = vpack.c.bf16 %v9708_v39, %v9707_v36 }
 0x8b1   : > { %8405 = vst.msk [vmem:[%s12069_s17 + $0x300] sm:$0xff] %vm8308_vm3, %v8276_v21  ;;  %v5646_v53 = vpop.f32.mrf.mxu2 }
 0x8b2   : > { %v6491_v8 = vpop.f32.mrf.mxu3  ;;  %v10185_v52 = vpop.eup %10184  ;;  %v7766_v23 = vmul.f32 0.5, %v7638_v19  ;;  %v5818_v25 = vadd.f32 %v5646_v53, %v4973_v45 }
 0x8b3   : > { %v4804_v22 = vpop.f32.mrf.mxu1  ;;  %v8021_v46 = vmul.f32 0.5, %v10185_v52 }
 0x8b4   : > { %10186 = vtanh.f32 %v7766_v23  ;;  %v6663_v0 = vadd.f32 %v6491_v8, %v5818_v25  ;;  %v4974_v38 = vadd.f32 %v4804_v22, %v13580_v59  ;;  %v13583_v59 = vld [vmem:[#allocation17_spill] sm:$0xff] }
 0x8b5   : > { %v7338_v1 = vpop.f32.mrf.mxu0  ;;  %v8149_v3 = vadd.f32 0.5, %v8021_v46  ;;  %v9325_v46 = vld [vmem:[%s10316_s28 + $0xf01] sm:$0xff] }
 0x8b6   : > { %9391 = vmatmul.msk.bf16.gmra.mxu1 %vm571_vm2, %v4344_v42  ;;  %v7507_v63 = vadd.f32 %v7335_v4, %v6663_v0  ;;  %9583 = vmatmul.msk.bf16.gmra.mxu2 %vm571_vm2, %v5189_v49  ;;  %v9517_v0 = vld [vmem:[%s10316_s28 + $0x4d8] sm:$0xff] }
 0x8b7   : > { %9775 = vmatmul.msk.bf16.gmra.mxu3 %vm571_vm2, %v6034_v40  ;;  %v8277_v15 = vmul.f32 %v8149_v3, %v7637_v34  ;;  %v9518_v3 = vld [vmem:[%s10316_s28 + $0x4e0] sm:$0xff] }
 0x8b8   : > { %9967 = vmatmul.msk.bf16.gmra.mxu0 %vm571_vm2, %v6878_v7  ;;  %v7639_v62 = vadd.f32 %v12945_v37, %v7507_v63  ;;  %v9326_v7 = vld [vmem:[%s10316_s28 + $0xf09] sm:$0xff]  ;;  %v9709_v63 = vld [vmem:[%s10316_s28 + $0xa00] sm:$0xff] }
 0x8b9   : > { %8406 = vst.msk [vmem:[%s12069_s17 + $0x308] sm:$0xff] %vm8308_vm3, %v8277_v15  ;;  %v5649_v41 = vpop.f32.mrf.mxu2  ;;  %v9710_v15 = vld [vmem:[%s10316_s28 + $0xa08] sm:$0xff] }
 0x8ba   : > { %v6494_v28 = vpop.f32.mrf.mxu3  ;;  %v10187_v48 = vpop.eup %10186  ;;  %v7767_v55 = vmul.f32 0.5, %v7639_v62  ;;  %v5819_v29 = vadd.f32 %v5649_v41, %v4974_v38  ;;  %v9901_v41 = vld [vmem:[%s10316_s28 + $0x4d9] sm:$0xff] }
 0x8bb   : > { %v4806_v54 = vpop.f32.mrf.mxu1  ;;  %v8022_v33 = vmul.f32 0.5, %v10187_v48 }
 0x8bc   : > { %10188 = vtanh.f32 %v7767_v55  ;;  %v6664_v10 = vadd.f32 %v6494_v28, %v5819_v29  ;;  %v4975_v14 = vadd.f32 %v4806_v54, %v13581_v5  ;;  %v9902_v28 = vld [vmem:[%s10316_s28 + $0x4e1] sm:$0xff]  ;;  %v4346_v29 = vpack.c.bf16 %v9326_v7, %v9325_v46 }
 0x8bd   : > { %v7340_v47 = vpop.f32.mrf.mxu0  ;;  %v8150_v2 = vadd.f32 0.5, %v8022_v33  ;;  %v6880_v50 = vpack.c.bf16 %v9902_v28, %v9901_v41  ;;  %v13584_v5 = vld [vmem:[#allocation19_spill] sm:$0xff] }
 0x8be   : > { %v7508_v31 = vadd.f32 %v7338_v1, %v6664_v10 }
 0x8bf   : > { %v8278_v24 = vmul.f32 %v8150_v2, %v7638_v19  ;;  %v5191_v2 = vpack.c.bf16 %v9518_v3, %v9517_v0 }
 0x8c0   : > { %v7640_v34 = vadd.f32 %v12945_v37, %v7508_v31  ;;  %v6036_v31 = vpack.c.bf16 %v9710_v15, %v9709_v63 }
 0x8c1   : > { %8407 = vst.msk [vmem:[%s12069_s17 + $0x310] sm:$0xff] %vm8308_vm3, %v8278_v24  ;;  %v5651_v6 = vpop.f32.mrf.mxu2 }
 0x8c2   : > { %v6496_v61 = vpop.f32.mrf.mxu3  ;;  %v10189_v12 = vpop.eup %10188  ;;  %v7768_v57 = vmul.f32 0.5, %v7640_v34  ;;  %v5820_v16 = vadd.f32 %v5651_v6, %v4975_v14 }
 0x8c3   : > { %v4809_v4 = vpop.f32.mrf.mxu1  ;;  %v8023_v43 = vmul.f32 0.5, %v10189_v12 }
 0x8c4   : > { %10190 = vtanh.f32 %v7768_v57  ;;  %v6665_v30 = vadd.f32 %v6496_v61, %v5820_v16  ;;  %v4976_v45 = vadd.f32 %v4809_v4, %v13582_v35  ;;  %v13585_v35 = vld [vmem:[#allocation21_spill] sm:$0xff] }
 0x8c5   : > { %v7343_v21 = vpop.f32.mrf.mxu0  ;;  %v8151_v9 = vadd.f32 0.5, %v8023_v43  ;;  %v9327_v43 = vld [vmem:[%s10316_s28 + $0xf11] sm:$0xff] }
 0x8c6   : > { %9392 = vmatmul.msk.bf16.gmra.mxu1 %vm571_vm2, %v4345_v18  ;;  %v7509_v13 = vadd.f32 %v7340_v47, %v6665_v30  ;;  %9584 = vmatmul.msk.bf16.gmra.mxu2 %vm571_vm2, %v5190_v17  ;;  %v9519_v30 = vld [vmem:[%s10316_s28 + $0x4e8] sm:$0xff] }
 0x8c7   : > { %9776 = vmatmul.msk.bf16.gmra.mxu3 %vm571_vm2, %v6035_v26  ;;  %v8279_v58 = vmul.f32 %v8151_v9, %v7639_v62  ;;  %v9520_v9 = vld [vmem:[%s10316_s28 + $0x4f0] sm:$0xff] }
 0x8c8   : > { %9968 = vmatmul.msk.bf16.gmra.mxu0 %vm571_vm2, %v6879_v56  ;;  %v7641_v19 = vadd.f32 %v12945_v37, %v7509_v13  ;;  %v9328_v56 = vld [vmem:[%s10316_s28 + $0xf19] sm:$0xff]  ;;  %v9711_v13 = vld [vmem:[%s10316_s28 + $0xa10] sm:$0xff] }
 0x8c9   : > { %8408 = vst.msk [vmem:[%s12069_s17 + $0x318] sm:$0xff] %vm8308_vm3, %v8279_v58  ;;  %v5654_v44 = vpop.f32.mrf.mxu2  ;;  %v9712_v58 = vld [vmem:[%s10316_s28 + $0xa18] sm:$0xff] }
 0x8ca   : > { %v6499_v32 = vpop.f32.mrf.mxu3  ;;  %v10191_v53 = vpop.eup %10190  ;;  %v7769_v8 = vmul.f32 0.5, %v7641_v19  ;;  %v5821_v42 = vadd.f32 %v5654_v44, %v4976_v45  ;;  %v9903_v44 = vld [vmem:[%s10316_s28 + $0x4e9] sm:$0xff] }
 0x8cb   : > { %v4811_v52 = vpop.f32.mrf.mxu1  ;;  %v8024_v23 = vmul.f32 0.5, %v10191_v53 }
 0x8cc   : > { %10192 = vtanh.f32 %v7769_v8  ;;  %v6666_v25 = vadd.f32 %v6499_v32, %v5821_v42  ;;  %v4977_v38 = vadd.f32 %v4811_v52, %v13583_v59  ;;  %v9904_v32 = vld [vmem:[%s10316_s28 + $0x4f1] sm:$0xff]  ;;  %v4347_v42 = vpack.c.bf16 %v9328_v56, %v9327_v43 }
 0x8cd   : > { %v7345_v22 = vpop.f32.mrf.mxu0  ;;  %v8152_v49 = vadd.f32 0.5, %v8024_v23  ;;  %v6881_v7 = vpack.c.bf16 %v9904_v32, %v9903_v44  ;;  %v13586_v59 = vld [vmem:[#allocation24_spill] sm:$0xff] }
 0x8ce   : > { %v7510_v40 = vadd.f32 %v7343_v21, %v6666_v25 }
 0x8cf   : > { %v8280_v1 = vmul.f32 %v8152_v49, %v7640_v34  ;;  %v5192_v49 = vpack.c.bf16 %v9520_v9, %v9519_v30 }
 0x8d0   : > { %v7642_v62 = vadd.f32 %v12945_v37, %v7510_v40  ;;  %v6037_v40 = vpack.c.bf16 %v9712_v58, %v9711_v13 }
 0x8d1   : > { %8409 = vst.msk [vmem:[%s12069_s17 + $0x320] sm:$0xff] %vm8308_vm3, %v8280_v1  ;;  %v5656_v48 = vpop.f32.mrf.mxu2 }
 0x8d2   : > { %v6501_v55 = vpop.f32.mrf.mxu3  ;;  %v10193_v54 = vpop.eup %10192  ;;  %v7770_v33 = vmul.f32 0.5, %v7642_v62  ;;  %v5822_v10 = vadd.f32 %v5656_v48, %v4977_v38 }
 0x8d3   : > { %v4814_v47 = vpop.f32.mrf.mxu1  ;;  %v8025_v11 = vmul.f32 0.5, %v10193_v54 }
 0x8d4   : > { %10194 = vtanh.f32 %v7770_v33  ;;  %v6667_v27 = vadd.f32 %v6501_v55, %v5822_v10  ;;  %v4978_v14 = vadd.f32 %v4814_v47, %v13584_v5  ;;  %v13587_v5 = vld [vmem:[#allocation27_spill] sm:$0xff] }
 0x8d5   : > { %v7348_v24 = vpop.f32.mrf.mxu0  ;;  %v8153_v51 = vadd.f32 0.5, %v8025_v11  ;;  %v9329_v11 = vld [vmem:[%s10316_s28 + $0xf29] sm:$0xff] }
 0x8d6   : > { %9393 = vmatmul.msk.bf16.gmra.mxu1 %vm571_vm2, %v4346_v29  ;;  %v7511_v36 = vadd.f32 %v7345_v22, %v6667_v27  ;;  %9585 = vmatmul.msk.bf16.gmra.mxu2 %vm571_vm2, %v5191_v2  ;;  %v9521_v27 = vld [vmem:[%s10316_s28 + $0x500] sm:$0xff] }
 0x8d7   : > { %9777 = vmatmul.msk.bf16.gmra.mxu3 %vm571_vm2, %v6036_v31  ;;  %v8281_v39 = vmul.f32 %v8153_v51, %v7641_v19  ;;  %v9522_v51 = vld [vmem:[%s10316_s28 + $0x508] sm:$0xff] }
 0x8d8   : > { %9969 = vmatmul.msk.bf16.gmra.mxu0 %vm571_vm2, %v6880_v50  ;;  %v7643_v34 = vadd.f32 %v12945_v37, %v7511_v36  ;;  %v9330_v50 = vld [vmem:[%s10316_s28 + $0xf31] sm:$0xff]  ;;  %v9713_v36 = vld [vmem:[%s10316_s28 + $0xa28] sm:$0xff] }
 0x8d9   : > { %8410 = vst.msk [vmem:[%s12069_s17 + $0x328] sm:$0xff] %vm8308_vm3, %v8281_v39  ;;  %v5659_v60 = vpop.f32.mrf.mxu2  ;;  %v9714_v39 = vld [vmem:[%s10316_s28 + $0xa30] sm:$0xff] }
 0x8da   : > { %v6504_v20 = vpop.f32.mrf.mxu3  ;;  %v10195_v6 = vpop.eup %10194  ;;  %v7771_v61 = vmul.f32 0.5, %v7643_v34  ;;  %v5823_v18 = vadd.f32 %v5659_v60, %v4978_v14  ;;  %v9905_v60 = vld [vmem:[%s10316_s28 + $0x501] sm:$0xff] }
 0x8db   : > { %v4816_v12 = vpop.f32.mrf.mxu1  ;;  %v8026_v57 = vmul.f32 0.5, %v10195_v6 }
 0x8dc   : > { %10196 = vtanh.f32 %v7771_v61  ;;  %v6668_v16 = vadd.f32 %v6504_v20, %v5823_v18  ;;  %v4979_v45 = vadd.f32 %v4816_v12, %v13585_v35  ;;  %v9906_v20 = vld [vmem:[%s10316_s28 + $0x509] sm:$0xff]  ;;  %v4348_v18 = vpack.c.bf16 %v9330_v50, %v9329_v11  ;;  %v13588_v35 = vld [vmem:[#allocation30_spill] sm:$0xff] }
 0x8dd   : > { %v7350_v4 = vpop.f32.mrf.mxu0  ;;  %v8154_v17 = vadd.f32 0.5, %v8026_v57  ;;  %v6882_v56 = vpack.c.bf16 %v9906_v20, %v9905_v60 }
 0x8de   : > { %v7512_v26 = vadd.f32 %v7348_v24, %v6668_v16 }
 0x8df   : > { %v8282_v21 = vmul.f32 %v8154_v17, %v7642_v62  ;;  %v5193_v17 = vpack.c.bf16 %v9522_v51, %v9521_v27 }
 0x8e0   : > { %v7644_v19 = vadd.f32 %v12945_v37, %v7512_v26  ;;  %v6038_v26 = vpack.c.bf16 %v9714_v39, %v9713_v36  ;;  %v13170_v39 = vld [vmem:[%s13256_s2] ss:$0 sm:$0xff] }
 0x8e1   : > { %8411 = vst.msk [vmem:[%s12069_s17 + $0x330] sm:$0xff] %vm8308_vm3, %v8282_v21  ;;  %v5661_v53 = vpop.f32.mrf.mxu2 }
 0x8e2   : > { %v6506_v8 = vpop.f32.mrf.mxu3  ;;  %v10197_v52 = vpop.eup %10196  ;;  %v7772_v23 = vmul.f32 0.5, %v7644_v19  ;;  %v5824_v25 = vadd.f32 %v5661_v53, %v4979_v45 }
 0x8e3   : > { %v4819_v22 = vpop.f32.mrf.mxu1  ;;  %v8027_v46 = vmul.f32 0.5, %v10197_v52 }
 0x8e4   : > { %10198 = vtanh.f32 %v7772_v23  ;;  %v6669_v0 = vadd.f32 %v6506_v8, %v5824_v25  ;;  %v4980_v38 = vadd.f32 %v4819_v22, %v13586_v59  ;;  %v13589_v59 = vld [vmem:[#allocation33_spill] sm:$0xff] }
 0x8e5   : > { %v7353_v1 = vpop.f32.mrf.mxu0  ;;  %v8155_v3 = vadd.f32 0.5, %v8027_v46  ;;  %v9331_v46 = vld [vmem:[%s10316_s28 + $0xf39] sm:$0xff] }
 0x8e6   : > { %9394 = vmatmul.msk.bf16.gmra.mxu1 %vm571_vm2, %v4347_v42  ;;  %v7513_v63 = vadd.f32 %v7350_v4, %v6669_v0  ;;  %9586 = vmatmul.msk.bf16.gmra.mxu2 %vm571_vm2, %v5192_v49  ;;  %v9523_v0 = vld [vmem:[%s10316_s28 + $0x510] sm:$0xff] }
 0x8e7   : > { %9778 = vmatmul.msk.bf16.gmra.mxu3 %vm571_vm2, %v6037_v40  ;;  %v8283_v15 = vmul.f32 %v8155_v3, %v7643_v34  ;;  %v9524_v3 = vld [vmem:[%s10316_s28 + $0x518] sm:$0xff] }
 0x8e8   : > { %9970 = vmatmul.msk.bf16.gmra.mxu0 %vm571_vm2, %v6881_v7  ;;  %v7645_v62 = vadd.f32 %v12945_v37, %v7513_v63  ;;  %v9332_v7 = vld [vmem:[%s10316_s28 + $0xf41] sm:$0xff]  ;;  %v9715_v63 = vld [vmem:[%s10316_s28 + $0xa38] sm:$0xff] }
 0x8e9   : > { %8412 = vst.msk [vmem:[%s12069_s17 + $0x338] sm:$0xff] %vm8308_vm3, %v8283_v15  ;;  %v5664_v41 = vpop.f32.mrf.mxu2  ;;  %v9716_v15 = vld [vmem:[%s10316_s28 + $0xa40] sm:$0xff] }
 0x8ea   : > { %v6509_v28 = vpop.f32.mrf.mxu3  ;;  %v10199_v48 = vpop.eup %10198  ;;  %v7773_v55 = vmul.f32 0.5, %v7645_v62  ;;  %v5825_v29 = vadd.f32 %v5664_v41, %v4980_v38  ;;  %v9907_v41 = vld [vmem:[%s10316_s28 + $0x511] sm:$0xff] }
 0x8eb   : > { %v4821_v54 = vpop.f32.mrf.mxu1  ;;  %v8028_v33 = vmul.f32 0.5, %v10199_v48 }
 0x8ec   : > { %10200 = vtanh.f32 %v7773_v55  ;;  %v6670_v10 = vadd.f32 %v6509_v28, %v5825_v29  ;;  %v4981_v14 = vadd.f32 %v4821_v54, %v13587_v5  ;;  %v9908_v28 = vld [vmem:[%s10316_s28 + $0x519] sm:$0xff]  ;;  %v4349_v29 = vpack.c.bf16 %v9332_v7, %v9331_v46  ;;  %v13590_v5 = vld [vmem:[#allocation36_spill] sm:$0xff] }
 0x8ed   : > { %v7355_v47 = vpop.f32.mrf.mxu0  ;;  %v8156_v2 = vadd.f32 0.5, %v8028_v33  ;;  %v6883_v50 = vpack.c.bf16 %v9908_v28, %v9907_v41  ;;  %v13593_v28 = vld [vmem:[#allocation45_spill] sm:$0xff] }
 0x8ee   : > { %v7514_v31 = vadd.f32 %v7353_v1, %v6670_v10 }
 0x8ef   : > { %v8284_v24 = vmul.f32 %v8156_v2, %v7644_v19  ;;  %v5194_v2 = vpack.c.bf16 %v9524_v3, %v9523_v0 }
 0x8f0   : > { %v7646_v34 = vadd.f32 %v12945_v37, %v7514_v31  ;;  %v6039_v31 = vpack.c.bf16 %v9716_v15, %v9715_v63 }
 0x8f1   : > { %8413 = vst.msk [vmem:[%s12069_s17 + $0x340] sm:$0xff] %vm8308_vm3, %v8284_v24  ;;  %v5666_v6 = vpop.f32.mrf.mxu2 }
 0x8f2   : > { %v6511_v61 = vpop.f32.mrf.mxu3  ;;  %v10201_v12 = vpop.eup %10200  ;;  %v7774_v57 = vmul.f32 0.5, %v7646_v34  ;;  %v5826_v16 = vadd.f32 %v5666_v6, %v4981_v14 }
 0x8f3   : > { %v4824_v4 = vpop.f32.mrf.mxu1  ;;  %v8029_v43 = vmul.f32 0.5, %v10201_v12 }
 0x8f4   : > { %10202 = vtanh.f32 %v7774_v57  ;;  %v6671_v30 = vadd.f32 %v6511_v61, %v5826_v16  ;;  %v4982_v45 = vadd.f32 %v4824_v4, %v13588_v35 }
 0x8f5   : > { %v7358_v21 = vpop.f32.mrf.mxu0  ;;  %v8157_v9 = vadd.f32 0.5, %v8029_v43 }
 0x8f6   : > { %9395 = vmatmul.msk.bf16.gmra.mxu1 %vm571_vm2, %v4348_v18  ;;  %v7515_v13 = vadd.f32 %v7355_v47, %v6671_v30  ;;  %9587 = vmatmul.msk.bf16.gmra.mxu2 %vm571_vm2, %v5193_v17  ;;  %v13591_v30 = vld [vmem:[#allocation39_spill] sm:$0xff] }
 0x8f7   : > { %9779 = vmatmul.msk.bf16.gmra.mxu3 %vm571_vm2, %v6038_v26  ;;  %v8285_v58 = vmul.f32 %v8157_v9, %v7645_v62 }
 0x8f8   : > { %9971 = vmatmul.msk.bf16.gmra.mxu0 %vm571_vm2, %v6882_v56  ;;  %v7647_v19 = vadd.f32 %v12945_v37, %v7515_v13 }
 0x8f9   : > { %8414 = vst.msk [vmem:[%s12069_s17 + $0x348] sm:$0xff] %vm8308_vm3, %v8285_v58  ;;  %v5669_v44 = vpop.f32.mrf.mxu2 }
 0x8fa   : > { %v6514_v32 = vpop.f32.mrf.mxu3  ;;  %v10203_v53 = vpop.eup %10202  ;;  %v7775_v8 = vmul.f32 0.5, %v7647_v19  ;;  %v5827_v42 = vadd.f32 %v5669_v44, %v4982_v45 }
 0x8fb   : > { %v4826_v52 = vpop.f32.mrf.mxu1  ;;  %v8030_v23 = vmul.f32 0.5, %v10203_v53 }
 0x8fc   : > { %10204 = vtanh.f32 %v7775_v8  ;;  %v6672_v25 = vadd.f32 %v6514_v32, %v5827_v42  ;;  %v4983_v38 = vadd.f32 %v4826_v52, %v13589_v59 }
 0x8fd   : > { %v7360_v22 = vpop.f32.mrf.mxu0  ;;  %v8158_v49 = vadd.f32 0.5, %v8030_v23 }
 0x8fe   : > { %v7516_v40 = vadd.f32 %v7358_v21, %v6672_v25  ;;  %v13592_v25 = vld [vmem:[#allocation42_spill] sm:$0xff] }
 0x8ff   : > { %v8286_v1 = vmul.f32 %v8158_v49, %v7646_v34 }
 0x900   : > { %v7648_v62 = vadd.f32 %v12945_v37, %v7516_v40 }
 0x901   : > { %8415 = vst.msk [vmem:[%s12069_s17 + $0x350] sm:$0xff] %vm8308_vm3, %v8286_v1  ;;  %v5671_v48 = vpop.f32.mrf.mxu2 }
 0x902   : > { %v6516_v55 = vpop.f32.mrf.mxu3  ;;  %v10205_v54 = vpop.eup %10204  ;;  %v7776_v33 = vmul.f32 0.5, %v7648_v62  ;;  %v5828_v10 = vadd.f32 %v5671_v48, %v4983_v38 }
 0x903   : > { %v4829_v47 = vpop.f32.mrf.mxu1  ;;  %v8031_v11 = vmul.f32 0.5, %v10205_v54 }
 0x904   : > { %10206 = vtanh.f32 %v7776_v33  ;;  %v6673_v37 = vadd.f32 %v6516_v55, %v5828_v10  ;;  %v4984_v14 = vadd.f32 %v4829_v47, %v13590_v5 }
 0x905   : > { %v7363_v27 = vpop.f32.mrf.mxu0  ;;  %v8159_v24 = vadd.f32 0.5, %v8031_v11 }
 0x906   : > { %9396 = vmatmul.msk.bf16.gmra.mxu1 %vm571_vm2, %v4349_v29  ;;  %v7517_v51 = vadd.f32 %v7360_v22, %v6673_v37  ;;  %9588 = vmatmul.msk.bf16.gmra.mxu2 %vm571_vm2, %v5194_v2 }
 0x907   : > { %9780 = vmatmul.msk.bf16.gmra.mxu3 %vm571_vm2, %v6039_v31  ;;  %v8287_v36 = vmul.f32 %v8159_v24, %v7647_v19 }
 0x908   : > { %9972 = vmatmul.msk.bf16.gmra.mxu0 %vm571_vm2, %v6883_v50  ;;  %v7649_v34 = vadd.f32 %v13170_v39, %v7517_v51  ;;  %v13594_v51 = vld [vmem:[#allocation48_spill] sm:$0xff] }
 0x909   : > { %8416 = vst.msk [vmem:[%s12069_s17 + $0x358] sm:$0xff] %vm8308_vm3, %v8287_v36  ;;  %v5674_v60 = vpop.f32.mrf.mxu2 }
 0x90a   : > { %v6519_v20 = vpop.f32.mrf.mxu3  ;;  %v10207_v6 = vpop.eup %10206  ;;  %v7777_v61 = vmul.f32 0.5, %v7649_v34  ;;  %v5829_v18 = vadd.f32 %v5674_v60, %v4984_v14 }
 0x90b   : > { %v4831_v12 = vpop.f32.mrf.mxu1  ;;  %v8032_v57 = vmul.f32 0.5, %v10207_v6 }
 0x90c   : > { %10208 = vtanh.f32 %v7777_v61  ;;  %v6674_v16 = vadd.f32 %v6519_v20, %v5829_v18  ;;  %v4985_v21 = vadd.f32 %v4831_v12, %v13591_v30 }
 0x90d   : > { %v7365_v4 = vpop.f32.mrf.mxu0  ;;  %v8160_v17 = vadd.f32 0.5, %v8032_v57 }
 0x90e   : > { %v7518_v26 = vadd.f32 %v7363_v27, %v6674_v16 }
 0x90f   : > { %v8288_v43 = vmul.f32 %v8160_v17, %v7648_v62 }
 0x910   : > { %v7650_v56 = vadd.f32 %v13170_v39, %v7518_v26  ;;  %v13595_v26 = vld [vmem:[#allocation51_spill] sm:$0xff] }
 0x911   : > { %8417 = vst.msk [vmem:[%s12069_s17 + $0x360] sm:$0xff] %vm8308_vm3, %v8288_v43  ;;  %v5676_v9 = vpop.f32.mrf.mxu2 }
 0x912   : > { %v6521_v13 = vpop.f32.mrf.mxu3  ;;  %v10209_v58 = vpop.eup %10208  ;;  %v7778_v19 = vmul.f32 0.5, %v7650_v56  ;;  %v5830_v35 = vadd.f32 %v5676_v9, %v4985_v21 }
 0x913   : > { %v4834_v45 = vpop.f32.mrf.mxu1  ;;  %v8033_v44 = vmul.f32 0.5, %v10209_v58 }
 0x914   : > { %10210 = vtanh.f32 %v7778_v19  ;;  %v6675_v32 = vadd.f32 %v6521_v13, %v5830_v35  ;;  %v4986_v22 = vadd.f32 %v4834_v45, %v13592_v25 }
 0x915   : > { %v7368_v53 = vpop.f32.mrf.mxu0  ;;  %v8161_v8 = vadd.f32 0.5, %v8033_v44 }
 0x916   : > { %v7519_v42 = vadd.f32 %v7365_v4, %v6675_v32 }
 0x917   : > { %v8289_v52 = vmul.f32 %v8161_v8, %v7649_v34 }
 0x918   : > { %v7651_v23 = vadd.f32 %v13170_v39, %v7519_v42  ;;  %v13596_v42 = vld [vmem:[#allocation54_spill] sm:$0xff] }
 0x919   : > { %8418 = vst.msk [vmem:[%s12069_s17 + $0x368] sm:$0xff] %vm8308_vm3, %v8289_v52  ;;  %v5679_v49 = vpop.f32.mrf.mxu2 }
 0x91a   : > { %v6524_v40 = vpop.f32.mrf.mxu3  ;;  %v10211_v46 = vpop.eup %10210  ;;  %v7779_v7 = vmul.f32 0.5, %v7651_v23  ;;  %v5831_v0 = vadd.f32 %v5679_v49, %v4986_v22 }
 0x91b   : > { %v4836_v1 = vpop.f32.mrf.mxu1  ;;  %v8034_v3 = vmul.f32 0.5, %v10211_v46 }
 0x91c   : > { %10212 = vtanh.f32 %v7779_v7  ;;  %v6676_v63 = vadd.f32 %v6524_v40, %v5831_v0  ;;  %v4987_v48 = vadd.f32 %v4836_v1, %v13593_v28 }
 0x91d   : > { %v7370_v15 = vpop.f32.mrf.mxu0  ;;  %v8162_v62 = vadd.f32 0.5, %v8034_v3 }
 0x91e   : > { %v7520_v59 = vadd.f32 %v7368_v53, %v6676_v63 }
 0x91f   : > { %v8290_v38 = vmul.f32 %v8162_v62, %v7650_v56 }
 0x920   : > { %v7652_v41 = vadd.f32 %v13170_v39, %v7520_v59  ;;  %v13597_v59 = vld [vmem:[#allocation57_spill] sm:$0xff] }
 0x921   : > { %8419 = vst.msk [vmem:[%s12069_s17 + $0x370] sm:$0xff] %vm8308_vm3, %v8290_v38  ;;  %v5681_v55 = vpop.f32.mrf.mxu2 }
 0x922   : > { %v6526_v29 = vpop.f32.mrf.mxu3  ;;  %v10213_v54 = vpop.eup %10212  ;;  %v7780_v33 = vmul.f32 0.5, %v7652_v41  ;;  %v5832_v10 = vadd.f32 %v5681_v55, %v4987_v48 }
 0x923   : > { %v4839_v47 = vpop.f32.mrf.mxu1  ;;  %v8035_v2 = vmul.f32 0.5, %v10213_v54 }
 0x924   : > { %10214 = vtanh.f32 %v7780_v33  ;;  %v6677_v31 = vadd.f32 %v6526_v29, %v5832_v10  ;;  %v4988_v36 = vadd.f32 %v4839_v47, %v13594_v51 }
 0x925   : > { %v7373_v11 = vpop.f32.mrf.mxu0  ;;  %v8163_v50 = vadd.f32 0.5, %v8035_v2 }
 0x926   : > { %v7521_v37 = vadd.f32 %v7370_v15, %v6677_v31 }
 0x927   : > { %v8291_v27 = vmul.f32 %v8163_v50, %v7651_v23 }
 0x928   : > { %v7653_v24 = vadd.f32 %v13170_v39, %v7521_v37  ;;  %v13598_v37 = vld [vmem:[#allocation60_spill] sm:$0xff] }
 0x929   : > { %8420 = vst.msk [vmem:[%s12069_s17 + $0x378] sm:$0xff] %vm8308_vm3, %v8291_v27  ;;  %v5684_v34 = vpop.f32.mrf.mxu2 }
 0x92a   : > { %v6529_v5 = vpop.f32.mrf.mxu3  ;;  %v10215_v14 = vpop.eup %10214  ;;  %v7781_v60 = vmul.f32 0.5, %v7653_v24  ;;  %v5833_v20 = vadd.f32 %v5684_v34, %v4988_v36 }
 0x92b   : > { %v4841_v6 = vpop.f32.mrf.mxu1  ;;  %v8036_v61 = vmul.f32 0.5, %v10215_v14 }
 0x92c   : > { %10216 = vtanh.f32 %v7781_v60  ;;  %v6678_v18 = vadd.f32 %v6529_v5, %v5833_v20  ;;  %v4989_v43 = vadd.f32 %v4841_v6, %v13595_v26 }
 0x92d   : > { %v7375_v12 = vpop.f32.mrf.mxu0  ;;  %v8164_v57 = vadd.f32 0.5, %v8036_v61 }
 0x92e   : > { %v7522_v16 = vadd.f32 %v7373_v11, %v6678_v18 }
 0x92f   : > { %v8292_v4 = vmul.f32 %v8164_v57, %v7652_v41 }
 0x930   : > { %v7654_v17 = vadd.f32 %v13170_v39, %v7522_v16  ;;  %v13599_v16 = vld [vmem:[#allocation63_spill] sm:$0xff] }
 0x931   : > { %8421 = vst.msk [vmem:[%s12069_s17 + $0x380] sm:$0xff] %vm8308_vm3, %v8292_v4  ;;  %v5686_v56 = vpop.f32.mrf.mxu2 }
 0x932   : > { %v6531_v30 = vpop.f32.mrf.mxu3  ;;  %v10217_v21 = vpop.eup %10216  ;;  %v7782_v9 = vmul.f32 0.5, %v7654_v17  ;;  %v5834_v13 = vadd.f32 %v5686_v56, %v4989_v43 }
 0x933   : > { %v4844_v58 = vpop.f32.mrf.mxu1  ;;  %v8037_v19 = vmul.f32 0.5, %v10217_v21 }
 0x934   : > { %10218 = vtanh.f32 %v7782_v9  ;;  %v6679_v35 = vadd.f32 %v6531_v30, %v5834_v13  ;;  %v4990_v52 = vadd.f32 %v4844_v58, %v13596_v42 }
 0x935   : > { %v7378_v45 = vpop.f32.mrf.mxu0  ;;  %v8165_v44 = vadd.f32 0.5, %v8037_v19 }
 0x936   : > { %v7523_v32 = vadd.f32 %v7375_v12, %v6679_v35 }
 0x937   : > { %v8293_v53 = vmul.f32 %v8165_v44, %v7653_v24 }
 0x938   : > { %v7655_v8 = vadd.f32 %v13170_v39, %v7523_v32  ;;  %v13600_v32 = vld [vmem:[#allocation66_spill] sm:$0xff] }
 0x939   : > { %8422 = vst.msk [vmem:[%s12069_s17 + $0x388] sm:$0xff] %vm8308_vm3, %v8293_v53  ;;  %v5689_v23 = vpop.f32.mrf.mxu2 }
 0x93a   : > { %v6534_v25 = vpop.f32.mrf.mxu3  ;;  %v10219_v22 = vpop.eup %10218  ;;  %v7783_v49 = vmul.f32 0.5, %v7655_v8  ;;  %v5835_v40 = vadd.f32 %v5689_v23, %v4990_v52 }
 0x93b   : > { %v4846_v46 = vpop.f32.mrf.mxu1  ;;  %v8038_v7 = vmul.f32 0.5, %v10219_v22 }
 0x93c   : > { %10220 = vtanh.f32 %v7783_v49  ;;  %v6680_v0 = vadd.f32 %v6534_v25, %v5835_v40  ;;  %v4991_v38 = vadd.f32 %v4846_v46, %v13597_v59 }
 0x93d   : > { %v7380_v1 = vpop.f32.mrf.mxu0  ;;  %v8166_v3 = vadd.f32 0.5, %v8038_v7 }
 0x93e   : > { %v7524_v63 = vadd.f32 %v7378_v45, %v6680_v0 }
 0x93f   : > { %v8294_v15 = vmul.f32 %v8166_v3, %v7654_v17 }
 0x940   : > { %v7656_v62 = vadd.f32 %v13170_v39, %v7524_v63  ;;  %v13601_v63 = vld [vmem:[#allocation69_spill] sm:$0xff] }
 0x941   : > { %8423 = vst.msk [vmem:[%s12069_s17 + $0x390] sm:$0xff] %vm8308_vm3, %v8294_v15  ;;  %v5691_v41 = vpop.f32.mrf.mxu2 }
 0x942   : > { %v6536_v28 = vpop.f32.mrf.mxu3  ;;  %v10221_v48 = vpop.eup %10220  ;;  %v7784_v55 = vmul.f32 0.5, %v7656_v62  ;;  %v5836_v29 = vadd.f32 %v5691_v41, %v4991_v38 }
 0x943   : > { %v4849_v54 = vpop.f32.mrf.mxu1  ;;  %v8039_v33 = vmul.f32 0.5, %v10221_v48 }
 0x944   : > { %10222 = vtanh.f32 %v7784_v55  ;;  %v6681_v10 = vadd.f32 %v6536_v28, %v5836_v29  ;;  %v4992_v27 = vadd.f32 %v4849_v54, %v13598_v37 }
 0x945   : > { %v7383_v47 = vpop.f32.mrf.mxu0  ;;  %v8167_v2 = vadd.f32 0.5, %v8039_v33 }
 0x946   : > { %v7525_v31 = vadd.f32 %v7380_v1, %v6681_v10 }
 0x947   : > { %v8295_v11 = vmul.f32 %v8167_v2, %v7655_v8 }
 0x948   : > { %v7657_v50 = vadd.f32 %v13170_v39, %v7525_v31  ;;  %v13602_v31 = vld [vmem:[#allocation72_spill] sm:$0xff] }
 0x949   : > { %8424 = vst.msk [vmem:[%s12069_s17 + $0x398] sm:$0xff] %vm8308_vm3, %v8295_v11  ;;  %v5694_v24 = vpop.f32.mrf.mxu2 }
 0x94a   : > { %v6539_v51 = vpop.f32.mrf.mxu3  ;;  %v10223_v36 = vpop.eup %10222  ;;  %v7785_v34 = vmul.f32 0.5, %v7657_v50  ;;  %v5837_v5 = vadd.f32 %v5694_v24, %v4992_v27 }
 0x94b   : > { %v4851_v14 = vpop.f32.mrf.mxu1  ;;  %v8040_v60 = vmul.f32 0.5, %v10223_v36 }
 0x94c   : > { %10224 = vtanh.f32 %v7785_v34  ;;  %v6682_v20 = vadd.f32 %v6539_v51, %v5837_v5  ;;  %v4993_v4 = vadd.f32 %v4851_v14, %v13599_v16 }
 0x94d   : > { %v7385_v6 = vpop.f32.mrf.mxu0  ;;  %v8168_v61 = vadd.f32 0.5, %v8040_v60 }
 0x94e   : > { %v7526_v18 = vadd.f32 %v7383_v47, %v6682_v20 }
 0x94f   : > { %v8296_v12 = vmul.f32 %v8168_v61, %v7656_v62 }
 0x950   : > { %v7658_v57 = vadd.f32 %v13170_v39, %v7526_v18  ;;  %v13603_v18 = vld [vmem:[#allocation75_spill] sm:$0xff] }
 0x951   : > { %8425 = vst.msk [vmem:[%s12069_s17 + $0x3a0] sm:$0xff] %vm8308_vm3, %v8296_v12  ;;  %v5696_v17 = vpop.f32.mrf.mxu2 }
 0x952   : > { %v6541_v26 = vpop.f32.mrf.mxu3  ;;  %v10225_v43 = vpop.eup %10224  ;;  %v7786_v56 = vmul.f32 0.5, %v7658_v57  ;;  %v5838_v30 = vadd.f32 %v5696_v17, %v4993_v4 }
 0x953   : > { %v4854_v21 = vpop.f32.mrf.mxu1  ;;  %v8041_v9 = vmul.f32 0.5, %v10225_v43 }
 0x954   : > { %10226 = vtanh.f32 %v7786_v56  ;;  %v6683_v13 = vadd.f32 %v6541_v26, %v5838_v30  ;;  %v4994_v53 = vadd.f32 %v4854_v21, %v13600_v32 }
 0x955   : > { %v7388_v58 = vpop.f32.mrf.mxu0  ;;  %v8169_v19 = vadd.f32 0.5, %v8041_v9 }
 0x956   : > { %v7527_v35 = vadd.f32 %v7385_v6, %v6683_v13 }
 0x957   : > { %v8297_v45 = vmul.f32 %v8169_v19, %v7657_v50 }
 0x958   : > { %v7659_v44 = vadd.f32 %v13170_v39, %v7527_v35  ;;  %v13604_v35 = vld [vmem:[#allocation78_spill] sm:$0xff] }
 0x959   : > { %8426 = vst.msk [vmem:[%s12069_s17 + $0x3a8] sm:$0xff] %vm8308_vm3, %v8297_v45  ;;  %v5699_v8 = vpop.f32.mrf.mxu2 }
 0x95a   : > { %v6544_v42 = vpop.f32.mrf.mxu3  ;;  %v10227_v52 = vpop.eup %10226  ;;  %v7787_v23 = vmul.f32 0.5, %v7659_v44  ;;  %v5839_v25 = vadd.f32 %v5699_v8, %v4994_v53 }
 0x95b   : > { %v4856_v22 = vpop.f32.mrf.mxu1  ;;  %v8042_v49 = vmul.f32 0.5, %v10227_v52 }
 0x95c   : > { %10228 = vtanh.f32 %v7787_v23  ;;  %v6684_v40 = vadd.f32 %v6544_v42, %v5839_v25  ;;  %v4995_v15 = vadd.f32 %v4856_v22, %v13601_v63 }
 0x95d   : > { %v7390_v46 = vpop.f32.mrf.mxu0  ;;  %v8170_v7 = vadd.f32 0.5, %v8042_v49 }
 0x95e   : > { %v7528_v0 = vadd.f32 %v7388_v58, %v6684_v40 }
 0x95f   : > { %v8298_v1 = vmul.f32 %v8170_v7, %v7658_v57  ;;  %v13605_v7 = vld [vmem:[#allocation81_spill] sm:$0xff] }
 0x960   : > { %v7660_v3 = vadd.f32 %v13170_v39, %v7528_v0 }
 0x961   : > { %8427 = vst.msk [vmem:[%s12069_s17 + $0x3b0] sm:$0xff] %vm8308_vm3, %v8298_v1  ;;  %v5701_v62 = vpop.f32.mrf.mxu2 }
 0x962   : > { %v6546_v59 = vpop.f32.mrf.mxu3  ;;  %v10229_v38 = vpop.eup %10228  ;;  %v7788_v41 = vmul.f32 0.5, %v7660_v3  ;;  %v5840_v28 = vadd.f32 %v5701_v62, %v4995_v15 }
 0x963   : > { %v4859_v48 = vpop.f32.mrf.mxu1  ;;  %v8043_v55 = vmul.f32 0.5, %v10229_v38 }
 0x964   : > { %10230 = vtanh.f32 %v7788_v41  ;;  %v6685_v29 = vadd.f32 %v6546_v59, %v5840_v28  ;;  %v4996_v11 = vadd.f32 %v4859_v48, %v13602_v31 }
 0x965   : > { %v7393_v54 = vpop.f32.mrf.mxu0  ;;  %v8171_v33 = vadd.f32 0.5, %v8043_v55 }
 0x966   : > { %v7529_v10 = vadd.f32 %v7390_v46, %v6685_v29 }
 0x967   : > { %v8299_v47 = vmul.f32 %v8171_v33, %v7659_v44  ;;  %v13606_v33 = vld [vmem:[#allocation84_spill] sm:$0xff] }
 0x968   : > { %v7661_v2 = vadd.f32 %v13170_v39, %v7529_v10 }
 0x969   : > { %8428 = vst.msk [vmem:[%s12069_s17 + $0x3b8] sm:$0xff] %vm8308_vm3, %v8299_v47  ;;  %v5704_v50 = vpop.f32.mrf.mxu2 }
 0x96a   : > { %v6549_v37 = vpop.f32.mrf.mxu3  ;;  %v10231_v27 = vpop.eup %10230  ;;  %v7789_v24 = vmul.f32 0.5, %v7661_v2  ;;  %v5841_v51 = vadd.f32 %v5704_v50, %v4996_v11 }
 0x96b   : > { %v4861_v36 = vpop.f32.mrf.mxu1  ;;  %v8044_v34 = vmul.f32 0.5, %v10231_v27 }
 0x96c   : > { %10232 = vtanh.f32 %v7789_v24  ;;  %v6686_v5 = vadd.f32 %v6549_v37, %v5841_v51  ;;  %v4997_v12 = vadd.f32 %v4861_v36, %v13603_v18 }
 0x96d   : > { %v7395_v14 = vpop.f32.mrf.mxu0  ;;  %v8172_v60 = vadd.f32 0.5, %v8044_v34 }
 0x96e   : > { %v7530_v20 = vadd.f32 %v7393_v54, %v6686_v5 }
 0x96f   : > { %v8300_v6 = vmul.f32 %v8172_v60, %v7660_v3  ;;  %v13607_v60 = vld [vmem:[#allocation87_spill] sm:$0xff] }
 0x970   : > { %v7662_v61 = vadd.f32 %v13170_v39, %v7530_v20 }
 0x971   : > { %8429 = vst.msk [vmem:[%s12069_s17 + $0x3c0] sm:$0xff] %vm8308_vm3, %v8300_v6  ;;  %v5706_v57 = vpop.f32.mrf.mxu2 }
 0x972   : > { %v6551_v16 = vpop.f32.mrf.mxu3  ;;  %v10233_v4 = vpop.eup %10232  ;;  %v7790_v17 = vmul.f32 0.5, %v7662_v61  ;;  %v5842_v26 = vadd.f32 %v5706_v57, %v4997_v12 }
 0x973   : > { %v4864_v43 = vpop.f32.mrf.mxu1  ;;  %v8045_v56 = vmul.f32 0.5, %v10233_v4 }
 0x974   : > { %10234 = vtanh.f32 %v7790_v17  ;;  %v6687_v30 = vadd.f32 %v6551_v16, %v5842_v26  ;;  %v4998_v45 = vadd.f32 %v4864_v43, %v13604_v35 }
 0x975   : > { %v8173_v21 = vadd.f32 0.5, %v8045_v56  ;;  %v7398_v13 = vpop.f32.mrf.mxu0 }
 0x976   : > { %v7531_v9 = vadd.f32 %v7395_v14, %v6687_v30 }
 0x977   : > { %v8301_v58 = vmul.f32 %v8173_v21, %v7661_v2 }
 0x978   : > { %v7663_v19 = vadd.f32 %v13170_v39, %v7531_v9 }
 0x979   : > { %8430 = vst.msk [vmem:[%s12069_s17 + $0x3c8] sm:$0xff] %vm8308_vm3, %v8301_v58  ;;  %v5709_v44 = vpop.f32.mrf.mxu2 }
 0x97a   : > { %v6554_v32 = vpop.f32.mrf.mxu3  ;;  %v10235_v53 = vpop.eup %10234  ;;  %v7791_v8 = vmul.f32 0.5, %v7663_v19  ;;  %v5843_v42 = vadd.f32 %v5709_v44, %v4998_v45 }
 0x97b   : > { %v4866_v52 = vpop.f32.mrf.mxu1  ;;  %v8046_v23 = vmul.f32 0.5, %v10235_v53 }
 0x97c   : > { %10236 = vtanh.f32 %v7791_v8  ;;  %v6688_v25 = vadd.f32 %v6554_v32, %v5843_v42  ;;  %v4999_v0 = vadd.f32 %v4866_v52, %v13605_v7 }
 0x97d   : > { %v8174_v22 = vadd.f32 0.5, %v8046_v23  ;;  %v7400_v1 = vpop.f32.mrf.mxu0 }
 0x97e   : > { %v7532_v49 = vadd.f32 %v7398_v13, %v6688_v25 }
 0x97f   : > { %v8302_v40 = vmul.f32 %v8174_v22, %v7662_v61 }
 0x980   : > { %v7664_v46 = vadd.f32 %v13170_v39, %v7532_v49 }
 0x981   : > { %8431 = vst.msk [vmem:[%s12069_s17 + $0x3d0] sm:$0xff] %vm8308_vm3, %v8302_v40  ;;  %v5711_v3 = vpop.f32.mrf.mxu2 }
 0x982   : > { %v6556_v63 = vpop.f32.mrf.mxu3  ;;  %v10237_v15 = vpop.eup %10236  ;;  %v7792_v62 = vmul.f32 0.5, %v7664_v46  ;;  %v5844_v59 = vadd.f32 %v5711_v3, %v4999_v0 }
 0x983   : > { %v8047_v38 = vmul.f32 0.5, %v10237_v15  ;;  %v4869_v41 = vpop.f32.mrf.mxu1 }
 0x984   : > { %10238 = vtanh.f32 %v7792_v62  ;;  %v6689_v28 = vadd.f32 %v6556_v63, %v5844_v59  ;;  %v5000_v10 = vadd.f32 %v4869_v41, %v13606_v33 }
 0x985   : > { %v8175_v48 = vadd.f32 0.5, %v8047_v38  ;;  %v7403_v27 = vpop.f32.mrf.mxu0 }
 0x986   : > { %v7533_v55 = vadd.f32 %v7400_v1, %v6689_v28 }
 0x987   : > { %v8303_v29 = vmul.f32 %v8175_v48, %v7663_v19 }
 0x988   : > { %v7665_v54 = vadd.f32 %v13170_v39, %v7533_v55 }
 0x989   : > { %8432 = vst.msk [vmem:[%s12069_s17 + $0x3d8] sm:$0xff] %vm8308_vm3, %v8303_v29  ;;  %v5714_v47 = vpop.f32.mrf.mxu2 }
 0x98a   : > { %v6559_v2 = vpop.f32.mrf.mxu3  ;;  %v10239_v31 = vpop.eup %10238  ;;  %v7793_v11 = vmul.f32 0.5, %v7665_v54  ;;  %v5845_v50 = vadd.f32 %v5714_v47, %v5000_v10 }
 0x98b   : > { %v8048_v37 = vmul.f32 0.5, %v10239_v31  ;;  %v4871_v36 = vpop.f32.mrf.mxu1 }
 0x98c   : > { %10240 = vtanh.f32 %v7793_v11  ;;  %v6690_v24 = vadd.f32 %v6559_v2, %v5845_v50  ;;  %v5001_v20 = vadd.f32 %v4871_v36, %v13607_v60 }
 0x98d   : > { %v8176_v51 = vadd.f32 0.5, %v8048_v37  ;;  %v7405_v26 = vpop.f32.mrf.mxu0 }
 0x98e   : > { %v7534_v34 = vadd.f32 %v7403_v27, %v6690_v24 }
 0x98f   : > { %v8304_v5 = vmul.f32 %v8176_v51, %v7664_v46 }
 0x990   : > { %v7666_v14 = vadd.f32 %v13170_v39, %v7534_v34 }
 0x991   : > { %8433 = vst.msk [vmem:[%s12069_s17 + $0x3e0] sm:$0xff] %vm8308_vm3, %v8304_v5  ;;  %v5716_v6 = vpop.f32.mrf.mxu2 }
 0x992   : > { %v10241_v61 = vpop.eup %10240  ;;  %v7794_v18 = vmul.f32 0.5, %v7666_v14  ;;  %v5846_v12 = vadd.f32 %v5716_v6, %v5001_v20  ;;  %v6561_v16 = vpop.f32.mrf.mxu3 }
 0x993   : > { %v8049_v57 = vmul.f32 0.5, %v10241_v61 }
 0x994   : > { %10242 = vtanh.f32 %v7794_v18  ;;  %v6691_v4 = vadd.f32 %v6561_v16, %v5846_v12 }
 0x995   : > { %v8177_v17 = vadd.f32 0.5, %v8049_v57 }
 0x996   : > { %v7535_v43 = vadd.f32 %v7405_v26, %v6691_v4 }
 0x997   : > { %v8305_v56 = vmul.f32 %v8177_v17, %v7665_v54 }
 0x998   : > { %v7667_v30 = vadd.f32 %v13170_v39, %v7535_v43 }
 0x999   : > { %8434 = vst.msk [vmem:[%s12069_s17 + $0x3e8] sm:$0xff] %vm8308_vm3, %v8305_v56 }
 0x99a   : > { %v10243_v21 = vpop.eup %10242  ;;  %v7795_v9 = vmul.f32 0.5, %v7667_v30 }
 0x99b   : > { %v8050_v13 = vmul.f32 0.5, %v10243_v21 }
 0x99c   : > { %10244 = vtanh.f32 %v7795_v9 }
 0x99d   : > { %v8178_v58 = vadd.f32 0.5, %v8050_v13 }
 0x99f   : > { %v8306_v19 = vmul.f32 %v8178_v58, %v7666_v14 }
 0x9a1   : > { %8435 = vst.msk [vmem:[%s12069_s17 + $0x3f0] sm:$0xff] %vm8308_vm3, %v8306_v19 }
 0x9a2   : > { %v10245_v35 = vpop.eup %10244 }
 0x9a3   : > { %v8051_v45 = vmul.f32 0.5, %v10245_v35 }
 0x9a5   : > { %v8179_v44 = vadd.f32 0.5, %v8051_v45 }
 0x9a7   : > { %v8307_v32 = vmul.f32 %v8179_v44, %v7667_v30 }
 0x9a9   : > { %8436 = vst.msk [vmem:[%s12069_s17 + $0x3f8] sm:$0xff] %vm8308_vm3, %v8307_v32 }
 0x9aa PF: > { %s13_s12 = sadd.s32 1, %s10257_s12  }
 0x9ab   : > { %p10_p5 = scmp.ge.s32.totalorder %s13_s12, 4  }
 0x9ad   :  { %12 = sbr.rel (!%p10_p5) target bundleno = 1 (0x1), region = 67 }

</bundles_post_ra>
